<compile_context>
chip_gen: v7x
topology: tpu7x:2x2x1
jax: 0.10.0
libtpu: 0.0.40
codegen_flags: <defaults>
</compile_context>

<pallas_src>
import functools

import numpy as np
import jax
import jax.numpy as jnp
from jax.experimental import pallas as pl
from jax.experimental.pallas import tpu as pltpu

_LANE = 128          # lane padding for all GNN feature dims
_N_SHIFTS = 6        # angle features per node (rows 2..7 of the feature matrix)
_PI = 3.141592653589793
_HALF_PI = 1.5707963267948966


# ----------------------------------------------------------------------------
# Static (trace-time, numpy) graph constants
# ----------------------------------------------------------------------------
def read_edge_index(num_points):
    # TODO(synk): read_edge_index source not provided; deterministic placeholder
    # graph: ring edges inside each point set + cross edges between matching points.
    edges = []
    for i in range(num_points):
        edges.append((i, (i + 1) % num_points))                              # ring, set 1
        edges.append((num_points + i, num_points + (i + 1) % num_points))    # ring, set 2
        edges.append((i, num_points + i))                                    # cross edge
    return np.asarray(edges, dtype=np.int64)                                 # (E, 2)


@functools.lru_cache(maxsize=None)
def _static_slab(num_points, samples_per_block):
    """One packed, lane-dense constant slab:
       rows [0, 6R)        neighbor-minus-self operator (block-diag per sample)
       rows [6R, 7R)       symmetric-normalized adjacency (block-diag per sample)
       rows [7R, 7R+S)     per-sample mean-pool matrix
    """
    K = num_points
    N = 2 * K
    S = samples_per_block
    R = S * N

    # Per-sample symmetric normalized adjacency with self loops: D^-1/2 (A + I) D^-1/2.
    e = read_edge_index(K)
    a = np.zeros((N, N), np.float32)
    a[e[:, 0], e[:, 1]] = 1.0
    a[e[:, 1], e[:, 0]] = 1.0
    a += np.eye(N, dtype=np.float32)
    dinv = 1.0 / np.sqrt(a.sum(axis=1))
    anorm = a * dinv[:, None] * dinv[None, :]

    anorm_bd = np.zeros((R, R), np.float32)
    for s in range(S):
        anorm_bd[s * N:(s + 1) * N, s * N:(s + 1) * N] = anorm

    # (roll_k - I) per point set, block-diagonal per sample; row order (shift, sample, node)
    # so the per-shift block sum inside the kernel is a contiguous (R,128) slice.
    dstack = np.zeros((_N_SHIFTS * R, R), np.float32)
    for j in range(_N_SHIFTS):
        k = j + 1
        for s in range(S):
            rb = j * R + s * N
            cb = s * N
            for i in range(K):
                dstack[rb + i, cb + (i + k) % K] += 1.0
                dstack[rb + i, cb + i] -= 1.0
                dstack[rb + K + i, cb + K + (i + k) % K] += 1.0
                dstack[rb + K + i, cb + K + i] -= 1.0

    pool = np.zeros((S, R), np.float32)
    for s in range(S):
        pool[s, s * N:(s + 1) * N] = 1.0 / N

    rows = _N_SHIFTS * R + R + S
    rows_pad = -(-rows // 8) * 8
    slab = np.zeros((rows_pad, _LANE), np.float32)
    slab[0:_N_SHIFTS * R, 0:R] = dstack
    slab[_N_SHIFTS * R:_N_SHIFTS * R + R, 0:R] = anorm_bd
    slab[(_N_SHIFTS + 1) * R:(_N_SHIFTS + 1) * R + S, 0:R] = pool
    return slab


# ----------------------------------------------------------------------------
# In-kernel helpers
# ----------------------------------------------------------------------------
def _atan2_approx(y, x):
    """arctan2 from VPU/EUP-friendly ops only.
    TODO(synk): Angle_relation_multiAngles source not provided; angle features are a
    deterministic placeholder and use this fast atan2 approximation."""
    ax = jnp.abs(x)
    ay = jnp.abs(y)
    mx = jnp.maximum(ax, ay)
    mn = jnp.minimum(ax, ay)
    a = mn * pl.reciprocal(mx + 1e-12, approx=True)        # EUP slot, nearly free
    s = a * a
    r = ((-0.0464964749 * s + 0.15931422) * s - 0.327622764) * s * a + a
    r = jnp.where(ay > ax, _HALF_PI - r, r)
    r = jnp.where(x < 0.0, _PI - r, r)
    return jnp.where(y < 0.0, -r, r)


# ----------------------------------------------------------------------------
# Fused kernel (one grid step = S stacked samples)
# ----------------------------------------------------------------------------
def _fused_kernel(hm_ref, cst_ref, par_ref, out_ref, *, beta, S, N, H, W):
    f32 = jnp.float32
    R = S * N
    HW = H * W
    NS = _N_SHIFTS
    W2_OFF = 16
    W3_OFF = 16 + _LANE

    # ---- soft-argmax over the S*2K stacked heatmaps ----
    logits = hm_ref[...] * beta                                      # (R, HW)
    m = jnp.max(logits, axis=-1, keepdims=True)
    e = jnp.exp(logits - m)
    inv_s = 1.0 / jnp.sum(e, axis=-1, keepdims=True)                 # (R, 1), exact divide

    # Packed [row | col] coordinate table generated in-kernel (no HBM traffic).
    pix = jax.lax.broadcasted_iota(jnp.int32, (HW, 2 * _LANE), 0).astype(f32)
    lane = jax.lax.broadcasted_iota(jnp.int32, (HW, 2 * _LANE), 1)
    inv_w = 1.0 / W
    if (W & (W - 1)) == 0:
        rr = jnp.floor(pix * inv_w)                                  # exact: power-of-two W
    else:
        rr = jnp.floor((pix + 0.5) * inv_w)   # TODO(synk): exact only for HW < ~2**23
    cc = pix - rr * W
    coords = jnp.where(lane < _LANE, rr, cc)                         # (HW, 256)

    # One MXU matmul yields both expected coordinates (row half | col half).
    # TODO(synk): verify (row, col) vs (x, y) convention of the original softargmax2d.
    p = jnp.dot(e, coords, preferred_element_type=f32) * inv_s       # (R, 256)

    # ---- placeholder multi-shift angle features (lane-constant) ----
    dstack = cst_ref[0:NS * R, 0:R]                                  # block-diag diff op
    d = jnp.dot(dstack, p, preferred_element_type=f32)               # (6R, 256)
    ang = _atan2_approx(d[:, _LANE:], d[:, 0:_LANE])                 # (6R, 128)

    # ---- X @ W1 without materializing X: broadcast rows of W1 (pure VPU) ----
    w1 = par_ref[0:8, :]                                             # (8, 128)
    xw1 = p[:, 0:_LANE] * w1[0:1, :] + p[:, _LANE:] * w1[1:2, :]     # coord part
    for j in range(NS):                                              # per-shift block sum
        xw1 = xw1 + ang[j * R:(j + 1) * R, :] * w1[2 + j:3 + j, :]

    # ---- two GCN-style layers + per-sample mean pool + linear head ----
    a_n = cst_ref[NS * R:(NS + 1) * R, 0:R]                          # block-diag adjacency
    b1 = par_ref[8:9, :]
    b2 = par_ref[9:10, :]
    b3 = par_ref[10:11, :]
    w2 = par_ref[W2_OFF:W2_OFF + _LANE, :]
    w3 = par_ref[W3_OFF:W3_OFF + _LANE, :]

    h1 = jnp.maximum(jnp.dot(a_n, xw1, preferred_element_type=f32) + b1, 0.0)
    h2 = jnp.dot(h1, w2, preferred_element_type=f32)
    h2 = jnp.maximum(jnp.dot(a_n, h2, preferred_element_type=f32) + b2, 0.0)
    pool = cst_ref[(NS + 1) * R:(NS + 1) * R + S, 0:R]               # (S, R)
    pooled = jnp.dot(pool, h2, preferred_element_type=f32)           # (S, 128)
    out_ref[...] = jnp.dot(pooled, w3, preferred_element_type=f32) + b3


# ----------------------------------------------------------------------------
# Parameters & wrapper
# ----------------------------------------------------------------------------
def init_gnn_params(key, f_in=8, hidden=32, out_dim=2):
    # TODO(synk): GraphNet architecture not provided; placeholder 2-layer GCN
    # (normalized-adjacency message passing) + global mean pool + linear head.
    k1, k2, k3 = jax.random.split(key, 3)
    s = lambda fan_in: 1.0 / jnp.sqrt(jnp.float32(fan_in))
    return {
        "w1": jax.random.normal(k1, (f_in, hidden), jnp.float32) * s(f_in),
        "b1": jnp.zeros((1, hidden), jnp.float32),
        "w2": jax.random.normal(k2, (hidden, hidden), jnp.float32) * s(hidden),
        "b2": jnp.zeros((1, hidden), jnp.float32),
        "w3": jax.random.normal(k3, (hidden, out_dim), jnp.float32) * s(hidden),
        "b3": jnp.zeros((1, out_dim), jnp.float32),
    }


def _pad2(w, rows, cols):
    w = jnp.asarray(w, jnp.float32)
    return jnp.pad(w, ((0, rows - w.shape[0]), (0, cols - w.shape[1])))


def _pack_params(gnn_params):
    """One (272, 128) lane-dense parameter slab:
       rows 0..7: W1 (8 x hidden, padded); 8: b1; 9: b2; 10: b3; 11..15: zero;
       rows 16..143: W2; rows 144..271: W3."""
    w1 = jnp.asarray(gnn_params["w1"], jnp.float32)
    hidden = w1.shape[1]
    out_dim = gnn_params["w3"].shape[1]
    assert w1.shape[0] == 8 and hidden <= _LANE and out_dim <= _LANE
    slab = jnp.concatenate([
        _pad2(w1, 8, _LANE),
        _pad2(gnn_params["b1"], 1, _LANE),
        _pad2(gnn_params["b2"], 1, _LANE),
        _pad2(gnn_params["b3"], 1, _LANE),
        jnp.zeros((5, _LANE), jnp.float32),
        _pad2(gnn_params["w2"], _LANE, _LANE),
        _pad2(gnn_params["w3"], _LANE, _LANE),
    ], axis=0)
    return slab, int(out_dim)


def graph_contrastive_loss(gnn_params, heatmaps1, heatmaps2, num_points, beta=100.0):
    """Batched forward pass of GraphContrastiveLoss: each batch element is an
    independent (heatmaps1, heatmaps2) pair and yields one GNN prediction (same
    per-sample semantics as the PyTorch module, which returns the prediction)."""
    assert heatmaps1.shape == heatmaps2.shape and heatmaps1.ndim == 4
    H, W = int(heatmaps1.shape[-2]), int(heatmaps1.shape[-1])
    if heatmaps1.shape[1] != num_points:
        # original module layout (B, C, H, W) with B*C == num_points -> single sample
        assert heatmaps1.shape[0] * heatmaps1.shape[1] == num_points
        heatmaps1 = heatmaps1.reshape(1, num_points, H, W)
        heatmaps2 = heatmaps2.reshape(1, num_points, H, W)

    batch = int(heatmaps1.shape[0])
    K = num_points
    N = 2 * K
    HW = H * W
    assert _LANE % N == 0, "2*num_points must divide 128 for this kernel"
    S = _LANE // N                      # samples stacked per grid step -> 128 MXU rows
    R = S * N
    nblk = -(-batch // S)
    assert S % 8 == 0 or nblk == 1
    batch_pad = nblk * S

    pad = batch_pad - batch
    if pad:
        z = jnp.zeros((pad,) + heatmaps1.shape[1:], heatmaps1.dtype)
        heatmaps1 = jnp.concatenate([heatmaps1, z], axis=0)
        heatmaps2 = jnp.concatenate([heatmaps2, z], axis=0)

    # Per sample s: rows s*N..s*N+K-1 <- heatmaps1[s], rows s*N+K..s*N+2K-1 <- heatmaps2[s]
    hm = jnp.concatenate(
        [heatmaps1.reshape(batch_pad, K, HW), heatmaps2.reshape(batch_pad, K, HW)],
        axis=1).reshape(batch_pad * N, HW).astype(jnp.float32)

    cst = jnp.asarray(_static_slab(num_points, S))     # constants: one slab, resident
    par, out_dim = _pack_params(gnn_params)            # parameters: one slab, resident

    kernel = functools.partial(_fused_kernel, beta=float(beta), S=S, N=N, H=H, W=W)

    out_padded = pl.pallas_call(
        kernel,
        out_shape=jax.ShapeDtypeStruct((batch_pad, _LANE), jnp.float32),
        grid=(nblk,),
        in_specs=[
            pl.BlockSpec((R, HW), lambda b: (b, 0)),        # per-step heatmap block
            pl.BlockSpec(cst.shape, lambda b: (0, 0)),      # VMEM-resident constants
            pl.BlockSpec(par.shape, lambda b: (0, 0)),      # VMEM-resident parameters
        ],
        out_specs=pl.BlockSpec((S, _LANE), lambda b: (b, 0)),
        compiler_params=pltpu.CompilerParams(
            dimension_semantics=("parallel",)),             # megacore-shardable batch axis
    )(hm, cst, par)

    return out_padded[:batch, :out_dim]


# ----------------------------------------------------------------------------
if __name__ == "__main__":
    num_points, H, W = 8, 16, 16
    batch = 12                                  # exercises padding (-> 16) and 2 grid steps
    key = jax.random.PRNGKey(0)
    k_hm1, k_hm2, k_gnn = jax.random.split(key, 3)

    heatmaps1 = jax.random.normal(k_hm1, (batch, num_points, H, W), jnp.float32)
    heatmaps2 = jax.random.normal(k_hm2, (batch, num_points, H, W), jnp.float32)
    gnn_params = init_gnn_params(k_gnn, f_in=8, hidden=32, out_dim=2)

    loss_fn = jax.jit(functools.partial(graph_contrastive_loss, num_points=num_points))
    pred = loss_fn(gnn_params, heatmaps1, heatmaps2)
    jax.block_until_ready(pred)
    assert pred.shape == (batch, 2) and pred.dtype == jnp.float32
    assert bool(jnp.all(jnp.isfinite(pred)))
    print("KERNEL_OK")
</pallas_src>

<mosaic_0001>
module attributes {stable_mosaic.version = 11 : i64} {
  func.func @_fused_kernel(%arg0: i32, %arg1: memref<128x256xf32, #tpu.memory_space<vmem>>, %arg2: memref<904x128xf32, #tpu.memory_space<vmem>>, %arg3: memref<272x128xf32, #tpu.memory_space<vmem>>, %arg4: memref<8x128xf32, #tpu.memory_space<vmem>>) attributes {dimension_semantics = [#tpu.dimension_semantics<parallel>], iteration_bounds = array<i64: 2>, scalar_prefetch = 0 : i64, scratch_operands = 0 : i64, tpu.core_type = #tpu.core_type<tc>, window_params = [{transform_indices = @transform_0, window_bounds = array<i64: 128, 256>}, {pipeline_mode = #tpu.pipeline_mode<synchronous>, transform_indices = @transform_1, window_bounds = array<i64: 904, 128>}, {pipeline_mode = #tpu.pipeline_mode<synchronous>, transform_indices = @transform_2, window_bounds = array<i64: 272, 128>}, {transform_indices = @transform_3, window_bounds = array<i64: 8, 128>}]} {
    %c0 = arith.constant 0 : index
    %c0_0 = arith.constant 0 : index
    %0 = vector.load %arg1[%c0, %c0_0] : memref<128x256xf32, #tpu.memory_space<vmem>>, vector<128x256xf32>
    %cst = arith.constant 1.000000e+02 : f32
    %1 = vector.broadcast %cst : f32 to vector<128x256xf32>
    %2 = arith.mulf %0, %1 : vector<128x256xf32>
    %cst_1 = arith.constant dense<0xFF800000> : vector<128xf32>
    %3 = vector.multi_reduction <maximumf>, %2, %cst_1 [1] : vector<128x256xf32> to vector<128xf32>
    %4 = vector.shape_cast %3 : vector<128xf32> to vector<128x1xf32>
    %5 = vector.broadcast %4 : vector<128x1xf32> to vector<128x256xf32>
    %6 = arith.subf %2, %5 : vector<128x256xf32>
    %7 = math.exp %6 : vector<128x256xf32>
    %cst_2 = arith.constant dense<0.000000e+00> : vector<128xf32>
    %8 = vector.multi_reduction <add>, %7, %cst_2 [1] : vector<128x256xf32> to vector<128xf32>
    %9 = vector.shape_cast %8 : vector<128xf32> to vector<128x1xf32>
    %cst_3 = arith.constant 1.000000e+00 : f32
    %10 = vector.broadcast %cst_3 : f32 to vector<128x1xf32>
    %11 = arith.divf %10, %9 : vector<128x1xf32>
    %12 = tpu.iota {dimensions = array<i32: 0>} : vector<256x256xi32>
    %13 = arith.sitofp %12 : vector<256x256xi32> to vector<256x256xf32>
    %14 = tpu.iota {dimensions = array<i32: 1>} : vector<256x256xi32>
    %cst_4 = arith.constant 6.250000e-02 : f32
    %15 = vector.broadcast %cst_4 : f32 to vector<256x256xf32>
    %16 = arith.mulf %13, %15 : vector<256x256xf32>
    %17 = math.floor %16 : vector<256x256xf32>
    %cst_5 = arith.constant 1.600000e+01 : f32
    %18 = vector.broadcast %cst_5 : f32 to vector<256x256xf32>
    %19 = arith.mulf %17, %18 : vector<256x256xf32>
    %20 = arith.subf %13, %19 : vector<256x256xf32>
    %c128_i32 = arith.constant 128 : i32
    %21 = vector.broadcast %c128_i32 : i32 to vector<256x256xi32>
    %22 = arith.cmpi slt, %14, %21 : vector<256x256xi32>
    %23 = arith.select %22, %17, %20 : vector<256x256xi1>, vector<256x256xf32>
    %cst_6 = arith.constant dense<0.000000e+00> : vector<128x256xf32>
    %24 = tpu.matmul %7, %23, %cst_6 {dimension_numbers = #tpu.dot_dimension_numbers<[1], [0], [0], [1], [0, 0, 1, 1], [], []>} : vector<128x256xf32>, vector<256x256xf32>, vector<128x256xf32> -> vector<128x256xf32>
    %25 = vector.broadcast %11 : vector<128x1xf32> to vector<128x256xf32>
    %26 = arith.mulf %24, %25 : vector<128x256xf32>
    %c0_7 = arith.constant 0 : index
    %c0_8 = arith.constant 0 : index
    %27 = vector.load %arg2[%c0_7, %c0_8] : memref<904x128xf32, #tpu.memory_space<vmem>>, vector<768x128xf32>
    %cst_9 = arith.constant dense<0.000000e+00> : vector<768x256xf32>
    %28 = tpu.matmul %27, %26, %cst_9 {dimension_numbers = #tpu.dot_dimension_numbers<[1], [0], [0], [1], [0, 0, 1, 1], [], []>} : vector<768x128xf32>, vector<128x256xf32>, vector<768x256xf32> -> vector<768x256xf32>
    %29 = vector.extract_strided_slice %28 {offsets = [0, 128], sizes = [768, 128], strides = [1, 1]} : vector<768x256xf32> to vector<768x128xf32>
    %30 = vector.extract_strided_slice %28 {offsets = [0, 0], sizes = [768, 128], strides = [1, 1]} : vector<768x256xf32> to vector<768x128xf32>
    %31 = math.absf %30 : vector<768x128xf32>
    %32 = math.absf %29 : vector<768x128xf32>
    %33 = arith.maximumf %31, %32 : vector<768x128xf32>
    %34 = arith.minimumf %31, %32 : vector<768x128xf32>
    %cst_10 = arith.constant 9.99999996E-13 : f32
    %35 = vector.broadcast %cst_10 : f32 to vector<768x128xf32>
    %36 = arith.addf %33, %35 : vector<768x128xf32>
    %37 = tpu.reciprocal %36 {approx = true} : vector<768x128xf32> -> vector<768x128xf32>
    %38 = arith.mulf %34, %37 : vector<768x128xf32>
    %39 = arith.mulf %38, %38 : vector<768x128xf32>
    %cst_11 = arith.constant -0.0464964733 : f32
    %40 = vector.broadcast %cst_11 : f32 to vector<768x128xf32>
    %41 = arith.mulf %40, %39 : vector<768x128xf32>
    %cst_12 = arith.constant 0.159314215 : f32
    %42 = vector.broadcast %cst_12 : f32 to vector<768x128xf32>
    %43 = arith.addf %41, %42 : vector<768x128xf32>
    %44 = arith.mulf %43, %39 : vector<768x128xf32>
    %cst_13 = arith.constant 0.327622771 : f32
    %45 = vector.broadcast %cst_13 : f32 to vector<768x128xf32>
    %46 = arith.subf %44, %45 : vector<768x128xf32>
    %47 = arith.mulf %46, %39 : vector<768x128xf32>
    %48 = arith.mulf %47, %38 : vector<768x128xf32>
    %49 = arith.addf %48, %38 : vector<768x128xf32>
    %50 = arith.cmpf ogt, %32, %31 : vector<768x128xf32>
    %cst_14 = arith.constant 1.57079637 : f32
    %51 = vector.broadcast %cst_14 : f32 to vector<768x128xf32>
    %52 = arith.subf %51, %49 : vector<768x128xf32>
    %53 = arith.select %50, %52, %49 : vector<768x128xi1>, vector<768x128xf32>
    %cst_15 = arith.constant 0.000000e+00 : f32
    %54 = vector.broadcast %cst_15 : f32 to vector<768x128xf32>
    %55 = arith.cmpf olt, %30, %54 : vector<768x128xf32>
    %cst_16 = arith.constant 3.14159274 : f32
    %56 = vector.broadcast %cst_16 : f32 to vector<768x128xf32>
    %57 = arith.subf %56, %53 : vector<768x128xf32>
    %58 = arith.select %55, %57, %53 : vector<768x128xi1>, vector<768x128xf32>
    %cst_17 = arith.constant 0.000000e+00 : f32
    %59 = vector.broadcast %cst_17 : f32 to vector<768x128xf32>
    %60 = arith.cmpf olt, %29, %59 : vector<768x128xf32>
    %cst_18 = arith.constant 0.000000e+00 : f32
    %61 = vector.broadcast %cst_18 : f32 to vector<768x128xf32>
    %62 = arith.subf %61, %58 : vector<768x128xf32>
    %63 = arith.select %60, %62, %58 : vector<768x128xi1>, vector<768x128xf32>
    %c0_19 = arith.constant 0 : index
    %c0_20 = arith.constant 0 : index
    %64 = vector.load %arg3[%c0_19, %c0_20] : memref<272x128xf32, #tpu.memory_space<vmem>>, vector<8x128xf32>
    %65 = vector.extract_strided_slice %26 {offsets = [0, 0], sizes = [128, 128], strides = [1, 1]} : vector<128x256xf32> to vector<128x128xf32>
    %66 = vector.extract_strided_slice %64 {offsets = [0, 0], sizes = [1, 128], strides = [1, 1]} : vector<8x128xf32> to vector<1x128xf32>
    %67 = vector.broadcast %66 : vector<1x128xf32> to vector<128x128xf32>
    %68 = arith.mulf %65, %67 : vector<128x128xf32>
    %69 = vector.extract_strided_slice %26 {offsets = [0, 128], sizes = [128, 128], strides = [1, 1]} : vector<128x256xf32> to vector<128x128xf32>
    %70 = vector.extract_strided_slice %64 {offsets = [1, 0], sizes = [1, 128], strides = [1, 1]} : vector<8x128xf32> to vector<1x128xf32>
    %71 = vector.broadcast %70 : vector<1x128xf32> to vector<128x128xf32>
    %72 = arith.mulf %69, %71 : vector<128x128xf32>
    %73 = arith.addf %68, %72 : vector<128x128xf32>
    %74 = vector.extract_strided_slice %63 {offsets = [0, 0], sizes = [128, 128], strides = [1, 1]} : vector<768x128xf32> to vector<128x128xf32>
    %75 = vector.extract_strided_slice %64 {offsets = [2, 0], sizes = [1, 128], strides = [1, 1]} : vector<8x128xf32> to vector<1x128xf32>
    %76 = vector.broadcast %75 : vector<1x128xf32> to vector<128x128xf32>
    %77 = arith.mulf %74, %76 : vector<128x128xf32>
    %78 = arith.addf %73, %77 : vector<128x128xf32>
    %79 = vector.extract_strided_slice %63 {offsets = [128, 0], sizes = [128, 128], strides = [1, 1]} : vector<768x128xf32> to vector<128x128xf32>
    %80 = vector.extract_strided_slice %64 {offsets = [3, 0], sizes = [1, 128], strides = [1, 1]} : vector<8x128xf32> to vector<1x128xf32>
    %81 = vector.broadcast %80 : vector<1x128xf32> to vector<128x128xf32>
    %82 = arith.mulf %79, %81 : vector<128x128xf32>
    %83 = arith.addf %78, %82 : vector<128x128xf32>
    %84 = vector.extract_strided_slice %63 {offsets = [256, 0], sizes = [128, 128], strides = [1, 1]} : vector<768x128xf32> to vector<128x128xf32>
    %85 = vector.extract_strided_slice %64 {offsets = [4, 0], sizes = [1, 128], strides = [1, 1]} : vector<8x128xf32> to vector<1x128xf32>
    %86 = vector.broadcast %85 : vector<1x128xf32> to vector<128x128xf32>
    %87 = arith.mulf %84, %86 : vector<128x128xf32>
    %88 = arith.addf %83, %87 : vector<128x128xf32>
    %89 = vector.extract_strided_slice %63 {offsets = [384, 0], sizes = [128, 128], strides = [1, 1]} : vector<768x128xf32> to vector<128x128xf32>
    %90 = vector.extract_strided_slice %64 {offsets = [5, 0], sizes = [1, 128], strides = [1, 1]} : vector<8x128xf32> to vector<1x128xf32>
    %91 = vector.broadcast %90 : vector<1x128xf32> to vector<128x128xf32>
    %92 = arith.mulf %89, %91 : vector<128x128xf32>
    %93 = arith.addf %88, %92 : vector<128x128xf32>
    %94 = vector.extract_strided_slice %63 {offsets = [512, 0], sizes = [128, 128], strides = [1, 1]} : vector<768x128xf32> to vector<128x128xf32>
    %95 = vector.extract_strided_slice %64 {offsets = [6, 0], sizes = [1, 128], strides = [1, 1]} : vector<8x128xf32> to vector<1x128xf32>
    %96 = vector.broadcast %95 : vector<1x128xf32> to vector<128x128xf32>
    %97 = arith.mulf %94, %96 : vector<128x128xf32>
    %98 = arith.addf %93, %97 : vector<128x128xf32>
    %99 = vector.extract_strided_slice %63 {offsets = [640, 0], sizes = [128, 128], strides = [1, 1]} : vector<768x128xf32> to vector<128x128xf32>
    %100 = vector.extract_strided_slice %64 {offsets = [7, 0], sizes = [1, 128], strides = [1, 1]} : vector<8x128xf32> to vector<1x128xf32>
    %101 = vector.broadcast %100 : vector<1x128xf32> to vector<128x128xf32>
    %102 = arith.mulf %99, %101 : vector<128x128xf32>
    %103 = arith.addf %98, %102 : vector<128x128xf32>
    %c768 = arith.constant 768 : index
    %c0_21 = arith.constant 0 : index
    %104 = vector.load %arg2[%c768, %c0_21] : memref<904x128xf32, #tpu.memory_space<vmem>>, vector<128x128xf32>
    %c8 = arith.constant 8 : index
    %c0_22 = arith.constant 0 : index
    %105 = vector.load %arg3[%c8, %c0_22] : memref<272x128xf32, #tpu.memory_space<vmem>>, vector<1x128xf32>
    %c9 = arith.constant 9 : index
    %c0_23 = arith.constant 0 : index
    %106 = vector.load %arg3[%c9, %c0_23] : memref<272x128xf32, #tpu.memory_space<vmem>>, vector<1x128xf32>
    %c10 = arith.constant 10 : index
    %c0_24 = arith.constant 0 : index
    %107 = vector.load %arg3[%c10, %c0_24] : memref<272x128xf32, #tpu.memory_space<vmem>>, vector<1x128xf32>
    %c16 = arith.constant 16 : index
    %c0_25 = arith.constant 0 : index
    %108 = vector.load %arg3[%c16, %c0_25] : memref<272x128xf32, #tpu.memory_space<vmem>>, vector<128x128xf32>
    %c144 = arith.constant 144 : index
    %c0_26 = arith.constant 0 : index
    %109 = vector.load %arg3[%c144, %c0_26] : memref<272x128xf32, #tpu.memory_space<vmem>>, vector<128x128xf32>
    %cst_27 = arith.constant dense<0.000000e+00> : vector<128x128xf32>
    %110 = tpu.matmul %104, %103, %cst_27 {dimension_numbers = #tpu.dot_dimension_numbers<[1], [0], [0], [1], [0, 0, 1, 1], [], []>} : vector<128x128xf32>, vector<128x128xf32>, vector<128x128xf32> -> vector<128x128xf32>
    %111 = vector.broadcast %105 : vector<1x128xf32> to vector<128x128xf32>
    %112 = arith.addf %110, %111 : vector<128x128xf32>
    %cst_28 = arith.constant 0.000000e+00 : f32
    %113 = vector.broadcast %cst_28 : f32 to vector<128x128xf32>
    %114 = arith.maximumf %112, %113 : vector<128x128xf32>
    %cst_29 = arith.constant dense<0.000000e+00> : vector<128x128xf32>
    %115 = tpu.matmul %114, %108, %cst_29 {dimension_numbers = #tpu.dot_dimension_numbers<[1], [0], [0], [1], [0, 0, 1, 1], [], []>} : vector<128x128xf32>, vector<128x128xf32>, vector<128x128xf32> -> vector<128x128xf32>
    %cst_30 = arith.constant dense<0.000000e+00> : vector<128x128xf32>
    %116 = tpu.matmul %104, %115, %cst_30 {dimension_numbers = #tpu.dot_dimension_numbers<[1], [0], [0], [1], [0, 0, 1, 1], [], []>} : vector<128x128xf32>, vector<128x128xf32>, vector<128x128xf32> -> vector<128x128xf32>
    %117 = vector.broadcast %106 : vector<1x128xf32> to vector<128x128xf32>
    %118 = arith.addf %116, %117 : vector<128x128xf32>
    %cst_31 = arith.constant 0.000000e+00 : f32
    %119 = vector.broadcast %cst_31 : f32 to vector<128x128xf32>
    %120 = arith.maximumf %118, %119 : vector<128x128xf32>
    %c896 = arith.constant 896 : index
    %c0_32 = arith.constant 0 : index
    %121 = vector.load %arg2[%c896, %c0_32] : memref<904x128xf32, #tpu.memory_space<vmem>>, vector<8x128xf32>
    %cst_33 = arith.constant dense<0.000000e+00> : vector<8x128xf32>
    %122 = tpu.matmul %121, %120, %cst_33 {dimension_numbers = #tpu.dot_dimension_numbers<[1], [0], [0], [1], [0, 0, 1, 1], [], []>} : vector<8x128xf32>, vector<128x128xf32>, vector<8x128xf32> -> vector<8x128xf32>
    %cst_34 = arith.constant dense<0.000000e+00> : vector<8x128xf32>
    %123 = tpu.matmul %122, %109, %cst_34 {dimension_numbers = #tpu.dot_dimension_numbers<[1], [0], [0], [1], [0, 0, 1, 1], [], []>} : vector<8x128xf32>, vector<128x128xf32>, vector<8x128xf32> -> vector<8x128xf32>
    %124 = vector.broadcast %107 : vector<1x128xf32> to vector<8x128xf32>
    %125 = arith.addf %123, %124 : vector<8x128xf32>
    %c0_35 = arith.constant 0 : index
    %c0_36 = arith.constant 0 : index
    %126 = vector.load %arg4[%c0_35, %c0_36] : memref<8x128xf32, #tpu.memory_space<vmem>>, vector<8x128xf32>
    tpu.vector_store %arg4[%c0_35, %c0_36], %125 {strides = array<i32>} : memref<8x128xf32, #tpu.memory_space<vmem>>, vector<8x128xf32>,
    return
  }
  func.func @transform_0(%arg0: i32) -> (i32, i32) {
    %c0_i32 = arith.constant 0 : i32
    %c0_i32_0 = arith.constant 0 : i32
    return %arg0, %c0_i32 : i32, i32
  }
  func.func @transform_1(%arg0: i32) -> (i32, i32) {
    %c0_i32 = arith.constant 0 : i32
    %c0_i32_0 = arith.constant 0 : i32
    %c0_i32_1 = arith.constant 0 : i32
    return %c0_i32, %c0_i32_0 : i32, i32
  }
  func.func @transform_2(%arg0: i32) -> (i32, i32) {
    %c0_i32 = arith.constant 0 : i32
    %c0_i32_0 = arith.constant 0 : i32
    %c0_i32_1 = arith.constant 0 : i32
    return %c0_i32, %c0_i32_0 : i32, i32
  }
  func.func @transform_3(%arg0: i32) -> (i32, i32) {
    %c0_i32 = arith.constant 0 : i32
    %c0_i32_0 = arith.constant 0 : i32
    return %arg0, %c0_i32 : i32, i32
  }
}

</mosaic_0001>

<bundles_post_ra>
// kernel: graph_contrastive_loss.1
= control target key start
LH: loop header
LB: loop body
LE: loop exit
PB: predicated region body
PF: predicated region fallthrough
CT: control target
= control target key end

     0   :  { %s6026_s12 = smov 0   ;;  %s10612_s0 = inlined_call_operand.vmem [shape: f32[256,256], index: 0, kind: input, shape index: {}]   ;;  %s10613_s1 = inlined_call_operand.vmem [shape: f32[904,128], index: 1, kind: input, shape index: {}]   ;;  %s10614_s2 = inlined_call_operand.vmem [shape: f32[272,128], index: 2, kind: input, shape index: {}]   ;;  %s10615_s3 = inlined_call_operand.vmem [shape: f32[16,128], index: 3, kind: output, shape index: {}]  }
   0x1 LB: > { %s6032_s13 = sadd.s32 4294967295, %s6001_s12   ;;  %p4960_p0 = scmp.ge.s32.totalorder %s6001_s12, 1  ;;  %s6001_s12 = sphi %s6026_s12, %s13_s12  }
   0x2   : > { %p139_p1 = scmp.lt.s32.totalorder %s6001_s12, 3 }
   0x4   : > { %p140_p2 = pnand %p4960_p0, %p139_p1 }
   0x6   : > { %143 = sbr.rel (%p140_p2) target bundleno = 2490 (0x9ba), region = 32 }
   0xd   : > { %s4961_s14 = sshll.u32 %s6032_s13, 4  ;;  %v462_v0 = vlaneseq  ;;  %p170_p4 = scmp.lt.s32.totalorder %s6032_s13, 1 }
   0xe   : > { %p164_p3 = scmp.lt.s32.totalorder %s4961_s14, 31 }
   0xf   : > { %v6037_v1 = vshrl.u32 %v462_v0, 7  ;;  %s11452_s13 = smov (!%p170_p4, %s6032_s13), 1 }
  0x10   : > { %s11450_s14 = smov (!%p164_p3, %s4961_s14), 31  ;;  %s4964_s25 = sshll.u32 %s11452_s13, 3 }
  0x11   : > { %10817 = vst [vmem:[#allocation2_spill] sm:$0xff] %v6037_v1  ;;  %v6040_v2 = vadd.s32 8, %v6037_v1  ;;  %v495_v3 = vcvt.s32.f32 %v6037_v1  ;;  %v6044_v4 = vadd.s32 16, %v6037_v1  ;;  %v6047_v5 = vadd.s32 24, %v6037_v1  ;;  %s5066_s15 = sshll.u32 %s11450_s14, 4  ;;  %s173_s30 = scalar_lea.vmem %s10615_s3, %s4964_s25 }
  0x12   : > { %v6050_v6 = vadd.s32 32, %v6037_v1  ;;  %v6053_v7 = vadd.s32 40, %v6037_v1  ;;  %v6056_v8 = vadd.s32 48, %v6037_v1  ;;  %s6061_s18 = scalar_lea.vmem %s10612_s0, %s5066_s15  ;;  %v6065_v10 = vadd.s32 56, %v6037_v1 }
  0x13   : > { %v10616_v9 = vcvt.s32.f32 %v6040_v2  ;;  %v174_v11 = vld [vmem:[%s6061_s18] sm:$0xff]  ;;  %v175_v12 = vld [vmem:[%s6061_s18 + $0x8] sm:$0xff]  ;;  %v176_v13 = vld [vmem:[%s6061_s18 + $0x10] sm:$0xff]  ;;  %v6072_v14 = vmul.f32 0.0625, %v495_v3  ;;  %v10617_v15 = vcvt.s32.f32 %v6044_v4  ;;  %v10618_v16 = vcvt.s32.f32 %v6047_v5 }
  0x14   : > { %v10619_v17 = vcvt.s32.f32 %v6050_v6  ;;  %v6077_v18 = vmul.f32 100.0, %v174_v11  ;;  %v6079_v19 = vmul.f32 100.0, %v175_v12  ;;  %v177_v20 = vld [vmem:[%s6061_s18 + $0x18] sm:$0xff]  ;;  %v6082_v21 = vmul.f32 100.0, %v176_v13  ;;  %v178_v22 = vld [vmem:[%s6061_s18 + $0x20] sm:$0xff]  ;;  %v179_v23 = vld [vmem:[%s6061_s18 + $0x28] sm:$0xff] }
  0x15   : > { %v10621_v24 = vcvt.s32.f32 %v6053_v7  ;;  %v6087_v25 = vmul.f32 100.0, %v177_v20  ;;  %v6089_v26 = vmul.f32 100.0, %v178_v22  ;;  %v6091_v27 = vmul.f32 100.0, %v179_v23  ;;  %v180_v28 = vld [vmem:[%s6061_s18 + $0x30] sm:$0xff]  ;;  %v181_v29 = vld [vmem:[%s6061_s18 + $0x38] sm:$0xff]  ;;  %v182_v30 = vld [vmem:[%s6061_s18 + $0x40] sm:$0xff] }
  0x16   : > { %v10622_v31 = vcvt.s32.f32 %v6056_v8  ;;  %v238_v32 = vmax.f32 %v6077_v18, %v6079_v19  ;;  %v6099_v33 = vmul.f32 100.0, %v180_v28  ;;  %v6101_v34 = vmul.f32 100.0, %v181_v29  ;;  %v183_v35 = vld [vmem:[%s6061_s18 + $0x48] sm:$0xff]  ;;  %v184_v37 = vld [vmem:[%s6061_s18 + $0x50] sm:$0xff]  ;;  %v185_v38 = vld [vmem:[%s6061_s18 + $0x58] sm:$0xff] }
  0x17   : > { %v6104_v36 = vmul.f32 100.0, %v182_v30  ;;  %v244_v39 = vmax.f32 %v6089_v26, %v6091_v27  ;;  %v6110_v40 = vmul.f32 100.0, %v183_v35  ;;  %v6112_v41 = vmul.f32 100.0, %v184_v37  ;;  %v186_v42 = vld [vmem:[%s6061_s18 + $0x60] sm:$0xff]  ;;  %v187_v43 = vld [vmem:[%s6061_s18 + $0x68] sm:$0xff]  ;;  %v188_v44 = vld [vmem:[%s6061_s18 + $0x70] sm:$0xff] }
  0x18   : > { %239 = vmax.xlane.f32.xlu0 %v238_v32  ;;  %v241_v46 = vmax.f32 %v6082_v21, %v6087_v25  ;;  %v6120_v47 = vmul.f32 100.0, %v185_v38  ;;  %v6122_v48 = vmul.f32 100.0, %v186_v42  ;;  %v6124_v49 = vmul.f32 100.0, %v187_v43  ;;  %v189_v50 = vld [vmem:[%s6061_s18 + $0x78] sm:$0xff]  ;;  %v190_v51 = vld [vmem:[%s6061_s18 + $0x80] sm:$0xff]  ;;  %v191_v52 = vld [vmem:[%s6061_s18 + $0x88] sm:$0xff] }
  0x19   : > { %245 = vmax.xlane.f32.xlu1 %v244_v39  ;;  %v247_v53 = vmax.f32 %v6099_v33, %v6101_v34  ;;  %v6131_v54 = vmul.f32 100.0, %v188_v44  ;;  %v6133_v55 = vmul.f32 100.0, %v189_v50  ;;  %v6135_v56 = vmul.f32 100.0, %v190_v51  ;;  %v192_v57 = vld [vmem:[%s6061_s18 + $0x90] sm:$0xff]  ;;  %v193_v58 = vld [vmem:[%s6061_s18 + $0x98] sm:$0xff]  ;;  %v194_v59 = vld [vmem:[%s6061_s18 + $0xa0] sm:$0xff] }
  0x1a   : > { %v250_v60 = vmax.f32 %v6104_v36, %v6110_v40  ;;  %v6142_v61 = vmul.f32 100.0, %v191_v52  ;;  %v6144_v62 = vmul.f32 100.0, %v192_v57  ;;  %v195_v63 = vld [vmem:[%s6061_s18 + $0xa8] sm:$0xff]  ;;  %v196_v0 = vld [vmem:[%s6061_s18 + $0xb0] sm:$0xff]  ;;  %v197_v11 = vld [vmem:[%s6061_s18 + $0xb8] sm:$0xff]  ;;  %v562_v12 = vfloor.f32 %v6072_v14 }
  0x1b   : > { %v253_v13 = vmax.f32 %v6112_v41, %v6120_v47  ;;  %v6152_v20 = vmul.f32 100.0, %v193_v58  ;;  %v6154_v22 = vmul.f32 100.0, %v194_v59  ;;  %v6156_v23 = vmul.f32 100.0, %v195_v63  ;;  %v198_v28 = vld [vmem:[%s6061_s18 + $0xc0] sm:$0xff]  ;;  %v199_v29 = vld [vmem:[%s6061_s18 + $0xc8] sm:$0xff]  ;;  %v200_v30 = vld [vmem:[%s6061_s18 + $0xd0] sm:$0xff] }
  0x1c   : > { %10818 = vst [vmem:[#allocation3_spill] sm:$0xff] %v6142_v61  ;;  %10819 = vst [vmem:[#allocation4_spill] sm:$0xff] %v6144_v62  ;;  %242 = vmax.xlane.f32.xlu0 %v241_v46  ;;  %v256_v32 = vmax.f32 %v6122_v48, %v6124_v49  ;;  %v6163_v35 = vmul.f32 100.0, %v196_v0  ;;  %v6165_v14 = vmul.f32 100.0, %v197_v11  ;;  %v6167_v37 = vmul.f32 100.0, %v198_v28  ;;  %v201_v38 = vld [vmem:[%s6061_s18 + $0xd8] sm:$0xff] }
  0x1d   : > { %10820 = vst [vmem:[#allocation5_spill] sm:$0xff] %v6152_v20  ;;  %10821 = vst [vmem:[#allocation6_spill] sm:$0xff] %v6154_v22  ;;  %v202_v39 = vld [vmem:[%s6061_s18 + $0xe0] sm:$0xff]  ;;  %v203_v42 = vld [vmem:[%s6061_s18 + $0xe8] sm:$0xff]  ;;  %248 = vmax.xlane.f32.xlu1 %v247_v53  ;;  %v259_v43 = vmax.f32 %v6131_v54, %v6133_v55  ;;  %v262_v44 = vmax.f32 %v6135_v56, %v6142_v61  ;;  %v6176_v46 = vmul.f32 100.0, %v199_v29  ;;  %v6178_v50 = vmul.f32 100.0, %v200_v30 }
  0x1e   : > { %10822 = vst [vmem:[#allocation7_spill] sm:$0xff] %v6156_v23  ;;  %v204_v51 = vld [vmem:[%s6061_s18 + $0xf0] sm:$0xff]  ;;  %v205_v52 = vld [vmem:[%s6061_s18 + $0xf8] sm:$0xff]  ;;  %v265_v57 = vmax.f32 %v6144_v62, %v6152_v20  ;;  %v6184_v58 = vmul.f32 100.0, %v201_v38  ;;  %v6186_v59 = vmul.f32 100.0, %v202_v39  ;;  %v6188_v53 = vmul.f32 100.0, %v203_v42 }
  0x1f   : > { %v268_v63 = vmax.f32 %v6154_v22, %v6156_v23  ;;  %v531_v28 = vmul.f32 0.0625, %v10616_v9  ;;  %v6198_v29 = vmul.f32 100.0, %v204_v51  ;;  %v6200_v30 = vmul.f32 100.0, %v205_v52 }
  0x20   : > { %10823 = vst [vmem:[#allocation8_spill] sm:$0xff] %v6188_v53  ;;  %251 = vmax.xlane.f32.xlu0 %v250_v60  ;;  %v594_v38 = vmul.f32 16.0, %v562_v12  ;;  %v532_v39 = vmul.f32 0.0625, %v10617_v15  ;;  %v533_v11 = vmul.f32 0.0625, %v10618_v16  ;;  %v534_v9 = vmul.f32 0.0625, %v10619_v17 }
  0x21   : > { %10824 = vst [vmem:[#allocation9_spill] sm:$0xff] %v6198_v29  ;;  %10825 = vst [vmem:[#allocation10_spill] sm:$0xff] %v6200_v30  ;;  %254 = vmax.xlane.f32.xlu1 %v253_v13  ;;  %v563_v0 = vfloor.f32 %v531_v28  ;;  %v535_v52 = vmul.f32 0.0625, %v10621_v24  ;;  %v6216_v13 = vmul.f32 0.0625, %v10622_v31  ;;  %v10826_v23 = vcvt.s32.f32 %v6065_v10 }
  0x22   : > { %v564_v51 = vfloor.f32 %v532_v39  ;;  %v626_v28 = vsub.f32 %v495_v3, %v594_v38  ;;  %v565_v42 = vfloor.f32 %v533_v11  ;;  %v566_v16 = vfloor.f32 %v534_v9 }
  0x23   : > { %v595_v15 = vmul.f32 16.0, %v563_v0  ;;  %v567_v17 = vfloor.f32 %v535_v52  ;;  %v6222_v60 = vmul.f32 0.0625, %v10826_v23  ;;  %v10827_v24 = vcvt.s32.f32 %v6040_v2 }
  0x24   : > { %257 = vmax.xlane.f32.xlu0 %v256_v32  ;;  %v596_v45 = vmul.f32 16.0, %v564_v51  ;;  %v5437_v22 = vpack.c.bf16 %v563_v0, %v562_v12  ;;  %v597_v20 = vmul.f32 16.0, %v565_v42  ;;  %v598_v62 = vmul.f32 16.0, %v566_v16 }
  0x25   : > { %260 = vmax.xlane.f32.xlu1 %v259_v43  ;;  %v627_v31 = vsub.f32 %v10827_v24, %v595_v15  ;;  %v10828_v3 = vcvt.s32.f32 %v6044_v4  ;;  %v5441_v9 = vpack.c.bf16 %v565_v42, %v564_v51  ;;  %v599_v32 = vmul.f32 16.0, %v567_v17 }
  0x26   : > { %v569_v38 = vfloor.f32 %v6222_v60  ;;  %v10829_v23 = vcvt.s32.f32 %v6047_v5  ;;  %v10830_v39 = vcvt.s32.f32 %v6050_v6  ;;  %v10831_v2 = vfloor.f32 %v6216_v13 }
  0x27   : > { %v628_v11 = vsub.f32 %v10828_v3, %v596_v45  ;;  %v5435_v52 = vpack.c.bf16 %v627_v31, %v626_v28  ;;  %v10832_v24 = vcvt.s32.f32 %v6053_v7  ;;  %v5445_v4 = vpack.c.bf16 %v567_v17, %v566_v16 }
  0x28   : > { %v629_v61 = vsub.f32 %v10829_v23, %v597_v20  ;;  %v630_v43 = vsub.f32 %v10830_v39, %v598_v62  ;;  %v600_v15 = vmul.f32 16.0, %v10831_v2  ;;  %263 = vmax.xlane.f32.xlu0 %v262_v44  ;;  %v601_v45 = vmul.f32 16.0, %v569_v38 }
  0x29   : > { %v631_v12 = vsub.f32 %v10832_v24, %v599_v32  ;;  %v471_v0 = vadd.s32 64, %v6037_v1  ;;  %266 = vmax.xlane.f32.xlu1 %v265_v57  ;;  %5436 = vmatprep.subr.bf16.mxu0 %v5435_v52  ;;  %v10833_v5 = vcvt.s32.f32 %v6056_v8  ;;  %v472_v6 = vadd.s32 72, %v6037_v1 }
  0x2a   : > { %v5439_v31 = vpack.c.bf16 %v629_v61, %v628_v11  ;;  %v473_v62 = vadd.s32 80, %v6037_v1  ;;  %5438 = vmatpush1.bf16.msra.mxu0 %v5437_v22  ;;  %v10834_v44 = vcvt.s32.f32 %v6065_v10  ;;  %v474_v16 = vadd.s32 88, %v6037_v1 }
  0x2b   : > { %v632_v20 = vsub.f32 %v10833_v5, %v600_v15  ;;  %v5443_v42 = vpack.c.bf16 %v631_v12, %v630_v43  ;;  %v503_v60 = vcvt.s32.f32 %v471_v0  ;;  %v504_v17 = vcvt.s32.f32 %v472_v6 }
  0x2c   : > { %v633_v7 = vsub.f32 %v10834_v44, %v601_v45  ;;  %5440 = vmatprep.subr.bf16.mxu0 %v5439_v31  ;;  %v505_v57 = vcvt.s32.f32 %v473_v62  ;;  %v475_v61 = vadd.s32 96, %v6037_v1  ;;  %v476_v8 = vadd.s32 104, %v6037_v1  ;;  %269 = vmax.xlane.f32.xlu0 %v268_v63 }
  0x2d   : > { %v538_v28 = vmul.f32 0.0625, %v503_v60  ;;  %v506_v39 = vcvt.s32.f32 %v474_v16  ;;  %v477_v22 = vadd.s32 112, %v6037_v1  ;;  %v10835_v10 = vmax.f32 %v6163_v35, %v6165_v14 }
  0x2e   : > { %v5447_v51 = vpack.c.bf16 %v633_v7, %v632_v20  ;;  %v539_v3 = vmul.f32 0.0625, %v504_v17  ;;  %v540_v11 = vmul.f32 0.0625, %v505_v57  ;;  %v507_v32 = vcvt.s32.f32 %v475_v61  ;;  %5442 = vmatpush1.bf16.msra.mxu0 %v5441_v9 }
  0x2f   : > { %272 = vmax.xlane.f32.xlu1 %v10835_v10  ;;  %v508_v52 = vcvt.s32.f32 %v476_v8  ;;  %v570_v23 = vfloor.f32 %v538_v28  ;;  %v541_v43 = vmul.f32 0.0625, %v506_v39  ;;  %v478_v2 = vadd.s32 120, %v6037_v1  ;;  %5444 = vmatprep.subr.bf16.mxu0 %v5443_v42 }
  0x30   : > { %v509_v15 = vcvt.s32.f32 %v477_v22  ;;  %v571_v63 = vfloor.f32 %v539_v3  ;;  %v572_v24 = vfloor.f32 %v540_v11  ;;  %v542_v12 = vmul.f32 0.0625, %v507_v32 }
  0x31   : > { %v543_v45 = vmul.f32 0.0625, %v508_v52  ;;  %v10836_v0 = vmax.f32 %v6167_v37, %v6176_v46  ;;  %v602_v31 = vmul.f32 16.0, %v570_v23  ;;  %v573_v5 = vfloor.f32 %v541_v43 }
  0x32   : > { %v510_v20 = vcvt.s32.f32 %v478_v2  ;;  %v6256_v6 = vmul.f32 0.0625, %v509_v15  ;;  %v10837_v9 = vmax.f32 %v6178_v50, %v6184_v58  ;;  %v283_v62 = vmax.f32 %v6198_v29, %v6200_v30  ;;  %5446 = vmatpush1.bf16.msra.mxu0 %v5445_v4 }
  0x33   : > { %275 = vmax.xlane.f32.xlu0 %v10836_v0  ;;  %v603_v42 = vmul.f32 16.0, %v571_v63  ;;  %v604_v44 = vmul.f32 16.0, %v572_v24  ;;  %v574_v7 = vfloor.f32 %v542_v12  ;;  %v10838_v16 = vfloor.f32 %v6216_v13  ;;  %5448 = vmatprep.subr.bf16.mxu0 %v5447_v51 }
  0x34   : > { %278 = vmax.xlane.f32.xlu1 %v10837_v9  ;;  %v634_v8 = vsub.f32 %v503_v60, %v602_v31  ;;  %v605_v28 = vmul.f32 16.0, %v573_v5  ;;  %v575_v22 = vfloor.f32 %v543_v45  ;;  %v545_v43 = vmul.f32 0.0625, %v510_v20 }
  0x35   : > { %v5449_v61 = vpack.c.bf16 %v569_v38, %v10838_v16  ;;  %v635_v10 = vsub.f32 %v504_v17, %v603_v42  ;;  %v636_v3 = vsub.f32 %v505_v57, %v604_v44  ;;  %v606_v11 = vmul.f32 16.0, %v574_v7 }
  0x36   : > { %v10839_v2 = vmax.f32 %v6186_v59, %v6188_v53  ;;  %v5453_v0 = vpack.c.bf16 %v571_v63, %v570_v23  ;;  %v637_v9 = vsub.f32 %v506_v39, %v605_v28  ;;  %v607_v30 = vmul.f32 16.0, %v575_v22 }
  0x37   : > { %v576_v4 = vfloor.f32 %v6256_v6  ;;  %v5451_v13 = vpack.c.bf16 %v635_v10, %v634_v8  ;;  %v5457_v38 = vpack.c.bf16 %v573_v5, %v572_v24  ;;  %v577_v60 = vfloor.f32 %v545_v43  ;;  %5450 = vmatpush1.bf16.msra.mxu0 %v5449_v61 }
  0x38   : > { %281 = vmax.xlane.f32.xlu0 %v10839_v2  ;;  %284 = vmax.xlane.f32.xlu1 %v283_v62  ;;  %v479_v12 = vadd.s32 128, %v6037_v1  ;;  %v5455_v17 = vpack.c.bf16 %v637_v9, %v636_v3  ;;  %v638_v57 = vsub.f32 %v507_v32, %v606_v11  ;;  %v480_v45 = vadd.s32 136, %v6037_v1 }
  0x39   : > { %v608_v51 = vmul.f32 16.0, %v576_v4  ;;  %5452 = vmatprep.subr.bf16.mxu0 %v5451_v13  ;;  %v639_v31 = vsub.f32 %v508_v52, %v607_v30  ;;  %v609_v42 = vmul.f32 16.0, %v577_v60  ;;  %v481_v39 = vadd.s32 144, %v6037_v1 }
  0x3a   : > { %v511_v23 = vcvt.s32.f32 %v479_v12  ;;  %v5461_v63 = vpack.c.bf16 %v575_v22, %v574_v7  ;;  %v512_v62 = vcvt.s32.f32 %v480_v45  ;;  %v482_v24 = vadd.s32 152, %v6037_v1 }
  0x3b   : > { %v640_v6 = vsub.f32 %v509_v15, %v608_v51  ;;  %v641_v5 = vsub.f32 %v510_v20, %v609_v42  ;;  %v513_v16 = vcvt.s32.f32 %v481_v39  ;;  %v483_v61 = vadd.s32 160, %v6037_v1  ;;  %5454 = vmatpush1.bf16.msra.mxu0 %v5453_v0 }
  0x3c   : > { %v546_v44 = vmul.f32 0.0625, %v511_v23  ;;  %v547_v32 = vmul.f32 0.0625, %v512_v62  ;;  %v514_v8 = vcvt.s32.f32 %v482_v24  ;;  %v484_v28 = vadd.s32 168, %v6037_v1  ;;  %5456 = vmatprep.subr.bf16.mxu0 %v5455_v17 }
  0x3d   : > { %v485_v30 = vadd.s32 176, %v6037_v1  ;;  %v5459_v52 = vpack.c.bf16 %v639_v31, %v638_v57  ;;  %v548_v7 = vmul.f32 0.0625, %v513_v16  ;;  %v515_v15 = vcvt.s32.f32 %v483_v61 }
  0x3e   : > { %v578_v10 = vfloor.f32 %v546_v44  ;;  %v579_v22 = vfloor.f32 %v547_v32  ;;  %v549_v3 = vmul.f32 0.0625, %v514_v8  ;;  %v516_v11 = vcvt.s32.f32 %v484_v28 }
  0x3f   : > { %v486_v20 = vadd.s32 184, %v6037_v1  ;;  %v580_v2 = vfloor.f32 %v548_v7  ;;  %v6277_v9 = vmul.f32 0.0625, %v515_v15  ;;  %v517_v0 = vcvt.s32.f32 %v485_v30  ;;  %5458 = vmatpush1.bf16.msra.mxu0 %v5457_v38 }
  0x40   : > { %v610_v43 = vmul.f32 16.0, %v578_v10  ;;  %v5463_v13 = vpack.c.bf16 %v641_v5, %v640_v6  ;;  %v611_v12 = vmul.f32 16.0, %v579_v22  ;;  %v581_v51 = vfloor.f32 %v549_v3  ;;  %5460 = vmatprep.subr.bf16.mxu0 %v5459_v52 }
  0x41   : > { %v551_v45 = vmul.f32 0.0625, %v516_v11  ;;  %v612_v57 = vmul.f32 16.0, %v580_v2  ;;  %v582_v31 = vfloor.f32 %v6277_v9  ;;  %v518_v42 = vcvt.s32.f32 %v486_v20 }
  0x42   : > { %v642_v17 = vsub.f32 %v511_v23, %v610_v43  ;;  %v643_v39 = vsub.f32 %v512_v62, %v611_v12  ;;  %v613_v24 = vmul.f32 16.0, %v581_v51  ;;  %v5465_v61 = vpack.c.bf16 %v577_v60, %v576_v4 }
  0x43   : > { %v583_v44 = vfloor.f32 %v551_v45  ;;  %v614_v32 = vmul.f32 16.0, %v582_v31  ;;  %v6280_v28 = vmul.f32 0.0625, %v517_v0  ;;  %v6282_v7 = vmul.f32 0.0625, %v518_v42  ;;  %5462 = vmatpush1.bf16.msra.mxu0 %v5461_v63 }
  0x44   : > { %v5467_v38 = vpack.c.bf16 %v643_v39, %v642_v17  ;;  %v644_v6 = vsub.f32 %v513_v16, %v612_v57  ;;  %v645_v5 = vsub.f32 %v514_v8, %v613_v24  ;;  %5464 = vmatprep.subr.bf16.mxu0 %v5463_v13  ;;  %v487_v62 = vadd.s32 192, %v6037_v1 }
  0x45   : > { %v615_v30 = vmul.f32 16.0, %v583_v44  ;;  %v646_v23 = vsub.f32 %v515_v15, %v614_v32  ;;  %v584_v52 = vfloor.f32 %v6280_v28  ;;  %v585_v3 = vfloor.f32 %v6282_v7 }
  0x46   : > { %v5469_v20 = vpack.c.bf16 %v579_v22, %v578_v10  ;;  %v488_v60 = vadd.s32 200, %v6037_v1  ;;  %v489_v43 = vadd.s32 208, %v6037_v1  ;;  %v5473_v9 = vpack.c.bf16 %v581_v51, %v580_v2 }
  0x47   : > { %v647_v4 = vsub.f32 %v516_v11, %v615_v30  ;;  %v616_v63 = vmul.f32 16.0, %v584_v52  ;;  %v617_v12 = vmul.f32 16.0, %v585_v3  ;;  %v519_v16 = vcvt.s32.f32 %v487_v62  ;;  %5466 = vmatpush1.bf16.msra.mxu0 %v5465_v61 }
  0x48   : > { %v5471_v8 = vpack.c.bf16 %v645_v5, %v644_v6  ;;  %v520_v13 = vcvt.s32.f32 %v488_v60  ;;  %v490_v15 = vadd.s32 216, %v6037_v1  ;;  %v521_v45 = vcvt.s32.f32 %v489_v43  ;;  %5468 = vmatprep.subr.bf16.mxu0 %v5467_v38 }
  0x49   : > { %v5475_v17 = vpack.c.bf16 %v647_v4, %v646_v23  ;;  %v648_v57 = vsub.f32 %v517_v0, %v616_v63  ;;  %v554_v39 = vmul.f32 0.0625, %v519_v16  ;;  %v491_v10 = vadd.s32 224, %v6037_v1 }
  0x4a   : > { %v555_v22 = vmul.f32 0.0625, %v520_v13  ;;  %v522_v11 = vcvt.s32.f32 %v490_v15  ;;  %v556_v24 = vmul.f32 0.0625, %v521_v45  ;;  %v492_v2 = vadd.s32 232, %v6037_v1 }
  0x4b   : > { %v649_v51 = vsub.f32 %v518_v42, %v617_v12  ;;  %v586_v32 = vfloor.f32 %v554_v39  ;;  %v523_v28 = vcvt.s32.f32 %v491_v10  ;;  %v493_v61 = vadd.s32 240, %v6037_v1  ;;  %5470 = vmatpush1.bf16.msra.mxu0 %v5469_v20 }
  0x4c   : > { %v587_v7 = vfloor.f32 %v555_v22  ;;  %v557_v6 = vmul.f32 0.0625, %v522_v11  ;;  %v588_v5 = vfloor.f32 %v556_v24  ;;  %v524_v38 = vcvt.s32.f32 %v492_v2  ;;  %5472 = vmatprep.subr.bf16.mxu0 %v5471_v8 }
  0x4d   : > { %v618_v0 = vmul.f32 16.0, %v586_v32  ;;  %v558_v30 = vmul.f32 0.0625, %v523_v28  ;;  %v494_v23 = vadd.s32 248, %v6037_v1  ;;  %v525_v62 = vcvt.s32.f32 %v493_v61 }
  0x4e   : > { %v619_v4 = vmul.f32 16.0, %v587_v7  ;;  %v589_v60 = vfloor.f32 %v557_v6  ;;  %v5477_v43 = vpack.c.bf16 %v583_v44, %v582_v31  ;;  %v5479_v63 = vpack.c.bf16 %v649_v51, %v648_v57 }
  0x4f   : > { %v559_v42 = vmul.f32 0.0625, %v524_v38  ;;  %v526_v12 = vcvt.s32.f32 %v494_v23  ;;  %5474 = vmatpush1.bf16.msra.mxu0 %v5473_v9  ;;  %v650_v15 = vsub.f32 %v519_v16, %v618_v0  ;;  %v620_v20 = vmul.f32 16.0, %v588_v5 }
  0x50   : > { %v651_v39 = vsub.f32 %v520_v13, %v619_v4  ;;  %v590_v10 = vfloor.f32 %v558_v30  ;;  %5476 = vmatprep.subr.bf16.mxu0 %v5475_v17  ;;  %v621_v22 = vmul.f32 16.0, %v589_v60  ;;  %v560_v8 = vmul.f32 0.0625, %v525_v62 }
  0x51   : > { %v591_v24 = vfloor.f32 %v559_v42  ;;  %v561_v2 = vmul.f32 0.0625, %v526_v12  ;;  %v5481_v29 = vpack.c.bf16 %v585_v3, %v584_v52  ;;  %v652_v61 = vsub.f32 %v521_v45, %v620_v20 }
  0x52   : > { %v5483_v1 = vpack.c.bf16 %v651_v39, %v650_v15  ;;  %v622_v53 = vmul.f32 16.0, %v590_v10  ;;  %v653_v31 = vsub.f32 %v522_v11, %v621_v22  ;;  %v592_v57 = vfloor.f32 %v560_v8 }
  0x53   : > { %5478 = vmatpush1.bf16.msra.mxu0 %v5477_v43  ;;  %v623_v44 = vmul.f32 16.0, %v591_v24  ;;  %v593_v51 = vfloor.f32 %v561_v2  ;;  %v5485_v9 = vpack.c.bf16 %v587_v7, %v586_v32  ;;  %v5489_v30 = vpack.c.bf16 %v589_v60, %v588_v5 }
  0x54   : > { %5480 = vmatprep.subr.bf16.mxu0 %v5479_v63  ;;  %v654_v16 = vsub.f32 %v523_v28, %v622_v53  ;;  %v5487_v13 = vpack.c.bf16 %v653_v31, %v652_v61  ;;  %v624_v6 = vmul.f32 16.0, %v592_v57  ;;  %v5493_v23 = vpack.c.bf16 %v591_v24, %v590_v10 }
  0x55   : > { %v655_v17 = vsub.f32 %v524_v38, %v623_v44  ;;  %v625_v0 = vmul.f32 16.0, %v593_v51  ;;  %v5497_v4 = vpack.c.bf16 %v593_v51, %v592_v57 }
  0x56   : > { %v656_v3 = vsub.f32 %v525_v62, %v624_v6 }
  0x57   : > { %5482 = vmatpush1.bf16.msra.mxu0 %v5481_v29  ;;  %v5491_v52 = vpack.c.bf16 %v655_v17, %v654_v16  ;;  %v657_v45 = vsub.f32 %v526_v12, %v625_v0  ;;  %v10840_v0 = vld [vmem:[#allocation3_spill] sm:$0xff] }
  0x58   : > { %5484 = vmatprep.subr.bf16.mxu0 %v5483_v1 }
  0x59   : > { %v5495_v11 = vpack.c.bf16 %v657_v45, %v656_v3  ;;  %v10842_v45 = vld [vmem:[#allocation5_spill] sm:$0xff] }
  0x5b   : > { %5486 = vmatpush1.bf16.msra.mxu0 %v5485_v9 }
  0x5c   : > { %5488 = vmatprep.subr.bf16.mxu0 %v5487_v13 }
  0x5f   : > { %5490 = vmatpush1.bf16.msra.mxu0 %v5489_v30 }
  0x60   : > { %5492 = vmatprep.subr.bf16.mxu0 %v5491_v52 }
  0x63   : > { %5494 = vmatpush1.bf16.msra.mxu0 %v5493_v23 }
  0x64   : > { %5496 = vmatprep.subr.bf16.mxu0 %v5495_v11 }
  0x67   : > { %5498 = vmatpush1.bf16.msra.mxu0 %v5497_v4 }
  0xa5   : > { %v240_v53 = vpop.xlane.xlu0 %239 }
  0xa6   : > { %v286_v1 = vsub.f32 %v6077_v18, %v240_v53  ;;  %v287_v29 = vsub.f32 %v6079_v19, %v240_v53  ;;  %v246_v32 = vpop.xlane.xlu1 %245 }
  0xa7   : > { %v290_v28 = vsub.f32 %v6089_v26, %v246_v32  ;;  %v291_v7 = vsub.f32 %v6091_v27, %v246_v32 }
  0xa8   : > { %v318_v5 = vmul.f32 1.442695, %v286_v1  ;;  %v320_v38 = vmul.f32 1.442695, %v287_v29 }
  0xa9   : > { %v243_v62 = vpop.xlane.xlu0 %242  ;;  %v326_v60 = vmul.f32 1.442695, %v290_v28  ;;  %v328_v43 = vmul.f32 1.442695, %v291_v7 }
  0xaa   : > { %5702 = vpow2.f32 %v318_v5  ;;  %v288_v63 = vsub.f32 %v6082_v21, %v243_v62  ;;  %v289_v42 = vsub.f32 %v6087_v25, %v243_v62  ;;  %v249_v12 = vpop.xlane.xlu1 %248 }
  0xab   : > { %5704 = vpow2.f32 %v320_v38  ;;  %v292_v18 = vsub.f32 %v6099_v33, %v249_v12  ;;  %v293_v19 = vsub.f32 %v6101_v34, %v249_v12  ;;  %v10843_v38 = vld [vmem:[#allocation6_spill] sm:$0xff] }
  0xac   : > { %v322_v15 = vmul.f32 1.442695, %v288_v63  ;;  %v324_v26 = vmul.f32 1.442695, %v289_v42  ;;  %5706 = vpow2.f32 %v326_v60  ;;  %v10844_v60 = vld [vmem:[#allocation7_spill] sm:$0xff] }
  0xad   : > { %5708 = vpow2.f32 %v328_v43  ;;  %v330_v27 = vmul.f32 1.442695, %v292_v18  ;;  %v332_v39 = vmul.f32 1.442695, %v293_v19  ;;  %v252_v20 = vpop.xlane.xlu0 %251 }
  0xae   : > { %5710 = vpow2.f32 %v322_v15  ;;  %v294_v10 = vsub.f32 %v6104_v36, %v252_v20  ;;  %v295_v21 = vsub.f32 %v6110_v40, %v252_v20  ;;  %v255_v22 = vpop.xlane.xlu1 %254 }
  0xaf   : > { %5712 = vpow2.f32 %v324_v26  ;;  %v296_v25 = vsub.f32 %v6112_v41, %v255_v22  ;;  %v297_v33 = vsub.f32 %v6120_v47, %v255_v22 }
  0xb0   : > { %5714 = vpow2.f32 %v330_v27  ;;  %v334_v34 = vmul.f32 1.442695, %v294_v10  ;;  %v336_v24 = vmul.f32 1.442695, %v295_v21 }
  0xb1   : > { %5716 = vpow2.f32 %v332_v39  ;;  %v338_v8 = vmul.f32 1.442695, %v296_v25  ;;  %v340_v2 = vmul.f32 1.442695, %v297_v33  ;;  %v258_v61 = vpop.xlane.xlu0 %257 }
  0xb2   : > { %5718 = vpow2.f32 %v334_v34  ;;  %v298_v31 = vsub.f32 %v6122_v48, %v258_v61  ;;  %v299_v36 = vsub.f32 %v6124_v49, %v258_v61  ;;  %v261_v44 = vpop.xlane.xlu1 %260 }
  0xb3   : > { %5720 = vpow2.f32 %v336_v24  ;;  %v300_v40 = vsub.f32 %v6131_v54, %v261_v44  ;;  %v301_v41 = vsub.f32 %v6133_v55, %v261_v44  ;;  %v10841_v55 = vld [vmem:[#allocation4_spill] sm:$0xff] }
  0xb4   : > { %v5703_v57 = vpop.eup %5702  ;;  %5722 = vpow2.f32 %v338_v8  ;;  %v342_v47 = vmul.f32 1.442695, %v298_v31  ;;  %v344_v51 = vmul.f32 1.442695, %v299_v36 }
  0xb5   : > { %v5705_v9 = vpop.eup %5704  ;;  %5724 = vpow2.f32 %v340_v2  ;;  %v346_v16 = vmul.f32 1.442695, %v300_v40  ;;  %v348_v13 = vmul.f32 1.442695, %v301_v41  ;;  %v264_v17 = vpop.xlane.xlu0 %263 }
  0xb6   : > { %v5707_v6 = vpop.eup %5706  ;;  %788 = vmatprep.mubr.f32.mxu0 %v5705_v9  ;;  %v382_v48 = vadd.f32 %v5705_v9, %v5703_v57  ;;  %5726 = vpow2.f32 %v342_v47  ;;  %v302_v49 = vsub.f32 %v6135_v56, %v264_v17  ;;  %v303_v30 = vsub.f32 %v10840_v0, %v264_v17  ;;  %v267_v54 = vpop.xlane.xlu1 %266  ;;  %v10847_v17 = vld [vmem:[#allocation10_spill] sm:$0xff] }
  0xb7   : > { %v5709_v52 = vpop.eup %5708  ;;  %789 = vmatmul.mubr.f32.vlgmr.msra.gmra.mrb[0].mxu0 %v5703_v57  ;;  %5728 = vpow2.f32 %v344_v51  ;;  %v304_v3 = vsub.f32 %v10841_v55, %v267_v54  ;;  %v305_v23 = vsub.f32 %v10842_v45, %v267_v54 }
  0xb8   : > { %v5711_v11 = vpop.eup %5710  ;;  %383 = vadd.xlane.f32.xlu0 %v382_v48  ;;  %5730 = vpow2.f32 %v346_v16  ;;  %v350_v4 = vmul.f32 1.442695, %v302_v49  ;;  %v352_v53 = vmul.f32 1.442695, %v303_v30  ;;  %v388_v29 = vadd.f32 %v5709_v52, %v5707_v6  ;;  %v10846_v16 = vld [vmem:[#allocation9_spill] sm:$0xff] }
  0xb9   : > { %v5713_v1 = vpop.eup %5712  ;;  %5732 = vpow2.f32 %v348_v13  ;;  %v354_v32 = vmul.f32 1.442695, %v304_v3  ;;  %v356_v56 = vmul.f32 1.442695, %v305_v23  ;;  %v270_v28 = vpop.xlane.xlu0 %269 }
  0xba   : > { %v5715_v7 = vpop.eup %5714  ;;  %794 = vmatprep.mubr.f32.mxu0 %v5713_v1  ;;  %v385_v5 = vadd.f32 %v5713_v1, %v5711_v11  ;;  %5734 = vpow2.f32 %v350_v4  ;;  %v306_v62 = vsub.f32 %v10843_v38, %v270_v28  ;;  %v307_v43 = vsub.f32 %v10844_v60, %v270_v28 }
  0xbb   : > { %v5717_v42 = vpop.eup %5716  ;;  %795 = vmatmul.mubr.f32.gmra.mrb[2].mxu0 %v5711_v11  ;;  %5736 = vpow2.f32 %v352_v53 }
  0xbc   : > { %v273_v63 = vpop.xlane.xlu1 %272  ;;  %v6318_v19 = vpop.eup %5718  ;;  %386 = vadd.xlane.f32.xlu1 %v385_v5  ;;  %800 = vmatprep.mubr.f32.mxu0 %v5709_v52  ;;  %v391_v15 = vadd.f32 %v5717_v42, %v5715_v7  ;;  %5738 = vpow2.f32 %v354_v32  ;;  %v358_v26 = vmul.f32 1.442695, %v306_v62  ;;  %v360_v27 = vmul.f32 1.442695, %v307_v43 }
  0xbd   : > { %v308_v12 = vsub.f32 %v6163_v35, %v273_v63  ;;  %v309_v18 = vsub.f32 %v6165_v14, %v273_v63  ;;  %v5721_v39 = vpop.eup %5720  ;;  %389 = vadd.xlane.f32.xlu0 %v388_v29  ;;  %5740 = vpow2.f32 %v356_v56 }
  0xbe   : > { %v6320_v22 = vpop.eup %5722  ;;  %v394_v35 = vadd.f32 %v5721_v39, %v6318_v19  ;;  %5742 = vpow2.f32 %v358_v26 }
  0xbf   : > { %v362_v20 = vmul.f32 1.442695, %v308_v12  ;;  %v364_v10 = vmul.f32 1.442695, %v309_v18  ;;  %v5725_v34 = vpop.eup %5724  ;;  %801 = vmatmul.mubr.f32.gmra.mrb[4].mxu0 %v5707_v6  ;;  %5744 = vpow2.f32 %v360_v27 }
  0xc0   : > { %v276_v21 = vpop.xlane.xlu0 %275  ;;  %v5727_v2 = vpop.eup %5726  ;;  %806 = vmatprep.mubr.f32.mxu0 %v5717_v42  ;;  %392 = vadd.xlane.f32.xlu1 %v391_v15  ;;  %v397_v61 = vadd.f32 %v5725_v34, %v6320_v22 }
  0xc1   : > { %v310_v14 = vsub.f32 %v6167_v37, %v276_v21  ;;  %v311_v25 = vsub.f32 %v6176_v46, %v276_v21  ;;  %v279_v33 = vpop.xlane.xlu1 %278  ;;  %5746 = vpow2.f32 %v362_v20  ;;  %v5729_v44 = vpop.eup %5728  ;;  %395 = vadd.xlane.f32.xlu0 %v394_v35 }
  0xc2   : > { %v312_v24 = vsub.f32 %v6178_v50, %v279_v33  ;;  %v313_v8 = vsub.f32 %v6184_v58, %v279_v33  ;;  %5748 = vpow2.f32 %v364_v10  ;;  %v5731_v41 = vpop.eup %5730  ;;  %v400_v57 = vadd.f32 %v5729_v44, %v5727_v2  ;;  %v10845_v58 = vld [vmem:[#allocation8_spill] sm:$0xff]  ;;  %v3958_v10 = vld [vmem:[%s10614_s2] sm:$0xff] }
  0xc3   : > { %v366_v31 = vmul.f32 1.442695, %v310_v14  ;;  %v368_v36 = vmul.f32 1.442695, %v311_v25  ;;  %v5733_v9 = vpop.eup %5732  ;;  %807 = vmatmul.mubr.f32.gmra.mrb[6].mxu0 %v5715_v7 }
  0xc4   : > { %v370_v37 = vmul.f32 1.442695, %v312_v24  ;;  %v372_v46 = vmul.f32 1.442695, %v313_v8  ;;  %v5735_v48 = vpop.eup %5734  ;;  %812 = vmatprep.mubr.f32.mxu0 %v5721_v39  ;;  %398 = vadd.xlane.f32.xlu1 %v397_v61  ;;  %v403_v49 = vadd.f32 %v5733_v9, %v5731_v41  ;;  %v10848_v39 = vld [vmem:[#allocation2_spill] sm:$0xff] }
  0xc5   : > { %v282_v40 = vpop.xlane.xlu0 %281  ;;  %5750 = vpow2.f32 %v366_v31  ;;  %v285_v51 = vpop.xlane.xlu1 %284  ;;  %401 = vadd.xlane.f32.xlu0 %v400_v57  ;;  %v3961_v20 = vsub.s32 0, %v10848_v39  ;;  %v3981_v21 = vsub.s32 1, %v10848_v39 }
  0xc6   : > { %v314_v50 = vsub.f32 %v6186_v59, %v282_v40  ;;  %v315_v47 = vsub.f32 %v10845_v58, %v282_v40  ;;  %5752 = vpow2.f32 %v368_v36  ;;  %v316_v13 = vsub.f32 %v10846_v16, %v285_v51  ;;  %v5737_v54 = vpop.eup %5736 }
  0xc7   : > { %v317_v6 = vsub.f32 %v10847_v17, %v285_v51  ;;  %5754 = vpow2.f32 %v370_v37  ;;  %v5739_v55 = vpop.eup %5738  ;;  %v406_v3 = vadd.f32 %v5737_v54, %v5735_v48  ;;  %813 = vmatmul.mubr.f32.gmra.mrb[8].mxu0 %v6318_v19  ;;  %v10632_v19 = vmov 0.0  }
  0xc8   : > { %v374_v0 = vmul.f32 1.442695, %v314_v50  ;;  %v376_v30 = vmul.f32 1.442695, %v315_v47  ;;  %5756 = vpow2.f32 %v372_v46  ;;  %v378_v59 = vmul.f32 1.442695, %v316_v13  ;;  %v5741_v45 = vpop.eup %5740  ;;  %818 = vmatprep.mubr.f32.mxu0 %v5725_v34  ;;  %404 = vadd.xlane.f32.xlu1 %v403_v49 }
  0xc9   : > { %v380_v52 = vmul.f32 1.442695, %v317_v6  ;;  %v5743_v23 = vpop.eup %5742  ;;  %v409_v11 = vadd.f32 %v5741_v45, %v5739_v55  ;;  %407 = vadd.xlane.f32.xlu0 %v406_v3  ;;  %1191 = vmatprep.mubr.f32.mxu1 %v10632_v19  ;;  %v6341_v35 = vrot.slane %v3958_v10, %v3961_v20  ;;  %v6343_v33 = vrot.slane %v3958_v10, %v3981_v21 }
  0xca   : > { %5758 = vpow2.f32 %v374_v0  ;;  %v5745_v4 = vpop.eup %5744 }
  0xcb   : > { %5760 = vpow2.f32 %v376_v30  ;;  %v5747_v53 = vpop.eup %5746  ;;  %v412_v1 = vadd.f32 %v5745_v4, %v5743_v23  ;;  %819 = vmatmul.mubr.f32.gmra.mrb[10].mxu0 %v6320_v22 }
  0xcc   : > { %5762 = vpow2.f32 %v378_v59  ;;  %v5749_v29 = vpop.eup %5748  ;;  %824 = vmatprep.mubr.f32.mxu0 %v5729_v44  ;;  %410 = vadd.xlane.f32.xlu1 %v409_v11 }
  0xcd   : > { %5764 = vpow2.f32 %v380_v52  ;;  %v415_v56 = vadd.f32 %v5749_v29, %v5747_v53  ;;  %413 = vadd.xlane.f32.xlu0 %v412_v1 }
  0xcf   : > { %v5751_v32 = vpop.eup %5750  ;;  %825 = vmatmul.mubr.f32.gmra.mrb[12].mxu0 %v5727_v2 }
  0xd0   : > { %v5753_v28 = vpop.eup %5752  ;;  %830 = vmatprep.mubr.f32.mxu0 %v5733_v9  ;;  %416 = vadd.xlane.f32.xlu1 %v415_v56 }
  0xd1   : > { %v5755_v7 = vpop.eup %5754  ;;  %v418_v5 = vadd.f32 %v5753_v28, %v5751_v32 }
  0xd2   : > { %v5757_v38 = vpop.eup %5756 }
  0xd3   : > { %v421_v60 = vadd.f32 %v5757_v38, %v5755_v7  ;;  %419 = vadd.xlane.f32.xlu0 %v418_v5  ;;  %831 = vmatmul.mubr.f32.gmra.mrb[14].mxu0 %v5731_v41 }
  0xd4   : > { %v5759_v62 = vpop.eup %5758  ;;  %836 = vmatprep.mubr.f32.mxu0 %v5737_v54 }
  0xd5   : > { %v5761_v43 = vpop.eup %5760  ;;  %422 = vadd.xlane.f32.xlu1 %v421_v60 }
  0xd6   : > { %v5763_v63 = vpop.eup %5762  ;;  %v424_v42 = vadd.f32 %v5761_v43, %v5759_v62 }
  0xd7   : > { %v5765_v12 = vpop.eup %5764  ;;  %837 = vmatmul.mubr.f32.gmra.mrb[16].mxu0 %v5735_v48 }
  0xd8   : > { %v427_v18 = vadd.f32 %v5765_v12, %v5763_v63  ;;  %425 = vadd.xlane.f32.xlu0 %v424_v42  ;;  %842 = vmatprep.mubr.f32.mxu0 %v5741_v45 }
  0xda   : > { %428 = vadd.xlane.f32.xlu1 %v427_v18 }
  0xdb   : > { %843 = vmatmul.mubr.f32.gmra.mrb[18].mxu0 %v5739_v55 }
  0xdc   : > { %848 = vmatprep.mubr.f32.mxu0 %v5745_v4 }
  0xdf   : > { %849 = vmatmul.mubr.f32.gmra.mrb[20].mxu0 %v5743_v23 }
  0xe0   : > { %854 = vmatprep.mubr.f32.mxu0 %v5749_v29 }
  0xe3   : > { %855 = vmatmul.mubr.f32.gmra.mrb[22].mxu0 %v5747_v53 }
  0xe4   : > { %860 = vmatprep.mubr.f32.mxu0 %v5753_v28 }
  0xe7   : > { %861 = vmatmul.mubr.f32.gmra.mrb[24].mxu0 %v5751_v32 }
  0xe8   : > { %866 = vmatprep.mubr.f32.mxu0 %v5757_v38 }
  0xeb   : > { %867 = vmatmul.mubr.f32.gmra.mrb[26].mxu0 %v5755_v7 }
  0xec   : > { %872 = vmatprep.mubr.f32.mxu0 %v5761_v43 }
  0xef   : > { %873 = vmatmul.mubr.f32.gmra.mrb[28].mxu0 %v5759_v62 }
  0xf0   : > { %878 = vmatprep.mubr.f32.mxu0 %v5765_v12 }
  0xf3   : > { %879 = vmatmul.mubr.f32.gmra.mrb[30].mxu0 %v5763_v63 }
  0xf4   : > { %1077 = vmatprep.mubr.f32.mxu0 %v10632_v19 }
 0x145   : > { %v384_v15 = vpop.xlane.xlu0 %383 }
 0x146   : > { %5766 = vrcp.f32 %v384_v15 }
 0x149   : > { %v387_v26 = vpop.xlane.xlu1 %386 }
 0x14a   : > { %5768 = vrcp.f32 %v387_v26  ;;  %v390_v27 = vpop.xlane.xlu0 %389 }
 0x14b   : > { %5770 = vrcp.f32 %v390_v27 }
 0x14d   : > { %v393_v22 = vpop.xlane.xlu1 %392 }
 0x14e   : > { %5772 = vrcp.f32 %v393_v22  ;;  %v396_v2 = vpop.xlane.xlu0 %395 }
 0x14f   : > { %5774 = vrcp.f32 %v396_v2 }
 0x150   : > { %v5767_v14 = vpop.eup %5766 }
 0x151   : > { %v399_v57 = vpop.xlane.xlu1 %398 }
 0x152   : > { %5776 = vrcp.f32 %v399_v57  ;;  %v402_v49 = vpop.xlane.xlu0 %401 }
 0x153   : > { %5778 = vrcp.f32 %v402_v49 }
 0x154   : > { %v5769_v31 = vpop.eup %5768 }
 0x155   : > { %v5771_v47 = vpop.eup %5770  ;;  %v405_v23 = vpop.xlane.xlu1 %404 }
 0x156   : > { %5780 = vrcp.f32 %v405_v23  ;;  %v408_v38 = vpop.xlane.xlu0 %407 }
 0x157   : > { %5782 = vrcp.f32 %v408_v38 }
 0x158   : > { %v5773_v30 = vpop.eup %5772 }
 0x159   : > { %v5775_v53 = vpop.eup %5774  ;;  %v411_v26 = vpop.xlane.xlu1 %410 }
 0x15a   : > { %5784 = vrcp.f32 %v411_v26  ;;  %v414_v2 = vpop.xlane.xlu0 %413 }
 0x15b   : > { %5786 = vrcp.f32 %v414_v2 }
 0x15c   : > { %v5777_v60 = vpop.eup %5776 }
 0x15d   : > { %v5779_v10 = vpop.eup %5778 }
 0x18a   : > { %v790_v25 = vpop.f32.mrb[0].mxu0 }
 0x18b   : > { %v885_v34 = vmul.f32 %v5767_v14, %v790_v25  ;;  %v792_v24 = vpop.f32.mrb[1].mxu0 }
 0x18c   : > { %v886_v8 = vmul.f32 %v5767_v14, %v792_v24 }
 0x18d   : > { %v3963_v61 = vmul.f32 %v6341_v35, %v885_v34 }
 0x18e   : > { %v3983_v36 = vmul.f32 %v6343_v33, %v886_v8  ;;  %v796_v44 = vpop.f32.mrb[2].mxu0 }
 0x18f   : > { %v887_v37 = vmul.f32 %v5769_v31, %v796_v44  ;;  %v798_v46 = vpop.f32.mrb[3].mxu0 }
 0x190   : > { %v6347_v40 = vadd.f32 %v3983_v36, %v3963_v61  ;;  %v888_v41 = vmul.f32 %v5769_v31, %v798_v46  ;;  %v5781_v31 = vpop.eup %5780 }
 0x191   : > { %v5501_v50 = vpack.c.bf16 %v887_v37, %v885_v34  ;;  %v3964_v58 = vmul.f32 %v6341_v35, %v887_v37 }
 0x192   : > { %v5499_v51 = vpack.c.bf16 %v888_v41, %v886_v8  ;;  %v3984_v9 = vmul.f32 %v6343_v33, %v888_v41  ;;  %v802_v16 = vpop.f32.mrb[4].mxu0 }
 0x193   : > { %v889_v13 = vmul.f32 %v5771_v47, %v802_v16  ;;  %v804_v17 = vpop.f32.mrb[5].mxu0 }
 0x194   : > { %v6351_v6 = vadd.f32 %v3984_v9, %v3964_v58  ;;  %v890_v48 = vmul.f32 %v5771_v47, %v804_v17  ;;  %5500 = vmatprep.subr.bf16.mxu0 %v5499_v51  ;;  %5675 = vmatprep.subr.bf16.mxu1 %v5499_v51  ;;  %v5783_v51 = vpop.eup %5782 }
 0x195   : > { %v3965_v0 = vmul.f32 %v6341_v35, %v889_v13  ;;  %5502 = vmatpush1.bf16.msra.mxu0 %v5501_v50  ;;  %5683 = vmatpush1.bf16.msra.mxu1 %v5501_v50  ;;  %v417_v50 = vpop.xlane.xlu1 %416 }
 0x196   : > { %v3985_v54 = vmul.f32 %v6343_v33, %v890_v48  ;;  %v808_v59 = vpop.f32.mrb[6].mxu0  ;;  %5788 = vrcp.f32 %v417_v50 }
 0x197   : > { %v891_v52 = vmul.f32 %v5773_v30, %v808_v59  ;;  %v810_v55 = vpop.f32.mrb[7].mxu0  ;;  %v5785_v59 = vpop.eup %5784 }
 0x198   : > { %v6355_v3 = vadd.f32 %v3985_v54, %v3965_v0  ;;  %v892_v45 = vmul.f32 %v5773_v30, %v810_v55  ;;  %v420_v30 = vpop.xlane.xlu0 %419 }
 0x199   : > { %v5505_v11 = vpack.c.bf16 %v891_v52, %v889_v13  ;;  %v3966_v4 = vmul.f32 %v6341_v35, %v891_v52  ;;  %5790 = vrcp.f32 %v420_v30 }
 0x19a   : > { %10849 = vst [vmem:[#allocation3_spill] sm:$0xff] %v6355_v3  ;;  %v5503_v1 = vpack.c.bf16 %v892_v45, %v890_v48  ;;  %v3986_v29 = vmul.f32 %v6343_v33, %v892_v45  ;;  %v814_v32 = vpop.f32.mrb[8].mxu0 }
 0x19b   : > { %v893_v56 = vmul.f32 %v5775_v53, %v814_v32  ;;  %v816_v28 = vpop.f32.mrb[9].mxu0  ;;  %v5787_v32 = vpop.eup %5786 }
 0x19c   : > { %v6359_v7 = vadd.f32 %v3986_v29, %v3966_v4  ;;  %v894_v5 = vmul.f32 %v5775_v53, %v816_v28  ;;  %5504 = vmatprep.subr.bf16.mxu0 %v5503_v1  ;;  %5676 = vmatprep.subr.bf16.mxu1 %v5503_v1  ;;  %v423_v53 = vpop.xlane.xlu1 %422 }
 0x19d   : > { %v3967_v62 = vmul.f32 %v6341_v35, %v893_v56  ;;  %5506 = vmatpush1.bf16.msra.mxu0 %v5505_v11  ;;  %5684 = vmatpush1.bf16.msra.mxu1 %v5505_v11  ;;  %5792 = vrcp.f32 %v423_v53 }
 0x19e   : > { %10850 = vst [vmem:[#allocation4_spill] sm:$0xff] %v6359_v7  ;;  %v3987_v43 = vmul.f32 %v6343_v33, %v894_v5  ;;  %v820_v63 = vpop.f32.mrb[10].mxu0 }
 0x19f   : > { %v895_v42 = vmul.f32 %v5777_v60, %v820_v63  ;;  %v822_v12 = vpop.f32.mrb[11].mxu0  ;;  %v426_v63 = vpop.xlane.xlu0 %425 }
 0x1a0   : > { %v6363_v18 = vadd.f32 %v3987_v43, %v3967_v62  ;;  %v896_v15 = vmul.f32 %v5777_v60, %v822_v12  ;;  %v5789_v12 = vpop.eup %5788  ;;  %5794 = vrcp.f32 %v426_v63 }
 0x1a1   : > { %v5509_v27 = vpack.c.bf16 %v895_v42, %v893_v56  ;;  %v3968_v20 = vmul.f32 %v6341_v35, %v895_v42 }
 0x1a2   : > { %10851 = vst [vmem:[#allocation5_spill] sm:$0xff] %v6363_v18  ;;  %v5507_v21 = vpack.c.bf16 %v896_v15, %v894_v5  ;;  %v3988_v22 = vmul.f32 %v6343_v33, %v896_v15  ;;  %v826_v14 = vpop.f32.mrb[12].mxu0 }
 0x1a3   : > { %v897_v25 = vmul.f32 %v5779_v10, %v826_v14  ;;  %v828_v34 = vpop.f32.mrb[13].mxu0 }
 0x1a4   : > { %v6367_v24 = vadd.f32 %v3988_v22, %v3968_v20  ;;  %v898_v8 = vmul.f32 %v5779_v10, %v828_v34  ;;  %5508 = vmatprep.subr.bf16.mxu0 %v5507_v21  ;;  %5677 = vmatprep.subr.bf16.mxu1 %v5507_v21  ;;  %v429_v22 = vpop.xlane.xlu1 %428  ;;  %v5791_v34 = vpop.eup %5790 }
 0x1a5   : > { %v3969_v61 = vmul.f32 %v6341_v35, %v897_v25  ;;  %5510 = vmatpush1.bf16.msra.mxu0 %v5509_v27  ;;  %5685 = vmatpush1.bf16.msra.mxu1 %v5509_v27  ;;  %5796 = vrcp.f32 %v429_v22  ;;  %v940_v22 = vld [vmem:[%s10613_s1 + $0xb8] sm:$0xff] }
 0x1a6   : > { %10852 = vst [vmem:[#allocation6_spill] sm:$0xff] %v6367_v24  ;;  %v3989_v36 = vmul.f32 %v6343_v33, %v898_v8  ;;  %v832_v44 = vpop.f32.mrb[14].mxu0 }
 0x1a7   : > { %v899_v37 = vmul.f32 %v5781_v31, %v832_v44  ;;  %v834_v46 = vpop.f32.mrb[15].mxu0 }
 0x1a8   : > { %v6371_v41 = vadd.f32 %v3989_v36, %v3969_v61  ;;  %v900_v57 = vmul.f32 %v5781_v31, %v834_v46 }
 0x1a9   : > { %v5513_v58 = vpack.c.bf16 %v899_v37, %v897_v25  ;;  %v3970_v47 = vmul.f32 %v6341_v35, %v899_v37 }
 0x1aa   : > { %10853 = vst [vmem:[#allocation7_spill] sm:$0xff] %v6371_v41  ;;  %v5511_v9 = vpack.c.bf16 %v900_v57, %v898_v8  ;;  %v3990_v16 = vmul.f32 %v6343_v33, %v900_v57  ;;  %v838_v13 = vpop.f32.mrb[16].mxu0  ;;  %v5793_v57 = vpop.eup %5792 }
 0x1ab   : > { %v901_v17 = vmul.f32 %v5783_v51, %v838_v13  ;;  %v840_v48 = vpop.f32.mrb[17].mxu0 }
 0x1ac   : > { %v6375_v49 = vadd.f32 %v3990_v16, %v3970_v47  ;;  %v902_v0 = vmul.f32 %v5783_v51, %v840_v48  ;;  %5512 = vmatprep.subr.bf16.mxu0 %v5511_v9  ;;  %5678 = vmatprep.subr.bf16.mxu1 %v5511_v9  ;;  %v5795_v48 = vpop.eup %5794 }
 0x1ad   : > { %v3971_v54 = vmul.f32 %v6341_v35, %v901_v17  ;;  %5514 = vmatpush1.bf16.msra.mxu0 %v5513_v58  ;;  %5686 = vmatpush1.bf16.msra.mxu1 %v5513_v58 }
 0x1ae   : > { %10854 = vst [vmem:[#allocation8_spill] sm:$0xff] %v6375_v49  ;;  %v3991_v52 = vmul.f32 %v6343_v33, %v902_v0  ;;  %v844_v55 = vpop.f32.mrb[18].mxu0 }
 0x1af   : > { %v903_v45 = vmul.f32 %v5785_v59, %v844_v55  ;;  %v846_v23 = vpop.f32.mrb[19].mxu0 }
 0x1b0   : > { %v6379_v11 = vadd.f32 %v3991_v52, %v3971_v54  ;;  %v904_v4 = vmul.f32 %v5785_v59, %v846_v23 }
 0x1b1   : > { %v5517_v1 = vpack.c.bf16 %v903_v45, %v901_v17  ;;  %v3972_v29 = vmul.f32 %v6341_v35, %v903_v45 }
 0x1b2   : > { %10855 = vst [vmem:[#allocation9_spill] sm:$0xff] %v6379_v11  ;;  %v5515_v56 = vpack.c.bf16 %v904_v4, %v902_v0  ;;  %v3992_v28 = vmul.f32 %v6343_v33, %v904_v4  ;;  %v850_v5 = vpop.f32.mrb[20].mxu0  ;;  %v5797_v4 = vpop.eup %5796 }
 0x1b3   : > { %v905_v38 = vmul.f32 %v5787_v32, %v850_v5  ;;  %v852_v62 = vpop.f32.mrb[21].mxu0 }
 0x1b4   : > { %v6383_v60 = vadd.f32 %v3992_v28, %v3972_v29  ;;  %v906_v43 = vmul.f32 %v5787_v32, %v852_v62  ;;  %5516 = vmatprep.subr.bf16.mxu0 %v5515_v56  ;;  %5679 = vmatprep.subr.bf16.mxu1 %v5515_v56 }
 0x1b5   : > { %v3973_v42 = vmul.f32 %v6341_v35, %v905_v38  ;;  %5518 = vmatpush1.bf16.msra.mxu0 %v5517_v1  ;;  %5687 = vmatpush1.bf16.msra.mxu1 %v5517_v1 }
 0x1b6   : > { %10856 = vst [vmem:[#allocation10_spill] sm:$0xff] %v6383_v60  ;;  %v3993_v15 = vmul.f32 %v6343_v33, %v906_v43  ;;  %v856_v26 = vpop.f32.mrb[22].mxu0 }
 0x1b7   : > { %v907_v27 = vmul.f32 %v5789_v12, %v856_v26  ;;  %v858_v20 = vpop.f32.mrb[23].mxu0  ;;  %v938_v26 = vld [vmem:[%s10613_s1 + $0xa8] sm:$0xff] }
 0x1b8   : > { %v6387_v10 = vadd.f32 %v3993_v15, %v3973_v42  ;;  %v908_v21 = vmul.f32 %v5789_v12, %v858_v20  ;;  %v917_v42 = vld [vmem:[%s10613_s1] sm:$0xff]  ;;  %v936_v12 = vld [vmem:[%s10613_s1 + $0x98] sm:$0xff]  ;;  %v919_v15 = vld [vmem:[%s10613_s1 + $0x10] sm:$0xff] }
 0x1b9   : > { %v5521_v14 = vpack.c.bf16 %v907_v27, %v905_v38  ;;  %v3974_v25 = vmul.f32 %v6341_v35, %v907_v27  ;;  %v920_v27 = vld [vmem:[%s10613_s1 + $0x18] sm:$0xff]  ;;  %v939_v20 = vld [vmem:[%s10613_s1 + $0xb0] sm:$0xff] }
 0x1ba   : > { %10857 = vst [vmem:[#allocation11_spill] sm:$0xff] %v6387_v10  ;;  %v5519_v8 = vpack.c.bf16 %v908_v21, %v906_v43  ;;  %v3994_v2 = vmul.f32 %v6343_v33, %v908_v21  ;;  %v862_v61 = vpop.f32.mrb[24].mxu0  ;;  %v921_v21 = vld [vmem:[%s10613_s1 + $0x20] sm:$0xff] }
 0x1bb   : > { %v909_v31 = vmul.f32 %v5791_v34, %v862_v61  ;;  %v864_v36 = vpop.f32.mrb[25].mxu0  ;;  %v943_v61 = vld [vmem:[%s10613_s1 + $0xd0] sm:$0xff] }
 0x1bc   : > { %v6391_v44 = vadd.f32 %v3994_v2, %v3974_v25  ;;  %v910_v37 = vmul.f32 %v5791_v34, %v864_v36  ;;  %5520 = vmatprep.subr.bf16.mxu0 %v5519_v8  ;;  %5680 = vmatprep.subr.bf16.mxu1 %v5519_v8  ;;  %v941_v25 = vld [vmem:[%s10613_s1 + $0xc0] sm:$0xff]  ;;  %v923_v34 = vld [vmem:[%s10613_s1 + $0x30] sm:$0xff]  ;;  %v942_v8 = vld [vmem:[%s10613_s1 + $0xc8] sm:$0xff] }
 0x1bd   : > { %v3975_v46 = vmul.f32 %v6341_v35, %v909_v31  ;;  %5522 = vmatpush1.bf16.msra.mxu0 %v5521_v14  ;;  %5688 = vmatpush1.bf16.msra.mxu1 %v5521_v14  ;;  %v922_v14 = vld [vmem:[%s10613_s1 + $0x28] sm:$0xff]  ;;  %v924_v2 = vld [vmem:[%s10613_s1 + $0x38] sm:$0xff] }
 0x1be   : > { %10858 = vst [vmem:[#allocation12_spill] sm:$0xff] %v6391_v44  ;;  %v3995_v50 = vmul.f32 %v6343_v33, %v910_v37  ;;  %v868_v58 = vpop.f32.mrb[26].mxu0  ;;  %v944_v36 = vld [vmem:[%s10613_s1 + $0xd8] sm:$0xff] }
 0x1bf   : > { %v911_v47 = vmul.f32 %v5793_v57, %v868_v58  ;;  %v870_v51 = vpop.f32.mrb[27].mxu0  ;;  %v928_v58 = vld [vmem:[%s10613_s1 + $0x58] sm:$0xff] }
 0x1c0   : > { %v6395_v9 = vadd.f32 %v3995_v50, %v3975_v46  ;;  %v912_v16 = vmul.f32 %v5793_v57, %v870_v51  ;;  %v945_v46 = vld [vmem:[%s10613_s1 + $0xe0] sm:$0xff]  ;;  %v927_v57 = vld [vmem:[%s10613_s1 + $0x50] sm:$0xff]  ;;  %v946_v50 = vld [vmem:[%s10613_s1 + $0xe8] sm:$0xff] }
 0x1c1   : > { %v5525_v13 = vpack.c.bf16 %v911_v47, %v909_v31  ;;  %v3976_v17 = vmul.f32 %v6341_v35, %v911_v47  ;;  %v925_v31 = vld [vmem:[%s10613_s1 + $0x40] sm:$0xff]  ;;  %v947_v47 = vld [vmem:[%s10613_s1 + $0xf0] sm:$0xff] }
 0x1c2   : > { %10859 = vst [vmem:[#allocation13_spill] sm:$0xff] %v6395_v9  ;;  %v5523_v0 = vpack.c.bf16 %v912_v16, %v910_v37  ;;  %v3996_v30 = vmul.f32 %v6343_v33, %v912_v16  ;;  %v874_v54 = vpop.f32.mrb[28].mxu0  ;;  %v926_v37 = vld [vmem:[%s10613_s1 + $0x48] sm:$0xff]  ;;  %v929_v51 = vld [vmem:[%s10613_s1 + $0x60] sm:$0xff]  ;;  %v948_v16 = vld [vmem:[%s10613_s1 + $0xf8] sm:$0xff] }
 0x1c3   : > { %v913_v59 = vmul.f32 %v5795_v48, %v874_v54  ;;  %v876_v52 = vpop.f32.mrb[29].mxu0  ;;  %v951_v54 = vld [vmem:[%s10613_s1 + $0x110] sm:$0xff] }
 0x1c4   : > { %v6399_v55 = vadd.f32 %v3996_v30, %v3976_v17  ;;  %v914_v45 = vmul.f32 %v5795_v48, %v876_v52  ;;  %5524 = vmatprep.subr.bf16.mxu0 %v5523_v0  ;;  %5681 = vmatprep.subr.bf16.mxu1 %v5523_v0  ;;  %v949_v17 = vld [vmem:[%s10613_s1 + $0x100] sm:$0xff]  ;;  %v931_v48 = vld [vmem:[%s10613_s1 + $0x70] sm:$0xff]  ;;  %v950_v0 = vld [vmem:[%s10613_s1 + $0x108] sm:$0xff] }
 0x1c5   : > { %v3977_v23 = vmul.f32 %v6341_v35, %v913_v59  ;;  %5526 = vmatpush1.bf16.msra.mxu0 %v5525_v13  ;;  %5689 = vmatpush1.bf16.msra.mxu1 %v5525_v13  ;;  %v930_v13 = vld [vmem:[%s10613_s1 + $0x68] sm:$0xff]  ;;  %v932_v30 = vld [vmem:[%s10613_s1 + $0x78] sm:$0xff] }
 0x1c6   : > { %10860 = vst [vmem:[#allocation14_spill] sm:$0xff] %v6399_v55  ;;  %v3997_v53 = vmul.f32 %v6343_v33, %v914_v45  ;;  %v880_v1 = vpop.f32.mrb[30].mxu0  ;;  %v952_v52 = vld [vmem:[%s10613_s1 + $0x118] sm:$0xff] }
 0x1c7   : > { %v915_v29 = vmul.f32 %v5797_v4, %v880_v1  ;;  %v882_v32 = vpop.f32.mrb[31].mxu0  ;;  %v955_v1 = vld [vmem:[%s10613_s1 + $0x130] sm:$0xff] }
 0x1c8   : > { %v6403_v56 = vadd.f32 %v3997_v53, %v3977_v23  ;;  %v916_v28 = vmul.f32 %v5797_v4, %v882_v32  ;;  %v953_v23 = vld [vmem:[%s10613_s1 + $0x120] sm:$0xff]  ;;  %v935_v4 = vld [vmem:[%s10613_s1 + $0x90] sm:$0xff]  ;;  %v954_v53 = vld [vmem:[%s10613_s1 + $0x128] sm:$0xff] }
 0x1c9   : > { %v5529_v5 = vpack.c.bf16 %v915_v29, %v913_v59  ;;  %v3978_v38 = vmul.f32 %v6341_v35, %v915_v29  ;;  %v918_v35 = vld [vmem:[%s10613_s1 + $0x8] sm:$0xff]  ;;  %v933_v59 = vld [vmem:[%s10613_s1 + $0x80] sm:$0xff]  ;;  %v956_v29 = vld [vmem:[%s10613_s1 + $0x138] sm:$0xff] }
 0x1ca   : > { %10861 = vst [vmem:[#allocation15_spill] sm:$0xff] %v6403_v56  ;;  %v5527_v62 = vpack.c.bf16 %v916_v28, %v914_v45  ;;  %v3998_v43 = vmul.f32 %v6343_v33, %v916_v28  ;;  %v937_v33 = vld [vmem:[%s10613_s1 + $0xa0] sm:$0xff]  ;;  %v934_v45 = vld [vmem:[%s10613_s1 + $0x88] sm:$0xff] }
 0x1cb   : > { %v957_v32 = vld [vmem:[%s10613_s1 + $0x140] sm:$0xff]  ;;  %v958_v28 = vld [vmem:[%s10613_s1 + $0x148] sm:$0xff] }
 0x1cc   : > { %v6407_v63 = vadd.f32 %v3998_v43, %v3978_v38  ;;  %5528 = vmatprep.subr.bf16.mxu0 %v5527_v62  ;;  %5682 = vmatprep.subr.bf16.mxu1 %v5527_v62  ;;  %v960_v38 = vld [vmem:[%s10613_s1 + $0x158] sm:$0xff]  ;;  %v961_v62 = vld [vmem:[%s10613_s1 + $0x160] sm:$0xff]  ;;  %v962_v43 = vld [vmem:[%s10613_s1 + $0x168] sm:$0xff] }
 0x1cd   : > { %5530 = vmatpush1.bf16.msra.mxu0 %v5529_v5  ;;  %5690 = vmatpush1.bf16.msra.mxu1 %v5529_v5  ;;  %v959_v5 = vld [vmem:[%s10613_s1 + $0x150] sm:$0xff] }
 0x1ce   : > { %10862 = vst [vmem:[#allocation16_spill] sm:$0xff] %v6407_v63 }
 0x1d0   : > { %1078 = vmatmul.mubr.f32.vlgmr.msra.gmra.mrb[32].mxu0 %v917_v42  ;;  %1192 = vmatmul.mubr.f32.vlgmr.msra.gmra.mrb[0].mxu1 %v936_v12  ;;  %v963_v42 = vld [vmem:[%s10613_s1 + $0x170] sm:$0xff]  ;;  %v964_v12 = vld [vmem:[%s10613_s1 + $0x178] sm:$0xff] }
 0x1d1   : > { %1083 = vmatprep.mubr.f32.mxu0 %v10632_v19  ;;  %1197 = vmatprep.mubr.f32.mxu1 %v10632_v19 }
 0x1d4   : > { %1084 = vmatmul.mubr.f32.gmra.mrb[34].mxu0 %v918_v35  ;;  %1198 = vmatmul.mubr.f32.gmra.mrb[2].mxu1 %v937_v33  ;;  %v965_v35 = vld [vmem:[%s10613_s1 + $0x180] sm:$0xff]  ;;  %v966_v33 = vld [vmem:[%s10613_s1 + $0x188] sm:$0xff] }
 0x1d5   : > { %1089 = vmatprep.mubr.f32.mxu0 %v10632_v19  ;;  %1203 = vmatprep.mubr.f32.mxu1 %v10632_v19 }
 0x1d8   : > { %1090 = vmatmul.mubr.f32.gmra.mrb[36].mxu0 %v919_v15  ;;  %1204 = vmatmul.mubr.f32.gmra.mrb[4].mxu1 %v938_v26  ;;  %v967_v15 = vld [vmem:[%s10613_s1 + $0x190] sm:$0xff]  ;;  %v968_v26 = vld [vmem:[%s10613_s1 + $0x198] sm:$0xff] }
 0x1d9   : > { %1095 = vmatprep.mubr.f32.mxu0 %v10632_v19  ;;  %1209 = vmatprep.mubr.f32.mxu1 %v10632_v19 }
 0x1dc   : > { %1096 = vmatmul.mubr.f32.gmra.mrb[38].mxu0 %v920_v27  ;;  %1210 = vmatmul.mubr.f32.gmra.mrb[6].mxu1 %v939_v20  ;;  %v969_v27 = vld [vmem:[%s10613_s1 + $0x1a0] sm:$0xff]  ;;  %v970_v20 = vld [vmem:[%s10613_s1 + $0x1a8] sm:$0xff] }
 0x1dd   : > { %1101 = vmatprep.mubr.f32.mxu0 %v10632_v19  ;;  %1215 = vmatprep.mubr.f32.mxu1 %v10632_v19 }
 0x1e0   : > { %1102 = vmatmul.mubr.f32.gmra.mrb[40].mxu0 %v921_v21  ;;  %1216 = vmatmul.mubr.f32.gmra.mrb[8].mxu1 %v940_v22  ;;  %v971_v21 = vld [vmem:[%s10613_s1 + $0x1b0] sm:$0xff]  ;;  %v972_v22 = vld [vmem:[%s10613_s1 + $0x1b8] sm:$0xff] }
 0x1e1   : > { %1107 = vmatprep.mubr.f32.mxu0 %v10632_v19  ;;  %1221 = vmatprep.mubr.f32.mxu1 %v10632_v19 }
 0x1e4   : > { %1108 = vmatmul.mubr.f32.gmra.mrb[42].mxu0 %v922_v14  ;;  %1222 = vmatmul.mubr.f32.gmra.mrb[10].mxu1 %v941_v25  ;;  %v973_v14 = vld [vmem:[%s10613_s1 + $0x1c0] sm:$0xff]  ;;  %v974_v25 = vld [vmem:[%s10613_s1 + $0x1c8] sm:$0xff] }
 0x1e5   : > { %1113 = vmatprep.mubr.f32.mxu0 %v10632_v19  ;;  %1227 = vmatprep.mubr.f32.mxu1 %v10632_v19 }
 0x1e8   : > { %1114 = vmatmul.mubr.f32.gmra.mrb[44].mxu0 %v923_v34  ;;  %1228 = vmatmul.mubr.f32.gmra.mrb[12].mxu1 %v942_v8  ;;  %v975_v34 = vld [vmem:[%s10613_s1 + $0x1d0] sm:$0xff]  ;;  %v976_v8 = vld [vmem:[%s10613_s1 + $0x1d8] sm:$0xff] }
 0x1e9   : > { %1119 = vmatprep.mubr.f32.mxu0 %v10632_v19  ;;  %1233 = vmatprep.mubr.f32.mxu1 %v10632_v19 }
 0x1ec   : > { %1120 = vmatmul.mubr.f32.gmra.mrb[46].mxu0 %v924_v2  ;;  %1234 = vmatmul.mubr.f32.gmra.mrb[14].mxu1 %v943_v61  ;;  %v977_v2 = vld [vmem:[%s10613_s1 + $0x1e0] sm:$0xff]  ;;  %v978_v61 = vld [vmem:[%s10613_s1 + $0x1e8] sm:$0xff] }
 0x1ed   : > { %1125 = vmatprep.mubr.f32.mxu0 %v10632_v19  ;;  %1239 = vmatprep.mubr.f32.mxu1 %v10632_v19 }
 0x1f0   : > { %1126 = vmatmul.mubr.f32.gmra.mrb[48].mxu0 %v925_v31  ;;  %1240 = vmatmul.mubr.f32.gmra.mrb[16].mxu1 %v944_v36  ;;  %v979_v31 = vld [vmem:[%s10613_s1 + $0x1f0] sm:$0xff]  ;;  %v980_v36 = vld [vmem:[%s10613_s1 + $0x1f8] sm:$0xff] }
 0x1f1   : > { %1131 = vmatprep.mubr.f32.mxu0 %v10632_v19  ;;  %1245 = vmatprep.mubr.f32.mxu1 %v10632_v19 }
 0x1f4   : > { %1132 = vmatmul.mubr.f32.gmra.mrb[50].mxu0 %v926_v37  ;;  %1246 = vmatmul.mubr.f32.gmra.mrb[18].mxu1 %v945_v46  ;;  %v981_v37 = vld [vmem:[%s10613_s1 + $0x200] sm:$0xff]  ;;  %v982_v46 = vld [vmem:[%s10613_s1 + $0x208] sm:$0xff] }
 0x1f5   : > { %1137 = vmatprep.mubr.f32.mxu0 %v10632_v19  ;;  %1251 = vmatprep.mubr.f32.mxu1 %v10632_v19 }
 0x1f8   : > { %1138 = vmatmul.mubr.f32.gmra.mrb[52].mxu0 %v927_v57  ;;  %1252 = vmatmul.mubr.f32.gmra.mrb[20].mxu1 %v946_v50  ;;  %v983_v57 = vld [vmem:[%s10613_s1 + $0x210] sm:$0xff]  ;;  %v984_v50 = vld [vmem:[%s10613_s1 + $0x218] sm:$0xff] }
 0x1f9   : > { %1143 = vmatprep.mubr.f32.mxu0 %v10632_v19  ;;  %1257 = vmatprep.mubr.f32.mxu1 %v10632_v19 }
 0x1fc   : > { %1144 = vmatmul.mubr.f32.gmra.mrb[54].mxu0 %v928_v58  ;;  %1258 = vmatmul.mubr.f32.gmra.mrb[22].mxu1 %v947_v47  ;;  %v985_v58 = vld [vmem:[%s10613_s1 + $0x220] sm:$0xff]  ;;  %v986_v47 = vld [vmem:[%s10613_s1 + $0x228] sm:$0xff] }
 0x1fd   : > { %1149 = vmatprep.mubr.f32.mxu0 %v10632_v19  ;;  %1263 = vmatprep.mubr.f32.mxu1 %v10632_v19 }
 0x200   : > { %1150 = vmatmul.mubr.f32.gmra.mrb[56].mxu0 %v929_v51  ;;  %1264 = vmatmul.mubr.f32.gmra.mrb[24].mxu1 %v948_v16  ;;  %v987_v51 = vld [vmem:[%s10613_s1 + $0x230] sm:$0xff]  ;;  %v988_v16 = vld [vmem:[%s10613_s1 + $0x238] sm:$0xff] }
 0x201   : > { %1155 = vmatprep.mubr.f32.mxu0 %v10632_v19  ;;  %1269 = vmatprep.mubr.f32.mxu1 %v10632_v19 }
 0x204   : > { %1156 = vmatmul.mubr.f32.gmra.mrb[58].mxu0 %v930_v13  ;;  %1270 = vmatmul.mubr.f32.gmra.mrb[26].mxu1 %v949_v17  ;;  %v989_v13 = vld [vmem:[%s10613_s1 + $0x240] sm:$0xff] }
 0x205   : > { %1161 = vmatprep.mubr.f32.mxu0 %v10632_v19  ;;  %1275 = vmatprep.mubr.f32.mxu1 %v10632_v19 }
 0x208   : > { %1162 = vmatmul.mubr.f32.gmra.mrb[60].mxu0 %v931_v48  ;;  %1276 = vmatmul.mubr.f32.gmra.mrb[28].mxu1 %v950_v0 }
 0x209   : > { %1167 = vmatprep.mubr.f32.mxu0 %v10632_v19  ;;  %1281 = vmatprep.mubr.f32.mxu1 %v10632_v19 }
 0x20c   : > { %1168 = vmatmul.mubr.f32.gmra.mrb[62].mxu0 %v932_v30  ;;  %1282 = vmatmul.mubr.f32.gmra.mrb[30].mxu1 %v951_v54 }
 0x20d   : > { %1173 = vmatprep.mubr.f32.mxu0 %v10632_v19  ;;  %1287 = vmatprep.mubr.f32.mxu1 %v10632_v19 }
 0x210   : > { %1174 = vmatmul.mubr.f32.gmra.mrb[64].mxu0 %v933_v59  ;;  %1288 = vmatmul.mubr.f32.gmra.mrb[32].mxu1 %v952_v52  ;;  %v990_v52 = vld [vmem:[%s10613_s1 + $0x248] sm:$0xff] }
 0x211   : > { %1179 = vmatprep.mubr.f32.mxu0 %v10632_v19  ;;  %1293 = vmatprep.mubr.f32.mxu1 %v10632_v19 }
 0x214   : > { %1180 = vmatmul.mubr.f32.gmra.mrb[66].mxu0 %v934_v45  ;;  %1294 = vmatmul.mubr.f32.gmra.mrb[34].mxu1 %v953_v23 }
 0x215   : > { %1185 = vmatprep.mubr.f32.mxu0 %v10632_v19  ;;  %1299 = vmatprep.mubr.f32.mxu1 %v10632_v19 }
 0x218   : > { %1186 = vmatmul.mubr.f32.gmra.mrb[68].mxu0 %v935_v4  ;;  %1300 = vmatmul.mubr.f32.gmra.mrb[36].mxu1 %v954_v53 }
 0x219   : > { %1305 = vmatprep.mubr.f32.mxu1 %v10632_v19 }
 0x21c   : > { %1306 = vmatmul.mubr.f32.gmra.mrb[38].mxu1 %v955_v1 }
 0x21d   : > { %1311 = vmatprep.mubr.f32.mxu1 %v10632_v19 }
 0x220   : > { %1312 = vmatmul.mubr.f32.gmra.mrb[40].mxu1 %v956_v29 }
 0x221   : > { %1317 = vmatprep.mubr.f32.mxu1 %v10632_v19 }
 0x224   : > { %1318 = vmatmul.mubr.f32.gmra.mrb[42].mxu1 %v957_v32 }
 0x225   : > { %1323 = vmatprep.mubr.f32.mxu1 %v10632_v19 }
 0x228   : > { %1324 = vmatmul.mubr.f32.gmra.mrb[44].mxu1 %v958_v28 }
 0x229   : > { %1329 = vmatprep.mubr.f32.mxu1 %v10632_v19 }
 0x22c   : > { %1330 = vmatmul.mubr.f32.gmra.mrb[46].mxu1 %v959_v5 }
 0x22d   : > { %1335 = vmatprep.mubr.f32.mxu1 %v10632_v19 }
 0x230   : > { %1336 = vmatmul.mubr.f32.gmra.mrb[48].mxu1 %v960_v38 }
 0x231   : > { %1341 = vmatprep.mubr.f32.mxu1 %v10632_v19 }
 0x234   : > { %1342 = vmatmul.mubr.f32.gmra.mrb[50].mxu1 %v961_v62 }
 0x235   : > { %1347 = vmatprep.mubr.f32.mxu1 %v10632_v19 }
 0x238   : > { %1348 = vmatmul.mubr.f32.gmra.mrb[52].mxu1 %v962_v43  ;;  %v991_v43 = vld [vmem:[%s10613_s1 + $0x250] sm:$0xff] }
 0x239   : > { %1353 = vmatprep.mubr.f32.mxu1 %v10632_v19 }
 0x23c   : > { %1354 = vmatmul.mubr.f32.gmra.mrb[54].mxu1 %v963_v42 }
 0x23d   : > { %1359 = vmatprep.mubr.f32.mxu1 %v10632_v19 }
 0x240   : > { %1360 = vmatmul.mubr.f32.gmra.mrb[56].mxu1 %v964_v12 }
 0x241   : > { %1365 = vmatprep.mubr.f32.mxu1 %v10632_v19 }
 0x244   : > { %1366 = vmatmul.mubr.f32.gmra.mrb[58].mxu1 %v965_v35 }
 0x245   : > { %1371 = vmatprep.mubr.f32.mxu1 %v10632_v19 }
 0x248   : > { %1372 = vmatmul.mubr.f32.gmra.mrb[60].mxu1 %v966_v33 }
 0x249   : > { %1377 = vmatprep.mubr.f32.mxu1 %v10632_v19 }
 0x24c   : > { %1378 = vmatmul.mubr.f32.gmra.mrb[62].mxu1 %v967_v15 }
 0x24d   : > { %1383 = vmatprep.mubr.f32.mxu1 %v10632_v19 }
 0x250   : > { %1384 = vmatmul.mubr.f32.gmra.mrb[64].mxu1 %v968_v26 }
 0x251   : > { %1389 = vmatprep.mubr.f32.mxu1 %v10632_v19 }
 0x254   : > { %1390 = vmatmul.mubr.f32.gmra.mrb[66].mxu1 %v969_v27 }
 0x255   : > { %1395 = vmatprep.mubr.f32.mxu1 %v10632_v19 }
 0x258   : > { %1396 = vmatmul.mubr.f32.gmra.mrb[68].mxu1 %v970_v20 }
 0x259   : > { %1401 = vmatprep.mubr.f32.mxu1 %v10632_v19 }
 0x25c   : > { %1402 = vmatmul.mubr.f32.gmra.mrb[70].mxu1 %v971_v21 }
 0x25d   : > { %1407 = vmatprep.mubr.f32.mxu1 %v10632_v19 }
 0x260   : > { %1408 = vmatmul.mubr.f32.gmra.mrb[72].mxu1 %v972_v22 }
 0x261   : > { %1413 = vmatprep.mubr.f32.mxu1 %v10632_v19 }
 0x264   : > { %1414 = vmatmul.mubr.f32.gmra.mrb[74].mxu1 %v973_v14 }
 0x265   : > { %1419 = vmatprep.mubr.f32.mxu1 %v10632_v19 }
 0x268   : > { %1420 = vmatmul.mubr.f32.gmra.mrb[76].mxu1 %v974_v25  ;;  %v992_v25 = vld [vmem:[%s10613_s1 + $0x258] sm:$0xff] }
 0x269   : > { %1425 = vmatprep.mubr.f32.mxu1 %v10632_v19 }
 0x26c   : > { %1426 = vmatmul.mubr.f32.gmra.mrb[78].mxu1 %v975_v34 }
 0x26d   : > { %1431 = vmatprep.mubr.f32.mxu1 %v10632_v19 }
 0x270   : > { %1432 = vmatmul.mubr.f32.gmra.mrb[80].mxu1 %v976_v8 }
 0x271   : > { %1437 = vmatprep.mubr.f32.mxu1 %v10632_v19 }
 0x274   : > { %1438 = vmatmul.mubr.f32.gmra.mrb[82].mxu1 %v977_v2 }
 0x275   : > { %1443 = vmatprep.mubr.f32.mxu1 %v10632_v19 }
 0x278   : > { %1444 = vmatmul.mubr.f32.gmra.mrb[84].mxu1 %v978_v61 }
 0x279   : > { %1449 = vmatprep.mubr.f32.mxu1 %v10632_v19 }
 0x27c   : > { %1450 = vmatmul.mubr.f32.gmra.mrb[86].mxu1 %v979_v31 }
 0x27d   : > { %1455 = vmatprep.mubr.f32.mxu1 %v10632_v19 }
 0x280   : > { %1456 = vmatmul.mubr.f32.gmra.mrb[88].mxu1 %v980_v36 }
 0x281   : > { %1461 = vmatprep.mubr.f32.mxu1 %v10632_v19 }
 0x284   : > { %1462 = vmatmul.mubr.f32.gmra.mrb[90].mxu1 %v981_v37 }
 0x285   : > { %1467 = vmatprep.mubr.f32.mxu1 %v10632_v19 }
 0x288   : > { %1468 = vmatmul.mubr.f32.gmra.mrb[92].mxu1 %v982_v46 }
 0x289   : > { %1473 = vmatprep.mubr.f32.mxu1 %v10632_v19 }
 0x28c   : > { %1474 = vmatmul.mubr.f32.gmra.mrb[94].mxu1 %v983_v57 }
 0x28d   : > { %1479 = vmatprep.mubr.f32.mxu1 %v10632_v19 }
 0x290   : > { %1480 = vmatmul.mubr.f32.gmra.mrb[96].mxu1 %v984_v50 }
 0x291   : > { %1485 = vmatprep.mubr.f32.mxu1 %v10632_v19 }
 0x294   : > { %1486 = vmatmul.mubr.f32.gmra.mrb[98].mxu1 %v985_v58  ;;  %v993_v58 = vld [vmem:[%s10613_s1 + $0x260] sm:$0xff] }
 0x295   : > { %1491 = vmatprep.mubr.f32.mxu1 %v10632_v19 }
 0x298   : > { %1492 = vmatmul.mubr.f32.gmra.mrb[100].mxu1 %v986_v47 }
 0x299   : > { %1497 = vmatprep.mubr.f32.mxu1 %v10632_v19 }
 0x29c   : > { %1498 = vmatmul.mubr.f32.gmra.mrb[102].mxu1 %v987_v51 }
 0x29d   : > { %1503 = vmatprep.mubr.f32.mxu1 %v10632_v19 }
 0x2a0   : > { %1504 = vmatmul.mubr.f32.gmra.mrb[104].mxu1 %v988_v16 }
 0x2a1   : > { %1509 = vmatprep.mubr.f32.mxu1 %v10632_v19 }
 0x2a3   : > { %v6699_v17 = vpop.f32.mrb[32].mxu0  ;;  %v6701_v48 = vpop.f32.mrb[0].mxu1 }
 0x2a4   : > { %v6704_v0 = vand.u32 2147483647, %v6699_v17  ;;  %v6707_v30 = vand.u32 2147483647, %v6701_v48  ;;  %1510 = vmatmul.mubr.f32.gmra.mrb[106].mxu1 %v989_v13  ;;  %v6709_v54 = vpop.f32.mrb[33].mxu0  ;;  %v6711_v59 = vpop.f32.mrb[1].mxu1 }
 0x2a5   : > { %1515 = vmatprep.mubr.f32.mxu1 %v10632_v19  ;;  %v6718_v45 = vand.u32 2147483647, %v6709_v54  ;;  %v6721_v23 = vand.u32 2147483647, %v6711_v59  ;;  %vm3382_vm10 = vcmp.lt.f32.partialorder %v6699_v17, 0.0  ;;  %vm3401_vm11 = vcmp.lt.f32.partialorder %v6701_v48, 0.0 }
 0x2a6   : > { %vm3670_vm12 = vcmp.lt.f32.partialorder %v6709_v54, 0.0  ;;  %vm3689_vm14 = vcmp.lt.f32.partialorder %v6711_v59, 0.0 }
 0x2a7   : > { %v6723_v4 = vpop.f32.mrb[34].mxu0  ;;  %v6725_v53 = vpop.f32.mrb[2].mxu1  ;;  %v1846_v1 = vmax.f32 %v6704_v0, %v6718_v45  ;;  %v1942_v29 = vmin.f32 %v6704_v0, %v6718_v45  ;;  %vm3094_vm0 = vcmp.gt.f32.partialorder %v6718_v45, %v6704_v0  ;;  %v1865_v32 = vmax.f32 %v6707_v30, %v6721_v23 }
 0x2a8   : > { %v6735_v28 = vpop.f32.mrb[35].mxu0  ;;  %v6737_v5 = vpop.f32.mrb[3].mxu1  ;;  %1516 = vmatmul.mubr.f32.gmra.mrb[108].mxu1 %v990_v52  ;;  %v1961_v38 = vmin.f32 %v6707_v30, %v6721_v23  ;;  %vm3113_vm1 = vcmp.gt.f32.partialorder %v6721_v23, %v6707_v30  ;;  %v6744_v62 = vand.u32 2147483647, %v6723_v4  ;;  %v6751_v35 = vand.u32 2147483647, %v6725_v53 }
 0x2a9   : > { %1521 = vmatprep.mubr.f32.mxu1 %v10632_v19  ;;  %v2038_v42 = vadd.f32 1e-12, %v1846_v1  ;;  %v2057_v12 = vadd.f32 1e-12, %v1865_v32  ;;  %v6754_v33 = vand.u32 2147483647, %v6735_v28 }
 0x2aa   : > { %v6757_v15 = vand.u32 2147483647, %v6737_v5  ;;  %vm3383_vm13 = vcmp.lt.f32.partialorder %v6723_v4, 0.0  ;;  %vm3402_vm15 = vcmp.lt.f32.partialorder %v6725_v53, 0.0  ;;  %vm3671_vm9 = vcmp.lt.f32.partialorder %v6735_v28, 0.0  ;;  %v1000_v30 = vld [vmem:[%s10613_s1 + $0x298] sm:$0xff] }
 0x2ab   : > { %5798 = vrcp.f32 %v2038_v42  ;;  %v6759_v26 = vpop.f32.mrb[36].mxu0  ;;  %v6761_v27 = vpop.f32.mrb[4].mxu1  ;;  %v1847_v20 = vmax.f32 %v6744_v62, %v6754_v33  ;;  %vm3095_vm2 = vcmp.gt.f32.partialorder %v6754_v33, %v6744_v62  ;;  %v10879_v18 = vmin.f32 %v6744_v62, %v6754_v33  ;;  %v1002_v53 = vld [vmem:[%s10613_s1 + $0x2a8] sm:$0xff] }
 0x2ac   : > { %1522 = vmatmul.mubr.f32.gmra.mrb[110].mxu1 %v991_v43  ;;  %5800 = vrcp.f32 %v2057_v12  ;;  %v6769_v22 = vpop.f32.mrb[37].mxu0  ;;  %v6771_v14 = vpop.f32.mrb[5].mxu1  ;;  %v1866_v34 = vmax.f32 %v6751_v35, %v6757_v15  ;;  %vm3114_vm3 = vcmp.gt.f32.partialorder %v6757_v15, %v6751_v35  ;;  %v6784_v2 = vand.u32 2147483647, %v6759_v26 }
 0x2ad   : > { %1527 = vmatprep.mubr.f32.mxu1 %v10632_v19  ;;  %v2039_v61 = vadd.f32 1e-12, %v1847_v20  ;;  %v6787_v31 = vand.u32 2147483647, %v6761_v27  ;;  %v6790_v37 = vand.u32 2147483647, %v6769_v22 }
 0x2ae   : > { %v2058_v36 = vadd.f32 1e-12, %v1866_v34  ;;  %v6793_v46 = vand.u32 2147483647, %v6771_v14  ;;  %vm3672_vm8 = vcmp.lt.f32.partialorder %v6769_v22, 0.0 }
 0x2af   : > { %5802 = vrcp.f32 %v2039_v61  ;;  %v6795_v57 = vpop.f32.mrb[38].mxu0  ;;  %v6797_v50 = vpop.f32.mrb[6].mxu1  ;;  %v1848_v47 = vmax.f32 %v6784_v2, %v6790_v37  ;;  %vm3096_vm4 = vcmp.gt.f32.partialorder %v6790_v37, %v6784_v2  ;;  %v994_v61 = vld [vmem:[%s10613_s1 + $0x268] sm:$0xff] }
 0x2b0   : > { %1528 = vmatmul.mubr.f32.gmra.mrb[112].mxu1 %v992_v25  ;;  %10863 = vst [vmem:[#allocation17_spill] sm:$0xff] %v6795_v57  ;;  %10864 = vst [vmem:[#allocation18_spill] sm:$0xff] %v6797_v50  ;;  %5804 = vrcp.f32 %v2058_v36  ;;  %v6809_v16 = vpop.f32.mrb[39].mxu0  ;;  %v6811_v13 = vpop.f32.mrb[7].mxu1  ;;  %v1867_v52 = vmax.f32 %v6787_v31, %v6793_v46  ;;  %vm3115_vm5 = vcmp.gt.f32.partialorder %v6793_v46, %v6787_v31  ;;  %v6820_v32 = vand.u32 2147483647, %v6795_v57 }
 0x2b1   : > { %1533 = vmatprep.mubr.f32.mxu1 %v10632_v19  ;;  %10865 = vst [vmem:[#allocation19_spill] sm:$0xff] %v6809_v16  ;;  %10866 = vst [vmem:[#allocation20_spill] sm:$0xff] %v6811_v13  ;;  %v2040_v12 = vadd.f32 1e-12, %v1848_v47  ;;  %v6827_v20 = vand.u32 2147483647, %v6797_v50 }
 0x2b2   : > { %10867 = vst [vmem:[#allocation21_spill] sm:$0xff] %v6820_v32  ;;  %v2059_v25 = vadd.f32 1e-12, %v1867_v52  ;;  %v6830_v34 = vand.u32 2147483647, %v6809_v16 }
 0x2b3   : > { %v6822_v43 = vpop.f32.mrb[40].mxu0  ;;  %v6824_v42 = vpop.f32.mrb[8].mxu1  ;;  %5806 = vrcp.f32 %v2040_v12  ;;  %v6837_v1 = vand.u32 2147483647, %v6811_v13 }
 0x2b4   : > { %10868 = vst [vmem:[#allocation22_spill] sm:$0xff] %v6822_v43  ;;  %10869 = vst [vmem:[#allocation23_spill] sm:$0xff] %v6824_v42  ;;  %1534 = vmatmul.mubr.f32.gmra.mrb[114].mxu1 %v993_v58  ;;  %v6840_v47 = vand.u32 2147483647, %v6822_v43  ;;  %v6842_v51 = vpop.f32.mrb[41].mxu0  ;;  %5808 = vrcp.f32 %v2059_v25  ;;  %v1849_v8 = vmax.f32 %v6820_v32, %v6830_v34  ;;  %v6853_v21 = vpop.f32.mrb[9].mxu1  ;;  %vm3097_vm6 = vcmp.gt.f32.partialorder %v6830_v34, %v6820_v32 }
 0x2b5   : > { %1539 = vmatprep.mubr.f32.mxu1 %v10632_v19  ;;  %v5799_v36 = vpop.eup %5798  ;;  %10870 = vst [vmem:[#allocation24_spill] sm:$0xff] %v6842_v51  ;;  %10871 = vst [vmem:[#allocation25_spill] sm:$0xff] %v6853_v21  ;;  %vm3116_vm7 = vcmp.gt.f32.partialorder %v6837_v1, %v6827_v20  ;;  %v995_v25 = vld [vmem:[%s10613_s1 + $0x270] sm:$0xff]  ;;  %v6891_v11 = vand.u32 2147483647, %v6853_v21  ;;  %v10882_v21 = vmin.f32 %v6751_v35, %v6757_v15 }
 0x2b6   : > { %v5801_v58 = vpop.eup %5800  ;;  %v6847_v52 = vmul.f32 %v5799_v36, %v1942_v29  ;;  %v1868_v29 = vmax.f32 %v6827_v20, %v6837_v1  ;;  %v2041_v55 = vadd.f32 1e-12, %v1849_v8  ;;  %v6888_v8 = vand.u32 2147483647, %v6842_v51 }
 0x2b7   : > { %v6855_v19 = vpop.f32.mrb[42].mxu0  ;;  %v6860_v63 = vmul.f32 %v5801_v58, %v1961_v38  ;;  %v6868_v36 = vpop.f32.mrb[10].mxu1  ;;  %v10875_v58 = vmov 0.0   ;;  %10877 = vst [vmem:[#allocation30_spill] sm:$0xff] %v6891_v11 }
 0x2b8   : > { %10872 = vst [vmem:[#allocation26_spill] sm:$0xff] %v6868_v36  ;;  %v6870_v12 = vpop.f32.mrb[43].mxu0  ;;  %1540 = vmatmul.mubr.f32.gmra.mrb[116].mxu1 %v994_v61  ;;  %v2326_v56 = vmul.f32 %v6847_v52, %v6847_v52  ;;  %v6876_v38 = vpop.f32.mrb[11].mxu1  ;;  %v2060_v44 = vadd.f32 1e-12, %v1868_v29  ;;  %5810 = vrcp.f32 %v2041_v55 }
 0x2b9   : > { %10873 = vst [vmem:[#allocation27_spill] sm:$0xff] %v6870_v12  ;;  %10874 = vst [vmem:[#allocation28_spill] sm:$0xff] %v6876_v38  ;;  %1545 = vmatprep.mubr.f32.mxu1 %v10875_v58  ;;  %v2345_v9 = vmul.f32 %v6860_v63, %v6860_v63  ;;  %v6885_v61 = vand.u32 2147483647, %v6824_v42  ;;  %v5803_v10 = vpop.eup %5802  ;;  %v1850_v42 = vmax.f32 %v6840_v47, %v6888_v8 }
 0x2ba   : > { %v2422_v60 = vmul.f32 -0.046496473, %v2326_v56  ;;  %v5805_v41 = vpop.eup %5804  ;;  %v6898_v29 = vmul.f32 %v5803_v10, %v10879_v18  ;;  %5812 = vrcp.f32 %v2060_v44  ;;  %v996_v10 = vld [vmem:[%s10613_s1 + $0x278] sm:$0xff] }
 0x2bb   : > { %10876 = vst [vmem:[#allocation29_spill] sm:$0xff] %v6885_v61  ;;  %v6893_v49 = vpop.f32.mrb[44].mxu0  ;;  %v2441_v24 = vmul.f32 -0.046496473, %v2345_v9  ;;  %v6902_v51 = vpop.f32.mrb[12].mxu1  ;;  %v6909_v13 = vmul.f32 %v5805_v41, %v10882_v21  ;;  %v1869_v21 = vmax.f32 %v6885_v61, %v6891_v11 }
 0x2bc   : > { %10878 = vst [vmem:[#allocation31_spill] sm:$0xff] %v6893_v49  ;;  %10880 = vst [vmem:[#allocation32_spill] sm:$0xff] %v6902_v51  ;;  %v6904_v43 = vpop.f32.mrb[45].mxu0  ;;  %1546 = vmatmul.mubr.f32.gmra.mrb[118].mxu1 %v995_v25  ;;  %v2518_v55 = vadd.f32 0.15931422, %v2422_v60  ;;  %v6915_v18 = vpop.f32.mrb[13].mxu1  ;;  %v2327_v41 = vmul.f32 %v6898_v29, %v6898_v29 }
 0x2bd   : > { %10881 = vst [vmem:[#allocation33_spill] sm:$0xff] %v6904_v43  ;;  %10883 = vst [vmem:[#allocation34_spill] sm:$0xff] %v6915_v18  ;;  %1551 = vmatprep.mubr.f32.mxu1 %v10875_v58  ;;  %v4017_v60 = vsub.s32 2, %v10848_v39  ;;  %v2537_v44 = vadd.f32 0.15931422, %v2441_v24  ;;  %v6928_v7 = vmul.f32 %v6909_v13, %v6909_v13  ;;  %v997_v39 = vld [vmem:[%s10613_s1 + $0x280] sm:$0xff]  ;;  %v5807_v51 = vpop.eup %5806 }
 0x2be   : > { %v2614_v25 = vmul.f32 %v2518_v55, %v2326_v56  ;;  %v2423_v49 = vmul.f32 -0.046496473, %v2327_v41  ;;  %v2042_v50 = vadd.f32 1e-12, %v1850_v42  ;;  %v5809_v18 = vpop.eup %5808  ;;  %v2061_v12 = vadd.f32 1e-12, %v1869_v21 }
 0x2bf   : > { %v6934_v43 = vpop.f32.mrb[46].mxu0  ;;  %v6936_v24 = vpop.f32.mrb[14].mxu1  ;;  %v2633_v55 = vmul.f32 %v2537_v44, %v2345_v9  ;;  %v2442_v36 = vmul.f32 -0.046496473, %v6928_v7  ;;  %v5990_v42 = vld [vmem:[%s10614_s2] sm:$0xff] }
 0x2c0   : > { %10884 = vst [vmem:[#allocation35_spill] sm:$0xff] %v6934_v43  ;;  %10885 = vst [vmem:[#allocation36_spill] sm:$0xff] %v6936_v24  ;;  %v6941_v38 = vpop.f32.mrb[47].mxu0  ;;  %v6943_v16 = vpop.f32.mrb[15].mxu1  ;;  %1552 = vmatmul.mubr.f32.gmra.mrb[120].mxu1 %v996_v10  ;;  %v4965_v3 = vadd.f32 -0.32762277, %v2614_v25  ;;  %v10888_v24 = vmin.f32 %v6784_v2, %v6790_v37  ;;  %v6955_v44 = vrot.slane %v5990_v42, %v4017_v60  ;;  %5814 = vrcp.f32 %v2042_v50 }
 0x2c1   : > { %10886 = vst [vmem:[#allocation37_spill] sm:$0xff] %v6941_v38  ;;  %10887 = vst [vmem:[#allocation38_spill] sm:$0xff] %v6943_v16  ;;  %1557 = vmatprep.mubr.f32.mxu1 %v10875_v58  ;;  %v4984_v16 = vadd.f32 -0.32762277, %v2633_v55  ;;  %v2519_v10 = vadd.f32 0.15931422, %v2423_v49  ;;  %v10889_v25 = vmin.f32 %v6787_v31, %v6793_v46  ;;  %5816 = vrcp.f32 %v2061_v12 }
 0x2c2   : > { %v6949_v43 = vmul.f32 %v5807_v51, %v10888_v24  ;;  %v2806_v51 = vmul.f32 %v4965_v3, %v2326_v56  ;;  %v2538_v24 = vadd.f32 0.15931422, %v2442_v36  ;;  %v5811_v3 = vpop.eup %5810  ;;  %v10908_v2 = vmin.f32 %v6840_v47, %v6888_v8 }
 0x2c3   : > { %v6960_v38 = vmul.f32 %v5809_v18, %v10889_v25  ;;  %v6967_v57 = vpop.f32.mrb[48].mxu0  ;;  %v6969_v11 = vpop.f32.mrb[16].mxu1  ;;  %v2825_v60 = vmul.f32 %v4984_v16, %v2345_v9  ;;  %v2615_v55 = vmul.f32 %v2519_v10, %v2327_v41  ;;  %v998_v9 = vld [vmem:[%s10613_s1 + $0x288] sm:$0xff] }
 0x2c4   : > { %v6965_v21 = vmul.f32 %v6949_v43, %v6949_v43  ;;  %10890 = vst [vmem:[#allocation39_spill] sm:$0xff] %v6967_v57  ;;  %10891 = vst [vmem:[#allocation40_spill] sm:$0xff] %v6969_v11  ;;  %v6975_v18 = vpop.f32.mrb[49].mxu0  ;;  %v6977_v42 = vpop.f32.mrb[17].mxu1  ;;  %1558 = vmatmul.mubr.f32.gmra.mrb[122].mxu1 %v997_v39  ;;  %v2902_v56 = vmul.f32 %v2806_v51, %v6847_v52  ;;  %v2634_v36 = vmul.f32 %v2538_v24, %v6928_v7 }
 0x2c5   : > { %v6973_v49 = vmul.f32 %v6960_v38, %v6960_v38  ;;  %10892 = vst [vmem:[#allocation41_spill] sm:$0xff] %v6975_v18  ;;  %10893 = vst [vmem:[#allocation42_spill] sm:$0xff] %v6977_v42  ;;  %1563 = vmatprep.mubr.f32.mxu1 %v10875_v58  ;;  %v5813_v50 = vpop.eup %5812  ;;  %v2921_v39 = vmul.f32 %v2825_v60, %v6860_v63  ;;  %v4966_v16 = vadd.f32 -0.32762277, %v2615_v55 }
 0x2c6   : > { %v2424_v25 = vmul.f32 -0.046496473, %v6965_v21  ;;  %v10894_v51 = vmin.f32 %v6820_v32, %v6830_v34  ;;  %v2998_v24 = vadd.f32 %v2902_v56, %v6847_v52  ;;  %v4985_v42 = vadd.f32 -0.32762277, %v2634_v36 }
 0x2c7   : > { %v2443_v10 = vmul.f32 -0.046496473, %v6973_v49  ;;  %v10895_v18 = vmin.f32 %v6827_v20, %v6837_v1  ;;  %v7001_v61 = vpop.f32.mrb[50].mxu0  ;;  %v7003_v60 = vpop.f32.mrb[18].mxu1  ;;  %v3017_v55 = vadd.f32 %v2921_v39, %v6860_v63  ;;  %v2807_v32 = vmul.f32 %v4966_v16, %v2327_v41 }
 0x2c8   : > { %v6993_v12 = vmul.f32 %v5811_v3, %v10894_v51  ;;  %v2520_v11 = vadd.f32 0.15931422, %v2424_v25  ;;  %10896 = vst [vmem:[#allocation43_spill] sm:$0xff] %v7001_v61  ;;  %10897 = vst [vmem:[#allocation44_spill] sm:$0xff] %v7003_v60  ;;  %v7011_v56 = vpop.f32.mrb[51].mxu0  ;;  %v7013_v36 = vpop.f32.mrb[19].mxu1  ;;  %1564 = vmatmul.mubr.f32.gmra.mrb[124].mxu1 %v998_v9  ;;  %v2826_v25 = vmul.f32 %v4985_v42, %v6928_v7 }
 0x2c9   : > { %v6999_v57 = vmul.f32 %v5813_v50, %v10895_v18  ;;  %v2539_v3 = vadd.f32 0.15931422, %v2443_v10  ;;  %10898 = vst [vmem:[#allocation45_spill] sm:$0xff] %v7013_v36  ;;  %v3190_v18 = vsub.f32 1.5707964, %v2998_v24  ;;  %1569 = vmatprep.mubr.f32.mxu1 %v10875_v58  ;;  %v999_v50 = vld [vmem:[%s10613_s1 + $0x290] sm:$0xff]  ;;  %v2903_v9 = vmul.f32 %v2807_v32, %v6898_v29 }
 0x2ca   : > { %v7009_v52 = vmul.f32 %v6993_v12, %v6993_v12  ;;  %v2616_v63 = vmul.f32 %v2520_v11, %v6965_v21  ;;  %v3209_v39 = vsub.f32 1.5707964, %v3017_v55  ;;  %v2922_v11 = vmul.f32 %v2826_v25, %v6909_v13  ;;  %v5815_v23 = vpop.eup %5814 }
 0x2cb   : > { %v7020_v41 = vmul.f32 %v6999_v57, %v6999_v57  ;;  %v2635_v16 = vmul.f32 %v2539_v3, %v6973_v49  ;;  %v3286_v7 = vsel %vm3094_vm0, %v3190_v18, %v2998_v24  ;;  %v7036_v36 = vpop.f32.mrb[52].mxu0  ;;  %v7038_v32 = vpop.f32.mrb[20].mxu1  ;;  %v2999_v0 = vadd.f32 %v2903_v9, %v6898_v29 }
 0x2cc   : > { %v2425_v10 = vmul.f32 -0.046496473, %v7009_v52  ;;  %v4967_v42 = vadd.f32 -0.32762277, %v2616_v63  ;;  %10899 = vst [vmem:[#allocation46_spill] sm:$0xff] %v7036_v36  ;;  %10900 = vst [vmem:[#allocation47_spill] sm:$0xff] %v7038_v32  ;;  %v3305_v60 = vsel %vm3113_vm1, %v3209_v39, %v3017_v55  ;;  %1570 = vmatmul.mubr.f32.gmra.mrb[126].mxu1 %v999_v50  ;;  %v3018_v63 = vadd.f32 %v2922_v11, %v6909_v13  ;;  %v7059_v39 = vpop.eup %5816 }
 0x2cd   : > { %v2444_v51 = vmul.f32 -0.046496473, %v7020_v41  ;;  %v3478_v3 = vsub.f32 3.1415927, %v3286_v7  ;;  %v4986_v45 = vadd.f32 -0.32762277, %v2635_v16  ;;  %1575 = vmatprep.mubr.f32.mxu1 %v10875_v58  ;;  %v7128_v37 = vmul.f32 %v5815_v23, %v10908_v2 }
 0x2ce   : > { %v7044_v24 = vpop.f32.mrb[53].mxu0  ;;  %v7046_v18 = vpop.f32.mrb[21].mxu1  ;;  %v3497_v25 = vsub.f32 3.1415927, %v3305_v60  ;;  %vm3384_vm0 = vcmp.lt.f32.partialorder %v6759_v26, 0.0  ;;  %v2808_v32 = vmul.f32 %v4967_v42, %v6965_v21  ;;  %vm3690_vm1 = vcmp.lt.f32.partialorder %v6737_v5, 0.0 }
 0x2cf   : > { %v2521_v36 = vadd.f32 0.15931422, %v2425_v10  ;;  %v3574_v29 = vsel %vm3382_vm10, %v3478_v3, %v3286_v7  ;;  %v3191_v55 = vsub.f32 1.5707964, %v2999_v0  ;;  %v2827_v13 = vmul.f32 %v4986_v45, %v6973_v49  ;;  %v7064_v11 = vpop.f32.mrb[54].mxu0  ;;  %v7066_v42 = vpop.f32.mrb[22].mxu1 }
 0x2d0   : > { %v2540_v50 = vadd.f32 0.15931422, %v2444_v51  ;;  %v3766_v21 = vsub.f32 0.0, %v3574_v29  ;;  %v3593_v9 = vsel %vm3401_vm11, %v3497_v25, %v3305_v60  ;;  %v3210_v16 = vsub.f32 1.5707964, %v3018_v63  ;;  %v7075_v60 = vpop.f32.mrb[55].mxu0  ;;  %1576 = vmatmul.mubr.f32.gmra.mrb[128].mxu1 %v1000_v30 }
 0x2d1   : > { %v2904_v10 = vmul.f32 %v2808_v32, %v6949_v43  ;;  %v3785_v17 = vsub.f32 0.0, %v3593_v9  ;;  %v3287_v7 = vsel %vm3095_vm2, %v3191_v55, %v2999_v0  ;;  %vm3403_vm10 = vcmp.lt.f32.partialorder %v6761_v27, 0.0  ;;  %v7077_v51 = vpop.f32.mrb[23].mxu1  ;;  %1581 = vmatprep.mubr.f32.mxu1 %v10875_v58 }
 0x2d2   : > { %v2923_v49 = vmul.f32 %v2827_v13, %v6960_v38  ;;  %v2617_v48 = vmul.f32 %v2521_v36, %v7009_v52  ;;  %10901 = vst [vmem:[#allocation48_spill] sm:$0xff] %v7077_v51  ;;  %v3862_v32 = vsel %vm3670_vm12, %v3766_v21, %v3574_v29  ;;  %v3479_v3 = vsub.f32 3.1415927, %v3287_v7  ;;  %v1001_v36 = vld [vmem:[%s10613_s1 + $0x2a0] sm:$0xff] }
 0x2d3   : > { %v3306_v62 = vsel %vm3114_vm3, %v3210_v16, %v3018_v63  ;;  %v3000_v33 = vadd.f32 %v2904_v10, %v6949_v43  ;;  %v4019_v0 = vmul.f32 %v6955_v44, %v3862_v32  ;;  %v7092_v45 = vsel %vm3689_vm14, %v3785_v17, %v3593_v9  ;;  %v7098_v63 = vpop.f32.mrb[56].mxu0  ;;  %v7100_v30 = vpop.f32.mrb[24].mxu1 }
 0x2d4   : > { %10902 = vst [vmem:[#allocation49_spill] sm:$0xff] %v7092_v45  ;;  %v3498_v54 = vsub.f32 3.1415927, %v3306_v62  ;;  %v3019_v25 = vadd.f32 %v2923_v49, %v6960_v38  ;;  %v3575_v35 = vsel %vm3383_vm13, %v3479_v3, %v3287_v7  ;;  %vm3691_vm2 = vcmp.lt.f32.partialorder %v6771_v14, 0.0  ;;  %10903 = vst [vmem:[#allocation50_spill] sm:$0xff] %v7098_v63  ;;  %v7107_v38 = vpop.f32.mrb[57].mxu0  ;;  %1582 = vmatmul.mubr.f32.gmra.mrb[130].mxu1 %v1001_v36 }
 0x2d5   : > { %v3192_v15 = vsub.f32 1.5707964, %v3000_v33  ;;  %v4968_v43 = vadd.f32 -0.32762277, %v2617_v48  ;;  %10904 = vst [vmem:[#allocation51_spill] sm:$0xff] %v7100_v30  ;;  %v7103_v29 = vadd.f32 %v4019_v0, %v6347_v40  ;;  %v3767_v59 = vsub.f32 0.0, %v3575_v35  ;;  %1587 = vmatprep.mubr.f32.mxu1 %v10875_v58 }
 0x2d6   : > { %v3594_v55 = vsel %vm3402_vm15, %v3498_v54, %v3306_v62  ;;  %v3211_v13 = vsub.f32 1.5707964, %v3019_v25  ;;  %10906 = vst [vmem:[#allocation53_spill] sm:$0xff] %v7107_v38  ;;  %v7109_v4 = vpop.f32.mrb[25].mxu1  ;;  %v2636_v40 = vmul.f32 %v2540_v50, %v7020_v41  ;;  %v2330_v23 = vmul.f32 %v7128_v37, %v7128_v37  ;;  %v1003_v54 = vld [vmem:[%s10613_s1 + $0x2b0] sm:$0xff] }
 0x2d7   : > { %10905 = vst [vmem:[#allocation52_spill] sm:$0xff] %v7103_v29  ;;  %10907 = vst [vmem:[#allocation54_spill] sm:$0xff] %v7109_v4  ;;  %v3786_v21 = vsub.f32 0.0, %v3594_v55  ;;  %v3288_v9 = vsel %vm3096_vm4, %v3192_v15, %v3000_v33  ;;  %v2809_v16 = vmul.f32 %v4968_v43, %v7009_v52  ;;  %v3863_v10 = vsel %vm3671_vm9, %v3767_v59, %v3575_v35  ;;  %v7136_v48 = vpop.f32.mrb[58].mxu0  ;;  %v7138_v32 = vpop.f32.mrb[26].mxu1  ;;  %v10915_v43 = vld [vmem:[#allocation29_spill] sm:$0xff] }
 0x2d8   : > { %v3480_v17 = vsub.f32 3.1415927, %v3288_v9  ;;  %v3307_v7 = vsel %vm3115_vm5, %v3211_v13, %v3019_v25  ;;  %v4020_v52 = vmul.f32 %v6955_v44, %v3863_v10  ;;  %10910 = vst [vmem:[#allocation56_spill] sm:$0xff] %v7136_v48  ;;  %10911 = vst [vmem:[#allocation57_spill] sm:$0xff] %v7138_v32  ;;  %v4987_v46 = vadd.f32 -0.32762277, %v2636_v40  ;;  %1588 = vmatmul.mubr.f32.gmra.mrb[132].mxu1 %v1002_v53 }
 0x2d9   : > { %v7133_v50 = vsel %vm3690_vm1, %v3786_v21, %v3594_v55  ;;  %v3499_v49 = vsub.f32 3.1415927, %v3307_v7  ;;  %v2905_v28 = vmul.f32 %v2809_v16, %v6993_v12  ;;  %v7145_v3 = vand.u32 2147483647, %v6855_v19  ;;  %v7147_v5 = vpop.f32.mrb[59].mxu0  ;;  %v7149_v62 = vpop.f32.mrb[27].mxu1  ;;  %1593 = vmatprep.mubr.f32.mxu1 %v10875_v58 }
 0x2da   : > { %10909 = vst [vmem:[#allocation55_spill] sm:$0xff] %v7133_v50  ;;  %v3576_v31 = vsel %vm3384_vm0, %v3480_v17, %v3288_v9  ;;  %10912 = vst [vmem:[#allocation58_spill] sm:$0xff] %v7147_v5  ;;  %v7152_v33 = vadd.f32 %v4020_v52, %v6351_v6  ;;  %v2828_v35 = vmul.f32 %v4987_v46, %v7020_v41  ;;  %v2426_v15 = vmul.f32 -0.046496473, %v2330_v23  ;;  %v10916_v59 = vld [vmem:[#allocation30_spill] sm:$0xff]  ;;  %v10919_v21 = vld [vmem:[#allocation27_spill] sm:$0xff] }
 0x2db   : > { %10913 = vst [vmem:[#allocation59_spill] sm:$0xff] %v7149_v62  ;;  %v3768_v36 = vsub.f32 0.0, %v3576_v31  ;;  %v3595_v26 = vsel %vm3403_vm10, %v3499_v49, %v3307_v7  ;;  %v3001_v0 = vadd.f32 %v2905_v28, %v6993_v12  ;;  %v10917_v6 = vmin.f32 %v10915_v43, %v10916_v59  ;;  %v10918_v12 = vld [vmem:[#allocation17_spill] sm:$0xff]  ;;  %v7174_v16 = vpop.f32.mrb[60].mxu0  ;;  %v7182_v10 = vpop.f32.mrb[28].mxu1  ;;  %v10925_v52 = vld [vmem:[#allocation26_spill] sm:$0xff] }
 0x2dc   : > { %10914 = vst [vmem:[#allocation60_spill] sm:$0xff] %v7152_v33  ;;  %v3787_v25 = vsub.f32 0.0, %v3595_v26  ;;  %vm3385_vm3 = vcmp.lt.f32.partialorder %v10918_v12, 0.0  ;;  %v7172_v9 = vand.u32 2147483647, %v10919_v21  ;;  %10920 = vst [vmem:[#allocation29_spill] sm:$0xff] %v7174_v16  ;;  %1594 = vmatmul.mubr.f32.gmra.mrb[134].mxu1 %v1003_v54  ;;  %vm10951_vm11 = vcmp.gt.f32.partialorder %v6888_v8, %v6840_v47 }
 0x2dd   : > { %v7166_v55 = vmul.f32 %v7059_v39, %v10917_v6  ;;  %v3864_v27 = vsel %vm3672_vm8, %v3768_v36, %v3576_v31  ;;  %v3193_v13 = vsub.f32 1.5707964, %v3001_v0  ;;  %v2924_v39 = vmul.f32 %v2828_v35, %v6999_v57  ;;  %10922 = vst [vmem:[#allocation17_spill] sm:$0xff] %v7182_v10  ;;  %v7184_v22 = vpop.f32.mrb[61].mxu0  ;;  %v7196_v28 = vpop.f32.mrb[29].mxu1  ;;  %1599 = vmatprep.mubr.f32.mxu1 %v10875_v58  ;;  %v1004_v31 = vld [vmem:[%s10613_s1 + $0x2b8] sm:$0xff] }
 0x2de   : > { %v4021_v41 = vmul.f32 %v6955_v44, %v3864_v27  ;;  %v7179_v40 = vsel %vm3691_vm2, %v3787_v25, %v3595_v26  ;;  %v2522_v53 = vadd.f32 0.15931422, %v2426_v15  ;;  %10923 = vst [vmem:[#allocation27_spill] sm:$0xff] %v7184_v22  ;;  %v7192_v49 = vand.u32 2147483647, %v10925_v52  ;;  %10926 = vst [vmem:[#allocation21_spill] sm:$0xff] %v7196_v28 }
 0x2df   : > { %10921 = vst [vmem:[#allocation30_spill] sm:$0xff] %v7179_v40  ;;  %v3289_v7 = vsel %vm3097_vm6, %v3193_v13, %v3001_v0  ;;  %v2349_v2 = vmul.f32 %v7166_v55, %v7166_v55  ;;  %v1851_v14 = vmax.f32 %v7145_v3, %v7172_v9  ;;  %v10927_v46 = vld [vmem:[#allocation3_spill] sm:$0xff]  ;;  %v3020_v26 = vadd.f32 %v2924_v39, %v6999_v57  ;;  %v7210_v15 = vpop.f32.mrb[62].mxu0  ;;  %v7212_v6 = vpop.f32.mrb[30].mxu1  ;;  %v10943_v50 = vld [vmem:[#allocation32_spill] sm:$0xff]  ;;  %v10970_v10 = vld [vmem:[#allocation41_spill] sm:$0xff] }
 0x2e0   : > { %v7203_v34 = vadd.f32 %v4021_v41, %v10927_v46  ;;  %v3481_v36 = vsub.f32 3.1415927, %v3289_v7  ;;  %v2618_v0 = vmul.f32 %v2522_v53, %v2330_v23  ;;  %vm3099_vm4 = vcmp.gt.f32.partialorder %v7172_v9, %v7145_v3  ;;  %10929 = vst [vmem:[#allocation3_spill] sm:$0xff] %v7210_v15  ;;  %10930 = vst [vmem:[#allocation61_spill] sm:$0xff] %v7212_v6  ;;  %v10931_v13 = vld [vmem:[#allocation19_spill] sm:$0xff]  ;;  %v7217_v39 = vpop.f32.mrb[63].mxu0 }
 0x2e1   : > { %v2445_v54 = vmul.f32 -0.046496473, %v2349_v2  ;;  %v2043_v35 = vadd.f32 1e-12, %v1851_v14  ;;  %vm3673_vm5 = vcmp.lt.f32.partialorder %v10931_v13, 0.0  ;;  %10932 = vst [vmem:[#allocation19_spill] sm:$0xff] %v7217_v39  ;;  %1600 = vmatmul.mubr.f32.gmra.mrb[136].mxu1 %v1004_v31  ;;  %vm10959_vm0 = vcmp.gt.f32.partialorder %v10916_v59, %v10915_v43 }
 0x2e2   : > { %10928 = vst [vmem:[#allocation26_spill] sm:$0xff] %v7203_v34  ;;  %v3577_v27 = vsel %vm3385_vm3, %v3481_v36, %v3289_v7  ;;  %v3212_v41 = vsub.f32 1.5707964, %v3020_v26  ;;  %v4969_v57 = vadd.f32 -0.32762277, %v2618_v0  ;;  %v10933_v14 = vld [vmem:[#allocation28_spill] sm:$0xff]  ;;  %1605 = vmatprep.mubr.f32.mxu1 %v10875_v58 }
 0x2e3   : > { %v3769_v53 = vsub.f32 0.0, %v3577_v27  ;;  %v2541_v17 = vadd.f32 0.15931422, %v2445_v54  ;;  %5818 = vrcp.f32 %v2043_v35  ;;  %v7220_v46 = vand.u32 2147483647, %v10933_v14  ;;  %v7222_v25 = vpop.f32.mrb[31].mxu1 }
 0x2e4   : > { %10934 = vst [vmem:[#allocation28_spill] sm:$0xff] %v7222_v25  ;;  %v10935_v34 = vld [vmem:[#allocation18_spill] sm:$0xff]  ;;  %v3308_v12 = vsel %vm3116_vm7, %v3212_v41, %v3020_v26  ;;  %v2810_v7 = vmul.f32 %v4969_v57, %v2330_v23  ;;  %v7231_v35 = vpop.f32.mrb[64].mxu0  ;;  %v7233_v13 = vpop.f32.mrb[32].mxu1  ;;  %v10940_v57 = vld [vmem:[#allocation31_spill] sm:$0xff]  ;;  %v10954_v8 = vld [vmem:[#allocation24_spill] sm:$0xff] }
 0x2e5   : > { %vm3404_vm6 = vcmp.lt.f32.partialorder %v10935_v34, 0.0  ;;  %v3865_v36 = vsel %vm3673_vm5, %v3769_v53, %v3577_v27  ;;  %v3500_v0 = vsub.f32 3.1415927, %v3308_v12  ;;  %v2637_v31 = vmul.f32 %v2541_v17, %v2349_v2  ;;  %10936 = vst [vmem:[#allocation18_spill] sm:$0xff] %v7231_v35  ;;  %10937 = vst [vmem:[#allocation62_spill] sm:$0xff] %v7233_v13  ;;  %v7241_v1 = vpop.f32.mrb[65].mxu0 }
 0x2e6   : > { %v1870_v54 = vmax.f32 %v7192_v49, %v7220_v46  ;;  %v4022_v33 = vmul.f32 %v6955_v44, %v3865_v36  ;;  %v2906_v29 = vmul.f32 %v2810_v7, %v7128_v37  ;;  %vm3118_vm7 = vcmp.gt.f32.partialorder %v7220_v46, %v7192_v49  ;;  %10938 = vst [vmem:[#allocation63_spill] sm:$0xff] %v7241_v1  ;;  %v7243_v20 = vpop.f32.mrb[33].mxu1  ;;  %v1005_v23 = vld [vmem:[%s10613_s1 + $0x2c0] sm:$0xff]  ;;  %v10941_v17 = vld [vmem:[#allocation4_spill] sm:$0xff]  ;;  %v10964_v15 = vld [vmem:[#allocation5_spill] sm:$0xff] }
 0x2e7   : > { %10939 = vst [vmem:[#allocation64_spill] sm:$0xff] %v7243_v20  ;;  %v3596_v26 = vsel %vm3404_vm6, %v3500_v0, %v3308_v12  ;;  %v4988_v27 = vadd.f32 -0.32762277, %v2637_v31  ;;  %v7251_v53 = vand.u32 2147483647, %v10940_v57  ;;  %1606 = vmatmul.mubr.f32.gmra.mrb[138].mxu1 %v1005_v23  ;;  %v10944_v1 = vld [vmem:[#allocation20_spill] sm:$0xff] }
 0x2e8   : > { %v2062_v41 = vadd.f32 1e-12, %v1870_v54  ;;  %v7254_v7 = vadd.f32 %v4022_v33, %v10941_v17  ;;  %v3788_v36 = vsub.f32 0.0, %v3596_v26  ;;  %v3002_v40 = vadd.f32 %v2906_v29, %v7128_v37  ;;  %1611 = vmatprep.mubr.f32.mxu1 %v10875_v58  ;;  %v10945_v12 = vld [vmem:[#allocation33_spill] sm:$0xff]  ;;  %v10947_v33 = vld [vmem:[#allocation34_spill] sm:$0xff]  ;;  %v7270_v17 = vpop.f32.mrb[66].mxu0 }
 0x2e9   : > { %v7258_v20 = vand.u32 2147483647, %v10943_v50  ;;  %vm3692_vm8 = vcmp.lt.f32.partialorder %v10944_v1, 0.0  ;;  %v2829_v34 = vmul.f32 %v4988_v27, %v2349_v2  ;;  %v7263_v0 = vand.u32 2147483647, %v10945_v12  ;;  %10948 = vst [vmem:[#allocation32_spill] sm:$0xff] %v7270_v17 }
 0x2ea   : > { %10942 = vst [vmem:[#allocation31_spill] sm:$0xff] %v7254_v7  ;;  %5820 = vrcp.f32 %v2062_v41  ;;  %v7265_v31 = vsel %vm3692_vm8, %v3788_v36, %v3596_v26  ;;  %v3194_v54 = vsub.f32 1.5707964, %v3002_v40  ;;  %v7268_v23 = vand.u32 2147483647, %v10947_v33  ;;  %v10949_v29 = vld [vmem:[#allocation22_spill] sm:$0xff] }
 0x2eb   : > { %10946 = vst [vmem:[#allocation4_spill] sm:$0xff] %v7265_v31  ;;  %vm3386_vm9 = vcmp.lt.f32.partialorder %v10949_v29, 0.0  ;;  %v2925_v37 = vmul.f32 %v2829_v34, %v7166_v55  ;;  %v1852_v1 = vmax.f32 %v7251_v53, %v7263_v0  ;;  %v7278_v27 = vpop.f32.mrb[34].mxu1  ;;  %vm3100_vm12 = vcmp.gt.f32.partialorder %v7263_v0, %v7251_v53  ;;  %v7289_v34 = vpop.f32.mrb[67].mxu0  ;;  %v10958_v7 = vld [vmem:[#allocation23_spill] sm:$0xff]  ;;  %v10961_v29 = vld [vmem:[#allocation37_spill] sm:$0xff] }
 0x2ec   : > { %10950 = vst [vmem:[#allocation20_spill] sm:$0xff] %v7278_v27  ;;  %v3290_v26 = vsel %vm10951_vm11, %v3194_v54, %v3002_v40  ;;  %v1871_v41 = vmax.f32 %v7258_v20, %v7268_v23  ;;  %10952 = vst [vmem:[#allocation33_spill] sm:$0xff] %v7289_v34  ;;  %vm3119_vm13 = vcmp.gt.f32.partialorder %v7268_v23, %v7258_v20  ;;  %v7294_v47 = vpop.f32.mrb[35].mxu1  ;;  %vm3674_vm14 = vcmp.lt.f32.partialorder %v10954_v8, 0.0  ;;  %v10957_v8 = vld [vmem:[#allocation36_spill] sm:$0xff]  ;;  %v10962_v25 = vld [vmem:[#allocation38_spill] sm:$0xff] }
 0x2ed   : > { %v5819_v31 = vpop.eup %5818  ;;  %v3482_v17 = vsub.f32 3.1415927, %v3290_v26  ;;  %v3021_v2 = vadd.f32 %v2925_v37, %v7166_v55  ;;  %v2044_v27 = vadd.f32 1e-12, %v1852_v1  ;;  %10953 = vst [vmem:[#allocation34_spill] sm:$0xff] %v7294_v47  ;;  %v10955_v40 = vmin.f32 %v7145_v3, %v7172_v9  ;;  %v10956_v55 = vld [vmem:[#allocation35_spill] sm:$0xff] }
 0x2ee   : > { %v2063_v36 = vadd.f32 1e-12, %v1871_v41  ;;  %v7305_v37 = vand.u32 2147483647, %v10956_v55  ;;  %v7310_v35 = vand.u32 2147483647, %v10957_v8 }
 0x2ef   : > { %v7300_v54 = vmul.f32 %v5819_v31, %v10955_v40  ;;  %v3578_v34 = vsel %vm3386_vm9, %v3482_v17, %v3290_v26  ;;  %v3213_v13 = vsub.f32 1.5707964, %v3021_v2  ;;  %5822 = vrcp.f32 %v2044_v27  ;;  %v10960_v17 = vld [vmem:[#allocation25_spill] sm:$0xff] }
 0x2f0   : > { %v3770_v1 = vsub.f32 0.0, %v3578_v34  ;;  %5824 = vrcp.f32 %v2063_v36  ;;  %vm3405_vm15 = vcmp.lt.f32.partialorder %v10958_v7, 0.0  ;;  %vm3693_vm1 = vcmp.lt.f32.partialorder %v10960_v17, 0.0 }
 0x2f1   : > { %v2331_v47 = vmul.f32 %v7300_v54, %v7300_v54  ;;  %v3309_v31 = vsel %vm10959_vm0, %v3213_v13, %v3021_v2  ;;  %v7318_v27 = vand.u32 2147483647, %v10961_v29  ;;  %v7321_v39 = vand.u32 2147483647, %v10962_v25 }
 0x2f2   : > { %v3866_v26 = vsel %vm3674_vm14, %v3770_v1, %v3578_v34  ;;  %v3501_v41 = vsub.f32 3.1415927, %v3309_v31  ;;  %v10963_v2 = vmin.f32 %v7192_v49, %v7220_v46  ;;  %v7362_v22 = vand.u32 2147483647, %v10970_v10 }
 0x2f3   : > { %v2427_v40 = vmul.f32 -0.046496473, %v2331_v47  ;;  %v4023_v6 = vmul.f32 %v6955_v44, %v3866_v26  ;;  %v1853_v7 = vmax.f32 %v7305_v37, %v7318_v27  ;;  %vm3101_vm10 = vcmp.gt.f32.partialorder %v7318_v27, %v7305_v37  ;;  %v1006_v26 = vld [vmem:[%s10613_s1 + $0x2c8] sm:$0xff] }
 0x2f4   : > { %v5821_v36 = vpop.eup %5820  ;;  %v3597_v59 = vsel %vm3405_vm15, %v3501_v41, %v3309_v31  ;;  %v1872_v1 = vmax.f32 %v7310_v35, %v7321_v39  ;;  %v1968_v31 = vmin.f32 %v7310_v35, %v7321_v39  ;;  %1612 = vmatmul.mubr.f32.gmra.mrb[140].mxu1 %v1006_v26  ;;  %vm3120_vm2 = vcmp.gt.f32.partialorder %v7321_v39, %v7310_v35 }
 0x2f5   : > { %v2523_v13 = vadd.f32 0.15931422, %v2427_v40  ;;  %v7333_v34 = vmul.f32 %v5821_v36, %v10963_v2  ;;  %v7341_v45 = vadd.f32 %v4023_v6, %v10964_v15  ;;  %v3789_v43 = vsub.f32 0.0, %v3597_v59  ;;  %1617 = vmatprep.mubr.f32.mxu1 %v10875_v58  ;;  %v10967_v6 = vld [vmem:[#allocation39_spill] sm:$0xff] }
 0x2f6   : > { %v2045_v28 = vadd.f32 1e-12, %v1853_v7  ;;  %v2064_v36 = vadd.f32 1e-12, %v1872_v1  ;;  %v7355_v7 = vand.u32 2147483647, %v10967_v6 }
 0x2f7   : > { %10965 = vst [vmem:[#allocation22_spill] sm:$0xff] %v7341_v45  ;;  %v2619_v41 = vmul.f32 %v2523_v13, %v2331_v47  ;;  %v2350_v40 = vmul.f32 %v7333_v34, %v7333_v34  ;;  %v7352_v15 = vsel %vm3693_vm1, %v3789_v43, %v3597_v59  ;;  %v7357_v13 = vpop.f32.mrb[68].mxu0  ;;  %v7359_v45 = vpop.f32.mrb[36].mxu1  ;;  %v10972_v59 = vld [vmem:[#allocation40_spill] sm:$0xff]  ;;  %vm3387_vm6 = vcmp.lt.f32.partialorder %v6855_v19, 0.0 }
 0x2f8   : > { %10966 = vst [vmem:[#allocation24_spill] sm:$0xff] %v7352_v15  ;;  %5826 = vrcp.f32 %v2045_v28  ;;  %10968 = vst [vmem:[#allocation35_spill] sm:$0xff] %v7357_v13  ;;  %v10971_v28 = vmin.f32 %v7251_v53, %v7263_v0  ;;  %v1854_v15 = vmax.f32 %v7355_v7, %v7362_v22  ;;  %vm3102_vm3 = vcmp.gt.f32.partialorder %v7362_v22, %v7355_v7 }
 0x2f9   : > { %v4970_v2 = vadd.f32 -0.32762277, %v2619_v41  ;;  %v2446_v26 = vmul.f32 -0.046496473, %v2350_v40  ;;  %5828 = vrcp.f32 %v2064_v36  ;;  %10969 = vst [vmem:[#allocation36_spill] sm:$0xff] %v7359_v45  ;;  %v5823_v1 = vpop.eup %5822  ;;  %v7372_v36 = vpop.f32.mrb[69].mxu0  ;;  %v10974_v45 = vmin.f32 %v7258_v20, %v7268_v23 }
 0x2fa   : > { %v5825_v16 = vpop.eup %5824  ;;  %v7367_v43 = vmul.f32 %v5823_v1, %v10971_v28  ;;  %v7370_v41 = vand.u32 2147483647, %v10972_v59  ;;  %10973 = vst [vmem:[#allocation23_spill] sm:$0xff] %v7372_v36  ;;  %v10976_v36 = vld [vmem:[#allocation42_spill] sm:$0xff]  ;;  %v2046_v5 = vadd.f32 1e-12, %v1854_v15 }
 0x2fb   : > { %v2811_v62 = vmul.f32 %v4970_v2, %v2331_v47  ;;  %v2542_v17 = vadd.f32 0.15931422, %v2446_v26  ;;  %v7377_v13 = vmul.f32 %v5825_v16, %v10974_v45  ;;  %v7385_v2 = vpop.f32.mrb[37].mxu1  ;;  %v7391_v45 = vand.u32 2147483647, %v10976_v36 }
 0x2fc   : > { %10975 = vst [vmem:[#allocation25_spill] sm:$0xff] %v7385_v2  ;;  %v2332_v28 = vmul.f32 %v7367_v43, %v7367_v43  ;;  %5830 = vrcp.f32 %v2046_v5  ;;  %vm3675_vm8 = vcmp.lt.f32.partialorder %v10919_v21, 0.0  ;;  %vm3406_vm9 = vcmp.lt.f32.partialorder %v10925_v52, 0.0 }
 0x2fd   : > { %v2907_v26 = vmul.f32 %v2811_v62, %v7300_v54  ;;  %v2638_v1 = vmul.f32 %v2542_v17, %v2350_v40  ;;  %v2351_v16 = vmul.f32 %v7377_v13, %v7377_v13  ;;  %v1873_v2 = vmax.f32 %v7370_v41, %v7391_v45 }
 0x2fe   : > { %v2428_v48 = vmul.f32 -0.046496473, %v2332_v28  ;;  %vm3121_vm5 = vcmp.gt.f32.partialorder %v7391_v45, %v7370_v41  ;;  %v7423_v9 = vand.u32 2147483647, %v7011_v56  ;;  %vm3388_vm11 = vcmp.lt.f32.partialorder %v10940_v57, 0.0 }
 0x2ff   : > { %v3003_v47 = vadd.f32 %v2907_v26, %v7300_v54  ;;  %v4989_v32 = vadd.f32 -0.32762277, %v2638_v1  ;;  %v2447_v4 = vmul.f32 -0.046496473, %v2351_v16  ;;  %v2065_v63 = vadd.f32 1e-12, %v1873_v2 }
 0x300   : > { %v2524_v30 = vadd.f32 0.15931422, %v2428_v48  ;;  %v7405_v26 = vand.u32 2147483647, %v7001_v61  ;;  %vm3407_vm14 = vcmp.lt.f32.partialorder %v10943_v50, 0.0  ;;  %vm3676_vm15 = vcmp.lt.f32.partialorder %v10945_v12, 0.0 }
 0x301   : > { %v3195_v17 = vsub.f32 1.5707964, %v3003_v47  ;;  %v2830_v38 = vmul.f32 %v4989_v32, %v2350_v40  ;;  %v2543_v54 = vadd.f32 0.15931422, %v2447_v4  ;;  %v10977_v40 = vmin.f32 %v7305_v37, %v7318_v27 }
 0x302   : > { %v5827_v15 = vpop.eup %5826  ;;  %v2620_v48 = vmul.f32 %v2524_v30, %v2332_v28  ;;  %5832 = vrcp.f32 %v2065_v63  ;;  %v1951_v19 = vmin.f32 %v7405_v26, %v7423_v9  ;;  %vm3103_vm0 = vcmp.gt.f32.partialorder %v7423_v9, %v7405_v26 }
 0x303   : > { %v5829_v5 = vpop.eup %5828  ;;  %v3291_v1 = vsel %vm3099_vm4, %v3195_v17, %v3003_v47  ;;  %v2926_v32 = vmul.f32 %v2830_v38, %v7333_v34  ;;  %v7415_v2 = vmul.f32 %v5827_v15, %v10977_v40  ;;  %v2639_v4 = vmul.f32 %v2543_v54, %v2351_v16 }
 0x304   : > { %v3483_v62 = vsub.f32 3.1415927, %v3291_v1  ;;  %v7417_v51 = vmul.f32 %v5829_v5, %v1968_v31  ;;  %v4971_v36 = vadd.f32 -0.32762277, %v2620_v48  ;;  %vm3694_vm4 = vcmp.lt.f32.partialorder %v10933_v14, 0.0  ;;  %v1007_v14 = vld [vmem:[%s10613_s1 + $0x2d0] sm:$0xff] }
 0x305   : > { %v3022_v61 = vadd.f32 %v2926_v32, %v7333_v34  ;;  %v2333_v3 = vmul.f32 %v7415_v2, %v7415_v2  ;;  %v4990_v38 = vadd.f32 -0.32762277, %v2639_v4  ;;  %v1855_v5 = vmax.f32 %v7405_v26, %v7423_v9  ;;  %1618 = vmatmul.mubr.f32.gmra.mrb[142].mxu1 %v1007_v14 }
 0x306   : > { %v3579_v30 = vsel %vm3387_vm6, %v3483_v62, %v3291_v1  ;;  %v2352_v31 = vmul.f32 %v7417_v51, %v7417_v51  ;;  %v2812_v34 = vmul.f32 %v4971_v36, %v2332_v28  ;;  %v5831_v36 = vpop.eup %5830  ;;  %v10981_v0 = vmin.f32 %v7370_v41, %v7391_v45  ;;  %1623 = vmatprep.mubr.f32.mxu1 %v10875_v58  ;;  %v10998_v41 = vld [vmem:[#allocation9_spill] sm:$0xff] }
 0x307   : > { %v3771_v47 = vsub.f32 0.0, %v3579_v30  ;;  %v3214_v63 = vsub.f32 1.5707964, %v3022_v61  ;;  %v2429_v17 = vmul.f32 -0.046496473, %v2333_v3  ;;  %v2831_v15 = vmul.f32 %v4990_v38, %v2351_v16  ;;  %v10979_v38 = vld [vmem:[#allocation6_spill] sm:$0xff] }
 0x308   : > { %v2448_v54 = vmul.f32 -0.046496473, %v2352_v31  ;;  %v2908_v32 = vmul.f32 %v2812_v34, %v7367_v43  ;;  %v2047_v46 = vadd.f32 1e-12, %v1855_v5  ;;  %vm3677_vm1 = vcmp.lt.f32.partialorder %v10961_v29, 0.0 }
 0x309   : > { %v3867_v62 = vsel %vm3675_vm8, %v3771_v47, %v3579_v30  ;;  %v3310_v1 = vsel %vm3118_vm7, %v3214_v63, %v3022_v61  ;;  %v2525_v48 = vadd.f32 0.15931422, %v2429_v17  ;;  %v2927_v40 = vmul.f32 %v2831_v15, %v7377_v13 }
 0x30a   : > { %v4024_v28 = vmul.f32 %v6955_v44, %v3867_v62  ;;  %v3502_v16 = vsub.f32 3.1415927, %v3310_v1  ;;  %v2544_v4 = vadd.f32 0.15931422, %v2448_v54  ;;  %v3004_v21 = vadd.f32 %v2908_v32, %v7367_v43 }
 0x30b   : > { %v2621_v30 = vmul.f32 %v2525_v48, %v2333_v3  ;;  %v10978_v61 = vmin.f32 %v7355_v7, %v7362_v22  ;;  %v3023_v34 = vadd.f32 %v2927_v40, %v7377_v13  ;;  %vm3695_vm7 = vcmp.lt.f32.partialorder %v10947_v33, 0.0 }
 0x30c   : > { %v7452_v47 = vadd.f32 %v4024_v28, %v10979_v38  ;;  %v3598_v63 = vsel %vm3406_vm9, %v3502_v16, %v3310_v1  ;;  %v2640_v17 = vmul.f32 %v2544_v4, %v2352_v31  ;;  %v3196_v54 = vsub.f32 1.5707964, %v3004_v21  ;;  %v5833_v32 = vpop.eup %5832  ;;  %v10980_v4 = vld [vmem:[#allocation44_spill] sm:$0xff] }
 0x30d   : > { %v7449_v49 = vmul.f32 %v5831_v36, %v10978_v61  ;;  %v3790_v15 = vsub.f32 0.0, %v3598_v63  ;;  %v4972_v43 = vadd.f32 -0.32762277, %v2621_v30  ;;  %v3215_v48 = vsub.f32 1.5707964, %v3023_v34 }
 0x30e   : > { %v4991_v5 = vadd.f32 -0.32762277, %v2640_v17  ;;  %5834 = vrcp.f32 %v2047_v46  ;;  %v3292_v13 = vsel %vm3100_vm12, %v3196_v54, %v3004_v21  ;;  %v7473_v30 = vand.u32 2147483647, %v10980_v4 }
 0x30f   : > { %v2334_v62 = vmul.f32 %v7449_v49, %v7449_v49  ;;  %v7464_v52 = vsel %vm3694_vm4, %v3790_v15, %v3598_v63  ;;  %v2813_v1 = vmul.f32 %v4972_v43, %v2333_v3  ;;  %v3484_v28 = vsub.f32 3.1415927, %v3292_v13 }
 0x310   : > { %v3311_v16 = vsel %vm3119_vm13, %v3215_v48, %v3023_v34  ;;  %v2832_v40 = vmul.f32 %v4991_v5, %v2352_v31  ;;  %v7482_v3 = vmul.f32 %v5833_v32, %v10981_v0  ;;  %vm3389_vm12 = vcmp.lt.f32.partialorder %v10956_v55, 0.0  ;;  %v10982_v31 = vld [vmem:[#allocation45_spill] sm:$0xff]  ;;  %v7500_v32 = vpop.f32.mrb[38].mxu1 }
 0x311   : > { %v2430_v36 = vmul.f32 -0.046496473, %v2334_v62  ;;  %v3503_v61 = vsub.f32 3.1415927, %v3311_v16  ;;  %v2909_v46 = vmul.f32 %v2813_v1, %v7415_v2  ;;  %v3580_v20 = vsel %vm3388_vm11, %v3484_v28, %v3292_v13  ;;  %10983 = vst [vmem:[#allocation37_spill] sm:$0xff] %v7500_v32  ;;  %v1008_v48 = vld [vmem:[%s10613_s1 + $0x2d8] sm:$0xff] }
 0x312   : > { %v2928_v23 = vmul.f32 %v2832_v40, %v7417_v51  ;;  %v7489_v21 = vand.u32 2147483647, %v10982_v31  ;;  %v3772_v38 = vsub.f32 0.0, %v3580_v20  ;;  %v2353_v54 = vmul.f32 %v7482_v3, %v7482_v3  ;;  %v7509_v13 = vpop.f32.mrb[39].mxu1  ;;  %1624 = vmatmul.mubr.f32.gmra.mrb[144].mxu1 %v1008_v48 }
 0x313   : > { %v2526_v53 = vadd.f32 0.15931422, %v2430_v36  ;;  %v3599_v63 = vsel %vm3407_vm14, %v3503_v61, %v3311_v16  ;;  %v3005_v34 = vadd.f32 %v2909_v46, %v7415_v2  ;;  %10984 = vst [vmem:[#allocation38_spill] sm:$0xff] %v7509_v13  ;;  %1629 = vmatprep.mubr.f32.mxu1 %v10875_v58  ;;  %vm3408_vm13 = vcmp.lt.f32.partialorder %v10957_v8, 0.0  ;;  %v10985_v46 = vld [vmem:[#allocation7_spill] sm:$0xff]  ;;  %v1009_v8 = vld [vmem:[%s10613_s1 + $0x2e0] sm:$0xff] }
 0x314   : > { %v3791_v15 = vsub.f32 0.0, %v3599_v63  ;;  %v3024_v57 = vadd.f32 %v2928_v23, %v7417_v51  ;;  %v1874_v43 = vmax.f32 %v7473_v30, %v7489_v21  ;;  %v3868_v50 = vsel %vm3676_vm15, %v3772_v38, %v3580_v20  ;;  %v7527_v23 = vpop.f32.mrb[40].mxu1 }
 0x315   : > { %v2622_v17 = vmul.f32 %v2526_v53, %v2334_v62  ;;  %v3197_v2 = vsub.f32 1.5707964, %v3005_v34  ;;  %v1970_v51 = vmin.f32 %v7473_v30, %v7489_v21  ;;  %v4025_v1 = vmul.f32 %v6955_v44, %v3868_v50  ;;  %10987 = vst [vmem:[#allocation39_spill] sm:$0xff] %v7527_v23  ;;  %v7535_v27 = vpop.f32.mrb[41].mxu1 }
 0x316   : > { %v7514_v36 = vsel %vm3695_vm7, %v3791_v15, %v3599_v63  ;;  %v3216_v28 = vsub.f32 1.5707964, %v3024_v57  ;;  %v2449_v16 = vmul.f32 -0.046496473, %v2353_v54  ;;  %v2066_v14 = vadd.f32 1e-12, %v1874_v43  ;;  %1630 = vmatmul.mubr.f32.gmra.mrb[146].mxu1 %v1009_v8 }
 0x317   : > { %v4973_v5 = vadd.f32 -0.32762277, %v2622_v17  ;;  %v3293_v12 = vsel %vm3101_vm10, %v3197_v2, %v3005_v34  ;;  %v7522_v53 = vadd.f32 %v4025_v1, %v10985_v46  ;;  %10988 = vst [vmem:[#allocation41_spill] sm:$0xff] %v7535_v27  ;;  %vm3122_vm10 = vcmp.gt.f32.partialorder %v7489_v21, %v7473_v30  ;;  %v10989_v43 = vld [vmem:[#allocation46_spill] sm:$0xff]  ;;  %1635 = vmatprep.mubr.f32.mxu1 %v10875_v58  ;;  %v1011_v8 = vld [vmem:[%s10613_s1 + $0x2f0] sm:$0xff]  ;;  %v11023_v21 = vld [vmem:[#allocation57_spill] sm:$0xff] }
 0x318   : > { %v5835_v61 = vpop.eup %5834  ;;  %v3485_v0 = vsub.f32 3.1415927, %v3293_v12  ;;  %v3312_v33 = vsel %vm3120_vm2, %v3216_v28, %v3024_v57  ;;  %v2545_v20 = vadd.f32 0.15931422, %v2449_v16  ;;  %5836 = vrcp.f32 %v2066_v14  ;;  %v10991_v16 = vld [vmem:[#allocation47_spill] sm:$0xff] }
 0x319   : > { %v2814_v40 = vmul.f32 %v4973_v5, %v2334_v62  ;;  %10986 = vst [vmem:[#allocation5_spill] sm:$0xff] %v7522_v53  ;;  %v3504_v38 = vsub.f32 3.1415927, %v3312_v33  ;;  %v7533_v37 = vmul.f32 %v5835_v61, %v1951_v19  ;;  %v7548_v55 = vand.u32 2147483647, %v10989_v43 }
 0x31a   : > { %v3581_v62 = vsel %vm3389_vm12, %v3485_v0, %v3293_v12  ;;  %v2641_v39 = vmul.f32 %v2545_v20, %v2353_v54  ;;  %vm3696_vm2 = vcmp.lt.f32.partialorder %v10962_v25, 0.0  ;;  %v7558_v1 = vand.u32 2147483647, %v7044_v24  ;;  %v7574_v0 = vpop.f32.mrb[42].mxu1 }
 0x31b   : > { %v2910_v63 = vmul.f32 %v2814_v40, %v7449_v49  ;;  %v3773_v35 = vsub.f32 0.0, %v3581_v62  ;;  %v3600_v34 = vsel %vm3408_vm13, %v3504_v38, %v3312_v33  ;;  %v2335_v19 = vmul.f32 %v7533_v37, %v7533_v37  ;;  %v10992_v40 = vld [vmem:[#allocation8_spill] sm:$0xff]  ;;  %10994 = vst [vmem:[#allocation44_spill] sm:$0xff] %v7574_v0  ;;  %v7583_v20 = vpop.f32.mrb[43].mxu1  ;;  %v1010_v38 = vld [vmem:[%s10613_s1 + $0x2e8] sm:$0xff] }
 0x31c   : > { %v3792_v15 = vsub.f32 0.0, %v3600_v34  ;;  %v4992_v57 = vadd.f32 -0.32762277, %v2641_v39  ;;  %vm3390_vm6 = vcmp.lt.f32.partialorder %v10967_v6, 0.0  ;;  %v7565_v12 = vand.u32 2147483647, %v10991_v16  ;;  %1636 = vmatmul.mubr.f32.gmra.mrb[148].mxu1 %v1010_v38 }
 0x31d   : > { %v3006_v17 = vadd.f32 %v2910_v63, %v7449_v49  ;;  %v3869_v48 = vsel %vm3677_vm1, %v3773_v35, %v3581_v62  ;;  %v2431_v50 = vmul.f32 -0.046496473, %v2335_v19  ;;  %v1856_v46 = vmax.f32 %v7548_v55, %v7558_v1  ;;  %10995 = vst [vmem:[#allocation45_spill] sm:$0xff] %v7583_v20  ;;  %1641 = vmatprep.mubr.f32.mxu1 %v10875_v58  ;;  %v11000_v38 = vld [vmem:[#allocation42_spill] sm:$0xff] }
 0x31e   : > { %v4026_v2 = vmul.f32 %v6955_v44, %v3869_v48  ;;  %v7555_v49 = vsel %vm3696_vm2, %v3792_v15, %v3600_v34  ;;  %v2833_v5 = vmul.f32 %v4992_v57, %v2353_v54  ;;  %v1952_v22 = vmin.f32 %v7548_v55, %v7558_v1 }
 0x31f   : > { %v3198_v29 = vsub.f32 1.5707964, %v3006_v17  ;;  %10990 = vst [vmem:[#allocation40_spill] sm:$0xff] %v7555_v49  ;;  %v2527_v28 = vadd.f32 0.15931422, %v2431_v50  ;;  %vm3678_vm8 = vcmp.lt.f32.partialorder %v10970_v10, 0.0 }
 0x320   : > { %v7569_v14 = vadd.f32 %v4026_v2, %v10992_v40  ;;  %v2929_v61 = vmul.f32 %v2833_v5, %v7482_v3  ;;  %v7581_v7 = vand.u32 2147483647, %v7046_v18  ;;  %v2048_v39 = vadd.f32 1e-12, %v1856_v46  ;;  %v7604_v50 = vpop.f32.mrb[44].mxu1  ;;  %1642 = vmatmul.mubr.f32.gmra.mrb[150].mxu1 %v1011_v8 }
 0x321   : > { %v3294_v25 = vsel %vm3102_vm3, %v3198_v29, %v3006_v17  ;;  %v2623_v33 = vmul.f32 %v2527_v28, %v2335_v19  ;;  %vm3104_vm3 = vcmp.gt.f32.partialorder %v7558_v1, %v7548_v55  ;;  %10996 = vst [vmem:[#allocation7_spill] sm:$0xff] %v7604_v50  ;;  %1647 = vmatprep.mubr.f32.mxu1 %v10875_v58  ;;  %v7630_v46 = vand.u32 2147483647, %v7075_v60 }
 0x322   : > { %10993 = vst [vmem:[#allocation6_spill] sm:$0xff] %v7569_v14  ;;  %v3486_v54 = vsub.f32 3.1415927, %v3294_v25  ;;  %v3025_v62 = vadd.f32 %v2929_v61, %v7482_v3  ;;  %v5837_v35 = vpop.eup %5836  ;;  %v1875_v15 = vmax.f32 %v7565_v12, %v7581_v7  ;;  %5838 = vrcp.f32 %v2048_v39  ;;  %v11025_v14 = vld [vmem:[#allocation59_spill] sm:$0xff] }
 0x323   : > { %v4974_v17 = vadd.f32 -0.32762277, %v2623_v33  ;;  %v7600_v10 = vmul.f32 %v5837_v35, %v1970_v51  ;;  %vm3123_vm9 = vcmp.gt.f32.partialorder %v7581_v7, %v7565_v12  ;;  %vm3697_vm4 = vcmp.lt.f32.partialorder %v11000_v38, 0.0 }
 0x324   : > { %v3582_v63 = vsel %vm3390_vm6, %v3486_v54, %v3294_v25  ;;  %v3217_v48 = vsub.f32 1.5707964, %v3025_v62  ;;  %v2067_v29 = vadd.f32 1e-12, %v1875_v15  ;;  %v7616_v25 = vand.u32 2147483647, %v7064_v11 }
 0x325   : > { %v3774_v34 = vsub.f32 0.0, %v3582_v63  ;;  %v2815_v3 = vmul.f32 %v4974_v17, %v2335_v19  ;;  %v2354_v5 = vmul.f32 %v7600_v10, %v7600_v10  ;;  %v7618_v19 = vpop.f32.mrb[45].mxu1  ;;  %v7622_v54 = vand.u32 2147483647, %v7066_v42 }
 0x326   : > { %v3313_v51 = vsel %vm3121_vm5, %v3217_v48, %v3025_v62  ;;  %10997 = vst [vmem:[#allocation46_spill] sm:$0xff] %v7618_v19  ;;  %5840 = vrcp.f32 %v2067_v29  ;;  %vm3409_vm5 = vcmp.lt.f32.partialorder %v10972_v59, 0.0  ;;  %v11001_v62 = vld [vmem:[#allocation48_spill] sm:$0xff]  ;;  %v7637_v35 = vpop.f32.mrb[46].mxu1  ;;  %v1012_v59 = vld [vmem:[%s10613_s1 + $0x2f8] sm:$0xff]  ;;  %v1857_v15 = vmax.f32 %v7616_v25, %v7630_v46 }
 0x327   : > { %v3870_v6 = vsel %vm3678_vm8, %v3774_v34, %v3582_v63  ;;  %v3505_v28 = vsub.f32 3.1415927, %v3313_v51  ;;  %v2911_v40 = vmul.f32 %v2815_v3, %v7533_v37  ;;  %v2450_v61 = vmul.f32 -0.046496473, %v2354_v5  ;;  %11002 = vst [vmem:[#allocation8_spill] sm:$0xff] %v7637_v35  ;;  %1648 = vmatmul.mubr.f32.gmra.mrb[152].mxu1 %v1012_v59 }
 0x328   : > { %v4027_v2 = vmul.f32 %v6955_v44, %v3870_v6  ;;  %v7635_v39 = vand.u32 2147483647, %v11001_v62  ;;  %v7646_v6 = vpop.f32.mrb[47].mxu1  ;;  %vm3105_vm11 = vcmp.gt.f32.partialorder %v7630_v46, %v7616_v25  ;;  %vm3679_vm7 = vcmp.lt.f32.partialorder %v7011_v56, 0.0 }
 0x329   : > { %v3601_v33 = vsel %vm3409_vm5, %v3505_v28, %v3313_v51  ;;  %v3007_v63 = vadd.f32 %v2911_v40, %v7533_v37  ;;  %v2546_v17 = vadd.f32 0.15931422, %v2450_v61  ;;  %11003 = vst [vmem:[#allocation9_spill] sm:$0xff] %v7646_v6  ;;  %v2049_v51 = vadd.f32 1e-12, %v1857_v15  ;;  %v11005_v28 = vld [vmem:[#allocation43_spill] sm:$0xff] }
 0x32a   : > { %v7627_v45 = vadd.f32 %v4027_v2, %v10998_v41  ;;  %v3793_v34 = vsub.f32 0.0, %v3601_v33  ;;  %v1876_v3 = vmax.f32 %v7622_v54, %v7635_v39  ;;  %vm3124_vm14 = vcmp.gt.f32.partialorder %v7635_v39, %v7622_v54  ;;  %v7662_v61 = vpop.f32.mrb[48].mxu1  ;;  %v11008_v15 = vld [vmem:[#allocation51_spill] sm:$0xff] }
 0x32b   : > { %v3199_v37 = vsub.f32 1.5707964, %v3007_v63  ;;  %v2642_v2 = vmul.f32 %v2546_v17, %v2354_v5  ;;  %vm3391_vm15 = vcmp.lt.f32.partialorder %v11005_v28, 0.0  ;;  %11006 = vst [vmem:[#allocation48_spill] sm:$0xff] %v7662_v61  ;;  %5842 = vrcp.f32 %v2049_v51  ;;  %v7675_v26 = vpop.f32.mrb[49].mxu1  ;;  %v11011_v51 = vld [vmem:[#allocation2_spill] sm:$0xff] }
 0x32c   : > { %10999 = vst [vmem:[#allocation47_spill] sm:$0xff] %v7627_v45  ;;  %v7654_v8 = vsel %vm3697_vm4, %v3793_v34, %v3601_v33  ;;  %v2068_v41 = vadd.f32 1e-12, %v1876_v3  ;;  %v5839_v38 = vpop.eup %5838  ;;  %v11007_v33 = vld [vmem:[#allocation50_spill] sm:$0xff]  ;;  %v7673_v28 = vand.u32 2147483647, %v11008_v15  ;;  %v11014_v56 = vmin.f32 %v7565_v12, %v7581_v7 }
 0x32d   : > { %11004 = vst [vmem:[#allocation42_spill] sm:$0xff] %v7654_v8  ;;  %v3295_v40 = vsel %vm3103_vm0, %v3199_v37, %v3007_v63  ;;  %v4993_v48 = vadd.f32 -0.32762277, %v2642_v2  ;;  %v7665_v34 = vand.u32 2147483647, %v11007_v33  ;;  %v7670_v17 = vmul.f32 %v5839_v38, %v1952_v22  ;;  %11009 = vst [vmem:[#allocation43_spill] sm:$0xff] %v7675_v26 }
 0x32e   : > { %v3487_v59 = vsub.f32 3.1415927, %v3295_v40  ;;  %5844 = vrcp.f32 %v2068_v41  ;;  %v11010_v37 = vld [vmem:[#allocation53_spill] sm:$0xff]  ;;  %v4053_v29 = vsub.s32 3, %v11011_v51  ;;  %v11012_v41 = vld [vmem:[#allocation54_spill] sm:$0xff]  ;;  %v7687_v58 = vpop.f32.mrb[50].mxu1 }
 0x32f   : > { %v2834_v63 = vmul.f32 %v4993_v48, %v2354_v5  ;;  %v7679_v3 = vand.u32 2147483647, %v11010_v37  ;;  %v2336_v22 = vmul.f32 %v7670_v17, %v7670_v17  ;;  %v7685_v38 = vand.u32 2147483647, %v11012_v41  ;;  %11013 = vst [vmem:[#allocation50_spill] sm:$0xff] %v7687_v58  ;;  %v7699_v26 = vpop.f32.mrb[51].mxu1 }
 0x330   : > { %v3583_v9 = vsel %vm3391_vm15, %v3487_v59, %v3295_v40  ;;  %v5841_v2 = vpop.eup %5840  ;;  %11015 = vst [vmem:[#allocation51_spill] sm:$0xff] %v7699_v26  ;;  %vm3410_vm13 = vcmp.lt.f32.partialorder %v10980_v4, 0.0  ;;  %vm3698_vm1 = vcmp.lt.f32.partialorder %v10982_v31, 0.0  ;;  %v11022_v4 = vmin.f32 %v7622_v54, %v7635_v39  ;;  %v11034_v39 = vld [vmem:[#allocation29_spill] sm:$0xff] }
 0x331   : > { %v3775_v57 = vsub.f32 0.0, %v3583_v9  ;;  %v2930_v40 = vmul.f32 %v2834_v63, %v7600_v10  ;;  %v7693_v5 = vmul.f32 %v5841_v2, %v11014_v56  ;;  %v1858_v48 = vmax.f32 %v7665_v34, %v7679_v3 }
 0x332   : > { %v2432_v6 = vmul.f32 -0.046496473, %v2336_v22  ;;  %vm3106_vm0 = vcmp.gt.f32.partialorder %v7679_v3, %v7665_v34  ;;  %v1877_v63 = vmax.f32 %v7673_v28, %v7685_v38  ;;  %v1973_v59 = vmin.f32 %v7673_v28, %v7685_v38 }
 0x333   : > { %v3871_v61 = vsel %vm3679_vm7, %v3775_v57, %v3583_v9  ;;  %v3026_v2 = vadd.f32 %v2930_v40, %v7600_v10  ;;  %v2355_v56 = vmul.f32 %v7693_v5, %v7693_v5  ;;  %v2050_v35 = vadd.f32 1e-12, %v1858_v48  ;;  %v11016_v9 = vld [vmem:[#allocation10_spill] sm:$0xff] }
 0x334   : > { %v4028_v58 = vmul.f32 %v6955_v44, %v3871_v61  ;;  %v2528_v19 = vadd.f32 0.15931422, %v2432_v6  ;;  %v2069_v57 = vadd.f32 1e-12, %v1877_v63  ;;  %vm3125_vm12 = vcmp.gt.f32.partialorder %v7685_v38, %v7673_v28  ;;  %v7716_v61 = vpop.f32.mrb[52].mxu1  ;;  %v7721_v10 = vld [vmem:[%s10614_s2] sm:$0xff] }
 0x335   : > { %v3218_v50 = vsub.f32 1.5707964, %v3026_v2  ;;  %v2451_v45 = vmul.f32 -0.046496473, %v2355_v56  ;;  %5846 = vrcp.f32 %v2050_v35  ;;  %11018 = vst [vmem:[#allocation54_spill] sm:$0xff] %v7716_v61  ;;  %v7724_v6 = vrot.slane %v7721_v10, %v4053_v29  ;;  %v7726_v48 = vpop.f32.mrb[53].mxu1  ;;  %v5843_v63 = vpop.eup %5842 }
 0x336   : > { %v7714_v26 = vadd.f32 %v4028_v58, %v11016_v9  ;;  %v2624_v40 = vmul.f32 %v2528_v19, %v2336_v22  ;;  %5848 = vrcp.f32 %v2069_v57  ;;  %11019 = vst [vmem:[#allocation10_spill] sm:$0xff] %v7726_v48  ;;  %v11020_v9 = vld [vmem:[#allocation56_spill] sm:$0xff]  ;;  %v11021_v19 = vmin.f32 %v7616_v25, %v7630_v46 }
 0x337   : > { %v3314_v58 = vsel %vm3122_vm10, %v3218_v50, %v3026_v2  ;;  %v2547_v35 = vadd.f32 0.15931422, %v2451_v45  ;;  %v7733_v61 = vand.u32 2147483647, %v11020_v9  ;;  %v7747_v50 = vand.u32 2147483647, %v11023_v21 }
 0x338   : > { %11017 = vst [vmem:[#allocation53_spill] sm:$0xff] %v7714_v26  ;;  %v5845_v26 = vpop.eup %5844  ;;  %v3506_v20 = vsub.f32 3.1415927, %v3314_v58  ;;  %v4975_v29 = vadd.f32 -0.32762277, %v2624_v40  ;;  %v7739_v57 = vmul.f32 %v5843_v63, %v11021_v19  ;;  %v11024_v45 = vld [vmem:[#allocation58_spill] sm:$0xff] }
 0x339   : > { %v2643_v48 = vmul.f32 %v2547_v35, %v2355_v56  ;;  %v7744_v30 = vmul.f32 %v5845_v26, %v11022_v4  ;;  %v7750_v2 = vand.u32 2147483647, %v11024_v45  ;;  %v7755_v63 = vand.u32 2147483647, %v11025_v14 }
 0x33a   : > { %v3602_v8 = vsel %vm3410_vm13, %v3506_v20, %v3314_v58  ;;  %v2816_v0 = vmul.f32 %v4975_v29, %v2336_v22  ;;  %v2337_v40 = vmul.f32 %v7739_v57, %v7739_v57  ;;  %vm3392_vm2 = vcmp.lt.f32.partialorder %v10989_v43, 0.0 }
 0x33b   : > { %v3794_v35 = vsub.f32 0.0, %v3602_v8  ;;  %v4994_v19 = vadd.f32 -0.32762277, %v2643_v48  ;;  %v2356_v26 = vmul.f32 %v7744_v30, %v7744_v30  ;;  %v1859_v4 = vmax.f32 %v7733_v61, %v7750_v2 }
 0x33c   : > { %v2912_v27 = vmul.f32 %v2816_v0, %v7670_v17  ;;  %v2433_v49 = vmul.f32 -0.046496473, %v2337_v40  ;;  %vm3107_vm10 = vcmp.gt.f32.partialorder %v7750_v2, %v7733_v61  ;;  %v1878_v0 = vmax.f32 %v7747_v50, %v7755_v63 }
 0x33d   : > { %v7768_v22 = vsel %vm3698_vm1, %v3794_v35, %v3602_v8  ;;  %v2835_v48 = vmul.f32 %v4994_v19, %v2355_v56  ;;  %v2452_v58 = vmul.f32 -0.046496473, %v2356_v26  ;;  %v2051_v29 = vadd.f32 1e-12, %v1859_v4  ;;  %v7783_v19 = vpop.f32.mrb[54].mxu1 }
 0x33e   : > { %11026 = vst [vmem:[#allocation56_spill] sm:$0xff] %v7768_v22  ;;  %v3008_v23 = vadd.f32 %v2912_v27, %v7670_v17  ;;  %v2529_v53 = vadd.f32 0.15931422, %v2433_v49  ;;  %vm3411_vm6 = vcmp.lt.f32.partialorder %v10991_v16, 0.0  ;;  %v1974_v31 = vmin.f32 %v7747_v50, %v7755_v63  ;;  %11028 = vst [vmem:[#allocation57_spill] sm:$0xff] %v7783_v19  ;;  %v11031_v16 = vld [vmem:[#allocation11_spill] sm:$0xff] }
 0x33f   : > { %v5847_v13 = vpop.eup %5846  ;;  %v2931_v20 = vmul.f32 %v2835_v48, %v7693_v5  ;;  %v2548_v32 = vadd.f32 0.15931422, %v2452_v58  ;;  %5850 = vrcp.f32 %v2051_v29  ;;  %v11027_v27 = vmin.f32 %v7665_v34, %v7679_v3  ;;  %v7790_v58 = vpop.f32.mrb[55].mxu1 }
 0x340   : > { %v5849_v8 = vpop.eup %5848  ;;  %v3200_v56 = vsub.f32 1.5707964, %v3008_v23  ;;  %v2625_v35 = vmul.f32 %v2529_v53, %v2337_v40  ;;  %v2070_v17 = vadd.f32 1e-12, %v1878_v0  ;;  %vm3126_vm8 = vcmp.gt.f32.partialorder %v7755_v63, %v7747_v50  ;;  %11029 = vst [vmem:[#allocation58_spill] sm:$0xff] %v7790_v58 }
 0x341   : > { %v7781_v49 = vmul.f32 %v5847_v13, %v11027_v27  ;;  %v3027_v4 = vadd.f32 %v2931_v20, %v7693_v5  ;;  %v2644_v22 = vmul.f32 %v2548_v32, %v2356_v26  ;;  %v7786_v48 = vmul.f32 %v5849_v8, %v1973_v59 }
 0x342   : > { %v3296_v53 = vsel %vm3104_vm3, %v3200_v56, %v3008_v23  ;;  %v4976_v29 = vadd.f32 -0.32762277, %v2625_v35  ;;  %5852 = vrcp.f32 %v2070_v17  ;;  %vm3680_vm5 = vcmp.lt.f32.partialorder %v7044_v24, 0.0 }
 0x343   : > { %v2338_v13 = vmul.f32 %v7781_v49, %v7781_v49  ;;  %v3488_v0 = vsub.f32 3.1415927, %v3296_v53  ;;  %v3219_v27 = vsub.f32 1.5707964, %v3027_v4  ;;  %v4995_v5 = vadd.f32 -0.32762277, %v2644_v22 }
 0x344   : > { %v2357_v32 = vmul.f32 %v7786_v48, %v7786_v48  ;;  %vm3699_vm4 = vcmp.lt.f32.partialorder %v7046_v18, 0.0  ;;  %v2817_v59 = vmul.f32 %v4976_v29, %v2337_v40  ;;  %vm3393_vm3 = vcmp.lt.f32.partialorder %v7064_v11, 0.0 }
 0x345   : > { %v2434_v20 = vmul.f32 -0.046496473, %v2338_v13  ;;  %v3584_v23 = vsel %vm3392_vm2, %v3488_v0, %v3296_v53  ;;  %v3315_v55 = vsel %vm3123_vm9, %v3219_v27, %v3027_v4  ;;  %v2836_v1 = vmul.f32 %v4995_v5, %v2356_v26 }
 0x346   : > { %v2453_v8 = vmul.f32 -0.046496473, %v2357_v32  ;;  %v3776_v56 = vsub.f32 0.0, %v3584_v23  ;;  %v3507_v22 = vsub.f32 3.1415927, %v3315_v55  ;;  %v2913_v35 = vmul.f32 %v2817_v59, %v7739_v57 }
 0x347   : > { %v2530_v17 = vadd.f32 0.15931422, %v2434_v20  ;;  %vm3412_vm15 = vcmp.lt.f32.partialorder %v7066_v42, 0.0  ;;  %v2932_v40 = vmul.f32 %v2836_v1, %v7744_v30  ;;  %vm3681_vm9 = vcmp.lt.f32.partialorder %v7075_v60, 0.0 }
 0x348   : > { %v2549_v29 = vadd.f32 0.15931422, %v2453_v8  ;;  %v3872_v43 = vsel %vm3680_vm5, %v3776_v56, %v3584_v23  ;;  %v3603_v12 = vsel %vm3411_vm6, %v3507_v22, %v3315_v55  ;;  %v3009_v7 = vadd.f32 %v2913_v35, %v7739_v57 }
 0x349   : > { %v2626_v26 = vmul.f32 %v2530_v17, %v2338_v13  ;;  %v5851_v4 = vpop.eup %5850  ;;  %v4029_v53 = vmul.f32 %v6955_v44, %v3872_v43  ;;  %v3795_v0 = vsub.f32 0.0, %v3603_v12  ;;  %v3028_v27 = vadd.f32 %v2932_v40, %v7744_v30 }
 0x34a   : > { %v2645_v5 = vmul.f32 %v2549_v29, %v2357_v32  ;;  %v3201_v59 = vsub.f32 1.5707964, %v3009_v7  ;;  %v11030_v24 = vmin.f32 %v7733_v61, %v7750_v2  ;;  %vm3700_vm7 = vcmp.lt.f32.partialorder %v11001_v62, 0.0  ;;  %v11042_v62 = vld [vmem:[#allocation12_spill] sm:$0xff] }
 0x34b   : > { %v4977_v20 = vadd.f32 -0.32762277, %v2626_v26  ;;  %v7824_v55 = vadd.f32 %v4029_v53, %v11031_v16  ;;  %v7828_v57 = vsel %vm3699_vm4, %v3795_v0, %v3603_v12  ;;  %v3220_v1 = vsub.f32 1.5707964, %v3028_v27 }
 0x34c   : > { %v7821_v23 = vmul.f32 %v5851_v4, %v11030_v24  ;;  %11033 = vst [vmem:[#allocation11_spill] sm:$0xff] %v7828_v57  ;;  %v4996_v8 = vadd.f32 -0.32762277, %v2645_v5  ;;  %v5853_v30 = vpop.eup %5852  ;;  %v3297_v56 = vsel %vm3105_vm11, %v3201_v59, %v3009_v7  ;;  %vm3394_vm13 = vcmp.lt.f32.partialorder %v11007_v33, 0.0  ;;  %v11037_v59 = vld [vmem:[#allocation27_spill] sm:$0xff] }
 0x34d   : > { %11032 = vst [vmem:[#allocation59_spill] sm:$0xff] %v7824_v55  ;;  %v2818_v22 = vmul.f32 %v4977_v20, %v2338_v13  ;;  %v3489_v17 = vsub.f32 3.1415927, %v3297_v56  ;;  %v3316_v18 = vsel %vm3124_vm14, %v3220_v1, %v3028_v27  ;;  %v7839_v29 = vmul.f32 %v5853_v30, %v1974_v31  ;;  %v7852_v31 = vpop.f32.mrb[56].mxu1 }
 0x34e   : > { %v2339_v35 = vmul.f32 %v7821_v23, %v7821_v23  ;;  %v2837_v40 = vmul.f32 %v4996_v8, %v2357_v32  ;;  %v3508_v43 = vsub.f32 3.1415927, %v3316_v18  ;;  %vm3413_vm11 = vcmp.lt.f32.partialorder %v11008_v15, 0.0  ;;  %11035 = vst [vmem:[#allocation29_spill] sm:$0xff] %v7852_v31  ;;  %v7857_v53 = vpop.f32.mrb[57].mxu1  ;;  %v11078_v31 = vld [vmem:[#allocation33_spill] sm:$0xff] }
 0x34f   : > { %v2914_v25 = vmul.f32 %v2818_v22, %v7781_v49  ;;  %v3585_v13 = vsel %vm3393_vm3, %v3489_v17, %v3297_v56  ;;  %v2358_v54 = vmul.f32 %v7839_v29, %v7839_v29  ;;  %v7850_v32 = vand.u32 2147483647, %v11034_v39  ;;  %11036 = vst [vmem:[#allocation65_spill] sm:$0xff] %v7857_v53  ;;  %v11040_v22 = vld [vmem:[#allocation17_spill] sm:$0xff] }
 0x350   : > { %v2435_v46 = vmul.f32 -0.046496473, %v2339_v35  ;;  %v2933_v12 = vmul.f32 %v2837_v40, %v7786_v48  ;;  %v3777_v7 = vsub.f32 0.0, %v3585_v13  ;;  %v3604_v26 = vsel %vm3412_vm15, %v3508_v43, %v3316_v18 }
 0x351   : > { %v3010_v4 = vadd.f32 %v2914_v25, %v7781_v49  ;;  %v3796_v0 = vsub.f32 0.0, %v3604_v26  ;;  %v2454_v5 = vmul.f32 -0.046496473, %v2358_v54  ;;  %v7861_v20 = vand.u32 2147483647, %v11037_v59 }
 0x352   : > { %v2531_v11 = vadd.f32 0.15931422, %v2435_v46  ;;  %v3029_v27 = vadd.f32 %v2933_v12, %v7786_v48  ;;  %v3873_v24 = vsel %vm3681_vm9, %v3777_v7, %v3585_v13  ;;  %vm3682_vm14 = vcmp.lt.f32.partialorder %v11010_v37, 0.0  ;;  %v7871_v48 = vpop.f32.mrb[58].mxu1  ;;  %v11047_v37 = vld [vmem:[#allocation3_spill] sm:$0xff] }
 0x353   : > { %v3202_v16 = vsub.f32 1.5707964, %v3010_v4  ;;  %v4030_v1 = vmul.f32 %v6955_v44, %v3873_v24  ;;  %v7869_v49 = vsel %vm3700_vm7, %v3796_v0, %v3604_v26  ;;  %v2550_v30 = vadd.f32 0.15931422, %v2454_v5  ;;  %11039 = vst [vmem:[#allocation66_spill] sm:$0xff] %v7871_v48  ;;  %v7881_v40 = vpop.f32.mrb[59].mxu1 }
 0x354   : > { %v2627_v42 = vmul.f32 %v2531_v11, %v2339_v35  ;;  %11038 = vst [vmem:[#allocation27_spill] sm:$0xff] %v7869_v49  ;;  %v3221_v8 = vsub.f32 1.5707964, %v3029_v27  ;;  %v7877_v17 = vand.u32 2147483647, %v11040_v22  ;;  %v1860_v18 = vmax.f32 %v7850_v32, %v7861_v20  ;;  %11041 = vst [vmem:[#allocation17_spill] sm:$0xff] %v7881_v40 }
 0x355   : > { %v3298_v56 = vsel %vm3106_vm0, %v3202_v16, %v3010_v4  ;;  %v7884_v43 = vadd.f32 %v4030_v1, %v11042_v62  ;;  %v2646_v13 = vmul.f32 %v2550_v30, %v2358_v54  ;;  %v1956_v12 = vmin.f32 %v7850_v32, %v7861_v20  ;;  %v11044_v11 = vld [vmem:[#allocation21_spill] sm:$0xff]  ;;  %v11069_v24 = vld [vmem:[#allocation30_spill] sm:$0xff]  ;;  %v11075_v40 = vld [vmem:[#allocation20_spill] sm:$0xff] }
 0x356   : > { %v4978_v60 = vadd.f32 -0.32762277, %v2627_v42  ;;  %v3490_v25 = vsub.f32 3.1415927, %v3298_v56  ;;  %v3317_v46 = vsel %vm3125_vm12, %v3221_v8, %v3029_v27  ;;  %v2052_v7 = vadd.f32 1e-12, %v1860_v18 }
 0x357   : > { %11043 = vst [vmem:[#allocation12_spill] sm:$0xff] %v7884_v43  ;;  %v3509_v34 = vsub.f32 3.1415927, %v3317_v46  ;;  %v4997_v4 = vadd.f32 -0.32762277, %v2646_v13  ;;  %vm3108_vm0 = vcmp.gt.f32.partialorder %v7861_v20, %v7850_v32  ;;  %vm3701_vm12 = vcmp.lt.f32.partialorder %v11012_v41, 0.0 }
 0x358   : > { %v2819_v3 = vmul.f32 %v4978_v60, %v2339_v35  ;;  %v3586_v26 = vsel %vm3394_vm13, %v3490_v25, %v3298_v56  ;;  %v7896_v0 = vand.u32 2147483647, %v11044_v11  ;;  %5854 = vrcp.f32 %v2052_v7  ;;  %v11046_v30 = vld [vmem:[#allocation49_spill] sm:$0xff]  ;;  %v7927_v13 = vpop.f32.mrb[60].mxu1  ;;  %v11076_v48 = vld [vmem:[#allocation24_spill] sm:$0xff] }
 0x359   : > { %v3778_v5 = vsub.f32 0.0, %v3586_v26  ;;  %v3605_v28 = vsel %vm3413_vm11, %v3509_v34, %v3317_v46  ;;  %v2838_v27 = vmul.f32 %v4997_v4, %v2358_v54  ;;  %v4058_v56 = vmul.f32 %v7724_v6, %v11046_v30  ;;  %v11048_v41 = vld [vmem:[#allocation13_spill] sm:$0xff]  ;;  %11051 = vst [vmem:[#allocation3_spill] sm:$0xff] %v7927_v13 }
 0x35a   : > { %v2915_v38 = vmul.f32 %v2819_v3, %v7821_v23  ;;  %v3797_v35 = vsub.f32 0.0, %v3605_v28  ;;  %v1879_v33 = vmax.f32 %v7877_v17, %v7896_v0  ;;  %vm3127_vm1 = vcmp.gt.f32.partialorder %v7896_v0, %v7877_v17  ;;  %v11050_v25 = vld [vmem:[#allocation61_spill] sm:$0xff]  ;;  %v11052_v3 = vld [vmem:[#allocation19_spill] sm:$0xff] }
 0x35b   : > { %v3874_v16 = vsel %vm3682_vm14, %v3778_v5, %v3586_v26  ;;  %v2934_v54 = vmul.f32 %v2838_v27, %v7839_v29  ;;  %v7918_v18 = vand.u32 2147483647, %v11047_v37  ;;  %v7925_v46 = vand.u32 2147483647, %v11050_v25  ;;  %v7936_v26 = vpop.f32.mrb[61].mxu1 }
 0x35c   : > { %v3011_v42 = vadd.f32 %v2915_v38, %v7821_v23  ;;  %v4031_v15 = vmul.f32 %v6955_v44, %v3874_v16  ;;  %v7912_v1 = vsel %vm3701_vm12, %v3797_v35, %v3605_v28  ;;  %v2071_v8 = vadd.f32 1e-12, %v1879_v33  ;;  %11053 = vst [vmem:[#allocation13_spill] sm:$0xff] %v7936_v26  ;;  %v11055_v38 = vld [vmem:[#allocation31_spill] sm:$0xff] }
 0x35d   : > { %11045 = vst [vmem:[#allocation21_spill] sm:$0xff] %v7912_v1  ;;  %v3030_v23 = vadd.f32 %v2934_v54, %v7839_v29  ;;  %vm3395_vm2 = vcmp.lt.f32.partialorder %v11020_v9, 0.0  ;;  %v7934_v7 = vand.u32 2147483647, %v11052_v3  ;;  %v11054_v29 = vld [vmem:[#allocation28_spill] sm:$0xff]  ;;  %v7942_v35 = vadd.f32 %v4058_v56, %v11055_v38 }
 0x35e   : > { %v3203_v60 = vsub.f32 1.5707964, %v3011_v42  ;;  %v7921_v62 = vadd.f32 %v4031_v15, %v11048_v41  ;;  %5856 = vrcp.f32 %v2071_v8  ;;  %v7939_v28 = vand.u32 2147483647, %v11054_v29 }
 0x35f   : > { %v3222_v5 = vsub.f32 1.5707964, %v3030_v23  ;;  %11056 = vst [vmem:[#allocation61_spill] sm:$0xff] %v7942_v35  ;;  %vm3683_vm6 = vcmp.lt.f32.partialorder %v11024_v45, 0.0  ;;  %v1861_v9 = vmax.f32 %v7918_v18, %v7934_v7  ;;  %vm3414_vm4 = vcmp.lt.f32.partialorder %v11023_v21, 0.0  ;;  %v11063_v45 = vld [vmem:[#allocation64_spill] sm:$0xff] }
 0x360   : > { %11049 = vst [vmem:[#allocation49_spill] sm:$0xff] %v7921_v62  ;;  %v3299_v34 = vsel %vm3107_vm10, %v3203_v60, %v3011_v42  ;;  %vm3109_vm10 = vcmp.gt.f32.partialorder %v7934_v7, %v7918_v18  ;;  %v1880_v33 = vmax.f32 %v7925_v46, %v7939_v28  ;;  %v7958_v42 = vpop.f32.mrb[62].mxu1  ;;  %vm3128_vm5 = vcmp.gt.f32.partialorder %v7939_v28, %v7925_v46  ;;  %v11059_v60 = vld [vmem:[#allocation18_spill] sm:$0xff] }
 0x361   : > { %v3491_v4 = vsub.f32 3.1415927, %v3299_v34  ;;  %v3318_v27 = vsel %vm3126_vm8, %v3222_v5, %v3030_v23  ;;  %11057 = vst [vmem:[#allocation19_spill] sm:$0xff] %v7958_v42  ;;  %v2053_v30 = vadd.f32 1e-12, %v1861_v9  ;;  %v7962_v56 = vpop.f32.mrb[63].mxu1 }
 0x362   : > { %v5855_v15 = vpop.eup %5854  ;;  %v3510_v8 = vsub.f32 3.1415927, %v3318_v27  ;;  %11058 = vst [vmem:[#allocation28_spill] sm:$0xff] %v7962_v56  ;;  %v2072_v63 = vadd.f32 1e-12, %v1880_v33  ;;  %vm3702_vm8 = vcmp.lt.f32.partialorder %v11025_v14, 0.0  ;;  %v7998_v14 = vmul.f32 %v7724_v6, %v11069_v24 }
 0x363   : > { %v3587_v2 = vsel %vm3395_vm2, %v3491_v4, %v3299_v34  ;;  %v7965_v50 = vmul.f32 %v5855_v15, %v1956_v12  ;;  %v7968_v41 = vand.u32 2147483647, %v11059_v60  ;;  %5858 = vrcp.f32 %v2053_v30  ;;  %v11060_v4 = vld [vmem:[#allocation62_spill] sm:$0xff]  ;;  %v7978_v12 = vpop.f32.mrb[64].mxu1  ;;  %v11062_v33 = vld [vmem:[#allocation63_spill] sm:$0xff]  ;;  %v11074_v42 = vld [vmem:[#allocation4_spill] sm:$0xff] }
 0x364   : > { %v3779_v54 = vsub.f32 0.0, %v3587_v2  ;;  %v3606_v34 = vsel %vm3414_vm4, %v3510_v8, %v3318_v27  ;;  %v7973_v5 = vand.u32 2147483647, %v11060_v4  ;;  %5860 = vrcp.f32 %v2072_v63  ;;  %11061 = vst [vmem:[#allocation31_spill] sm:$0xff] %v7978_v12  ;;  %v11065_v30 = vld [vmem:[#allocation14_spill] sm:$0xff]  ;;  %v7994_v61 = vpop.f32.mrb[65].mxu1 }
 0x365   : > { %v3798_v9 = vsub.f32 0.0, %v3606_v34  ;;  %v2340_v21 = vmul.f32 %v7965_v50, %v7965_v50  ;;  %v7982_v15 = vand.u32 2147483647, %v11062_v33  ;;  %11068 = vst [vmem:[#allocation63_spill] sm:$0xff] %v7994_v61  ;;  %v11070_v12 = vmin.f32 %v7877_v17, %v7896_v0 }
 0x366   : > { %v3875_v23 = vsel %vm3683_vm6, %v3779_v54, %v3587_v2  ;;  %v7985_v2 = vand.u32 2147483647, %v11063_v45  ;;  %v11064_v54 = vld [vmem:[#allocation55_spill] sm:$0xff]  ;;  %v8028_v26 = vmul.f32 %v7724_v6, %v11074_v42  ;;  %v8038_v58 = vand.u32 2147483647, %v11078_v31 }
 0x367   : > { %v4032_v38 = vmul.f32 %v6955_v44, %v3875_v23  ;;  %v4059_v8 = vmul.f32 %v7724_v6, %v11064_v54  ;;  %v7992_v16 = vsel %vm3702_vm8, %v3798_v9, %v3606_v34  ;;  %v2436_v63 = vmul.f32 -0.046496473, %v2340_v21 }
 0x368   : > { %v5857_v27 = vpop.eup %5856  ;;  %11067 = vst [vmem:[#allocation62_spill] sm:$0xff] %v7992_v16  ;;  %v1862_v54 = vmax.f32 %v7968_v41, %v7982_v15  ;;  %vm3110_vm3 = vcmp.gt.f32.partialorder %v7982_v15, %v7968_v41  ;;  %v1881_v9 = vmax.f32 %v7973_v5, %v7985_v2  ;;  %vm3129_vm15 = vcmp.gt.f32.partialorder %v7985_v2, %v7973_v5 }
 0x369   : > { %v7990_v23 = vadd.f32 %v4032_v38, %v11065_v30  ;;  %v8003_v56 = vmul.f32 %v5857_v27, %v11070_v12  ;;  %v2532_v34 = vadd.f32 0.15931422, %v2436_v63  ;;  %v8015_v30 = vpop.f32.mrb[66].mxu1  ;;  %v11072_v38 = vld [vmem:[#allocation32_spill] sm:$0xff]  ;;  %v11083_v16 = vmin.f32 %v7918_v18, %v7934_v7 }
 0x36a   : > { %11071 = vst [vmem:[#allocation64_spill] sm:$0xff] %v8015_v30  ;;  %v2054_v27 = vadd.f32 1e-12, %v1862_v54  ;;  %v8022_v63 = vand.u32 2147483647, %v11072_v38  ;;  %v8024_v61 = vpop.f32.mrb[67].mxu1  ;;  %v8035_v54 = vmul.f32 %v7724_v6, %v11076_v48 }
 0x36b   : > { %11066 = vst [vmem:[#allocation18_spill] sm:$0xff] %v7990_v23  ;;  %v2359_v12 = vmul.f32 %v8003_v56, %v8003_v56  ;;  %11073 = vst [vmem:[#allocation55_spill] sm:$0xff] %v8024_v61  ;;  %v2628_v13 = vmul.f32 %v2532_v34, %v2340_v21  ;;  %v2073_v24 = vadd.f32 1e-12, %v1881_v9  ;;  %v8031_v30 = vand.u32 2147483647, %v11075_v40 }
 0x36c   : > { %11077 = vst [vmem:[#allocation14_spill] sm:$0xff] %v8035_v54  ;;  %5862 = vrcp.f32 %v2054_v27  ;;  %v8042_v61 = vmul.f32 %v7724_v6, %v7464_v52  ;;  %v11080_v34 = vld [vmem:[#allocation34_spill] sm:$0xff]  ;;  %v8047_v19 = vpop.f32.mrb[68].mxu1  ;;  %v1863_v48 = vmax.f32 %v8022_v63, %v8038_v58  ;;  %vm3111_vm9 = vcmp.gt.f32.partialorder %v8038_v58, %v8022_v63 }
 0x36d   : > { %v2455_v53 = vmul.f32 -0.046496473, %v2359_v12  ;;  %v4979_v42 = vadd.f32 -0.32762277, %v2628_v13  ;;  %5864 = vrcp.f32 %v2073_v24  ;;  %v8045_v9 = vand.u32 2147483647, %v11080_v34  ;;  %v5859_v23 = vpop.eup %5858 }
 0x36e   : > { %11079 = vst [vmem:[#allocation30_spill] sm:$0xff] %v8042_v61  ;;  %11081 = vst [vmem:[#allocation32_spill] sm:$0xff] %v8047_v19  ;;  %v8055_v52 = vpop.f32.mrb[69].mxu1  ;;  %v5861_v13 = vpop.eup %5860  ;;  %v8060_v43 = vmul.f32 %v5859_v23, %v11083_v16  ;;  %v11084_v27 = vmin.f32 %v7925_v46, %v7939_v28  ;;  %vm3396_vm13 = vcmp.lt.f32.partialorder %v11034_v39, 0.0  ;;  %vm3684_vm11 = vcmp.lt.f32.partialorder %v11037_v59, 0.0  ;;  %v11092_v61 = vld [vmem:[#allocation23_spill] sm:$0xff] }
 0x36f   : > { %v2551_v62 = vadd.f32 0.15931422, %v2455_v53  ;;  %11082 = vst [vmem:[#allocation4_spill] sm:$0xff] %v8055_v52  ;;  %v2820_v24 = vmul.f32 %v4979_v42, %v2340_v21  ;;  %v1882_v53 = vmax.f32 %v8031_v30, %v8045_v9  ;;  %v2055_v52 = vadd.f32 1e-12, %v1863_v48  ;;  %v8077_v49 = vpop.f32.mrb[70].mxu1 }
 0x370   : > { %v8069_v1 = vmul.f32 %v5861_v13, %v11084_v27  ;;  %vm3130_vm7 = vcmp.gt.f32.partialorder %v8045_v9, %v8031_v30  ;;  %v4089_v21 = vsub.s32 4, %v11011_v51  ;;  %v2341_v23 = vmul.f32 %v8060_v43, %v8060_v43  ;;  %11085 = vst [vmem:[#allocation20_spill] sm:$0xff] %v8077_v49  ;;  %v11086_v27 = vld [vmem:[#allocation22_spill] sm:$0xff]  ;;  %v8084_v13 = vpop.f32.mrb[71].mxu1 }
 0x371   : > { %v2647_v55 = vmul.f32 %v2551_v62, %v2359_v12  ;;  %v2916_v16 = vmul.f32 %v2820_v24, %v7965_v50  ;;  %v2074_v42 = vadd.f32 1e-12, %v1882_v53  ;;  %5866 = vrcp.f32 %v2055_v52  ;;  %11088 = vst [vmem:[#allocation33_spill] sm:$0xff] %v8084_v13  ;;  %v11090_v13 = vld [vmem:[#allocation35_spill] sm:$0xff] }
 0x372   : > { %v2360_v19 = vmul.f32 %v8069_v1, %v8069_v1  ;;  %v8082_v48 = vadd.f32 %v4059_v8, %v11086_v27  ;;  %v8088_v51 = vmul.f32 %v7724_v6, %v7514_v36  ;;  %v2437_v57 = vmul.f32 -0.046496473, %v2341_v23 }
 0x373   : > { %v4998_v62 = vadd.f32 -0.32762277, %v2647_v55  ;;  %v3012_v24 = vadd.f32 %v2916_v16, %v7965_v50  ;;  %5868 = vrcp.f32 %v2074_v42  ;;  %v8094_v52 = vrot.slane %v7721_v10, %v4089_v21  ;;  %v11091_v42 = vld [vmem:[#allocation36_spill] sm:$0xff] }
 0x374   : > { %11087 = vst [vmem:[#allocation24_spill] sm:$0xff] %v8082_v48  ;;  %11089 = vst [vmem:[#allocation22_spill] sm:$0xff] %v8088_v51  ;;  %v2456_v53 = vmul.f32 -0.046496473, %v2360_v19  ;;  %v2533_v27 = vadd.f32 0.15931422, %v2437_v57  ;;  %v11093_v21 = vmin.f32 %v7968_v41, %v7982_v15  ;;  %v11096_v34 = vmin.f32 %v7973_v5, %v7985_v2 }
 0x375   : > { %v2839_v55 = vmul.f32 %v4998_v62, %v2359_v12  ;;  %v3204_v8 = vsub.f32 1.5707964, %v3012_v24  ;;  %v8097_v49 = vand.u32 2147483647, %v11090_v13  ;;  %vm3415_vm14 = vcmp.lt.f32.partialorder %v11040_v22, 0.0  ;;  %v11094_v48 = vld [vmem:[#allocation25_spill] sm:$0xff] }
 0x376   : > { %v5863_v36 = vpop.eup %5862  ;;  %v2552_v16 = vadd.f32 0.15931422, %v2456_v53  ;;  %v8102_v51 = vand.u32 2147483647, %v11091_v42  ;;  %v8105_v12 = vand.u32 2147483647, %v11092_v61  ;;  %v2629_v57 = vmul.f32 %v2533_v27, %v2341_v23 }
 0x377   : > { %v2935_v50 = vmul.f32 %v2839_v55, %v8003_v56  ;;  %v5865_v62 = vpop.eup %5864  ;;  %v3300_v10 = vsel %vm3108_vm0, %v3204_v8, %v3012_v24  ;;  %v8113_v13 = vmul.f32 %v5863_v36, %v11093_v21  ;;  %v8116_v55 = vand.u32 2147483647, %v11094_v48  ;;  %v8118_v53 = vpop.f32.mrb[72].mxu1  ;;  %v11107_v2 = vld [vmem:[#allocation37_spill] sm:$0xff] }
 0x378   : > { %11095 = vst [vmem:[#allocation67_spill] sm:$0xff] %v8118_v53  ;;  %v3492_v42 = vsub.f32 3.1415927, %v3300_v10  ;;  %v2648_v54 = vmul.f32 %v2552_v16, %v2360_v19  ;;  %v8124_v32 = vmul.f32 %v5865_v62, %v11096_v34  ;;  %v8126_v20 = vpop.f32.mrb[73].mxu1  ;;  %vm3703_vm0 = vcmp.lt.f32.partialorder %v11044_v11, 0.0 }
 0x379   : > { %v3031_v61 = vadd.f32 %v2935_v50, %v8003_v56  ;;  %11097 = vst [vmem:[#allocation68_spill] sm:$0xff] %v8126_v20  ;;  %v4980_v24 = vadd.f32 -0.32762277, %v2629_v57  ;;  %v2342_v8 = vmul.f32 %v8113_v13, %v8113_v13  ;;  %v1864_v27 = vmax.f32 %v8097_v49, %v8105_v12 }
 0x37a   : > { %v3588_v36 = vsel %vm3396_vm13, %v3492_v42, %v3300_v10  ;;  %v4999_v34 = vadd.f32 -0.32762277, %v2648_v54  ;;  %v2361_v16 = vmul.f32 %v8124_v32, %v8124_v32  ;;  %vm3397_vm12 = vcmp.lt.f32.partialorder %v11047_v37, 0.0 }
 0x37b   : > { %v3223_v50 = vsub.f32 1.5707964, %v3031_v61  ;;  %v3780_v62 = vsub.f32 0.0, %v3588_v36  ;;  %v2821_v57 = vmul.f32 %v4980_v24, %v2341_v23  ;;  %v2438_v21 = vmul.f32 -0.046496473, %v2342_v8  ;;  %v5867_v53 = vpop.eup %5866 }
 0x37c   : > { %v2056_v20 = vadd.f32 1e-12, %v1864_v27  ;;  %v2840_v56 = vmul.f32 %v4999_v34, %v2360_v19  ;;  %v2457_v35 = vmul.f32 -0.046496473, %v2361_v16  ;;  %vm3112_vm2 = vcmp.gt.f32.partialorder %v8105_v12, %v8097_v49 }
 0x37d   : > { %v3319_v48 = vsel %vm3127_vm1, %v3223_v50, %v3031_v61  ;;  %v5869_v39 = vpop.eup %5868  ;;  %v3876_v54 = vsel %vm3684_vm11, %v3780_v62, %v3588_v36  ;;  %v2917_v10 = vmul.f32 %v2821_v57, %v8060_v43  ;;  %v2534_v23 = vadd.f32 0.15931422, %v2438_v21  ;;  %v11100_v62 = vld [vmem:[#allocation15_spill] sm:$0xff] }
 0x37e   : > { %v3511_v42 = vsub.f32 3.1415927, %v3319_v48  ;;  %v4033_v24 = vmul.f32 %v6955_v44, %v3876_v54  ;;  %vm3416_vm6 = vcmp.lt.f32.partialorder %v11050_v25, 0.0  ;;  %vm3685_vm4 = vcmp.lt.f32.partialorder %v11052_v3, 0.0 }
 0x37f   : > { %v2936_v19 = vmul.f32 %v2840_v56, %v8069_v1  ;;  %v2553_v17 = vadd.f32 0.15931422, %v2457_v35  ;;  %v11098_v0 = vmin.f32 %v8022_v63, %v8038_v58  ;;  %v3013_v27 = vadd.f32 %v2917_v10, %v8060_v43 }
 0x380   : > { %v3607_v59 = vsel %vm3415_vm14, %v3511_v42, %v3319_v48  ;;  %v2630_v36 = vmul.f32 %v2534_v23, %v2342_v8  ;;  %v11099_v50 = vmin.f32 %v8031_v30, %v8045_v9  ;;  %v8166_v57 = vadd.f32 %v4033_v24, %v11100_v62  ;;  %v8182_v24 = vpop.f32.mrb[74].mxu1  ;;  %v11116_v9 = vld [vmem:[#allocation39_spill] sm:$0xff] }
 0x381   : > { %v8155_v61 = vmul.f32 %v5867_v53, %v11098_v0  ;;  %v3799_v35 = vsub.f32 0.0, %v3607_v59  ;;  %v3032_v56 = vadd.f32 %v2936_v19, %v8069_v1  ;;  %v2649_v21 = vmul.f32 %v2553_v17, %v2361_v16  ;;  %11102 = vst [vmem:[#allocation69_spill] sm:$0xff] %v8182_v24 }
 0x382   : > { %v8163_v34 = vmul.f32 %v5869_v39, %v11099_v50  ;;  %v3205_v53 = vsub.f32 1.5707964, %v3013_v27  ;;  %vm3704_vm1 = vcmp.lt.f32.partialorder %v11054_v29, 0.0  ;;  %v4981_v22 = vadd.f32 -0.32762277, %v2630_v36 }
 0x383   : > { %v2343_v43 = vmul.f32 %v8155_v61, %v8155_v61  ;;  %v8176_v39 = vsel %vm3703_vm0, %v3799_v35, %v3607_v59  ;;  %v3224_v54 = vsub.f32 1.5707964, %v3032_v56  ;;  %v5000_v42 = vadd.f32 -0.32762277, %v2649_v21  ;;  %v8187_v59 = vpop.f32.mrb[75].mxu1 }
 0x384   : > { %v2362_v48 = vmul.f32 %v8163_v34, %v8163_v34  ;;  %11101 = vst [vmem:[#allocation15_spill] sm:$0xff] %v8176_v39  ;;  %5870 = vrcp.f32 %v2056_v20  ;;  %v3301_v1 = vsel %vm3109_vm10, %v3205_v53, %v3013_v27  ;;  %vm3398_vm8 = vcmp.lt.f32.partialorder %v11059_v60, 0.0  ;;  %11103 = vst [vmem:[#allocation70_spill] sm:$0xff] %v8187_v59  ;;  %v11169_v39 = vld [vmem:[#allocation25_spill] sm:$0xff] }
 0x385   : > { %v2822_v10 = vmul.f32 %v4981_v22, %v2342_v8  ;;  %v2439_v23 = vmul.f32 -0.046496473, %v2343_v43  ;;  %v3493_v19 = vsub.f32 3.1415927, %v3301_v1  ;;  %v3320_v11 = vsel %vm3128_vm5, %v3224_v54, %v3032_v56 }
 0x386   : > { %v2841_v17 = vmul.f32 %v5000_v42, %v2361_v16  ;;  %v2458_v0 = vmul.f32 -0.046496473, %v2362_v48  ;;  %v3512_v20 = vsub.f32 3.1415927, %v3320_v11  ;;  %v1883_v7 = vmax.f32 %v8102_v51, %v8116_v55 }
 0x387   : > { %v2918_v36 = vmul.f32 %v2822_v10, %v8113_v13  ;;  %v2535_v18 = vadd.f32 0.15931422, %v2439_v23  ;;  %v3589_v8 = vsel %vm3397_vm12, %v3493_v19, %v3301_v1  ;;  %vm3417_vm10 = vcmp.lt.f32.partialorder %v11060_v4, 0.0  ;;  %v11105_v19 = vld [vmem:[#allocation16_spill] sm:$0xff] }
 0x388   : > { %vm3686_vm13 = vcmp.lt.f32.partialorder %v11062_v33, 0.0  ;;  %v2937_v46 = vmul.f32 %v2841_v17, %v8124_v32  ;;  %v2554_v28 = vadd.f32 0.15931422, %v2458_v0  ;;  %v1979_v16 = vmin.f32 %v8102_v51, %v8116_v55 }
 0x389   : > { %v3781_v27 = vsub.f32 0.0, %v3589_v8  ;;  %v3608_v50 = vsel %vm3416_vm6, %v3512_v20, %v3320_v11  ;;  %v3014_v62 = vadd.f32 %v2918_v36, %v8113_v13  ;;  %v2631_v35 = vmul.f32 %v2535_v18, %v2343_v43 }
 0x38a   : > { %v3800_v56 = vsub.f32 0.0, %v3608_v50  ;;  %v3033_v37 = vadd.f32 %v2937_v46, %v8124_v32  ;;  %v2650_v21 = vmul.f32 %v2554_v28, %v2362_v48  ;;  %v2075_v53 = vadd.f32 1e-12, %v1883_v7  ;;  %v11109_v28 = vld [vmem:[#allocation38_spill] sm:$0xff] }
 0x38b   : > { %v3877_v22 = vsel %vm3685_vm4, %v3781_v27, %v3589_v8  ;;  %v3206_v54 = vsub.f32 1.5707964, %v3014_v62  ;;  %vm3705_vm5 = vcmp.lt.f32.partialorder %v11063_v45, 0.0  ;;  %v4982_v42 = vadd.f32 -0.32762277, %v2631_v35  ;;  %v11111_v35 = vld [vmem:[#allocation5_spill] sm:$0xff] }
 0x38c   : > { %vm3131_vm11 = vcmp.gt.f32.partialorder %v8116_v55, %v8102_v51  ;;  %v4034_v25 = vmul.f32 %v6955_v44, %v3877_v22  ;;  %v8211_v13 = vsel %vm3704_vm1, %v3800_v56, %v3608_v50  ;;  %v3225_v1 = vsub.f32 1.5707964, %v3033_v37  ;;  %v11163_v55 = vld [vmem:[#allocation50_spill] sm:$0xff] }
 0x38d   : > { %11104 = vst [vmem:[#allocation71_spill] sm:$0xff] %v8211_v13  ;;  %v5001_v32 = vadd.f32 -0.32762277, %v2650_v21  ;;  %v3302_v3 = vsel %vm3110_vm3, %v3206_v54, %v3014_v62  ;;  %vm3399_vm14 = vcmp.lt.f32.partialorder %v11072_v38, 0.0  ;;  %v2823_v10 = vmul.f32 %v4982_v42, %v2343_v43  ;;  %v11112_v42 = vld [vmem:[#allocation52_spill] sm:$0xff] }
 0x38e   : > { %5872 = vrcp.f32 %v2075_v53  ;;  %v5871_v23 = vpop.eup %5870  ;;  %v8218_v11 = vadd.f32 %v4034_v25, %v11105_v19  ;;  %v3494_v17 = vsub.f32 3.1415927, %v3302_v3  ;;  %v3321_v44 = vsel %vm3129_vm15, %v3225_v1, %v3033_v37 }
 0x38f   : > { %v2842_v29 = vmul.f32 %v5001_v32, %v2362_v48  ;;  %v3513_v0 = vsub.f32 3.1415927, %v3321_v44  ;;  %v2919_v20 = vmul.f32 %v2823_v10, %v8155_v61  ;;  %v11106_v41 = vmin.f32 %v8097_v49, %v8105_v12  ;;  %v11113_v10 = vld [vmem:[#allocation61_spill] sm:$0xff] }
 0x390   : > { %v8231_v43 = vadd.f32 %v7998_v14, %v7452_v47  ;;  %v3590_v36 = vsel %vm3398_vm8, %v3494_v17, %v3302_v3  ;;  %vm3418_vm3 = vcmp.lt.f32.partialorder %v11075_v40, 0.0  ;;  %v8238_v48 = vand.u32 2147483647, %v11107_v2  ;;  %v8245_v14 = vpop.f32.mrb[76].mxu1  ;;  %v11123_v40 = vld [vmem:[#allocation44_spill] sm:$0xff] }
 0x391   : > { %v8227_v15 = vmul.f32 %v5871_v23, %v11106_v41  ;;  %v2938_v5 = vmul.f32 %v2842_v29, %v8163_v34  ;;  %v3782_v18 = vsub.f32 0.0, %v3590_v36  ;;  %v3609_v7 = vsel %vm3417_vm10, %v3513_v0, %v3321_v44  ;;  %11108 = vst [vmem:[#allocation16_spill] sm:$0xff] %v8245_v14  ;;  %v8252_v50 = vpop.f32.mrb[77].mxu1  ;;  %v11118_v0 = vld [vmem:[#allocation40_spill] sm:$0xff] }
 0x392   : > { %v3015_v8 = vadd.f32 %v2919_v20, %v8155_v61  ;;  %v3801_v60 = vsub.f32 0.0, %v3609_v7  ;;  %vm3687_vm15 = vcmp.lt.f32.partialorder %v11078_v31, 0.0  ;;  %v8250_v27 = vand.u32 2147483647, %v11109_v28  ;;  %11110 = vst [vmem:[#allocation37_spill] sm:$0xff] %v8252_v50  ;;  %v8282_v63 = vpop.f32.mrb[78].mxu1 }
 0x393   : > { %v2344_v47 = vmul.f32 %v8227_v15, %v8227_v15  ;;  %v3034_v46 = vadd.f32 %v2938_v5, %v8163_v34  ;;  %v3878_v4 = vsel %vm3686_vm13, %v3782_v18, %v3590_v36  ;;  %v8258_v56 = vadd.f32 %v8028_v26, %v11111_v35  ;;  %11115 = vst [vmem:[#allocation5_spill] sm:$0xff] %v8282_v63  ;;  %v8294_v29 = vpop.f32.mrb[79].mxu1  ;;  %v11119_v5 = vld [vmem:[#allocation34_spill] sm:$0xff]  ;;  %v11159_v50 = vld [vmem:[#allocation12_spill] sm:$0xff] }
 0x394   : > { %v3207_v62 = vsub.f32 1.5707964, %v3015_v8  ;;  %v4055_v37 = vmul.f32 %v7724_v6, %v3878_v4  ;;  %v3897_v21 = vsel %vm3705_vm5, %v3801_v60, %v3609_v7  ;;  %v1884_v53 = vmax.f32 %v8238_v48, %v8250_v27  ;;  %11117 = vst [vmem:[#allocation52_spill] sm:$0xff] %v8294_v29  ;;  %v11120_v7 = vld [vmem:[#allocation41_spill] sm:$0xff]  ;;  %v11121_v4 = vld [vmem:[#allocation6_spill] sm:$0xff] }
 0x395   : > { %v2440_v61 = vmul.f32 -0.046496473, %v2344_v47  ;;  %v3226_v34 = vsub.f32 1.5707964, %v3034_v46  ;;  %v4094_v22 = vmul.f32 %v8094_v52, %v3897_v21  ;;  %v1980_v26 = vmin.f32 %v8238_v48, %v8250_v27  ;;  %v11149_v29 = vld [vmem:[#allocation21_spill] sm:$0xff] }
 0x396   : > { %v3303_v33 = vsel %vm3111_vm9, %v3207_v62, %v3015_v8  ;;  %v8272_v25 = vadd.f32 %v4055_v37, %v11112_v42  ;;  %v2076_v32 = vadd.f32 1e-12, %v1884_v53  ;;  %vm3132_vm9 = vcmp.gt.f32.partialorder %v8250_v27, %v8238_v48  ;;  %v11122_v62 = vld [vmem:[#allocation14_spill] sm:$0xff] }
 0x397   : > { %v2536_v54 = vadd.f32 0.15931422, %v2440_v61  ;;  %v3495_v1 = vsub.f32 3.1415927, %v3303_v33  ;;  %v3322_v45 = vsel %vm3130_vm7, %v3226_v34, %v3034_v46  ;;  %v8278_v23 = vadd.f32 %v4094_v22, %v11113_v10  ;;  %v8320_v22 = vpop.f32.mrb[80].mxu1  ;;  %v11126_v42 = vld [vmem:[#allocation42_spill] sm:$0xff] }
 0x398   : > { %v5873_v3 = vpop.eup %5872  ;;  %v3514_v19 = vsub.f32 3.1415927, %v3322_v45  ;;  %5874 = vrcp.f32 %v2076_v32  ;;  %v8292_v44 = vand.u32 2147483647, %v11116_v9  ;;  %v8298_v20 = vmul.f32 %v7724_v6, %v11118_v0  ;;  %11124 = vst [vmem:[#allocation61_spill] sm:$0xff] %v8320_v22 }
 0x399   : > { %11114 = vst [vmem:[#allocation38_spill] sm:$0xff] %v8278_v23  ;;  %v2632_v58 = vmul.f32 %v2536_v54, %v2344_v47  ;;  %v3591_v17 = vsel %vm3399_vm14, %v3495_v1, %v3303_v33  ;;  %v8289_v30 = vmul.f32 %v5873_v3, %v1979_v16  ;;  %vm3706_vm7 = vcmp.lt.f32.partialorder %v11119_v5, 0.0  ;;  %v8328_v54 = vpop.f32.mrb[81].mxu1  ;;  %v11142_v33 = vld [vmem:[#allocation22_spill] sm:$0xff] }
 0x39a   : > { %v3783_v41 = vsub.f32 0.0, %v3591_v17  ;;  %v3610_v38 = vsel %vm3418_vm3, %v3514_v19, %v3322_v45  ;;  %v8306_v8 = vand.u32 2147483647, %v11120_v7  ;;  %v8312_v61 = vadd.f32 %v11122_v62, %v11121_v4  ;;  %11125 = vst [vmem:[#allocation39_spill] sm:$0xff] %v8328_v54  ;;  %v11127_v45 = vld [vmem:[#allocation60_spill] sm:$0xff]  ;;  %v11135_v4 = vld [vmem:[#allocation7_spill] sm:$0xff] }
 0x39b   : > { %v4983_v36 = vadd.f32 -0.32762277, %v2632_v58  ;;  %v3802_v18 = vsub.f32 0.0, %v3610_v38  ;;  %v2363_v16 = vmul.f32 %v8289_v30, %v8289_v30  ;;  %v8315_v35 = vand.u32 2147483647, %v11123_v40  ;;  %v11129_v19 = vld [vmem:[#allocation56_spill] sm:$0xff] }
 0x39c   : > { %v3879_v60 = vsel %vm3687_vm15, %v3783_v41, %v3591_v17  ;;  %v1885_v53 = vmax.f32 %v8292_v44, %v8306_v8  ;;  %vm3133_vm0 = vcmp.gt.f32.partialorder %v8306_v8, %v8292_v44  ;;  %v8332_v1 = vmul.f32 %v7724_v6, %v11126_v42  ;;  %v11130_v17 = vld [vmem:[#allocation24_spill] sm:$0xff] }
 0x39d   : > { %v2824_v46 = vmul.f32 %v4983_v36, %v2344_v47  ;;  %v4056_v37 = vmul.f32 %v7724_v6, %v3879_v60  ;;  %v3898_v21 = vsel %vm3706_vm7, %v3802_v18, %v3610_v38  ;;  %v2459_v34 = vmul.f32 -0.046496473, %v2363_v16  ;;  %v11132_v38 = vld [vmem:[#allocation45_spill] sm:$0xff]  ;;  %v11133_v18 = vld [vmem:[#allocation47_spill] sm:$0xff]  ;;  %v11134_v60 = vld [vmem:[#allocation30_spill] sm:$0xff] }
 0x39e   : > { %v4095_v31 = vmul.f32 %v8094_v52, %v3898_v21  ;;  %v2077_v10 = vadd.f32 1e-12, %v1885_v53  ;;  %v8339_v58 = vmul.f32 %v7724_v6, %v11129_v19  ;;  %v8346_v36 = vand.u32 2147483647, %v11132_v38 }
 0x39f   : > { %v2920_v47 = vmul.f32 %v2824_v46, %v8227_v15  ;;  %v8335_v32 = vadd.f32 %v4056_v37, %v11127_v45  ;;  %v2555_v3 = vadd.f32 0.15931422, %v2459_v34  ;;  %v8350_v46 = vadd.f32 %v11134_v60, %v11133_v18  ;;  %v8355_v37 = vpop.f32.mrb[82].mxu1  ;;  %v11139_v45 = vld [vmem:[#allocation35_spill] sm:$0xff] }
 0x3a0   : > { %v8342_v0 = vadd.f32 %v4095_v31, %v11130_v17  ;;  %5876 = vrcp.f32 %v2077_v10  ;;  %v8353_v62 = vand.u32 2147483647, %v11135_v4  ;;  %11136 = vst [vmem:[#allocation41_spill] sm:$0xff] %v8355_v37  ;;  %v1886_v34 = vmax.f32 %v8315_v35, %v8346_v36  ;;  %v8363_v53 = vpop.f32.mrb[83].mxu1  ;;  %v11140_v10 = vld [vmem:[#allocation46_spill] sm:$0xff] }
 0x3a1   : > { %11128 = vst [vmem:[#allocation40_spill] sm:$0xff] %v8335_v32  ;;  %v3016_v41 = vadd.f32 %v2920_v47, %v8227_v15  ;;  %v2651_v5 = vmul.f32 %v2555_v3, %v2363_v16  ;;  %vm3134_vm12 = vcmp.gt.f32.partialorder %v8346_v36, %v8315_v35  ;;  %11137 = vst [vmem:[#allocation6_spill] sm:$0xff] %v8363_v53  ;;  %v11138_v47 = vld [vmem:[#allocation11_spill] sm:$0xff]  ;;  %vm3400_vm6 = vcmp.lt.f32.partialorder %v11139_v45, 0.0  ;;  %v11141_v15 = vld [vmem:[#allocation53_spill] sm:$0xff]  ;;  %v8389_v49 = vpop.f32.mrb[84].mxu1 }
 0x3a2   : > { %11131 = vst [vmem:[#allocation34_spill] sm:$0xff] %v8342_v0  ;;  %v5875_v31 = vpop.eup %5874  ;;  %v8367_v42 = vmul.f32 %v7724_v6, %v11138_v47  ;;  %v8371_v19 = vand.u32 2147483647, %v11140_v10  ;;  %v2078_v60 = vadd.f32 1e-12, %v1886_v34  ;;  %v8383_v47 = vadd.f32 %v11142_v33, %v11141_v15  ;;  %11143 = vst [vmem:[#allocation14_spill] sm:$0xff] %v8389_v49 }
 0x3a3   : > { %v3208_v21 = vsub.f32 1.5707964, %v3016_v41  ;;  %v5002_v3 = vadd.f32 -0.32762277, %v2651_v5  ;;  %v8379_v18 = vmul.f32 %v5875_v31, %v1980_v26  ;;  %v11144_v26 = vld [vmem:[#allocation8_spill] sm:$0xff]  ;;  %v11147_v31 = vld [vmem:[#allocation27_spill] sm:$0xff]  ;;  %v11166_v51 = vmin.f32 %v8315_v35, %v8346_v36 }
 0x3a4   : > { %v1887_v5 = vmax.f32 %v8353_v62, %v8371_v19  ;;  %5878 = vrcp.f32 %v2078_v60  ;;  %v8396_v33 = vand.u32 2147483647, %v11144_v26  ;;  %v11148_v49 = vld [vmem:[#allocation9_spill] sm:$0xff]  ;;  %v11150_v45 = vld [vmem:[#allocation59_spill] sm:$0xff]  ;;  %vm3707_vm13 = vcmp.lt.f32.partialorder %v11169_v39, 0.0 }
 0x3a5   : > { %v3304_v17 = vsel %vm3112_vm2, %v3208_v21, %v3016_v41  ;;  %v2843_v37 = vmul.f32 %v5002_v3, %v2363_v16  ;;  %v2364_v12 = vmul.f32 %v8379_v18, %v8379_v18  ;;  %vm3135_vm2 = vcmp.gt.f32.partialorder %v8371_v19, %v8353_v62  ;;  %v8398_v41 = vpop.f32.mrb[85].mxu1  ;;  %v11146_v21 = vld [vmem:[#allocation23_spill] sm:$0xff] }
 0x3a6   : > { %v3496_v53 = vsub.f32 3.1415927, %v3304_v17  ;;  %11145 = vst [vmem:[#allocation44_spill] sm:$0xff] %v8398_v41  ;;  %vm3688_vm4 = vcmp.lt.f32.partialorder %v11146_v21, 0.0  ;;  %v2079_v15 = vadd.f32 1e-12, %v1887_v5  ;;  %v8406_v3 = vmul.f32 %v7724_v6, %v11147_v31 }
 0x3a7   : > { %v2939_v34 = vmul.f32 %v2843_v37, %v8289_v30  ;;  %v2460_v54 = vmul.f32 -0.046496473, %v2364_v12  ;;  %v8409_v22 = vand.u32 2147483647, %v11148_v49  ;;  %v8413_v41 = vmul.f32 %v7724_v6, %v11149_v29  ;;  %v11155_v0 = vld [vmem:[#allocation43_spill] sm:$0xff] }
 0x3a8   : > { %v3592_v16 = vsel %vm3400_vm6, %v3496_v53, %v3304_v17  ;;  %5880 = vrcp.f32 %v2079_v15  ;;  %v8418_v37 = vadd.f32 %v8298_v20, %v11150_v45  ;;  %v8420_v17 = vpop.f32.mrb[86].mxu1  ;;  %v11153_v20 = vld [vmem:[#allocation48_spill] sm:$0xff]  ;;  %vm3708_vm14 = vcmp.lt.f32.partialorder %v11109_v28, 0.0 }
 0x3a9   : > { %v3784_v60 = vsub.f32 0.0, %v3592_v16  ;;  %v3035_v53 = vadd.f32 %v2939_v34, %v8289_v30  ;;  %11151 = vst [vmem:[#allocation42_spill] sm:$0xff] %v8420_v17  ;;  %v2556_v21 = vadd.f32 0.15931422, %v2460_v54  ;;  %v1888_v31 = vmax.f32 %v8396_v33, %v8409_v22  ;;  %v8426_v63 = vpop.f32.mrb[87].mxu1 }
 0x3aa   : > { %11152 = vst [vmem:[#allocation60_spill] sm:$0xff] %v8426_v63  ;;  %v5877_v29 = vpop.eup %5876  ;;  %vm3136_vm1 = vcmp.gt.f32.partialorder %v8409_v22, %v8396_v33  ;;  %v8432_v15 = vand.u32 2147483647, %v11153_v20  ;;  %v11154_v54 = vmin.f32 %v8292_v44, %v8306_v8  ;;  %v8440_v17 = vand.u32 2147483647, %v11155_v0  ;;  %v11156_v63 = vld [vmem:[#allocation36_spill] sm:$0xff] }
 0x3ab   : > { %v3880_v5 = vsel %vm3688_vm4, %v3784_v60, %v3592_v16  ;;  %v3227_v34 = vsub.f32 1.5707964, %v3035_v53  ;;  %v2652_v16 = vmul.f32 %v2556_v21, %v2364_v12  ;;  %v2080_v45 = vadd.f32 1e-12, %v1888_v31  ;;  %v8453_v14 = vpop.f32.mrb[88].mxu1 }
 0x3ac   : > { %v4057_v30 = vmul.f32 %v7724_v6, %v3880_v5  ;;  %v8437_v60 = vmul.f32 %v5877_v29, %v11154_v54  ;;  %vm3419_vm8 = vcmp.lt.f32.partialorder %v11156_v63, 0.0  ;;  %v11157_v6 = vld [vmem:[#allocation26_spill] sm:$0xff]  ;;  %v8451_v21 = vadd.f32 %v8332_v1, %v11159_v50  ;;  %11161 = vst [vmem:[#allocation45_spill] sm:$0xff] %v8453_v14  ;;  %v8457_v59 = vpop.f32.mrb[89].mxu1 }
 0x3ad   : > { %v3323_v23 = vsel %vm3131_vm11, %v3227_v34, %v3035_v53  ;;  %v5003_v31 = vadd.f32 -0.32762277, %v2652_v16  ;;  %5882 = vrcp.f32 %v2080_v45  ;;  %11162 = vst [vmem:[#allocation47_spill] sm:$0xff] %v8457_v59  ;;  %vm3137_vm10 = vcmp.gt.f32.partialorder %v8440_v17, %v8432_v15  ;;  %v11164_v53 = vld [vmem:[#allocation62_spill] sm:$0xff]  ;;  %v8482_v13 = vpop.f32.mrb[90].mxu1 }
 0x3ae   : > { %v8444_v5 = vadd.f32 %v4057_v30, %v11157_v6  ;;  %11160 = vst [vmem:[#allocation24_spill] sm:$0xff] %v8451_v21  ;;  %v3515_v29 = vsub.f32 3.1415927, %v3323_v23  ;;  %v2365_v54 = vmul.f32 %v8437_v60, %v8437_v60  ;;  %v1889_v30 = vmax.f32 %v8432_v15, %v8440_v17  ;;  %v5879_v1 = vpop.eup %5878  ;;  %11168 = vst [vmem:[#allocation7_spill] sm:$0xff] %v8482_v13  ;;  %v11179_v21 = vld [vmem:[#allocation18_spill] sm:$0xff] }
 0x3af   : > { %v8466_v50 = vand.u32 2147483647, %v11163_v55  ;;  %v8470_v34 = vmul.f32 %v8094_v52, %v11164_v53  ;;  %v2844_v45 = vmul.f32 %v5003_v31, %v2364_v12  ;;  %v8477_v14 = vmul.f32 %v5879_v1, %v11166_v51 }
 0x3b0   : > { %11158 = vst [vmem:[#allocation56_spill] sm:$0xff] %v8444_v5  ;;  %v3611_v16 = vsel %vm3419_vm8, %v3515_v29, %v3323_v23  ;;  %v2461_v6 = vmul.f32 -0.046496473, %v2365_v54  ;;  %v2081_v24 = vadd.f32 1e-12, %v1889_v30  ;;  %v11167_v5 = vld [vmem:[#allocation51_spill] sm:$0xff] }
 0x3b1   : > { %11165 = vst [vmem:[#allocation30_spill] sm:$0xff] %v8470_v34  ;;  %v3803_v59 = vsub.f32 0.0, %v3611_v16  ;;  %v8480_v32 = vand.u32 2147483647, %v11167_v5  ;;  %v2940_v53 = vmul.f32 %v2844_v45, %v8379_v18  ;;  %v11170_v23 = vld [vmem:[#allocation49_spill] sm:$0xff]  ;;  %v8490_v29 = vpop.f32.mrb[91].mxu1  ;;  %v2366_v30 = vmul.f32 %v8477_v14, %v8477_v14 }
 0x3b2   : > { %v2557_v63 = vadd.f32 0.15931422, %v2461_v6  ;;  %v8488_v12 = vadd.f32 %v8339_v58, %v11170_v23  ;;  %11172 = vst [vmem:[#allocation35_spill] sm:$0xff] %v8490_v29  ;;  %v5881_v31 = vpop.eup %5880  ;;  %5884 = vrcp.f32 %v2081_v24  ;;  %v11173_v58 = vmin.f32 %v8353_v62, %v8371_v19 }
 0x3b3   : > { %v3899_v51 = vsel %vm3707_vm13, %v3803_v59, %v3611_v16  ;;  %v1890_v1 = vmax.f32 %v8466_v50, %v8480_v32  ;;  %v3036_v45 = vadd.f32 %v2940_v53, %v8379_v18  ;;  %v2462_v29 = vmul.f32 -0.046496473, %v2366_v30 }
 0x3b4   : > { %11171 = vst [vmem:[#allocation11_spill] sm:$0xff] %v8488_v12  ;;  %v4096_v39 = vmul.f32 %v8094_v52, %v3899_v51  ;;  %v2653_v6 = vmul.f32 %v2557_v63, %v2365_v54  ;;  %v8501_v23 = vmul.f32 %v5881_v31, %v11173_v58  ;;  %v1986_v59 = vmin.f32 %v8466_v50, %v8480_v32  ;;  %v11175_v63 = vld [vmem:[#allocation54_spill] sm:$0xff] }
 0x3b5   : > { %v2082_v16 = vadd.f32 1e-12, %v1890_v1  ;;  %vm3138_vm5 = vcmp.gt.f32.partialorder %v8480_v32, %v8466_v50  ;;  %v3228_v51 = vsub.f32 1.5707964, %v3036_v45  ;;  %vm3420_vm11 = vcmp.lt.f32.partialorder %v11107_v2, 0.0  ;;  %v11202_v50 = vld [vmem:[#allocation15_spill] sm:$0xff] }
 0x3b6   : > { %v8508_v24 = vadd.f32 %v4096_v39, %v8231_v43  ;;  %v5004_v13 = vadd.f32 -0.32762277, %v2653_v6  ;;  %v2367_v18 = vmul.f32 %v8501_v23, %v8501_v23  ;;  %v2558_v53 = vadd.f32 0.15931422, %v2462_v29  ;;  %v11176_v39 = vld [vmem:[#allocation10_spill] sm:$0xff]  ;;  %v8522_v6 = vpop.f32.mrb[92].mxu1 }
 0x3b7   : > { %5886 = vrcp.f32 %v2082_v16  ;;  %v8514_v31 = vand.u32 2147483647, %v11175_v63  ;;  %v5883_v58 = vpop.eup %5882  ;;  %v3324_v1 = vsel %vm3132_vm9, %v3228_v51, %v3036_v45  ;;  %11177 = vst [vmem:[#allocation53_spill] sm:$0xff] %v8522_v6  ;;  %v11178_v16 = vmin.f32 %v8396_v33, %v8409_v22 }
 0x3b8   : > { %11174 = vst [vmem:[#allocation46_spill] sm:$0xff] %v8508_v24  ;;  %v2845_v12 = vmul.f32 %v5004_v13, %v2365_v54  ;;  %v2463_v43 = vmul.f32 -0.046496473, %v2367_v18  ;;  %v8520_v24 = vand.u32 2147483647, %v11176_v39  ;;  %v2654_v29 = vmul.f32 %v2558_v53, %v2366_v30 }
 0x3b9   : > { %v3516_v5 = vsub.f32 3.1415927, %v3324_v1  ;;  %v8528_v63 = vmul.f32 %v5883_v58, %v11178_v16  ;;  %vm3421_vm3 = vcmp.lt.f32.partialorder %v11116_v9, 0.0  ;;  %vm3709_vm9 = vcmp.lt.f32.partialorder %v11120_v7, 0.0 }
 0x3ba   : > { %v2941_v48 = vmul.f32 %v2845_v12, %v8437_v60  ;;  %v2559_v13 = vadd.f32 0.15931422, %v2463_v43  ;;  %v1891_v27 = vmax.f32 %v8514_v31, %v8520_v24  ;;  %v5005_v51 = vadd.f32 -0.32762277, %v2654_v29 }
 0x3bb   : > { %v3612_v45 = vsel %vm3420_vm11, %v3516_v5, %v3324_v1  ;;  %v2368_v53 = vmul.f32 %v8528_v63, %v8528_v63  ;;  %vm3139_vm15 = vcmp.gt.f32.partialorder %v8520_v24, %v8514_v31  ;;  %v8546_v2 = vadd.f32 %v8367_v42, %v11179_v21  ;;  %v8548_v5 = vpop.f32.mrb[93].mxu1 }
 0x3bc   : > { %v3804_v58 = vsub.f32 0.0, %v3612_v45  ;;  %v3037_v12 = vadd.f32 %v2941_v48, %v8437_v60  ;;  %v2655_v43 = vmul.f32 %v2559_v13, %v2367_v18  ;;  %v2083_v16 = vadd.f32 1e-12, %v1891_v27  ;;  %v5885_v6 = vpop.eup %5884  ;;  %11180 = vst [vmem:[#allocation22_spill] sm:$0xff] %v8548_v5 }
 0x3bd   : > { %v2846_v39 = vmul.f32 %v5005_v51, %v2366_v30  ;;  %v2464_v54 = vmul.f32 -0.046496473, %v2368_v53  ;;  %v11181_v60 = vmin.f32 %v8432_v15, %v8440_v17  ;;  %vm3422_vm7 = vcmp.lt.f32.partialorder %v11123_v40, 0.0 }
 0x3be   : > { %v3900_v1 = vsel %vm3708_vm14, %v3804_v58, %v3612_v45  ;;  %v3229_v29 = vsub.f32 1.5707964, %v3037_v12  ;;  %v5006_v34 = vadd.f32 -0.32762277, %v2655_v43  ;;  %5888 = vrcp.f32 %v2083_v16  ;;  %v11182_v45 = vld [vmem:[#allocation57_spill] sm:$0xff] }
 0x3bf   : > { %v8555_v48 = vmul.f32 %v5885_v6, %v11181_v60  ;;  %v4097_v13 = vmul.f32 %v8094_v52, %v3900_v1  ;;  %v2942_v30 = vmul.f32 %v2846_v39, %v8477_v14  ;;  %v2560_v42 = vadd.f32 0.15931422, %v2464_v54 }
 0x3c0   : > { %v3325_v28 = vsel %vm3133_vm0, %v3229_v29, %v3037_v12  ;;  %v2847_v21 = vmul.f32 %v5006_v34, %v2367_v18  ;;  %v8566_v51 = vand.u32 2147483647, %v11182_v45  ;;  %vm3710_vm6 = vcmp.lt.f32.partialorder %v11132_v38, 0.0  ;;  %v11183_v18 = vld [vmem:[#allocation58_spill] sm:$0xff] }
 0x3c1   : > { %v2369_v27 = vmul.f32 %v8555_v48, %v8555_v48  ;;  %v5887_v6 = vpop.eup %5886  ;;  %v8569_v58 = vadd.f32 %v4097_v13, %v8258_v56  ;;  %v3517_v43 = vsub.f32 3.1415927, %v3325_v28  ;;  %v3038_v39 = vadd.f32 %v2942_v30, %v8477_v14 }
 0x3c2   : > { %v2656_v54 = vmul.f32 %v2560_v42, %v2368_v53  ;;  %v2943_v44 = vmul.f32 %v2847_v21, %v8501_v23  ;;  %v8574_v34 = vmul.f32 %v5887_v6, %v1986_v59  ;;  %v8577_v12 = vand.u32 2147483647, %v11183_v18 }
 0x3c3   : > { %v2465_v8 = vmul.f32 -0.046496473, %v2369_v27  ;;  %v3613_v16 = vsel %vm3421_vm3, %v3517_v43, %v3325_v28  ;;  %v3230_v1 = vsub.f32 1.5707964, %v3038_v39  ;;  %vm3423_vm0 = vcmp.lt.f32.partialorder %v11135_v4, 0.0 }
 0x3c4   : > { %v5007_v56 = vadd.f32 -0.32762277, %v2656_v54  ;;  %v3805_v29 = vsub.f32 0.0, %v3613_v16  ;;  %v3039_v14 = vadd.f32 %v2943_v44, %v8501_v23  ;;  %v2370_v13 = vmul.f32 %v8574_v34, %v8574_v34 }
 0x3c5   : > { %v2561_v60 = vadd.f32 0.15931422, %v2465_v8  ;;  %v3326_v59 = vsel %vm3134_vm12, %v3230_v1, %v3038_v39  ;;  %vm3711_vm4 = vcmp.lt.f32.partialorder %v11140_v10, 0.0  ;;  %v1892_v9 = vmax.f32 %v8566_v51, %v8577_v12 }
 0x3c6   : > { %v2848_v30 = vmul.f32 %v5007_v56, %v2368_v53  ;;  %v1988_v42 = vmin.f32 %v8566_v51, %v8577_v12  ;;  %v3901_v23 = vsel %vm3709_vm9, %v3805_v29, %v3613_v16  ;;  %v3518_v28 = vsub.f32 3.1415927, %v3326_v59 }
 0x3c7   : > { %v3231_v21 = vsub.f32 1.5707964, %v3039_v14  ;;  %v2657_v6 = vmul.f32 %v2561_v60, %v2369_v27  ;;  %v4098_v43 = vmul.f32 %v8094_v52, %v3901_v23  ;;  %v2466_v36 = vmul.f32 -0.046496473, %v2370_v13  ;;  %v11185_v23 = vld [vmem:[#allocation29_spill] sm:$0xff] }
 0x3c8   : > { %v2944_v35 = vmul.f32 %v2848_v30, %v8528_v63  ;;  %v2084_v39 = vadd.f32 1e-12, %v1892_v9  ;;  %v3614_v53 = vsel %vm3422_vm7, %v3518_v28, %v3326_v59  ;;  %vm3140_vm12 = vcmp.gt.f32.partialorder %v8577_v12, %v8566_v51  ;;  %v5889_v7 = vpop.eup %5888  ;;  %v11228_v12 = vld [vmem:[#allocation32_spill] sm:$0xff] }
 0x3c9   : > { %v3327_v54 = vsel %vm3135_vm2, %v3231_v21, %v3039_v14  ;;  %v5008_v44 = vadd.f32 -0.32762277, %v2657_v6  ;;  %v8605_v8 = vadd.f32 %v4098_v43, %v8312_v61  ;;  %v3806_v16 = vsub.f32 0.0, %v3614_v53 }
 0x3ca   : > { %v3519_v1 = vsub.f32 3.1415927, %v3327_v54  ;;  %v3040_v56 = vadd.f32 %v2944_v35, %v8528_v63  ;;  %v2562_v60 = vadd.f32 0.15931422, %v2466_v36  ;;  %v11184_v40 = vmin.f32 %v8514_v31, %v8520_v24  ;;  %v11188_v35 = vld [vmem:[#allocation65_spill] sm:$0xff] }
 0x3cb   : > { %v2849_v29 = vmul.f32 %v5008_v44, %v2369_v27  ;;  %5890 = vrcp.f32 %v2084_v39  ;;  %v3902_v62 = vsel %vm3710_vm6, %v3806_v16, %v3614_v53  ;;  %v8619_v14 = vadd.f32 %v8406_v3, %v8166_v57 }
 0x3cc   : > { %v8611_v59 = vmul.f32 %v5889_v7, %v11184_v40  ;;  %v3615_v19 = vsel %vm3423_vm0, %v3519_v1, %v3327_v54  ;;  %v3232_v61 = vsub.f32 1.5707964, %v3040_v56  ;;  %v4099_v63 = vmul.f32 %v8094_v52, %v3902_v62 }
 0x3cd   : > { %v3807_v27 = vsub.f32 0.0, %v3615_v19  ;;  %v2945_v30 = vmul.f32 %v2849_v29, %v8555_v48  ;;  %v2658_v9 = vmul.f32 %v2562_v60, %v2370_v13  ;;  %vm3424_vm2 = vcmp.lt.f32.partialorder %v11144_v26, 0.0  ;;  %v8638_v26 = vpop.f32.mrb[94].mxu1  ;;  %v11192_v60 = vld [vmem:[#allocation66_spill] sm:$0xff] }
 0x3ce   : > { %v3328_v38 = vsel %vm3136_vm1, %v3232_v61, %v3040_v56  ;;  %v2371_v4 = vmul.f32 %v8611_v59, %v8611_v59  ;;  %v8630_v28 = vand.u32 2147483647, %v11185_v23  ;;  %v8633_v57 = vadd.f32 %v4099_v63, %v8350_v46  ;;  %11187 = vst [vmem:[#allocation23_spill] sm:$0xff] %v8638_v26  ;;  %v8649_v53 = vpop.f32.mrb[95].mxu1 }
 0x3cf   : > { %v3903_v3 = vsel %vm3711_vm4, %v3807_v27, %v3615_v19  ;;  %v3520_v21 = vsub.f32 3.1415927, %v3328_v38  ;;  %v3041_v6 = vadd.f32 %v2945_v30, %v8555_v48  ;;  %v5009_v33 = vadd.f32 -0.32762277, %v2658_v9  ;;  %11189 = vst [vmem:[#allocation27_spill] sm:$0xff] %v8649_v53  ;;  %v11240_v53 = vld [vmem:[#allocation67_spill] sm:$0xff] }
 0x3d0   : > { %11186 = vst [vmem:[#allocation8_spill] sm:$0xff] %v8633_v57  ;;  %v4100_v22 = vmul.f32 %v8094_v52, %v3903_v3  ;;  %v2467_v43 = vmul.f32 -0.046496473, %v2371_v4  ;;  %v8642_v36 = vand.u32 2147483647, %v11188_v35  ;;  %vm3712_vm1 = vcmp.lt.f32.partialorder %v11148_v49, 0.0 }
 0x3d1   : > { %v3616_v39 = vsel %vm3424_vm2, %v3520_v21, %v3328_v38  ;;  %v3233_v46 = vsub.f32 1.5707964, %v3041_v6  ;;  %v8647_v10 = vadd.f32 %v8413_v41, %v8218_v11  ;;  %v2850_v44 = vmul.f32 %v5009_v33, %v2370_v13  ;;  %v8663_v11 = vpop.f32.mrb[96].mxu1 }
 0x3d2   : > { %v8652_v48 = vadd.f32 %v4100_v22, %v8383_v47  ;;  %v3808_v54 = vsub.f32 0.0, %v3616_v39  ;;  %v2563_v7 = vadd.f32 0.15931422, %v2467_v43  ;;  %v1893_v49 = vmax.f32 %v8630_v28, %v8642_v36  ;;  %11191 = vst [vmem:[#allocation21_spill] sm:$0xff] %v8663_v11  ;;  %v8671_v62 = vpop.f32.mrb[97].mxu1 }
 0x3d3   : > { %v3329_v16 = vsel %vm3137_vm10, %v3233_v46, %v3041_v6  ;;  %v1989_v1 = vmin.f32 %v8630_v28, %v8642_v36  ;;  %vm3141_vm8 = vcmp.gt.f32.partialorder %v8642_v36, %v8630_v28  ;;  %v2946_v13 = vmul.f32 %v2850_v44, %v8574_v34  ;;  %11193 = vst [vmem:[#allocation59_spill] sm:$0xff] %v8671_v62  ;;  %v8688_v6 = vpop.f32.mrb[98].mxu1  ;;  %v11198_v44 = vld [vmem:[#allocation30_spill] sm:$0xff] }
 0x3d4   : > { %11190 = vst [vmem:[#allocation9_spill] sm:$0xff] %v8652_v48  ;;  %v3904_v47 = vsel %vm3712_vm1, %v3808_v54, %v3616_v39  ;;  %v3521_v41 = vsub.f32 3.1415927, %v3329_v16  ;;  %v2659_v56 = vmul.f32 %v2563_v7, %v2371_v4  ;;  %vm3425_vm10 = vcmp.lt.f32.partialorder %v11153_v20, 0.0  ;;  %v11195_v20 = vld [vmem:[#allocation17_spill] sm:$0xff]  ;;  %11196 = vst [vmem:[#allocation43_spill] sm:$0xff] %v8688_v6 }
 0x3d5   : > { %v5891_v29 = vpop.eup %5890  ;;  %v4101_v17 = vmul.f32 %v8094_v52, %v3904_v47  ;;  %v2085_v15 = vadd.f32 1e-12, %v1893_v49  ;;  %v8669_v40 = vand.u32 2147483647, %v11192_v60  ;;  %v3042_v61 = vadd.f32 %v2946_v13, %v8574_v34  ;;  %v8696_v33 = vpop.f32.mrb[99].mxu1  ;;  %v11201_v13 = vld [vmem:[#allocation3_spill] sm:$0xff] }
 0x3d6   : > { %v3617_v19 = vsel %vm3425_vm10, %v3521_v41, %v3329_v16  ;;  %v5010_v63 = vadd.f32 -0.32762277, %v2659_v56  ;;  %v8677_v27 = vmul.f32 %v5891_v29, %v1988_v42  ;;  %v8683_v38 = vand.u32 2147483647, %v11195_v20  ;;  %11197 = vst [vmem:[#allocation36_spill] sm:$0xff] %v8696_v33  ;;  %v11199_v16 = vld [vmem:[#allocation24_spill] sm:$0xff] }
 0x3d7   : > { %v8680_v30 = vadd.f32 %v4101_v17, %v8418_v37  ;;  %v3809_v9 = vsub.f32 0.0, %v3617_v19  ;;  %5892 = vrcp.f32 %v2085_v15  ;;  %vm3713_vm13 = vcmp.lt.f32.partialorder %v11155_v0, 0.0  ;;  %v11203_v29 = vld [vmem:[#allocation71_spill] sm:$0xff]  ;;  %v8719_v15 = vpop.f32.mrb[100].mxu1 }
 0x3d8   : > { %v3234_v3 = vsub.f32 1.5707964, %v3042_v61  ;;  %v2851_v21 = vmul.f32 %v5010_v63, %v2371_v4  ;;  %v2372_v34 = vmul.f32 %v8677_v27, %v8677_v27  ;;  %v1894_v42 = vmax.f32 %v8669_v40, %v8683_v38  ;;  %11204 = vst [vmem:[#allocation12_spill] sm:$0xff] %v8719_v15  ;;  %v11205_v63 = vld [vmem:[#allocation13_spill] sm:$0xff] }
 0x3d9   : > { %11194 = vst [vmem:[#allocation48_spill] sm:$0xff] %v8680_v30  ;;  %v3905_v22 = vsel %vm3713_vm13, %v3809_v9, %v3617_v19  ;;  %vm3142_vm11 = vcmp.gt.f32.partialorder %v8683_v38, %v8669_v40  ;;  %vm3426_vm14 = vcmp.lt.f32.partialorder %v11163_v55, 0.0  ;;  %v8706_v7 = vadd.f32 %v11198_v44, %v8272_v25 }
 0x3da   : > { %v4102_v0 = vmul.f32 %v8094_v52, %v3905_v22  ;;  %v3330_v4 = vsel %vm3138_vm5, %v3234_v3, %v3042_v61  ;;  %v2947_v43 = vmul.f32 %v2851_v21, %v8611_v59  ;;  %v2468_v39 = vmul.f32 -0.046496473, %v2372_v34  ;;  %v11207_v3 = vld [vmem:[#allocation51_spill] sm:$0xff]  ;;  %v11208_v21 = vld [vmem:[#allocation54_spill] sm:$0xff]  ;;  %v11209_v22 = vld [vmem:[#allocation40_spill] sm:$0xff] }
 0x3db   : > { %v3522_v46 = vsub.f32 3.1415927, %v3330_v4  ;;  %v2086_v54 = vadd.f32 1e-12, %v1894_v42  ;;  %v8713_v32 = vand.u32 2147483647, %v11201_v13  ;;  %v4092_v56 = vmul.f32 %v8094_v52, %v11202_v50 }
 0x3dc   : > { %v8709_v49 = vadd.f32 %v4102_v0, %v11199_v16  ;;  %v3043_v47 = vadd.f32 %v2947_v43, %v8611_v59  ;;  %v2564_v41 = vadd.f32 0.15931422, %v2468_v39  ;;  %v4093_v55 = vmul.f32 %v8094_v52, %v11203_v29  ;;  %v8724_v59 = vpop.f32.mrb[101].mxu1  ;;  %v11210_v0 = vld [vmem:[#allocation19_spill] sm:$0xff] }
 0x3dd   : > { %v3618_v17 = vsel %vm3426_vm14, %v3522_v46, %v3330_v4  ;;  %5894 = vrcp.f32 %v2086_v54  ;;  %v8722_v9 = vand.u32 2147483647, %v11205_v63  ;;  %11206 = vst [vmem:[#allocation50_spill] sm:$0xff] %v8724_v59  ;;  %vm3714_vm5 = vcmp.lt.f32.partialorder %v11207_v3, 0.0 }
 0x3de   : > { %11200 = vst [vmem:[#allocation26_spill] sm:$0xff] %v8709_v49  ;;  %v3810_v25 = vsub.f32 0.0, %v3618_v17  ;;  %v3235_v19 = vsub.f32 1.5707964, %v3043_v47  ;;  %v2660_v61 = vmul.f32 %v2564_v41, %v2372_v34  ;;  %vm3427_vm3 = vcmp.lt.f32.partialorder %v11208_v21, 0.0  ;;  %v11218_v21 = vld [vmem:[#allocation31_spill] sm:$0xff] }
 0x3df   : > { %v8729_v42 = vadd.f32 %v4092_v56, %v11209_v22  ;;  %v8732_v4 = vand.u32 2147483647, %v11210_v0  ;;  %v1895_v54 = vmax.f32 %v8713_v32, %v8722_v9  ;;  %v1991_v50 = vmin.f32 %v8713_v32, %v8722_v9  ;;  %v8744_v56 = vpop.f32.mrb[102].mxu1  ;;  %v11216_v22 = vld [vmem:[#allocation10_spill] sm:$0xff] }
 0x3e0   : > { %v3906_v43 = vsel %vm3714_vm5, %v3810_v25, %v3618_v17  ;;  %v3331_v39 = vsel %vm3139_vm15, %v3235_v19, %v3043_v47  ;;  %v5011_v46 = vadd.f32 -0.32762277, %v2660_v61  ;;  %vm3143_vm9 = vcmp.gt.f32.partialorder %v8722_v9, %v8713_v32  ;;  %11211 = vst [vmem:[#allocation62_spill] sm:$0xff] %v8744_v56  ;;  %v11212_v47 = vld [vmem:[#allocation28_spill] sm:$0xff]  ;;  %v8754_v25 = vpop.f32.mrb[103].mxu1  ;;  %v11214_v19 = vld [vmem:[#allocation11_spill] sm:$0xff] }
 0x3e1   : > { %v5893_v44 = vpop.eup %5892  ;;  %v4103_v16 = vmul.f32 %v8094_v52, %v3906_v43  ;;  %v3523_v41 = vsub.f32 3.1415927, %v3331_v39  ;;  %v2087_v31 = vadd.f32 1e-12, %v1895_v54  ;;  %v8752_v17 = vand.u32 2147483647, %v11212_v47 }
 0x3e2   : > { %v2852_v29 = vmul.f32 %v5011_v46, %v2372_v34  ;;  %v8749_v24 = vmul.f32 %v5893_v44, %v1989_v1  ;;  %11213 = vst [vmem:[#allocation25_spill] sm:$0xff] %v8754_v25  ;;  %vm3715_vm15 = vcmp.lt.f32.partialorder %v11216_v22, 0.0  ;;  %v11217_v34 = vld [vmem:[#allocation56_spill] sm:$0xff]  ;;  %v11221_v25 = vld [vmem:[#allocation63_spill] sm:$0xff]  ;;  %v11222_v15 = vmin.f32 %v8669_v40, %v8683_v38 }
 0x3e3   : > { %v8757_v61 = vadd.f32 %v4103_v16, %v11214_v19  ;;  %v3619_v3 = vsel %vm3427_vm3, %v3523_v41, %v3331_v39  ;;  %v8763_v43 = vadd.f32 %v4093_v55, %v11217_v34  ;;  %5896 = vrcp.f32 %v2087_v31  ;;  %v8777_v55 = vpop.f32.mrb[104].mxu1 }
 0x3e4   : > { %v3811_v46 = vsub.f32 0.0, %v3619_v3  ;;  %v2948_v1 = vmul.f32 %v2852_v29, %v8677_v27  ;;  %v2373_v54 = vmul.f32 %v8749_v24, %v8749_v24  ;;  %v1896_v44 = vmax.f32 %v8732_v4, %v8752_v17  ;;  %11219 = vst [vmem:[#allocation18_spill] sm:$0xff] %v8777_v55  ;;  %v8780_v22 = vpop.f32.mrb[105].mxu1 }
 0x3e5   : > { %11215 = vst [vmem:[#allocation49_spill] sm:$0xff] %v8757_v61  ;;  %vm3144_vm7 = vcmp.gt.f32.partialorder %v8752_v17, %v8732_v4  ;;  %v8775_v39 = vand.u32 2147483647, %v11218_v21  ;;  %11220 = vst [vmem:[#allocation57_spill] sm:$0xff] %v8780_v22  ;;  %v8784_v16 = vand.u32 2147483647, %v11221_v25 }
 0x3e6   : > { %v3907_v41 = vsel %vm3715_vm15, %v3811_v46, %v3619_v3  ;;  %v3044_v29 = vadd.f32 %v2948_v1, %v8677_v27  ;;  %v2469_v19 = vmul.f32 -0.046496473, %v2373_v54  ;;  %v2088_v37 = vadd.f32 1e-12, %v1896_v44  ;;  %v11223_v3 = vld [vmem:[#allocation64_spill] sm:$0xff] }
 0x3e7   : > { %v5895_v31 = vpop.eup %5894  ;;  %v4104_v34 = vmul.f32 %v8094_v52, %v3907_v41  ;;  %v8792_v46 = vand.u32 2147483647, %v11223_v3  ;;  %v1897_v1 = vmax.f32 %v8775_v39, %v8784_v16  ;;  %v8801_v41 = vpop.f32.mrb[106].mxu1  ;;  %vm3145_vm6 = vcmp.gt.f32.partialorder %v8784_v16, %v8775_v39 }
 0x3e8   : > { %v3236_v56 = vsub.f32 1.5707964, %v3044_v29  ;;  %v2565_v59 = vadd.f32 0.15931422, %v2469_v19  ;;  %v8789_v33 = vmul.f32 %v5895_v31, %v11222_v15  ;;  %5898 = vrcp.f32 %v2088_v37  ;;  %11225 = vst [vmem:[#allocation29_spill] sm:$0xff] %v8801_v41  ;;  %v11227_v41 = vld [vmem:[#allocation55_spill] sm:$0xff] }
 0x3e9   : > { %v8795_v27 = vadd.f32 %v4104_v34, %v8546_v2  ;;  %v8810_v2 = vpop.f32.mrb[107].mxu1  ;;  %vm3428_vm0 = vcmp.lt.f32.partialorder %v11182_v45, 0.0  ;;  %v2089_v34 = vadd.f32 1e-12, %v1897_v1  ;;  %v8814_v55 = vand.u32 2147483647, %v11227_v41 }
 0x3ea   : > { %v3332_v15 = vsel %vm3140_vm12, %v3236_v56, %v3044_v29  ;;  %v2661_v19 = vmul.f32 %v2565_v59, %v2373_v54  ;;  %v2374_v31 = vmul.f32 %v8789_v33, %v8789_v33  ;;  %11226 = vst [vmem:[#allocation65_spill] sm:$0xff] %v8810_v2  ;;  %vm3716_vm4 = vcmp.lt.f32.partialorder %v11183_v18, 0.0  ;;  %v8820_v56 = vpop.f32.mrb[108].mxu1 }
 0x3eb   : > { %11224 = vst [vmem:[#allocation58_spill] sm:$0xff] %v8795_v27  ;;  %v3524_v37 = vsub.f32 3.1415927, %v3332_v15  ;;  %5900 = vrcp.f32 %v2089_v34  ;;  %v8818_v59 = vand.u32 2147483647, %v11228_v12  ;;  %11229 = vst [vmem:[#allocation66_spill] sm:$0xff] %v8820_v56  ;;  %v1898_v1 = vmax.f32 %v8792_v46, %v8814_v55 }
 0x3ec   : > { %v5012_v44 = vadd.f32 -0.32762277, %v2661_v19  ;;  %v2470_v22 = vmul.f32 -0.046496473, %v2374_v31  ;;  %v8824_v19 = vpop.f32.mrb[109].mxu1  ;;  %vm3146_vm12 = vcmp.gt.f32.partialorder %v8814_v55, %v8792_v46  ;;  %vm3429_vm1 = vcmp.lt.f32.partialorder %v11185_v23, 0.0 }
 0x3ed   : > { %v3620_v51 = vsel %vm3428_vm0, %v3524_v37, %v3332_v15  ;;  %v5897_v29 = vpop.eup %5896  ;;  %11230 = vst [vmem:[#allocation17_spill] sm:$0xff] %v8824_v19  ;;  %v11231_v15 = vld [vmem:[#allocation4_spill] sm:$0xff]  ;;  %v11233_v18 = vmin.f32 %v8732_v4, %v8752_v17  ;;  %vm3717_vm10 = vcmp.lt.f32.partialorder %v11188_v35, 0.0  ;;  %vm3430_vm13 = vcmp.lt.f32.partialorder %v11192_v60, 0.0 }
 0x3ee   : > { %v3812_v2 = vsub.f32 0.0, %v3620_v51  ;;  %v2853_v6 = vmul.f32 %v5012_v44, %v2373_v54  ;;  %v2566_v45 = vadd.f32 0.15931422, %v2470_v22  ;;  %v8826_v62 = vmul.f32 %v5897_v29, %v1991_v50 }
 0x3ef   : > { %v8833_v37 = vand.u32 2147483647, %v11231_v15  ;;  %v2090_v44 = vadd.f32 1e-12, %v1898_v1  ;;  %vm3718_vm14 = vcmp.lt.f32.partialorder %v11195_v20, 0.0  ;;  %vm3431_vm5 = vcmp.lt.f32.partialorder %v11201_v13, 0.0 }
 0x3f0   : > { %v3908_v34 = vsel %vm3716_vm4, %v3812_v2, %v3620_v51  ;;  %v2949_v54 = vmul.f32 %v2853_v6, %v8749_v24  ;;  %v2662_v22 = vmul.f32 %v2566_v45, %v2374_v31  ;;  %v2375_v50 = vmul.f32 %v8826_v62, %v8826_v62 }
 0x3f1   : > { %v4105_v56 = vmul.f32 %v8094_v52, %v3908_v34  ;;  %v1899_v29 = vmax.f32 %v8818_v59, %v8833_v37  ;;  %5902 = vrcp.f32 %v2090_v44  ;;  %vm3147_vm2 = vcmp.gt.f32.partialorder %v8833_v37, %v8818_v59 }
 0x3f2   : > { %v3045_v19 = vadd.f32 %v2949_v54, %v8749_v24  ;;  %v5013_v27 = vadd.f32 -0.32762277, %v2662_v22  ;;  %v5899_v6 = vpop.eup %5898  ;;  %v2471_v51 = vmul.f32 -0.046496473, %v2375_v50  ;;  %v11234_v24 = vld [vmem:[#allocation20_spill] sm:$0xff]  ;;  %vm3432_vm15 = vcmp.lt.f32.partialorder %v11210_v0, 0.0 }
 0x3f3   : > { %v8847_v2 = vadd.f32 %v4105_v56, %v8619_v14  ;;  %v2091_v45 = vadd.f32 1e-12, %v1899_v29  ;;  %v8853_v11 = vmul.f32 %v5899_v6, %v11233_v18  ;;  %v8856_v54 = vand.u32 2147483647, %v11234_v24  ;;  %v11235_v14 = vld [vmem:[#allocation33_spill] sm:$0xff]  ;;  %v8870_v6 = vpop.f32.mrb[110].mxu1 }
 0x3f4   : > { %v3237_v1 = vsub.f32 1.5707964, %v3045_v19  ;;  %v2854_v34 = vmul.f32 %v5013_v27, %v2374_v31  ;;  %v2567_v22 = vadd.f32 0.15931422, %v2471_v51  ;;  %v8860_v56 = vand.u32 2147483647, %v11235_v14 }
 0x3f5   : > { %11232 = vst [vmem:[#allocation30_spill] sm:$0xff] %v8847_v2  ;;  %5904 = vrcp.f32 %v2091_v45  ;;  %v11236_v31 = vld [vmem:[#allocation2_spill] sm:$0xff]  ;;  %v2376_v29 = vmul.f32 %v8853_v11, %v8853_v11  ;;  %11237 = vst [vmem:[#allocation24_spill] sm:$0xff] %v8870_v6  ;;  %v5901_v51 = vpop.eup %5900  ;;  %v8876_v36 = vpop.f32.mrb[111].mxu1  ;;  %vm3720_vm0 = vcmp.lt.f32.partialorder %v11212_v47, 0.0  ;;  %vm3721_vm4 = vcmp.lt.f32.partialorder %v11221_v25, 0.0 }
 0x3f6   : > { %v3333_v44 = vsel %vm3141_vm8, %v3237_v1, %v3045_v19  ;;  %v2950_v27 = vmul.f32 %v2854_v34, %v8789_v33  ;;  %v4125_v18 = vsub.s32 5, %v11236_v31  ;;  %v2663_v2 = vmul.f32 %v2567_v22, %v2375_v50  ;;  %11238 = vst [vmem:[#allocation3_spill] sm:$0xff] %v8876_v36 }
 0x3f7   : > { %v3525_v45 = vsub.f32 3.1415927, %v3333_v44  ;;  %v1900_v61 = vmax.f32 %v8856_v54, %v8860_v56  ;;  %v2472_v1 = vmul.f32 -0.046496473, %v2376_v29  ;;  %v11239_v34 = vmin.f32 %v8775_v39, %v8784_v16 }
 0x3f8   : > { %v3046_v19 = vadd.f32 %v2950_v27, %v8789_v33  ;;  %vm3148_vm8 = vcmp.gt.f32.partialorder %v8860_v56, %v8856_v54  ;;  %v5014_v6 = vadd.f32 -0.32762277, %v2663_v2  ;;  %v8890_v36 = vand.u32 2147483647, %v11240_v53 }
 0x3f9   : > { %v8882_v31 = vmul.f32 %v5901_v51, %v11239_v34  ;;  %v3621_v22 = vsel %vm3429_vm1, %v3525_v45, %v3333_v44  ;;  %v2092_v28 = vadd.f32 1e-12, %v1900_v61  ;;  %v2568_v26 = vadd.f32 0.15931422, %v2472_v1  ;;  %v8897_v34 = vld [vmem:[%s10614_s2] sm:$0xff]  ;;  %v11241_v61 = vld [vmem:[#allocation68_spill] sm:$0xff] }
 0x3fa   : > { %v3813_v33 = vsub.f32 0.0, %v3621_v22  ;;  %v3238_v27 = vsub.f32 1.5707964, %v3046_v19  ;;  %v8900_v23 = vrot.slane %v8897_v34, %v4125_v18  ;;  %v2855_v44 = vmul.f32 %v5014_v6, %v2375_v50 }
 0x3fb   : > { %v2377_v51 = vmul.f32 %v8882_v31, %v8882_v31  ;;  %5906 = vrcp.f32 %v2092_v28  ;;  %v8903_v2 = vand.u32 2147483647, %v11241_v61  ;;  %v5903_v45 = vpop.eup %5902  ;;  %v2664_v30 = vmul.f32 %v2568_v26, %v2376_v29 }
 0x3fc   : > { %v3909_v1 = vsel %vm3717_vm10, %v3813_v33, %v3621_v22  ;;  %v3334_v49 = vsel %vm3142_vm11, %v3238_v27, %v3046_v19  ;;  %v2951_v50 = vmul.f32 %v2855_v44, %v8826_v62  ;;  %v11242_v18 = vmin.f32 %v8792_v46, %v8814_v55 }
 0x3fd   : > { %v2473_v5 = vmul.f32 -0.046496473, %v2377_v51  ;;  %v4106_v48 = vmul.f32 %v8094_v52, %v3909_v1  ;;  %v3526_v57 = vsub.f32 3.1415927, %v3334_v49  ;;  %v5015_v35 = vadd.f32 -0.32762277, %v2664_v30 }
 0x3fe   : > { %v8916_v6 = vmul.f32 %v5903_v45, %v11242_v18  ;;  %v1901_v40 = vmax.f32 %v8890_v36, %v8903_v2  ;;  %v1997_v26 = vmin.f32 %v8890_v36, %v8903_v2  ;;  %v3047_v22 = vadd.f32 %v2951_v50, %v8826_v62 }
 0x3ff   : > { %v2569_v28 = vadd.f32 0.15931422, %v2473_v5  ;;  %v5905_v38 = vpop.eup %5904  ;;  %v8923_v52 = vadd.f32 %v4106_v48, %v8647_v10  ;;  %v3622_v19 = vsel %vm3430_vm13, %v3526_v57, %v3334_v49  ;;  %vm3719_vm11 = vcmp.lt.f32.partialorder %v11205_v63, 0.0 }
 0x400   : > { %v2378_v33 = vmul.f32 %v8916_v6, %v8916_v6  ;;  %v3814_v30 = vsub.f32 0.0, %v3622_v19  ;;  %v2856_v5 = vmul.f32 %v5015_v35, %v2376_v29  ;;  %v11243_v44 = vmin.f32 %v8818_v59, %v8833_v37 }
 0x401   : > { %v2665_v27 = vmul.f32 %v2569_v28, %v2377_v51  ;;  %v3239_v10 = vsub.f32 1.5707964, %v3047_v22  ;;  %v2093_v1 = vadd.f32 1e-12, %v1901_v40  ;;  %vm3149_vm3 = vcmp.gt.f32.partialorder %v8903_v2, %v8890_v36 }
 0x402   : > { %v8934_v45 = vmul.f32 %v5905_v38, %v11243_v44  ;;  %v2474_v48 = vmul.f32 -0.046496473, %v2378_v33  ;;  %v3910_v57 = vsel %vm3718_vm14, %v3814_v30, %v3622_v19  ;;  %v2952_v60 = vmul.f32 %v2856_v5, %v8853_v11  ;;  %v11244_v5 = vld [vmem:[#allocation69_spill] sm:$0xff] }
 0x403   : > { %v5016_v62 = vadd.f32 -0.32762277, %v2665_v27  ;;  %v4127_v29 = vmul.f32 %v8900_v23, %v3910_v57  ;;  %v3335_v50 = vsel %vm3143_vm9, %v3239_v10, %v3047_v22  ;;  %5908 = vrcp.f32 %v2093_v1  ;;  %v11246_v57 = vld [vmem:[#allocation70_spill] sm:$0xff] }
 0x404   : > { %v2379_v49 = vmul.f32 %v8934_v45, %v8934_v45  ;;  %v2570_v18 = vadd.f32 0.15931422, %v2474_v48  ;;  %v3527_v35 = vsub.f32 3.1415927, %v3335_v50  ;;  %v3048_v20 = vadd.f32 %v2952_v60, %v8853_v11 }
 0x405   : > { %v2857_v28 = vmul.f32 %v5016_v62, %v2377_v51  ;;  %v5907_v38 = vpop.eup %5906  ;;  %v8950_v19 = vadd.f32 %v4127_v29, %v8706_v7  ;;  %v8954_v27 = vand.u32 2147483647, %v11244_v5  ;;  %vm3433_vm9 = vcmp.lt.f32.partialorder %v11218_v21, 0.0 }
 0x406   : > { %v2475_v40 = vmul.f32 -0.046496473, %v2379_v49  ;;  %v2666_v30 = vmul.f32 %v2570_v18, %v2378_v33  ;;  %v3623_v32 = vsel %vm3431_vm5, %v3527_v35, %v3335_v50  ;;  %v3240_v9 = vsub.f32 1.5707964, %v3048_v20  ;;  %v8977_v35 = vpop.f32.mrb[112].mxu1 }
 0x407   : > { %v2953_v22 = vmul.f32 %v2857_v28, %v8882_v31  ;;  %v3815_v11 = vsub.f32 0.0, %v3623_v32  ;;  %v11245_v7 = vmin.f32 %v8856_v54, %v8860_v56  ;;  %v8970_v60 = vand.u32 2147483647, %v11246_v57  ;;  %11247 = vst [vmem:[#allocation15_spill] sm:$0xff] %v8977_v35  ;;  %v8982_v28 = vpop.f32.mrb[113].mxu1  ;;  %v11262_v54 = vld [vmem:[#allocation46_spill] sm:$0xff] }
 0x408   : > { %v2571_v44 = vadd.f32 0.15931422, %v2475_v40  ;;  %v5017_v51 = vadd.f32 -0.32762277, %v2666_v30  ;;  %v3336_v48 = vsel %vm3144_vm7, %v3240_v9, %v3048_v20  ;;  %11248 = vst [vmem:[#allocation71_spill] sm:$0xff] %v8982_v28  ;;  %vm3434_vm7 = vcmp.lt.f32.partialorder %v11223_v3, 0.0 }
 0x409   : > { %v8963_v10 = vmul.f32 %v5907_v38, %v11245_v7  ;;  %v3049_v13 = vadd.f32 %v2953_v22, %v8882_v31  ;;  %v3911_v62 = vsel %vm3719_vm11, %v3815_v11, %v3623_v32  ;;  %v3528_v29 = vsub.f32 3.1415927, %v3336_v48  ;;  %v9007_v16 = vpop.f32.mrb[114].mxu1 }
 0x40a   : > { %v2667_v1 = vmul.f32 %v2571_v44, %v2379_v49  ;;  %v2858_v50 = vmul.f32 %v5017_v51, %v2378_v33  ;;  %v4128_v4 = vmul.f32 %v8900_v23, %v3911_v62  ;;  %v1902_v20 = vmax.f32 %v8954_v27, %v8970_v60  ;;  %11249 = vst [vmem:[#allocation13_spill] sm:$0xff] %v9007_v16 }
 0x40b   : > { %v2380_v18 = vmul.f32 %v8963_v10, %v8963_v10  ;;  %v3241_v17 = vsub.f32 1.5707964, %v3049_v13  ;;  %v3624_v63 = vsel %vm3432_vm15, %v3528_v29, %v3336_v48  ;;  %v1998_v38 = vmin.f32 %v8954_v27, %v8970_v60 }
 0x40c   : > { %v5018_v31 = vadd.f32 -0.32762277, %v2667_v1  ;;  %v2954_v33 = vmul.f32 %v2858_v50, %v8916_v6  ;;  %v8991_v30 = vadd.f32 %v4128_v4, %v8729_v42  ;;  %v3816_v32 = vsub.f32 0.0, %v3624_v63 }
 0x40d   : > { %v2476_v40 = vmul.f32 -0.046496473, %v2380_v18  ;;  %v3337_v9 = vsel %vm3145_vm6, %v3241_v17, %v3049_v13  ;;  %v5909_v44 = vpop.eup %5908  ;;  %v2094_v7 = vadd.f32 1e-12, %v1902_v20  ;;  %vm3150_vm6 = vcmp.gt.f32.partialorder %v8970_v60, %v8954_v27 }
 0x40e   : > { %v2859_v22 = vmul.f32 %v5018_v31, %v2379_v49  ;;  %v3529_v0 = vsub.f32 3.1415927, %v3337_v9  ;;  %v3050_v11 = vadd.f32 %v2954_v33, %v8916_v6  ;;  %v3912_v48 = vsel %vm3720_vm0, %v3816_v32, %v3624_v63  ;;  %v11252_v32 = vld [vmem:[#allocation37_spill] sm:$0xff] }
 0x40f   : > { %v2572_v51 = vadd.f32 0.15931422, %v2476_v40  ;;  %v9003_v42 = vmul.f32 %v5909_v44, %v1997_v26  ;;  %v4129_v39 = vmul.f32 %v8900_v23, %v3912_v48  ;;  %5910 = vrcp.f32 %v2094_v7  ;;  %v9015_v26 = vpop.f32.mrb[115].mxu1 }
 0x410   : > { %v2955_v1 = vmul.f32 %v2859_v22, %v8934_v45  ;;  %v3625_v6 = vsel %vm3433_vm9, %v3529_v0, %v3337_v9  ;;  %v3242_v49 = vsub.f32 1.5707964, %v3050_v11  ;;  %11250 = vst [vmem:[#allocation51_spill] sm:$0xff] %v9015_v26  ;;  %vm3722_vm1 = vcmp.lt.f32.partialorder %v11227_v41, 0.0  ;;  %v11253_v22 = vld [vmem:[#allocation38_spill] sm:$0xff] }
 0x411   : > { %v2668_v47 = vmul.f32 %v2572_v51, %v2380_v18  ;;  %v3817_v13 = vsub.f32 0.0, %v3625_v6  ;;  %v2381_v29 = vmul.f32 %v9003_v42, %v9003_v42  ;;  %v9018_v50 = vadd.f32 %v4129_v39, %v8763_v43  ;;  %v11251_v43 = vld [vmem:[#allocation16_spill] sm:$0xff]  ;;  %v9043_v51 = vpop.f32.mrb[116].mxu1 }
 0x412   : > { %v3051_v62 = vadd.f32 %v2955_v1, %v8934_v45  ;;  %v3338_v4 = vsel %vm3146_vm12, %v3242_v49, %v3050_v11  ;;  %vm3435_vm10 = vcmp.lt.f32.partialorder %v11228_v12, 0.0  ;;  %v9029_v40 = vand.u32 2147483647, %v11251_v43  ;;  %11254 = vst [vmem:[#allocation54_spill] sm:$0xff] %v9043_v51  ;;  %v9051_v37 = vpop.f32.mrb[117].mxu1 }
 0x413   : > { %v5019_v21 = vadd.f32 -0.32762277, %v2668_v47  ;;  %v3913_v17 = vsel %vm3721_vm4, %v3817_v13, %v3625_v6  ;;  %v3530_v45 = vsub.f32 3.1415927, %v3338_v4  ;;  %v2477_v20 = vmul.f32 -0.046496473, %v2381_v29 }
 0x414   : > { %v3243_v31 = vsub.f32 1.5707964, %v3051_v62  ;;  %v4130_v63 = vmul.f32 %v8900_v23, %v3913_v17  ;;  %v9037_v9 = vand.u32 2147483647, %v11252_v32  ;;  %11255 = vst [vmem:[#allocation40_spill] sm:$0xff] %v9051_v37  ;;  %vm3436_vm13 = vcmp.lt.f32.partialorder %v11234_v24, 0.0 }
 0x415   : > { %v2860_v33 = vmul.f32 %v5019_v21, %v2380_v18  ;;  %v3626_v55 = vsel %vm3434_vm7, %v3530_v45, %v3338_v4  ;;  %v2573_v25 = vadd.f32 0.15931422, %v2477_v20  ;;  %v11256_v4 = vld [vmem:[#allocation5_spill] sm:$0xff]  ;;  %v11257_v45 = vld [vmem:[#allocation34_spill] sm:$0xff]  ;;  %v9066_v20 = vpop.f32.mrb[118].mxu1  ;;  %vm3724_vm14 = vcmp.lt.f32.partialorder %v11235_v14, 0.0 }
 0x416   : > { %v3339_v46 = vsel %vm3147_vm2, %v3243_v31, %v3051_v62  ;;  %v9040_v44 = vadd.f32 %v4130_v63, %v11253_v22  ;;  %v3818_v0 = vsub.f32 0.0, %v3626_v55  ;;  %v1903_v3 = vmax.f32 %v9029_v40, %v9037_v9  ;;  %11258 = vst [vmem:[#allocation19_spill] sm:$0xff] %v9066_v20  ;;  %v11261_v22 = vld [vmem:[#allocation61_spill] sm:$0xff] }
 0x417   : > { %v3531_v11 = vsub.f32 3.1415927, %v3339_v46  ;;  %v2956_v18 = vmul.f32 %v2860_v33, %v8963_v10  ;;  %v2669_v7 = vmul.f32 %v2573_v25, %v2381_v29  ;;  %v1999_v59 = vmin.f32 %v9029_v40, %v9037_v9  ;;  %v11259_v33 = vld [vmem:[#allocation52_spill] sm:$0xff] }
 0x418   : > { %vm3151_vm12 = vcmp.gt.f32.partialorder %v9037_v9, %v9029_v40  ;;  %v3914_v48 = vsel %vm3722_vm1, %v3818_v0, %v3626_v55  ;;  %v2095_v13 = vadd.f32 1e-12, %v1903_v3  ;;  %vm3723_vm2 = vcmp.lt.f32.partialorder %v11231_v15, 0.0 }
 0x419   : > { %v3627_v1 = vsel %vm3435_vm10, %v3531_v11, %v3339_v46  ;;  %v3052_v39 = vadd.f32 %v2956_v18, %v8963_v10  ;;  %v4131_v6 = vmul.f32 %v8900_v23, %v3914_v48  ;;  %v5020_v47 = vadd.f32 -0.32762277, %v2669_v7  ;;  %v5911_v17 = vpop.eup %5910  ;;  %v9080_v46 = vpop.f32.mrb[119].mxu1  ;;  %v11265_v48 = vld [vmem:[#allocation39_spill] sm:$0xff] }
 0x41a   : > { %v3819_v49 = vsub.f32 0.0, %v3627_v1  ;;  %v9061_v21 = vand.u32 2147483647, %v11256_v4  ;;  %5912 = vrcp.f32 %v2095_v13  ;;  %v9075_v15 = vmul.f32 %v5911_v17, %v1998_v38  ;;  %11260 = vst [vmem:[#allocation28_spill] sm:$0xff] %v9080_v46  ;;  %v9096_v7 = vpop.f32.mrb[120].mxu1 }
 0x41b   : > { %v3244_v62 = vsub.f32 1.5707964, %v3052_v39  ;;  %v9064_v41 = vadd.f32 %v4131_v6, %v11257_v45  ;;  %v2861_v12 = vmul.f32 %v5020_v47, %v2381_v29  ;;  %v9078_v55 = vand.u32 2147483647, %v11259_v33  ;;  %11264 = vst [vmem:[#allocation10_spill] sm:$0xff] %v9096_v7 }
 0x41c   : > { %v3915_v31 = vsel %vm3723_vm2, %v3819_v49, %v3627_v1  ;;  %v9085_v0 = vand.u32 2147483647, %v11261_v22  ;;  %v2382_v38 = vmul.f32 %v9075_v15, %v9075_v15  ;;  %v9102_v1 = vand.u32 2147483647, %v11265_v48 }
 0x41d   : > { %v4132_v10 = vmul.f32 %v8900_v23, %v3915_v31  ;;  %v3340_v63 = vsel %vm3148_vm8, %v3244_v62, %v3052_v39  ;;  %v2957_v25 = vmul.f32 %v2861_v12, %v9003_v42  ;;  %v1904_v11 = vmax.f32 %v9061_v21, %v9078_v55  ;;  %v9104_v39 = vpop.f32.mrb[121].mxu1  ;;  %v11267_v31 = vld [vmem:[#allocation41_spill] sm:$0xff] }
 0x41e   : > { %v3532_v29 = vsub.f32 3.1415927, %v3340_v63  ;;  %vm3152_vm8 = vcmp.gt.f32.partialorder %v9078_v55, %v9061_v21  ;;  %11266 = vst [vmem:[#allocation56_spill] sm:$0xff] %v9104_v39  ;;  %v2478_v49 = vmul.f32 -0.046496473, %v2382_v38  ;;  %v1905_v62 = vmax.f32 %v9085_v0, %v9102_v1  ;;  %v9116_v14 = vpop.f32.mrb[122].mxu1 }
 0x41f   : > { %v9088_v56 = vadd.f32 %v4132_v10, %v11262_v54  ;;  %v3053_v3 = vadd.f32 %v2957_v25, %v9003_v42  ;;  %v2096_v47 = vadd.f32 1e-12, %v1904_v11  ;;  %vm3153_vm5 = vcmp.gt.f32.partialorder %v9102_v1, %v9085_v0  ;;  %11268 = vst [vmem:[#allocation31_spill] sm:$0xff] %v9116_v14  ;;  %v9122_v25 = vpop.f32.mrb[123].mxu1  ;;  %v11270_v42 = vld [vmem:[#allocation6_spill] sm:$0xff]  ;;  %v11279_v39 = vld [vmem:[#allocation60_spill] sm:$0xff] }
 0x420   : > { %v3628_v24 = vsel %vm3436_vm13, %v3532_v29, %v3340_v63  ;;  %v2574_v45 = vadd.f32 0.15931422, %v2478_v49  ;;  %v9114_v12 = vand.u32 2147483647, %v11267_v31  ;;  %v2097_v29 = vadd.f32 1e-12, %v1905_v62 }
 0x421   : > { %11263 = vst [vmem:[#allocation11_spill] sm:$0xff] %v9088_v56  ;;  %v3820_v6 = vsub.f32 0.0, %v3628_v24  ;;  %v3245_v13 = vsub.f32 1.5707964, %v3053_v3  ;;  %5914 = vrcp.f32 %v2096_v47  ;;  %11269 = vst [vmem:[#allocation63_spill] sm:$0xff] %v9122_v25  ;;  %vm3437_vm11 = vcmp.lt.f32.partialorder %v11240_v53, 0.0 }
 0x422   : > { %v2670_v11 = vmul.f32 %v2574_v45, %v2382_v38  ;;  %5916 = vrcp.f32 %v2097_v29  ;;  %v11272_v47 = vld [vmem:[#allocation14_spill] sm:$0xff]  ;;  %v9141_v62 = vpop.f32.mrb[124].mxu1  ;;  %v11274_v45 = vld [vmem:[#allocation44_spill] sm:$0xff]  ;;  %vm3725_vm15 = vcmp.lt.f32.partialorder %v11241_v61, 0.0  ;;  %v9173_v7 = vand.u32 2147483647, %v11279_v39 }
 0x423   : > { %v3916_v17 = vsel %vm3724_vm14, %v3820_v6, %v3628_v24  ;;  %v3341_v63 = vsel %vm3149_vm3, %v3245_v13, %v3053_v3  ;;  %v9125_v24 = vand.u32 2147483647, %v11270_v42  ;;  %11273 = vst [vmem:[#allocation55_spill] sm:$0xff] %v9141_v62  ;;  %vm3438_vm9 = vcmp.lt.f32.partialorder %v11244_v5, 0.0  ;;  %v11287_v5 = vld [vmem:[#allocation35_spill] sm:$0xff] }
 0x424   : > { %v4133_v10 = vmul.f32 %v8900_v23, %v3916_v17  ;;  %v3533_v54 = vsub.f32 3.1415927, %v3341_v63  ;;  %v5913_v6 = vpop.eup %5912  ;;  %v9132_v17 = vand.u32 2147483647, %v11272_v47  ;;  %v5021_v2 = vadd.f32 -0.32762277, %v2670_v11 }
 0x425   : > { %v9137_v3 = vmul.f32 %v5913_v6, %v1999_v59  ;;  %v1906_v13 = vmax.f32 %v9114_v12, %v9125_v24  ;;  %v2002_v53 = vmin.f32 %v9114_v12, %v9125_v24  ;;  %vm3154_vm3 = vcmp.gt.f32.partialorder %v9125_v24, %v9114_v12 }
 0x426   : > { %v9128_v49 = vadd.f32 %v4133_v10, %v8569_v58  ;;  %v3629_v36 = vsel %vm3437_vm11, %v3533_v54, %v3341_v63  ;;  %v9148_v10 = vand.u32 2147483647, %v11274_v45  ;;  %v9150_v63 = vpop.f32.mrb[125].mxu1  ;;  %v2862_v59 = vmul.f32 %v5021_v2, %v2382_v38 }
 0x427   : > { %v3821_v58 = vsub.f32 0.0, %v3629_v36  ;;  %11275 = vst [vmem:[#allocation32_spill] sm:$0xff] %v9150_v63  ;;  %v2383_v29 = vmul.f32 %v9137_v3, %v9137_v3  ;;  %v2098_v54 = vadd.f32 1e-12, %v1906_v13  ;;  %v9163_v38 = vpop.f32.mrb[126].mxu1  ;;  %v11277_v13 = vld [vmem:[#allocation42_spill] sm:$0xff] }
 0x428   : > { %11271 = vst [vmem:[#allocation64_spill] sm:$0xff] %v9128_v49  ;;  %v1907_v6 = vmax.f32 %v9132_v17, %v9148_v10  ;;  %vm3155_vm0 = vcmp.gt.f32.partialorder %v9148_v10, %v9132_v17  ;;  %v2958_v63 = vmul.f32 %v2862_v59, %v9075_v15  ;;  %11276 = vst [vmem:[#allocation4_spill] sm:$0xff] %v9163_v38  ;;  %vm3439_vm1 = vcmp.lt.f32.partialorder %v11251_v43, 0.0 }
 0x429   : > { %v3917_v11 = vsel %vm3725_vm15, %v3821_v58, %v3629_v36  ;;  %v2479_v61 = vmul.f32 -0.046496473, %v2383_v29  ;;  %5918 = vrcp.f32 %v2098_v54  ;;  %v9166_v36 = vand.u32 2147483647, %v11277_v13 }
 0x42a   : > { %v4134_v62 = vmul.f32 %v8900_v23, %v3917_v11  ;;  %v2099_v2 = vadd.f32 1e-12, %v1907_v6  ;;  %v3054_v18 = vadd.f32 %v2958_v63, %v9075_v15  ;;  %v9175_v11 = vpop.f32.mrb[127].mxu1  ;;  %v11281_v59 = vmin.f32 %v9061_v21, %v9078_v55  ;;  %v11282_v6 = vld [vmem:[#allocation45_spill] sm:$0xff]  ;;  %v11296_v21 = vld [vmem:[#allocation22_spill] sm:$0xff] }
 0x42b   : > { %v5915_v58 = vpop.eup %5914  ;;  %v2575_v14 = vadd.f32 0.15931422, %v2479_v61  ;;  %11280 = vst [vmem:[#allocation33_spill] sm:$0xff] %v9175_v11  ;;  %v9183_v38 = vand.u32 2147483647, %v11282_v6  ;;  %v1908_v15 = vmax.f32 %v9166_v36, %v9173_v7  ;;  %vm3156_vm4 = vcmp.gt.f32.partialorder %v9173_v7, %v9166_v36  ;;  %v9220_v26 = vpop.f32.mrb[128].mxu1 }
 0x42c   : > { %v9169_v25 = vadd.f32 %v4134_v62, %v8605_v8  ;;  %v9180_v54 = vmul.f32 %v5915_v58, %v11281_v59  ;;  %5920 = vrcp.f32 %v2099_v2  ;;  %v3246_v46 = vsub.f32 1.5707964, %v3054_v18  ;;  %v5917_v63 = vpop.eup %5916  ;;  %v11283_v2 = vld [vmem:[#allocation47_spill] sm:$0xff]  ;;  %11286 = vst [vmem:[#allocation67_spill] sm:$0xff] %v9220_v26 }
 0x42d   : > { %v2671_v8 = vmul.f32 %v2575_v14, %v2383_v29  ;;  %v9195_v58 = vand.u32 2147483647, %v11283_v2  ;;  %v11284_v62 = vmin.f32 %v9085_v0, %v9102_v1  ;;  %v2100_v20 = vadd.f32 1e-12, %v1908_v15 }
 0x42e   : > { %11278 = vst [vmem:[#allocation20_spill] sm:$0xff] %v9169_v25  ;;  %v2384_v61 = vmul.f32 %v9180_v54, %v9180_v54  ;;  %v3342_v14 = vsel %vm3150_vm6, %v3246_v46, %v3054_v18  ;;  %vm3726_vm6 = vcmp.lt.f32.partialorder %v11246_v57, 0.0  ;;  %vm3727_vm2 = vcmp.lt.f32.partialorder %v11252_v32, 0.0 }
 0x42f   : > { %v5022_v59 = vadd.f32 -0.32762277, %v2671_v8  ;;  %v9203_v11 = vmul.f32 %v5917_v63, %v11284_v62  ;;  %v3534_v37 = vsub.f32 3.1415927, %v3342_v14  ;;  %v1909_v25 = vmax.f32 %v9183_v38, %v9195_v58  ;;  %v11285_v8 = vld [vmem:[#allocation7_spill] sm:$0xff] }
 0x430   : > { %v2480_v51 = vmul.f32 -0.046496473, %v2384_v61  ;;  %5922 = vrcp.f32 %v2100_v20  ;;  %vm3157_vm7 = vcmp.gt.f32.partialorder %v9195_v58, %v9183_v38  ;;  %v9216_v15 = vand.u32 2147483647, %v11285_v8 }
 0x431   : > { %v2863_v49 = vmul.f32 %v5022_v59, %v2383_v29  ;;  %v2385_v27 = vmul.f32 %v9203_v11, %v9203_v11  ;;  %v3630_v60 = vsel %vm3438_vm9, %v3534_v37, %v3342_v14  ;;  %v2101_v18 = vadd.f32 1e-12, %v1909_v25 }
 0x432   : > { %v2576_v46 = vadd.f32 0.15931422, %v2480_v51  ;;  %v3822_v63 = vsub.f32 0.0, %v3630_v60  ;;  %v9225_v37 = vand.u32 2147483647, %v11287_v5  ;;  %v9227_v51 = vpop.f32.mrb[129].mxu1 }
 0x433   : > { %v5919_v62 = vpop.eup %5918  ;;  %v2959_v29 = vmul.f32 %v2863_v49, %v9137_v3  ;;  %v2481_v59 = vmul.f32 -0.046496473, %v2385_v27  ;;  %5924 = vrcp.f32 %v2101_v18  ;;  %11288 = vst [vmem:[#allocation68_spill] sm:$0xff] %v9227_v51  ;;  %vm3440_vm13 = vcmp.lt.f32.partialorder %v11256_v4, 0.0 }
 0x434   : > { %v2672_v20 = vmul.f32 %v2576_v46, %v2384_v61  ;;  %v9222_v16 = vmul.f32 %v5919_v62, %v2002_v53  ;;  %v3918_v25 = vsel %vm3726_vm6, %v3822_v63, %v3630_v60  ;;  %v1910_v46 = vmax.f32 %v9216_v15, %v9225_v37 }
 0x435   : > { %v3055_v57 = vadd.f32 %v2959_v29, %v9137_v3  ;;  %v2577_v14 = vadd.f32 0.15931422, %v2481_v59  ;;  %v4135_v49 = vmul.f32 %v8900_v23, %v3918_v25  ;;  %v11289_v60 = vmin.f32 %v9132_v17, %v9148_v10  ;;  %v11290_v29 = vld [vmem:[#allocation8_spill] sm:$0xff] }
 0x436   : > { %v5921_v56 = vpop.eup %5920  ;;  %v5023_v28 = vadd.f32 -0.32762277, %v2672_v20  ;;  %v2386_v53 = vmul.f32 %v9222_v16, %v9222_v16  ;;  %v2102_v51 = vadd.f32 1e-12, %v1910_v46  ;;  %vm3158_vm10 = vcmp.gt.f32.partialorder %v9225_v37, %v9216_v15 }
 0x437   : > { %v3247_v18 = vsub.f32 1.5707964, %v3055_v57  ;;  %v2673_v62 = vmul.f32 %v2577_v14, %v2385_v27  ;;  %v9239_v63 = vmul.f32 %v5921_v56, %v11289_v60  ;;  %v9244_v59 = vadd.f32 %v4135_v49, %v11290_v29 }
 0x438   : > { %v2864_v20 = vmul.f32 %v5023_v28, %v2384_v61  ;;  %v2482_v25 = vmul.f32 -0.046496473, %v2386_v53  ;;  %5926 = vrcp.f32 %v2102_v51  ;;  %v11291_v46 = vmin.f32 %v9166_v36, %v9173_v7 }
 0x439   : > { %v3343_v26 = vsel %vm3151_vm12, %v3247_v18, %v3055_v57  ;;  %v5024_v35 = vadd.f32 -0.32762277, %v2673_v62  ;;  %v2387_v14 = vmul.f32 %v9239_v63, %v9239_v63  ;;  %vm3728_vm12 = vcmp.lt.f32.partialorder %v11259_v33, 0.0 }
 0x43a   : > { %v3535_v56 = vsub.f32 3.1415927, %v3343_v26  ;;  %v2960_v60 = vmul.f32 %v2864_v20, %v9180_v54  ;;  %v2578_v3 = vadd.f32 0.15931422, %v2482_v25  ;;  %v5923_v49 = vpop.eup %5922  ;;  %vm3441_vm14 = vcmp.lt.f32.partialorder %v11261_v22, 0.0 }
 0x43b   : > { %v2865_v28 = vmul.f32 %v5024_v35, %v2385_v27  ;;  %v2483_v40 = vmul.f32 -0.046496473, %v2387_v14  ;;  %v9262_v18 = vmul.f32 %v5923_v49, %v11291_v46  ;;  %vm3729_vm11 = vcmp.lt.f32.partialorder %v11265_v48, 0.0 }
 0x43c   : > { %v3631_v9 = vsel %vm3439_vm1, %v3535_v56, %v3343_v26  ;;  %v3056_v61 = vadd.f32 %v2960_v60, %v9180_v54  ;;  %v2674_v57 = vmul.f32 %v2578_v3, %v2386_v53  ;;  %v11292_v54 = vld [vmem:[#allocation53_spill] sm:$0xff]  ;;  %v11293_v60 = vmin.f32 %v9183_v38, %v9195_v58 }
 0x43d   : > { %v3823_v62 = vsub.f32 0.0, %v3631_v9  ;;  %v2961_v51 = vmul.f32 %v2865_v28, %v9203_v11  ;;  %v2579_v35 = vadd.f32 0.15931422, %v2483_v40  ;;  %v5925_v27 = vpop.eup %5924  ;;  %v2388_v26 = vmul.f32 %v9262_v18, %v9262_v18 }
 0x43e   : > { %v3248_v29 = vsub.f32 1.5707964, %v3056_v61  ;;  %v5025_v43 = vadd.f32 -0.32762277, %v2674_v57  ;;  %v9270_v3 = vand.u32 2147483647, %v11292_v54  ;;  %v9278_v49 = vmul.f32 %v5925_v27, %v11293_v60 }
 0x43f   : > { %v3919_v20 = vsel %vm3727_vm2, %v3823_v62, %v3631_v9  ;;  %v3057_v25 = vadd.f32 %v2961_v51, %v9203_v11  ;;  %v2675_v56 = vmul.f32 %v2579_v35, %v2387_v14  ;;  %v2484_v46 = vmul.f32 -0.046496473, %v2388_v26  ;;  %v11294_v51 = vld [vmem:[#allocation9_spill] sm:$0xff] }
 0x440   : > { %v4136_v28 = vmul.f32 %v8900_v23, %v3919_v20  ;;  %v3344_v40 = vsel %vm3152_vm8, %v3248_v29, %v3056_v61  ;;  %v2866_v57 = vmul.f32 %v5025_v43, %v2386_v53  ;;  %v2389_v11 = vmul.f32 %v9278_v49, %v9278_v49  ;;  %v9295_v61 = vpop.f32.mrb[130].mxu1 }
 0x441   : > { %v3536_v32 = vsub.f32 3.1415927, %v3344_v40  ;;  %v3249_v9 = vsub.f32 1.5707964, %v3057_v25  ;;  %v5026_v62 = vadd.f32 -0.32762277, %v2675_v56 }
 0x442   : > { %v9288_v35 = vadd.f32 %v4136_v28, %v11294_v51  ;;  %vm3442_vm15 = vcmp.lt.f32.partialorder %v11267_v31, 0.0  ;;  %v2962_v27 = vmul.f32 %v2866_v57, %v9222_v16  ;;  %v2580_v20 = vadd.f32 0.15931422, %v2484_v46  ;;  %11297 = vst [vmem:[#allocation70_spill] sm:$0xff] %v9295_v61  ;;  %v9302_v60 = vpop.f32.mrb[131].mxu1  ;;  %v5927_v28 = vpop.eup %5926 }
 0x443   : > { %v9293_v55 = vand.u32 2147483647, %v11296_v21  ;;  %v3632_v53 = vsel %vm3440_vm13, %v3536_v32, %v3344_v40  ;;  %v3345_v29 = vsel %vm3153_vm5, %v3249_v9, %v3057_v25  ;;  %v2867_v43 = vmul.f32 %v5026_v62, %v2387_v14  ;;  %11298 = vst [vmem:[#allocation16_spill] sm:$0xff] %v9302_v60 }
 0x444   : > { %11295 = vst [vmem:[#allocation69_spill] sm:$0xff] %v9288_v35  ;;  %v2485_v56 = vmul.f32 -0.046496473, %v2389_v11  ;;  %v3824_v51 = vsub.f32 0.0, %v3632_v53  ;;  %v3537_v57 = vsub.f32 3.1415927, %v3345_v29  ;;  %v3058_v46 = vadd.f32 %v2962_v27, %v9222_v16 }
 0x445   : > { %v2676_v35 = vmul.f32 %v2580_v20, %v2388_v26  ;;  %vm3730_vm8 = vcmp.lt.f32.partialorder %v11270_v42, 0.0  ;;  %v2963_v61 = vmul.f32 %v2867_v43, %v9239_v63  ;;  %v11299_v40 = vmin.f32 %v9216_v15, %v9225_v37 }
 0x446   : > { %v2581_v4 = vadd.f32 0.15931422, %v2485_v56  ;;  %v1911_v1 = vmax.f32 %v9270_v3, %v9293_v55  ;;  %v3920_v14 = vsel %vm3728_vm12, %v3824_v51, %v3632_v53  ;;  %v3633_v16 = vsel %vm3441_vm14, %v3537_v57, %v3345_v29  ;;  %v11300_v53 = vld [vmem:[#allocation48_spill] sm:$0xff]  ;;  %v9334_v51 = vpop.f32.mrb[132].mxu1 }
 0x447   : > { %v9310_v0 = vmul.f32 %v5927_v28, %v11299_v40  ;;  %v3250_v25 = vsub.f32 1.5707964, %v3058_v46  ;;  %v5027_v32 = vadd.f32 -0.32762277, %v2676_v35  ;;  %v4137_v9 = vmul.f32 %v8900_v23, %v3920_v14  ;;  %11301 = vst [vmem:[#allocation37_spill] sm:$0xff] %v9334_v51  ;;  %v9343_v48 = vpop.f32.mrb[133].mxu1 }
 0x448   : > { %v3825_v62 = vsub.f32 0.0, %v3633_v16  ;;  %v3059_v27 = vadd.f32 %v2963_v61, %v9239_v63  ;;  %v2677_v20 = vmul.f32 %v2581_v4, %v2389_v11  ;;  %v2007_v22 = vmin.f32 %v9270_v3, %v9293_v55  ;;  %11302 = vst [vmem:[#allocation38_spill] sm:$0xff] %v9343_v48  ;;  %v11303_v40 = vld [vmem:[#allocation26_spill] sm:$0xff] }
 0x449   : > { %v3346_v43 = vsel %vm3154_vm3, %v3250_v25, %v3058_v46  ;;  %v2868_v56 = vmul.f32 %v5027_v32, %v2388_v26  ;;  %v2390_v33 = vmul.f32 %v9310_v0, %v9310_v0  ;;  %v9328_v29 = vadd.f32 %v4137_v9, %v11300_v53  ;;  %v11343_v48 = vld [vmem:[#allocation66_spill] sm:$0xff] }
 0x44a   : > { %v3921_v35 = vsel %vm3729_vm11, %v3825_v62, %v3633_v16  ;;  %v3538_v28 = vsub.f32 3.1415927, %v3346_v43  ;;  %v3251_v63 = vsub.f32 1.5707964, %v3059_v27  ;;  %v5028_v24 = vadd.f32 -0.32762277, %v2677_v20 }
 0x44b   : > { %v4138_v61 = vmul.f32 %v8900_v23, %v3921_v35  ;;  %v2964_v12 = vmul.f32 %v2868_v56, %v9262_v18  ;;  %v2486_v26 = vmul.f32 -0.046496473, %v2390_v33  ;;  %v2103_v4 = vadd.f32 1e-12, %v1911_v1  ;;  %v11305_v62 = vld [vmem:[#allocation23_spill] sm:$0xff]  ;;  %v11308_v35 = vld [vmem:[#allocation49_spill] sm:$0xff] }
 0x44c   : > { %v3634_v57 = vsel %vm3442_vm15, %v3538_v28, %v3346_v43  ;;  %v3347_v46 = vsel %vm3155_vm0, %v3251_v63, %v3059_v27  ;;  %vm3159_vm5 = vcmp.gt.f32.partialorder %v9293_v55, %v9270_v3  ;;  %vm3443_vm3 = vcmp.lt.f32.partialorder %v11272_v47, 0.0  ;;  %v11306_v47 = vld [vmem:[#allocation27_spill] sm:$0xff] }
 0x44d   : > { %v9346_v14 = vadd.f32 %v4138_v61, %v11303_v40  ;;  %v3826_v16 = vsub.f32 0.0, %v3634_v57  ;;  %v3539_v25 = vsub.f32 3.1415927, %v3347_v46  ;;  %v3060_v32 = vadd.f32 %v2964_v12, %v9262_v18 }
 0x44e   : > { %v2869_v31 = vmul.f32 %v5028_v24, %v2389_v11  ;;  %v2582_v9 = vadd.f32 0.15931422, %v2486_v26  ;;  %5928 = vrcp.f32 %v2103_v4  ;;  %v9353_v27 = vand.u32 2147483647, %v11305_v62  ;;  %v9365_v11 = vpop.f32.mrb[134].mxu1 }
 0x44f   : > { %11304 = vst [vmem:[#allocation5_spill] sm:$0xff] %v9346_v14  ;;  %v3922_v17 = vsel %vm3730_vm8, %v3826_v16, %v3634_v57  ;;  %v3635_v10 = vsel %vm3443_vm3, %v3539_v25, %v3347_v46  ;;  %v3252_v1 = vsub.f32 1.5707964, %v3060_v32  ;;  %vm3731_vm0 = vcmp.lt.f32.partialorder %v11274_v45, 0.0  ;;  %11307 = vst [vmem:[#allocation34_spill] sm:$0xff] %v9365_v11  ;;  %v9371_v24 = vpop.f32.mrb[135].mxu1 }
 0x450   : > { %v4139_v20 = vmul.f32 %v8900_v23, %v3922_v17  ;;  %v3827_v43 = vsub.f32 0.0, %v3635_v10  ;;  %v2965_v56 = vmul.f32 %v2869_v31, %v9278_v49  ;;  %v2678_v53 = vmul.f32 %v2582_v9, %v2390_v33  ;;  %11310 = vst [vmem:[#allocation61_spill] sm:$0xff] %v9371_v24  ;;  %v11311_v46 = vld [vmem:[#allocation21_spill] sm:$0xff]  ;;  %v9386_v31 = vpop.f32.mrb[136].mxu1  ;;  %v11315_v17 = vld [vmem:[#allocation59_spill] sm:$0xff] }
 0x451   : > { %vm3444_vm9 = vcmp.lt.f32.partialorder %v11277_v13, 0.0  ;;  %v3348_v42 = vsel %vm3156_vm4, %v3252_v1, %v3060_v32  ;;  %v9363_v18 = vand.u32 2147483647, %v11306_v47  ;;  %v9381_v4 = vand.u32 2147483647, %v11311_v46  ;;  %11314 = vst [vmem:[#allocation39_spill] sm:$0xff] %v9386_v31 }
 0x452   : > { %v9368_v28 = vadd.f32 %v4139_v20, %v11308_v35  ;;  %v3923_v63 = vsel %vm3731_vm0, %v3827_v43, %v3635_v10  ;;  %v3540_v61 = vsub.f32 3.1415927, %v3348_v42  ;;  %v3061_v12 = vadd.f32 %v2965_v56, %v9278_v49  ;;  %v11312_v49 = vld [vmem:[#allocation58_spill] sm:$0xff]  ;;  %v9396_v1 = vpop.f32.mrb[137].mxu1  ;;  %v11317_v35 = vld [vmem:[#allocation43_spill] sm:$0xff] }
 0x453   : > { %v4140_v45 = vmul.f32 %v8900_v23, %v3923_v63  ;;  %v5029_v13 = vadd.f32 -0.32762277, %v2678_v53  ;;  %v1912_v7 = vmax.f32 %v9353_v27, %v9363_v18  ;;  %vm3160_vm4 = vcmp.gt.f32.partialorder %v9363_v18, %v9353_v27  ;;  %11316 = vst [vmem:[#allocation41_spill] sm:$0xff] %v9396_v1 }
 0x454   : > { %11309 = vst [vmem:[#allocation52_spill] sm:$0xff] %v9368_v28  ;;  %v3636_v26 = vsel %vm3444_vm9, %v3540_v61, %v3348_v42  ;;  %v3253_v57 = vsub.f32 1.5707964, %v3061_v12  ;;  %vm3732_vm6 = vcmp.lt.f32.partialorder %v11279_v39, 0.0  ;;  %vm3445_vm1 = vcmp.lt.f32.partialorder %v11282_v6, 0.0  ;;  %v9415_v61 = vpop.f32.mrb[138].mxu1 }
 0x455   : > { %v9384_v40 = vadd.f32 %v4140_v45, %v11312_v49  ;;  %v3828_v16 = vsub.f32 0.0, %v3636_v26  ;;  %v2870_v25 = vmul.f32 %v5029_v13, %v2390_v33  ;;  %v2104_v32 = vadd.f32 1e-12, %v1912_v7  ;;  %11318 = vst [vmem:[#allocation6_spill] sm:$0xff] %v9415_v61  ;;  %v11337_v61 = vld [vmem:[#allocation57_spill] sm:$0xff] }
 0x456   : > { %v3349_v9 = vsel %vm3157_vm7, %v3253_v57, %v3061_v12  ;;  %v9394_v10 = vand.u32 2147483647, %v11315_v17  ;;  %v9413_v63 = vand.u32 2147483647, %v11317_v35  ;;  %v11319_v12 = vld [vmem:[#allocation30_spill] sm:$0xff]  ;;  %vm3733_vm2 = vcmp.lt.f32.partialorder %v11283_v2, 0.0 }
 0x457   : > { %11313 = vst [vmem:[#allocation46_spill] sm:$0xff] %v9384_v40  ;;  %v3924_v20 = vsel %vm3732_vm6, %v3828_v16, %v3636_v26  ;;  %v3541_v43 = vsub.f32 3.1415927, %v3349_v9  ;;  %v2966_v33 = vmul.f32 %v2870_v25, %v9310_v0  ;;  %5930 = vrcp.f32 %v2104_v32  ;;  %v9421_v26 = vpop.f32.mrb[139].mxu1  ;;  %v11322_v57 = vld [vmem:[#allocation2_spill] sm:$0xff]  ;;  %v11323_v16 = vld [vmem:[#allocation36_spill] sm:$0xff] }
 0x458   : > { %v5929_v56 = vpop.eup %5928  ;;  %v4141_v53 = vmul.f32 %v8900_v23, %v3924_v20  ;;  %v1913_v39 = vmax.f32 %v9381_v4, %v9394_v10  ;;  %vm3161_vm7 = vcmp.gt.f32.partialorder %v9394_v10, %v9381_v4  ;;  %11321 = vst [vmem:[#allocation44_spill] sm:$0xff] %v9421_v26  ;;  %v4161_v49 = vsub.s32 6, %v11322_v57 }
 0x459   : > { %v3637_v6 = vsel %vm3445_vm1, %v3541_v43, %v3349_v9  ;;  %v3062_v58 = vadd.f32 %v2966_v33, %v9310_v0  ;;  %v9410_v42 = vmul.f32 %v5929_v56, %v2007_v22  ;;  %v9427_v25 = vand.u32 2147483647, %v11323_v16  ;;  %v11324_v9 = vld [vmem:[#allocation12_spill] sm:$0xff] }
 0x45a   : > { %v9418_v45 = vadd.f32 %v4141_v53, %v11319_v12  ;;  %v3829_v13 = vsub.f32 0.0, %v3637_v6  ;;  %v2105_v7 = vadd.f32 1e-12, %v1913_v39  ;;  %vm3446_vm13 = vcmp.lt.f32.partialorder %v11285_v8, 0.0  ;;  %v9439_v53 = vpop.f32.mrb[140].mxu1  ;;  %v11326_v12 = vld [vmem:[#allocation50_spill] sm:$0xff] }
 0x45b   : > { %v3254_v0 = vsub.f32 1.5707964, %v3062_v58  ;;  %v2391_v22 = vmul.f32 %v9410_v42, %v9410_v42  ;;  %v9431_v20 = vand.u32 2147483647, %v11324_v9  ;;  %v1914_v56 = vmax.f32 %v9413_v63, %v9427_v25  ;;  %11325 = vst [vmem:[#allocation42_spill] sm:$0xff] %v9439_v53  ;;  %v11334_v53 = vld [vmem:[#allocation18_spill] sm:$0xff] }
 0x45c   : > { %11320 = vst [vmem:[#allocation14_spill] sm:$0xff] %v9418_v45  ;;  %v3925_v32 = vsel %vm3733_vm2, %v3829_v13, %v3637_v6  ;;  %5932 = vrcp.f32 %v2105_v7  ;;  %v2010_v6 = vmin.f32 %v9413_v63, %v9427_v25  ;;  %vm3162_vm12 = vcmp.gt.f32.partialorder %v9427_v25, %v9413_v63 }
 0x45d   : > { %v4142_v2 = vmul.f32 %v8900_v23, %v3925_v32  ;;  %v3350_v43 = vsel %vm3158_vm10, %v3254_v0, %v3062_v58  ;;  %v2487_v33 = vmul.f32 -0.046496473, %v2391_v22  ;;  %v9446_v13 = vand.u32 2147483647, %v11326_v12  ;;  %v9448_v23 = vpop.f32.mrb[141].mxu1 }
 0x45e   : > { %v3542_v39 = vsub.f32 3.1415927, %v3350_v43  ;;  %11327 = vst [vmem:[#allocation60_spill] sm:$0xff] %v9448_v23  ;;  %v9454_v37 = vrot.slane %v8897_v34, %v4161_v49  ;;  %v2106_v7 = vadd.f32 1e-12, %v1914_v56  ;;  %v11329_v34 = vld [vmem:[#allocation62_spill] sm:$0xff]  ;;  %v11331_v8 = vmin.f32 %v9353_v27, %v9363_v18 }
 0x45f   : > { %v9451_v15 = vadd.f32 %v4142_v2, %v8923_v52  ;;  %v2583_v58 = vadd.f32 0.15931422, %v2487_v33  ;;  %v1915_v32 = vmax.f32 %v9431_v20, %v9446_v13  ;;  %vm3163_vm10 = vcmp.gt.f32.partialorder %v9446_v13, %v9431_v20  ;;  %v9467_v33 = vpop.f32.mrb[142].mxu1 }
 0x460   : > { %v3638_v0 = vsel %vm3446_vm13, %v3542_v39, %v3350_v43  ;;  %5934 = vrcp.f32 %v2106_v7  ;;  %v9465_v49 = vand.u32 2147483647, %v11329_v34  ;;  %11330 = vst [vmem:[#allocation47_spill] sm:$0xff] %v9467_v33  ;;  %vm3734_vm14 = vcmp.lt.f32.partialorder %v11287_v5, 0.0  ;;  %v11332_v39 = vld [vmem:[#allocation25_spill] sm:$0xff]  ;;  %v9478_v23 = vpop.f32.mrb[143].mxu1 }
 0x461   : > { %11328 = vst [vmem:[#allocation45_spill] sm:$0xff] %v9451_v15  ;;  %v5931_v36 = vpop.eup %5930  ;;  %v3830_v52 = vsub.f32 0.0, %v3638_v0  ;;  %v2679_v2 = vmul.f32 %v2583_v58, %v2391_v22  ;;  %v2107_v56 = vadd.f32 1e-12, %v1915_v32  ;;  %v9476_v38 = vand.u32 2147483647, %v11332_v39 }
 0x462   : > { %v9473_v43 = vmul.f32 %v5931_v36, %v11331_v8  ;;  %11333 = vst [vmem:[#allocation7_spill] sm:$0xff] %v9478_v23  ;;  %v9481_v26 = vand.u32 2147483647, %v11334_v53  ;;  %v11339_v8 = vld [vmem:[#allocation29_spill] sm:$0xff]  ;;  %vm3447_vm8 = vcmp.lt.f32.partialorder %v11292_v54, 0.0  ;;  %vm3735_vm0 = vcmp.lt.f32.partialorder %v11296_v21, 0.0 }
 0x463   : > { %v3926_v58 = vsel %vm3734_vm14, %v3830_v52, %v3638_v0  ;;  %v5030_v7 = vadd.f32 -0.32762277, %v2679_v2  ;;  %5936 = vrcp.f32 %v2107_v56  ;;  %v1916_v36 = vmax.f32 %v9465_v49, %v9476_v38  ;;  %v9492_v0 = vpop.f32.mrb[144].mxu1 }
 0x464   : > { %v4163_v33 = vmul.f32 %v9454_v37, %v3926_v58  ;;  %v2392_v5 = vmul.f32 %v9473_v43, %v9473_v43  ;;  %vm3164_vm11 = vcmp.gt.f32.partialorder %v9476_v38, %v9465_v49  ;;  %11335 = vst [vmem:[#allocation35_spill] sm:$0xff] %v9492_v0  ;;  %v9498_v56 = vand.u32 2147483647, %v11337_v61  ;;  %v9509_v0 = vpop.f32.mrb[145].mxu1 }
 0x465   : > { %v2871_v32 = vmul.f32 %v5030_v7, %v2391_v22  ;;  %v2108_v23 = vadd.f32 1e-12, %v1916_v36  ;;  %v11338_v22 = vmin.f32 %v9381_v4, %v9394_v10  ;;  %v9507_v31 = vand.u32 2147483647, %v11339_v8  ;;  %11340 = vst [vmem:[#allocation53_spill] sm:$0xff] %v9509_v0  ;;  %v9524_v0 = vpop.f32.mrb[146].mxu1 }
 0x466   : > { %v5933_v52 = vpop.eup %5932  ;;  %v9495_v2 = vadd.f32 %v4163_v33, %v8950_v19  ;;  %v2488_v58 = vmul.f32 -0.046496473, %v2392_v5  ;;  %v1917_v19 = vmax.f32 %v9481_v26, %v9498_v56  ;;  %vm3165_vm15 = vcmp.gt.f32.partialorder %v9498_v56, %v9481_v26  ;;  %11342 = vst [vmem:[#allocation9_spill] sm:$0xff] %v9524_v0 }
 0x467   : > { %v2967_v1 = vmul.f32 %v2871_v32, %v9410_v42  ;;  %v9504_v7 = vmul.f32 %v5933_v52, %v11338_v22  ;;  %5938 = vrcp.f32 %v2108_v23  ;;  %v11345_v3 = vmin.f32 %v9431_v20, %v9446_v13 }
 0x468   : > { %11336 = vst [vmem:[#allocation8_spill] sm:$0xff] %v9495_v2  ;;  %v2584_v24 = vadd.f32 0.15931422, %v2488_v58  ;;  %v2109_v22 = vadd.f32 1e-12, %v1917_v19  ;;  %v11341_v58 = vld [vmem:[#allocation65_spill] sm:$0xff] }
 0x469   : > { %v3063_v36 = vadd.f32 %v2967_v1, %v9410_v42  ;;  %v2393_v32 = vmul.f32 %v9504_v7, %v9504_v7  ;;  %v9522_v23 = vand.u32 2147483647, %v11341_v58  ;;  %v9527_v1 = vand.u32 2147483647, %v11343_v48 }
 0x46a   : > { %v2680_v52 = vmul.f32 %v2584_v24, %v2392_v5  ;;  %v5935_v2 = vpop.eup %5934  ;;  %5940 = vrcp.f32 %v2109_v22  ;;  %v9533_v24 = vpop.f32.mrb[147].mxu1  ;;  %vm3736_vm6 = vcmp.lt.f32.partialorder %v11306_v47, 0.0  ;;  %vm3449_vm1 = vcmp.lt.f32.partialorder %v11311_v46, 0.0 }
 0x46b   : > { %v3255_v11 = vsub.f32 1.5707964, %v3063_v36  ;;  %v2489_v33 = vmul.f32 -0.046496473, %v2393_v32  ;;  %v9529_v57 = vmul.f32 %v5935_v2, %v2010_v6  ;;  %v1918_v51 = vmax.f32 %v9507_v31, %v9522_v23  ;;  %11344 = vst [vmem:[#allocation22_spill] sm:$0xff] %v9533_v24 }
 0x46c   : > { %v5031_v42 = vadd.f32 -0.32762277, %v2680_v52  ;;  %vm3166_vm3 = vcmp.gt.f32.partialorder %v9522_v23, %v9507_v31  ;;  %vm3737_vm2 = vcmp.lt.f32.partialorder %v11315_v17, 0.0  ;;  %vm3738_vm13 = vcmp.lt.f32.partialorder %v11323_v16, 0.0 }
 0x46d   : > { %v3351_v19 = vsel %vm3159_vm5, %v3255_v11, %v3063_v36  ;;  %v2585_v0 = vadd.f32 0.15931422, %v2489_v33  ;;  %v5937_v52 = vpop.eup %5936  ;;  %v2394_v22 = vmul.f32 %v9529_v57, %v9529_v57  ;;  %v2110_v45 = vadd.f32 1e-12, %v1918_v51  ;;  %v11346_v11 = vld [vmem:[#allocation17_spill] sm:$0xff] }
 0x46e   : > { %v3543_v6 = vsub.f32 3.1415927, %v3351_v19  ;;  %v2872_v2 = vmul.f32 %v5031_v42, %v2392_v5  ;;  %v9548_v55 = vmul.f32 %v5937_v52, %v11345_v3  ;;  %v9551_v33 = vand.u32 2147483647, %v11346_v11 }
 0x46f   : > { %v2681_v24 = vmul.f32 %v2585_v0, %v2393_v32  ;;  %vm3448_vm5 = vcmp.lt.f32.partialorder %v11305_v62, 0.0  ;;  %v2490_v42 = vmul.f32 -0.046496473, %v2394_v22  ;;  %5942 = vrcp.f32 %v2110_v45 }
 0x470   : > { %v3639_v36 = vsel %vm3447_vm8, %v3543_v6, %v3351_v19  ;;  %v2968_v5 = vmul.f32 %v2872_v2, %v9473_v43  ;;  %v2395_v0 = vmul.f32 %v9548_v55, %v9548_v55  ;;  %v1919_v52 = vmax.f32 %v9527_v1, %v9551_v33 }
 0x471   : > { %v3831_v51 = vsub.f32 0.0, %v3639_v36  ;;  %v5032_v15 = vadd.f32 -0.32762277, %v2681_v24  ;;  %v5939_v3 = vpop.eup %5938  ;;  %v2586_v40 = vadd.f32 0.15931422, %v2490_v42  ;;  %vm3167_vm9 = vcmp.gt.f32.partialorder %v9551_v33, %v9527_v1 }
 0x472   : > { %v3064_v60 = vadd.f32 %v2968_v5, %v9473_v43  ;;  %v2491_v19 = vmul.f32 -0.046496473, %v2395_v0  ;;  %v11347_v6 = vmin.f32 %v9465_v49, %v9476_v38  ;;  %v2111_v54 = vadd.f32 1e-12, %v1919_v52 }
 0x473   : > { %v3927_v45 = vsel %vm3735_vm0, %v3831_v51, %v3639_v36  ;;  %v2873_v24 = vmul.f32 %v5032_v15, %v2393_v32  ;;  %v2682_v42 = vmul.f32 %v2586_v40, %v2394_v22  ;;  %v9579_v15 = vpop.f32.mrb[148].mxu1  ;;  %vm3739_vm14 = vcmp.lt.f32.partialorder %v11326_v12, 0.0  ;;  %v11361_v12 = vld [vmem:[#allocation11_spill] sm:$0xff] }
 0x474   : > { %v9572_v2 = vmul.f32 %v5939_v3, %v11347_v6  ;;  %v4164_v43 = vmul.f32 %v9454_v37, %v3927_v45  ;;  %v3256_v5 = vsub.f32 1.5707964, %v3064_v60  ;;  %v2587_v21 = vadd.f32 0.15931422, %v2491_v19  ;;  %11348 = vst [vmem:[#allocation48_spill] sm:$0xff] %v9579_v15  ;;  %v5941_v32 = vpop.eup %5940  ;;  %v9597_v27 = vpop.f32.mrb[149].mxu1 }
 0x475   : > { %v2969_v28 = vmul.f32 %v2873_v24, %v9504_v7  ;;  %v5033_v40 = vadd.f32 -0.32762277, %v2682_v42  ;;  %5944 = vrcp.f32 %v2111_v54  ;;  %v11350_v15 = vmin.f32 %v9481_v26, %v9498_v56  ;;  %11352 = vst [vmem:[#allocation23_spill] sm:$0xff] %v9597_v27 }
 0x476   : > { %v2396_v36 = vmul.f32 %v9572_v2, %v9572_v2  ;;  %v9582_v51 = vadd.f32 %v4164_v43, %v8991_v30  ;;  %v3352_v3 = vsel %vm3160_vm4, %v3256_v5, %v3064_v60  ;;  %v2683_v24 = vmul.f32 %v2587_v21, %v2395_v0  ;;  %v11351_v30 = vld [vmem:[#allocation24_spill] sm:$0xff]  ;;  %v11353_v21 = vld [vmem:[#allocation3_spill] sm:$0xff] }
 0x477   : > { %v3544_v52 = vsub.f32 3.1415927, %v3352_v3  ;;  %v3065_v45 = vadd.f32 %v2969_v28, %v9504_v7  ;;  %v2874_v6 = vmul.f32 %v5033_v40, %v2394_v22  ;;  %v9592_v14 = vmul.f32 %v5941_v32, %v11350_v15 }
 0x478   : > { %11349 = vst [vmem:[#allocation26_spill] sm:$0xff] %v9582_v51  ;;  %v2492_v19 = vmul.f32 -0.046496473, %v2396_v36  ;;  %v9595_v43 = vand.u32 2147483647, %v11351_v30  ;;  %vm3450_vm4 = vcmp.lt.f32.partialorder %v11317_v35, 0.0  ;;  %v11354_v40 = vmin.f32 %v9507_v31, %v9522_v23 }
 0x479   : > { %v3640_v60 = vsel %vm3448_vm5, %v3544_v52, %v3352_v3  ;;  %v3257_v18 = vsub.f32 1.5707964, %v3065_v45  ;;  %v5034_v28 = vadd.f32 -0.32762277, %v2683_v24  ;;  %v5943_v54 = vpop.eup %5942  ;;  %v2970_v22 = vmul.f32 %v2874_v6, %v9529_v57 }
 0x47a   : > { %v2588_v7 = vadd.f32 0.15931422, %v2492_v19  ;;  %v3832_v5 = vsub.f32 0.0, %v3640_v60  ;;  %v2397_v42 = vmul.f32 %v9592_v14, %v9592_v14  ;;  %v9606_v15 = vand.u32 2147483647, %v11353_v21 }
 0x47b   : > { %v3353_v62 = vsel %vm3161_vm7, %v3257_v18, %v3065_v45  ;;  %v2875_v32 = vmul.f32 %v5034_v28, %v2395_v0  ;;  %v9614_v52 = vmul.f32 %v5943_v54, %v11354_v40  ;;  %v3066_v6 = vadd.f32 %v2970_v22, %v9529_v57 }
 0x47c   : > { %v2684_v3 = vmul.f32 %v2588_v7, %v2396_v36  ;;  %v3928_v24 = vsel %vm3736_vm6, %v3832_v5, %v3640_v60  ;;  %v3545_v19 = vsub.f32 3.1415927, %v3353_v62  ;;  %v2493_v51 = vmul.f32 -0.046496473, %v2397_v42 }
 0x47d   : > { %v4165_v27 = vmul.f32 %v9454_v37, %v3928_v24  ;;  %vm3451_vm7 = vcmp.lt.f32.partialorder %v11324_v9, 0.0  ;;  %v2971_v4 = vmul.f32 %v2875_v32, %v9548_v55  ;;  %v2398_v0 = vmul.f32 %v9614_v52, %v9614_v52 }
 0x47e   : > { %v5035_v10 = vadd.f32 -0.32762277, %v2684_v3  ;;  %v3641_v47 = vsel %vm3449_vm1, %v3545_v19, %v3353_v62  ;;  %v3258_v45 = vsub.f32 1.5707964, %v3066_v6  ;;  %v2589_v60 = vadd.f32 0.15931422, %v2493_v51 }
 0x47f   : > { %v1920_v57 = vmax.f32 %v9595_v43, %v9606_v15  ;;  %v9630_v18 = vadd.f32 %v4165_v27, %v9018_v50  ;;  %v3833_v28 = vsub.f32 0.0, %v3641_v47  ;;  %v3067_v7 = vadd.f32 %v2971_v4, %v9548_v55  ;;  %v5945_v5 = vpop.eup %5944 }
 0x480   : > { %v2876_v54 = vmul.f32 %v5035_v10, %v2396_v36  ;;  %v3354_v22 = vsel %vm3162_vm12, %v3258_v45, %v3066_v6  ;;  %v2685_v46 = vmul.f32 %v2589_v60, %v2397_v42  ;;  %v2494_v62 = vmul.f32 -0.046496473, %v2398_v0 }
 0x481   : > { %11355 = vst [vmem:[#allocation27_spill] sm:$0xff] %v9630_v18  ;;  %v2016_v51 = vmin.f32 %v9595_v43, %v9606_v15  ;;  %v3929_v50 = vsel %vm3737_vm2, %v3833_v28, %v3641_v47  ;;  %v3546_v27 = vsub.f32 3.1415927, %v3354_v22  ;;  %v3259_v32 = vsub.f32 1.5707964, %v3067_v7 }
 0x482   : > { %vm3452_vm8 = vcmp.lt.f32.partialorder %v11329_v34, 0.0  ;;  %v2972_v55 = vmul.f32 %v2876_v54, %v9572_v2  ;;  %v4166_v36 = vmul.f32 %v9454_v37, %v3929_v50  ;;  %v5036_v63 = vadd.f32 -0.32762277, %v2685_v46  ;;  %v11359_v50 = vld [vmem:[#allocation15_spill] sm:$0xff] }
 0x483   : > { %v2590_v25 = vadd.f32 0.15931422, %v2494_v62  ;;  %v11356_v3 = vmin.f32 %v9527_v1, %v9551_v33  ;;  %v3642_v24 = vsel %vm3450_vm4, %v3546_v27, %v3354_v22  ;;  %v3355_v17 = vsel %vm3163_vm10, %v3259_v32, %v3067_v7  ;;  %v11375_v33 = vld [vmem:[#allocation28_spill] sm:$0xff] }
 0x484   : > { %v3068_v19 = vadd.f32 %v2972_v55, %v9572_v2  ;;  %v2112_v6 = vadd.f32 1e-12, %v1920_v57  ;;  %v9656_v4 = vadd.f32 %v4166_v36, %v9040_v44  ;;  %v3834_v10 = vsub.f32 0.0, %v3642_v24  ;;  %v9667_v44 = vpop.f32.mrb[150].mxu1 }
 0x485   : > { %v9647_v40 = vmul.f32 %v5945_v5, %v11356_v3  ;;  %v3547_v47 = vsub.f32 3.1415927, %v3355_v17  ;;  %v2877_v45 = vmul.f32 %v5036_v63, %v2397_v42  ;;  %v2686_v28 = vmul.f32 %v2590_v25, %v2398_v0  ;;  %v9698_v3 = vpop.f32.mrb[151].mxu1 }
 0x486   : > { %11357 = vst [vmem:[#allocation49_spill] sm:$0xff] %v9656_v4  ;;  %v3260_v60 = vsub.f32 1.5707964, %v3068_v19  ;;  %5946 = vrcp.f32 %v2112_v6  ;;  %v3930_v35 = vsel %vm3738_vm13, %v3834_v10, %v3642_v24  ;;  %vm3168_vm12 = vcmp.gt.f32.partialorder %v9606_v15, %v9595_v43 }
 0x487   : > { %v2399_v54 = vmul.f32 %v9647_v40, %v9647_v40  ;;  %v3643_v20 = vsel %vm3451_vm7, %v3547_v47, %v3355_v17  ;;  %v2973_v13 = vmul.f32 %v2877_v45, %v9592_v14  ;;  %v4167_v2 = vmul.f32 %v9454_v37, %v3930_v35  ;;  %v11364_v35 = vld [vmem:[#allocation64_spill] sm:$0xff] }
 0x488   : > { %v3835_v42 = vsub.f32 0.0, %v3643_v20  ;;  %v3356_v57 = vsel %vm3164_vm11, %v3260_v60, %v3068_v19  ;;  %v5037_v7 = vadd.f32 -0.32762277, %v2686_v28  ;;  %vm3740_vm10 = vcmp.lt.f32.partialorder %v11332_v39, 0.0  ;;  %v11363_v28 = vld [vmem:[#allocation13_spill] sm:$0xff] }
 0x489   : > { %v3548_v16 = vsub.f32 3.1415927, %v3356_v57  ;;  %v3069_v9 = vadd.f32 %v2973_v13, %v9592_v14  ;;  %v2495_v5 = vmul.f32 -0.046496473, %v2399_v54  ;;  %v9676_v22 = vadd.f32 %v4167_v2, %v9064_v41  ;;  %v11360_v14 = vld [vmem:[#allocation71_spill] sm:$0xff] }
 0x48a   : > { %v3931_v46 = vsel %vm3739_vm14, %v3835_v42, %v3643_v20  ;;  %v2878_v62 = vmul.f32 %v5037_v7, %v2398_v0  ;;  %v9681_v27 = vand.u32 2147483647, %v11359_v50  ;;  %vm3453_vm11 = vcmp.lt.f32.partialorder %v11334_v53, 0.0  ;;  %v11367_v7 = vld [vmem:[#allocation51_spill] sm:$0xff] }
 0x48b   : > { %11358 = vst [vmem:[#allocation21_spill] sm:$0xff] %v9676_v22  ;;  %v4168_v38 = vmul.f32 %v9454_v37, %v3931_v46  ;;  %v3644_v49 = vsel %vm3452_vm8, %v3548_v16, %v3356_v57  ;;  %v3261_v32 = vsub.f32 1.5707964, %v3069_v9  ;;  %v2591_v55 = vadd.f32 0.15931422, %v2495_v5  ;;  %v9721_v57 = vpop.f32.mrb[152].mxu1 }
 0x48c   : > { %v3836_v36 = vsub.f32 0.0, %v3644_v49  ;;  %v2974_v41 = vmul.f32 %v2878_v62, %v9614_v52  ;;  %v9689_v63 = vand.u32 2147483647, %v11360_v14  ;;  %vm3741_vm0 = vcmp.lt.f32.partialorder %v11337_v61, 0.0  ;;  %11366 = vst [vmem:[#allocation43_spill] sm:$0xff] %v9721_v57 }
 0x48d   : > { %v9692_v0 = vadd.f32 %v4168_v38, %v11361_v12  ;;  %v3357_v25 = vsel %vm3165_vm15, %v3261_v32, %v3069_v9  ;;  %v2687_v34 = vmul.f32 %v2591_v55, %v2399_v54  ;;  %vm3454_vm5 = vcmp.lt.f32.partialorder %v11339_v8, 0.0  ;;  %v9730_v9 = vpop.f32.mrb[153].mxu1 }
 0x48e   : > { %v3932_v24 = vsel %vm3740_vm10, %v3836_v36, %v3644_v49  ;;  %v3549_v17 = vsub.f32 3.1415927, %v3357_v25  ;;  %v3070_v19 = vadd.f32 %v2974_v41, %v9614_v52  ;;  %v1921_v6 = vmax.f32 %v9681_v27, %v9689_v63  ;;  %11368 = vst [vmem:[#allocation30_spill] sm:$0xff] %v9730_v9  ;;  %v11369_v49 = vld [vmem:[#allocation20_spill] sm:$0xff]  ;;  %v11371_v41 = vld [vmem:[#allocation54_spill] sm:$0xff] }
 0x48f   : > { %11362 = vst [vmem:[#allocation58_spill] sm:$0xff] %v9692_v0  ;;  %v4169_v10 = vmul.f32 %v9454_v37, %v3932_v24  ;;  %v5038_v47 = vadd.f32 -0.32762277, %v2687_v34  ;;  %v2017_v26 = vmin.f32 %v9681_v27, %v9689_v63  ;;  %vm3169_vm15 = vcmp.gt.f32.partialorder %v9689_v63, %v9681_v27  ;;  %v11387_v27 = vld [vmem:[#allocation67_spill] sm:$0xff] }
 0x490   : > { %v5947_v56 = vpop.eup %5946  ;;  %v3645_v39 = vsel %vm3453_vm11, %v3549_v17, %v3357_v25  ;;  %v3262_v45 = vsub.f32 1.5707964, %v3070_v19  ;;  %v2113_v60 = vadd.f32 1e-12, %v1921_v6  ;;  %v9713_v52 = vand.u32 2147483647, %v11363_v28 }
 0x491   : > { %v9716_v20 = vadd.f32 %v4169_v10, %v11364_v35  ;;  %v3837_v13 = vsub.f32 0.0, %v3645_v39  ;;  %v2879_v2 = vmul.f32 %v5038_v47, %v2399_v54  ;;  %v2304_v42 = vmul.f32 %v5947_v56, %v2016_v51  ;;  %v11372_v17 = vld [vmem:[#allocation40_spill] sm:$0xff]  ;;  %v11373_v47 = vld [vmem:[#allocation19_spill] sm:$0xff] }
 0x492   : > { %v3358_v53 = vsel %vm3166_vm3, %v3262_v45, %v3070_v19  ;;  %5948 = vrcp.f32 %v2113_v60  ;;  %v9728_v16 = vand.u32 2147483647, %v11367_v7  ;;  %v9747_v12 = vand.u32 2147483647, %v11371_v41 }
 0x493   : > { %11365 = vst [vmem:[#allocation59_spill] sm:$0xff] %v9716_v20  ;;  %v3933_v54 = vsel %vm3741_vm0, %v3837_v13, %v3645_v39  ;;  %v3550_v5 = vsub.f32 3.1415927, %v3358_v53  ;;  %v2975_v51 = vmul.f32 %v2879_v2, %v9647_v40  ;;  %v2400_v46 = vmul.f32 %v2304_v42, %v2304_v42 }
 0x494   : > { %v4170_v62 = vmul.f32 %v9454_v37, %v3933_v54  ;;  %v1922_v8 = vmax.f32 %v9713_v52, %v9728_v16  ;;  %v2018_v31 = vmin.f32 %v9713_v52, %v9728_v16  ;;  %vm3170_vm3 = vcmp.gt.f32.partialorder %v9728_v16, %v9713_v52  ;;  %v11376_v54 = vld [vmem:[#allocation10_spill] sm:$0xff] }
 0x495   : > { %v3646_v23 = vsel %vm3454_vm5, %v3550_v5, %v3358_v53  ;;  %v3071_v38 = vadd.f32 %v2975_v51, %v9647_v40  ;;  %v2496_v61 = vmul.f32 -0.046496473, %v2400_v46  ;;  %vm3742_vm6 = vcmp.lt.f32.partialorder %v11341_v58, 0.0 }
 0x496   : > { %v9744_v32 = vadd.f32 %v4170_v62, %v11369_v49  ;;  %v3838_v55 = vsub.f32 0.0, %v3646_v23  ;;  %v2114_v36 = vadd.f32 1e-12, %v1922_v8  ;;  %v9751_v19 = vand.u32 2147483647, %v11372_v17 }
 0x497   : > { %v3263_v25 = vsub.f32 1.5707964, %v3071_v38  ;;  %v2592_v34 = vadd.f32 0.15931422, %v2496_v61  ;;  %v9758_v56 = vand.u32 2147483647, %v11373_v47 }
 0x498   : > { %11370 = vst [vmem:[#allocation36_spill] sm:$0xff] %v9744_v32  ;;  %v3934_v24 = vsel %vm3742_vm6, %v3838_v55, %v3646_v23  ;;  %5950 = vrcp.f32 %v2114_v36  ;;  %v1923_v58 = vmax.f32 %v9747_v12, %v9751_v19  ;;  %v2019_v45 = vmin.f32 %v9747_v12, %v9751_v19  ;;  %v11377_v23 = vld [vmem:[#allocation56_spill] sm:$0xff] }
 0x499   : > { %v4171_v40 = vmul.f32 %v9454_v37, %v3934_v24  ;;  %v3359_v6 = vsel %vm3167_vm9, %v3263_v25, %v3071_v38  ;;  %v2688_v10 = vmul.f32 %v2592_v34, %v2400_v46  ;;  %vm3171_vm1 = vcmp.gt.f32.partialorder %v9751_v19, %v9747_v12  ;;  %v4231_v12 = vld [vmem:[%s10613_s1 + $0x300] sm:$0xff]  ;;  %v11394_v19 = vld [vmem:[#allocation52_spill] sm:$0xff] }
 0x49a   : > { %v3551_v39 = vsub.f32 3.1415927, %v3359_v6  ;;  %vm3455_vm2 = vcmp.lt.f32.partialorder %v11343_v48, 0.0  ;;  %v9771_v35 = vand.u32 2147483647, %v11375_v33  ;;  %vm3743_vm9 = vcmp.lt.f32.partialorder %v11346_v11, 0.0  ;;  %5229 = vmatprep.mubr.f32.mxu0 %v4231_v12 }
 0x49b   : > { %v9767_v60 = vadd.f32 %v4171_v40, %v9244_v59  ;;  %v5039_v1 = vadd.f32 -0.32762277, %v2688_v10  ;;  %v2115_v53 = vadd.f32 1e-12, %v1923_v58  ;;  %v9775_v5 = vand.u32 2147483647, %v11376_v54 }
 0x49c   : > { %v5949_v13 = vpop.eup %5948  ;;  %v3647_v2 = vsel %vm3455_vm2, %v3551_v39, %v3359_v6  ;;  %v1924_v59 = vmax.f32 %v9758_v56, %v9771_v35  ;;  %v2020_v48 = vmin.f32 %v9758_v56, %v9771_v35  ;;  %vm3172_vm4 = vcmp.gt.f32.partialorder %v9771_v35, %v9758_v56  ;;  %v11378_v40 = vld [vmem:[#allocation69_spill] sm:$0xff]  ;;  %v11380_v39 = vld [vmem:[#allocation31_spill] sm:$0xff] }
 0x49d   : > { %11374 = vst [vmem:[#allocation12_spill] sm:$0xff] %v9767_v60  ;;  %v3839_v51 = vsub.f32 0.0, %v3647_v2  ;;  %v2880_v62 = vmul.f32 %v5039_v1, %v2400_v46  ;;  %v2305_v8 = vmul.f32 %v5949_v13, %v2017_v26  ;;  %5952 = vrcp.f32 %v2115_v53  ;;  %v11381_v53 = vld [vmem:[#allocation63_spill] sm:$0xff] }
 0x49e   : > { %v9784_v38 = vand.u32 2147483647, %v11377_v23  ;;  %v2116_v55 = vadd.f32 1e-12, %v1924_v59  ;;  %v9797_v58 = vand.u32 2147483647, %v11380_v39 }
 0x49f   : > { %v3935_v11 = vsel %vm3743_vm9, %v3839_v51, %v3647_v2  ;;  %v2976_v61 = vmul.f32 %v2880_v62, %v2304_v42  ;;  %v2401_v49 = vmul.f32 %v2305_v8, %v2305_v8  ;;  %v9800_v51 = vand.u32 2147483647, %v11381_v53 }
 0x4a0   : > { %v4172_v46 = vmul.f32 %v9454_v37, %v3935_v11  ;;  %v1925_v26 = vmax.f32 %v9775_v5, %v9784_v38  ;;  %v2021_v36 = vmin.f32 %v9775_v5, %v9784_v38  ;;  %vm3173_vm13 = vcmp.gt.f32.partialorder %v9784_v38, %v9775_v5 }
 0x4a1   : > { %v3072_v25 = vadd.f32 %v2976_v61, %v2304_v42  ;;  %v2497_v34 = vmul.f32 -0.046496473, %v2401_v49  ;;  %5954 = vrcp.f32 %v2116_v55  ;;  %vm3456_vm7 = vcmp.lt.f32.partialorder %v11351_v30, 0.0 }
 0x4a2   : > { %v5951_v24 = vpop.eup %5950  ;;  %v9794_v6 = vadd.f32 %v4172_v46, %v11378_v40  ;;  %v2117_v10 = vadd.f32 1e-12, %v1925_v26  ;;  %v1926_v11 = vmax.f32 %v9797_v58, %v9800_v51  ;;  %vm3174_vm14 = vcmp.gt.f32.partialorder %v9800_v51, %v9797_v58 }
 0x4a3   : > { %v3264_v1 = vsub.f32 1.5707964, %v3072_v25  ;;  %v2593_v13 = vadd.f32 0.15931422, %v2497_v34  ;;  %v2306_v2 = vmul.f32 %v5951_v24, %v2018_v31  ;;  %v11382_v31 = vld [vmem:[#allocation55_spill] sm:$0xff]  ;;  %vm3744_vm8 = vcmp.lt.f32.partialorder %v11353_v21, 0.0 }
 0x4a4   : > { %11379 = vst [vmem:[#allocation50_spill] sm:$0xff] %v9794_v6  ;;  %5956 = vrcp.f32 %v2117_v10  ;;  %v9813_v46 = vand.u32 2147483647, %v11382_v31  ;;  %v2118_v34 = vadd.f32 1e-12, %v1926_v11  ;;  %vm3457_vm10 = vcmp.lt.f32.partialorder %v11359_v50, 0.0 }
 0x4a5   : > { %v3360_v42 = vsel %vm3168_vm12, %v3264_v1, %v3072_v25  ;;  %v2689_v62 = vmul.f32 %v2593_v13, %v2401_v49  ;;  %v2402_v59 = vmul.f32 %v2306_v2, %v2306_v2  ;;  %v11383_v25 = vld [vmem:[#allocation32_spill] sm:$0xff]  ;;  %vm3745_vm11 = vcmp.lt.f32.partialorder %v11360_v14, 0.0 }
 0x4a6   : > { %v3552_v61 = vsub.f32 3.1415927, %v3360_v42  ;;  %v9817_v24 = vand.u32 2147483647, %v11383_v25  ;;  %5958 = vrcp.f32 %v2118_v34  ;;  %v11384_v34 = vld [vmem:[#allocation4_spill] sm:$0xff]  ;;  %vm3458_vm5 = vcmp.lt.f32.partialorder %v11363_v28, 0.0 }
 0x4a7   : > { %v5040_v30 = vadd.f32 -0.32762277, %v2689_v62  ;;  %v2498_v26 = vmul.f32 -0.046496473, %v2402_v59  ;;  %v5953_v43 = vpop.eup %5952  ;;  %v9862_v63 = vand.u32 2147483647, %v11387_v27 }
 0x4a8   : > { %v3648_v15 = vsel %vm3456_vm7, %v3552_v61, %v3360_v42  ;;  %v9819_v13 = vmul.f32 %v5953_v43, %v2019_v45  ;;  %v1927_v55 = vmax.f32 %v9813_v46, %v9817_v24  ;;  %vm3175_vm12 = vcmp.gt.f32.partialorder %v9817_v24, %v9813_v46 }
 0x4a9   : > { %v3840_v40 = vsub.f32 0.0, %v3648_v15  ;;  %v2881_v10 = vmul.f32 %v5040_v30, %v2401_v49  ;;  %v2594_v1 = vadd.f32 0.15931422, %v2498_v26  ;;  %v9833_v43 = vand.u32 2147483647, %v11384_v34 }
 0x4aa   : > { %v2403_v49 = vmul.f32 %v9819_v13, %v9819_v13  ;;  %v2119_v26 = vadd.f32 1e-12, %v1927_v55  ;;  %vm3459_vm6 = vcmp.lt.f32.partialorder %v11371_v41, 0.0  ;;  %v11390_v52 = vmin.f32 %v9813_v46, %v9817_v24 }
 0x4ab   : > { %v5955_v42 = vpop.eup %5954  ;;  %v3936_v21 = vsel %vm3744_vm8, %v3840_v40, %v3648_v15  ;;  %v2977_v11 = vmul.f32 %v2881_v10, %v2305_v8  ;;  %v2690_v61 = vmul.f32 %v2594_v1, %v2402_v59  ;;  %vm3460_vm2 = vcmp.lt.f32.partialorder %v11373_v47, 0.0  ;;  %v11397_v47 = vld [vmem:[#allocation46_spill] sm:$0xff] }
 0x4ac   : > { %v4173_v45 = vmul.f32 %v9454_v37, %v3936_v21  ;;  %v9830_v30 = vmul.f32 %v5955_v42, %v2020_v48  ;;  %v2499_v60 = vmul.f32 -0.046496473, %v2403_v49  ;;  %5960 = vrcp.f32 %v2119_v26  ;;  %v11386_v48 = vld [vmem:[#allocation33_spill] sm:$0xff] }
 0x4ad   : > { %v3073_v62 = vadd.f32 %v2977_v11, %v2305_v8  ;;  %v5041_v6 = vadd.f32 -0.32762277, %v2690_v61  ;;  %v9843_v55 = vand.u32 2147483647, %v11386_v48  ;;  %vm3748_vm9 = vcmp.lt.f32.partialorder %v11375_v33, 0.0 }
 0x4ae   : > { %v5957_v32 = vpop.eup %5956  ;;  %v9837_v15 = vadd.f32 %v4173_v45, %v9328_v29  ;;  %v2404_v40 = vmul.f32 %v9830_v30, %v9830_v30  ;;  %v2595_v42 = vadd.f32 0.15931422, %v2499_v60  ;;  %vm3750_vm8 = vcmp.lt.f32.partialorder %v11381_v53, 0.0  ;;  %v11408_v53 = vld [vmem:[#allocation61_spill] sm:$0xff] }
 0x4af   : > { %v3265_v10 = vsub.f32 1.5707964, %v3073_v62  ;;  %v2882_v1 = vmul.f32 %v5041_v6, %v2402_v59  ;;  %v9845_v21 = vmul.f32 %v5957_v32, %v2021_v36  ;;  %v1928_v11 = vmax.f32 %v9833_v43, %v9843_v55 }
 0x4b0   : > { %11385 = vst [vmem:[#allocation62_spill] sm:$0xff] %v9837_v15  ;;  %v2500_v8 = vmul.f32 -0.046496473, %v2404_v40  ;;  %vm3176_vm0 = vcmp.gt.f32.partialorder %v9843_v55, %v9833_v43  ;;  %v2691_v26 = vmul.f32 %v2595_v42, %v2403_v49  ;;  %v5959_v20 = vpop.eup %5958 }
 0x4b1   : > { %v3361_v61 = vsel %vm3169_vm15, %v3265_v10, %v3073_v62  ;;  %v2978_v45 = vmul.f32 %v2882_v1, %v2306_v2  ;;  %v2405_v32 = vmul.f32 %v9845_v21, %v9845_v21  ;;  %v2120_v6 = vadd.f32 1e-12, %v1928_v11 }
 0x4b2   : > { %v3553_v60 = vsub.f32 3.1415927, %v3361_v61  ;;  %v2596_v36 = vadd.f32 0.15931422, %v2500_v8  ;;  %v5042_v15 = vadd.f32 -0.32762277, %v2691_v26 }
 0x4b3   : > { %v3074_v59 = vadd.f32 %v2978_v45, %v2306_v2  ;;  %v2501_v29 = vmul.f32 -0.046496473, %v2405_v32  ;;  %5962 = vrcp.f32 %v2120_v6  ;;  %vm3746_vm15 = vcmp.lt.f32.partialorder %v11367_v7, 0.0  ;;  %v11389_v45 = vld [vmem:[#allocation68_spill] sm:$0xff] }
 0x4b4   : > { %v3649_v0 = vsel %vm3457_vm10, %v3553_v60, %v3361_v61  ;;  %v2692_v22 = vmul.f32 %v2596_v36, %v2404_v40  ;;  %v2883_v1 = vmul.f32 %v5042_v15, %v2403_v49  ;;  %v11388_v2 = vmin.f32 %v9797_v58, %v9800_v51 }
 0x4b5   : > { %v3841_v62 = vsub.f32 0.0, %v3649_v0  ;;  %v3266_v10 = vsub.f32 1.5707964, %v3074_v59  ;;  %v2597_v42 = vadd.f32 0.15931422, %v2501_v29  ;;  %v11393_v7 = vmin.f32 %v9833_v43, %v9843_v55  ;;  %v11411_v43 = vld [vmem:[#allocation6_spill] sm:$0xff] }
 0x4b6   : > { %v5043_v8 = vadd.f32 -0.32762277, %v2692_v22  ;;  %v9868_v11 = vmul.f32 %v5959_v20, %v11388_v2  ;;  %v9871_v50 = vand.u32 2147483647, %v11389_v45  ;;  %v2979_v49 = vmul.f32 %v2883_v1, %v9819_v13  ;;  %v5961_v15 = vpop.eup %5960 }
 0x4b7   : > { %v3937_v61 = vsel %vm3745_vm11, %v3841_v62, %v3649_v0  ;;  %v3362_v26 = vsel %vm3170_vm3, %v3266_v10, %v3074_v59  ;;  %v2693_v22 = vmul.f32 %v2597_v42, %v2405_v32  ;;  %v9887_v16 = vmul.f32 %v5961_v15, %v11390_v52  ;;  %v11391_v59 = vld [vmem:[#allocation5_spill] sm:$0xff] }
 0x4b8   : > { %v4174_v29 = vmul.f32 %v9454_v37, %v3937_v61  ;;  %v3554_v20 = vsub.f32 3.1415927, %v3362_v26  ;;  %v2884_v60 = vmul.f32 %v5043_v8, %v2404_v40  ;;  %v2406_v36 = vmul.f32 %v9868_v11, %v9868_v11 }
 0x4b9   : > { %v3075_v14 = vadd.f32 %v2979_v49, %v9819_v13  ;;  %v5044_v0 = vadd.f32 -0.32762277, %v2693_v22  ;;  %v1929_v6 = vmax.f32 %v9862_v63, %v9871_v50  ;;  %vm3747_vm3 = vcmp.lt.f32.partialorder %v11372_v17, 0.0  ;;  %v11396_v17 = vld [vmem:[#allocation70_spill] sm:$0xff] }
 0x4ba   : > { %v9892_v62 = vadd.f32 %v4174_v29, %v11391_v59  ;;  %v3650_v40 = vsel %vm3458_vm5, %v3554_v20, %v3362_v26  ;;  %v2980_v13 = vmul.f32 %v2884_v60, %v9830_v30  ;;  %v2502_v10 = vmul.f32 -0.046496473, %v2406_v36 }
 0x4bb   : > { %v3842_v1 = vsub.f32 0.0, %v3650_v40  ;;  %v3267_v42 = vsub.f32 1.5707964, %v3075_v14  ;;  %v2885_v8 = vmul.f32 %v5044_v0, %v2405_v32  ;;  %v2407_v2 = vmul.f32 %v9887_v16, %v9887_v16 }
 0x4bc   : > { %11392 = vst [vmem:[#allocation25_spill] sm:$0xff] %v9892_v62  ;;  %v3076_v61 = vadd.f32 %v2980_v13, %v9830_v30  ;;  %v2598_v49 = vadd.f32 0.15931422, %v2502_v10  ;;  %v2025_v28 = vmin.f32 %v9862_v63, %v9871_v50  ;;  %v2121_v26 = vadd.f32 1e-12, %v1929_v6 }
 0x4bd   : > { %v3938_v22 = vsel %vm3746_vm15, %v3842_v1, %v3650_v40  ;;  %v3363_v15 = vsel %vm3171_vm1, %v3267_v42, %v3075_v14  ;;  %v2981_v32 = vmul.f32 %v2885_v8, %v9845_v21  ;;  %v2503_v29 = vmul.f32 -0.046496473, %v2407_v2  ;;  %v5963_v20 = vpop.eup %5962 }
 0x4be   : > { %v4175_v30 = vmul.f32 %v9454_v37, %v3938_v22  ;;  %v3555_v60 = vsub.f32 3.1415927, %v3363_v15  ;;  %v3268_v0 = vsub.f32 1.5707964, %v3076_v61  ;;  %v2694_v52 = vmul.f32 %v2598_v49, %v2406_v36 }
 0x4bf   : > { %v3077_v6 = vadd.f32 %v2981_v32, %v9845_v21  ;;  %v2599_v59 = vadd.f32 0.15931422, %v2503_v29  ;;  %v9916_v40 = vmul.f32 %v5963_v20, %v11393_v7  ;;  %5964 = vrcp.f32 %v2121_v26 }
 0x4c0   : > { %v9922_v14 = vadd.f32 %v4175_v30, %v11394_v19  ;;  %v3651_v13 = vsel %vm3459_vm6, %v3555_v60, %v3363_v15  ;;  %v3364_v21 = vsel %vm3172_vm4, %v3268_v0, %v3076_v61  ;;  %v5045_v10 = vadd.f32 -0.32762277, %v2694_v52  ;;  %v11399_v19 = vld [vmem:[#allocation16_spill] sm:$0xff] }
 0x4c1   : > { %v3843_v1 = vsub.f32 0.0, %v3651_v13  ;;  %v3556_v42 = vsub.f32 3.1415927, %v3364_v21  ;;  %v3269_v8 = vsub.f32 1.5707964, %v3077_v6  ;;  %v2695_v49 = vmul.f32 %v2599_v59, %v2407_v2 }
 0x4c2   : > { %11395 = vst [vmem:[#allocation18_spill] sm:$0xff] %v9922_v14  ;;  %vm3461_vm1 = vcmp.lt.f32.partialorder %v11376_v54, 0.0  ;;  %v2886_v26 = vmul.f32 %v5045_v10, %v2406_v36  ;;  %v2408_v22 = vmul.f32 %v9916_v40, %v9916_v40  ;;  %vm3177_vm7 = vcmp.gt.f32.partialorder %v9871_v50, %v9862_v63 }
 0x4c3   : > { %v3939_v41 = vsel %vm3747_vm3, %v3843_v1, %v3651_v13  ;;  %v3652_v56 = vsel %vm3460_vm2, %v3556_v42, %v3364_v21  ;;  %v3365_v35 = vsel %vm3173_vm13, %v3269_v8, %v3077_v6  ;;  %v5046_v61 = vadd.f32 -0.32762277, %v2695_v49  ;;  %v11400_v21 = vld [vmem:[#allocation14_spill] sm:$0xff] }
 0x4c4   : > { %v4176_v15 = vmul.f32 %v9454_v37, %v3939_v41  ;;  %v3844_v36 = vsub.f32 0.0, %v3652_v56  ;;  %v3557_v32 = vsub.f32 3.1415927, %v3365_v35  ;;  %v2982_v29 = vmul.f32 %v2886_v26, %v9868_v11 }
 0x4c5   : > { %vm3749_vm4 = vcmp.lt.f32.partialorder %v11377_v23, 0.0  ;;  %v2887_v20 = vmul.f32 %v5046_v61, %v2407_v2  ;;  %v2504_v30 = vmul.f32 -0.046496473, %v2408_v22  ;;  %v9945_v60 = vand.u32 2147483647, %v11396_v17  ;;  %v11402_v61 = vld [vmem:[#allocation45_spill] sm:$0xff] }
 0x4c6   : > { %v9948_v0 = vadd.f32 %v4176_v15, %v11397_v47  ;;  %v3940_v5 = vsel %vm3748_vm9, %v3844_v36, %v3652_v56  ;;  %v3653_v38 = vsel %vm3461_vm1, %v3557_v32, %v3365_v35  ;;  %v3078_v52 = vadd.f32 %v2982_v29, %v9868_v11  ;;  %v11404_v36 = vld [vmem:[#allocation37_spill] sm:$0xff]  ;;  %v11405_v47 = vld [vmem:[#allocation2_spill] sm:$0xff] }
 0x4c7   : > { %v4177_v6 = vmul.f32 %v9454_v37, %v3940_v5  ;;  %v3845_v59 = vsub.f32 0.0, %v3653_v38  ;;  %v2983_v2 = vmul.f32 %v2887_v20, %v9887_v16  ;;  %v2600_v7 = vadd.f32 0.15931422, %v2504_v30 }
 0x4c8   : > { %11398 = vst [vmem:[#allocation57_spill] sm:$0xff] %v9948_v0  ;;  %vm3462_vm13 = vcmp.lt.f32.partialorder %v11380_v39, 0.0  ;;  %v3270_v12 = vsub.f32 1.5707964, %v3078_v52  ;;  %v9960_v13 = vand.u32 2147483647, %v11399_v19 }
 0x4c9   : > { %v5965_v33 = vpop.eup %5964  ;;  %v9963_v54 = vadd.f32 %v4177_v6, %v11400_v21  ;;  %v3941_v11 = vsel %vm3749_vm4, %v3845_v59, %v3653_v38  ;;  %v3079_v10 = vadd.f32 %v2983_v2, %v9887_v16  ;;  %v2696_v1 = vmul.f32 %v2600_v7, %v2408_v22  ;;  %v11406_v39 = vld [vmem:[#allocation38_spill] sm:$0xff] }
 0x4ca   : > { %v4178_v42 = vmul.f32 %v9454_v37, %v3941_v11  ;;  %v3366_v8 = vsel %vm3174_vm14, %v3270_v12, %v3078_v52  ;;  %v9972_v49 = vmul.f32 %v5965_v33, %v2025_v28  ;;  %v1930_v26 = vmax.f32 %v9945_v60, %v9960_v13  ;;  %v11407_v6 = vld [vmem:[#allocation34_spill] sm:$0xff] }
 0x4cb   : > { %11401 = vst [vmem:[#allocation29_spill] sm:$0xff] %v9963_v54  ;;  %v3558_v41 = vsub.f32 3.1415927, %v3366_v8  ;;  %v3271_v56 = vsub.f32 1.5707964, %v3079_v10  ;;  %v2026_v23 = vmin.f32 %v9945_v60, %v9960_v13  ;;  %vm3178_vm14 = vcmp.gt.f32.partialorder %v9960_v13, %v9945_v60 }
 0x4cc   : > { %v5047_v35 = vadd.f32 -0.32762277, %v2696_v1  ;;  %v9979_v16 = vadd.f32 %v4178_v42, %v11402_v61  ;;  %v2409_v37 = vmul.f32 %v9972_v49, %v9972_v49  ;;  %v2122_v15 = vadd.f32 1e-12, %v1930_v26 }
 0x4cd   : > { %v3654_v58 = vsel %vm3462_vm13, %v3558_v41, %v3366_v8  ;;  %v3367_v51 = vsel %vm3175_vm12, %v3271_v56, %v3079_v10  ;;  %v9991_v32 = vand.u32 2147483647, %v11404_v36  ;;  %v4197_v5 = vsub.s32 7, %v11405_v47  ;;  %v11409_v56 = vld [vmem:[#allocation39_spill] sm:$0xff] }
 0x4ce   : > { %11403 = vst [vmem:[#allocation65_spill] sm:$0xff] %v9979_v16  ;;  %v2888_v28 = vmul.f32 %v5047_v35, %v2408_v22  ;;  %v3846_v29 = vsub.f32 0.0, %v3654_v58  ;;  %v3559_v20 = vsub.f32 3.1415927, %v3367_v51  ;;  %v2505_v30 = vmul.f32 -0.046496473, %v2409_v37 }
 0x4cf   : > { %5966 = vrcp.f32 %v2122_v15  ;;  %vm3463_vm10 = vcmp.lt.f32.partialorder %v11382_v31, 0.0  ;;  %v9997_v52 = vand.u32 2147483647, %v11406_v39  ;;  %v10002_v59 = vand.u32 2147483647, %v11407_v6 }
 0x4d0   : > { %v2984_v38 = vmul.f32 %v2888_v28, %v9916_v40  ;;  %v3942_v46 = vsel %vm3750_vm8, %v3846_v29, %v3654_v58  ;;  %v3655_v24 = vsel %vm3463_vm10, %v3559_v20, %v3367_v51  ;;  %v2601_v22 = vadd.f32 0.15931422, %v2505_v30  ;;  %v11410_v28 = vld [vmem:[#allocation41_spill] sm:$0xff] }
 0x4d1   : > { %vm3751_vm12 = vcmp.lt.f32.partialorder %v11383_v25, 0.0  ;;  %v3847_v2 = vsub.f32 0.0, %v3655_v24  ;;  %v1931_v31 = vmax.f32 %v9991_v32, %v9997_v52  ;;  %v2027_v33 = vmin.f32 %v9991_v32, %v9997_v52  ;;  %v5993_v25 = vld [vmem:[%s10614_s2] sm:$0xff] }
 0x4d2   : > { %v3080_v7 = vadd.f32 %v2984_v38, %v9916_v40  ;;  %v2697_v12 = vmul.f32 %v2601_v22, %v2409_v37  ;;  %vm3179_vm11 = vcmp.gt.f32.partialorder %v9997_v52, %v9991_v32  ;;  %v10013_v21 = vand.u32 2147483647, %v11408_v53 }
 0x4d3   : > { %v10018_v11 = vrot.slane %v5993_v25, %v4197_v5  ;;  %v10020_v40 = vsel %vm3751_vm12, %v3847_v2, %v3655_v24  ;;  %v2123_v1 = vadd.f32 1e-12, %v1931_v31  ;;  %v10032_v35 = vand.u32 2147483647, %v11409_v56  ;;  %v11412_v5 = vld [vmem:[#allocation44_spill] sm:$0xff] }
 0x4d4   : > { %v3272_v10 = vsub.f32 1.5707964, %v3080_v7  ;;  %v5048_v42 = vadd.f32 -0.32762277, %v2697_v12  ;;  %v1932_v8 = vmax.f32 %v10002_v59, %v10013_v21  ;;  %v2028_v26 = vmin.f32 %v10002_v59, %v10013_v21 }
 0x4d5   : > { %5968 = vrcp.f32 %v2123_v1  ;;  %vm3180_vm5 = vcmp.gt.f32.partialorder %v10013_v21, %v10002_v59  ;;  %vm3464_vm15 = vcmp.lt.f32.partialorder %v11384_v34, 0.0  ;;  %v4199_v51 = vmul.f32 %v10018_v11, %v3942_v46  ;;  %v11413_v1 = vld [vmem:[#allocation42_spill] sm:$0xff] }
 0x4d6   : > { %v3368_v41 = vsel %vm3176_vm0, %v3272_v10, %v3080_v7  ;;  %v2889_v15 = vmul.f32 %v5048_v42, %v2409_v37  ;;  %v2124_v58 = vadd.f32 1e-12, %v1932_v8  ;;  %vm3752_vm6 = vcmp.lt.f32.partialorder %v11386_v48, 0.0  ;;  %v11414_v8 = vld [vmem:[#allocation60_spill] sm:$0xff] }
 0x4d7   : > { %v3560_v61 = vsub.f32 3.1415927, %v3368_v41  ;;  %v10038_v29 = vand.u32 2147483647, %v11410_v28  ;;  %v10041_v55 = vand.u32 2147483647, %v11411_v43 }
 0x4d8   : > { %v2985_v47 = vmul.f32 %v2889_v15, %v9972_v49  ;;  %5970 = vrcp.f32 %v2124_v58  ;;  %v10045_v34 = vand.u32 2147483647, %v11412_v5  ;;  %v10065_v42 = vand.u32 2147483647, %v11413_v1 }
 0x4d9   : > { %v5967_v20 = vpop.eup %5966  ;;  %v3656_v30 = vsel %vm3464_vm15, %v3560_v61, %v3368_v41  ;;  %v1933_v46 = vmax.f32 %v10032_v35, %v10038_v29  ;;  %v2029_v24 = vmin.f32 %v10032_v35, %v10038_v29  ;;  %vm3181_vm0 = vcmp.gt.f32.partialorder %v10038_v29, %v10032_v35 }
 0x4da   : > { %v3848_v37 = vsub.f32 0.0, %v3656_v30  ;;  %v2314_v38 = vmul.f32 %v5967_v20, %v2026_v23  ;;  %v3081_v22 = vadd.f32 %v2985_v47, %v9972_v49  ;;  %v1934_v2 = vmax.f32 %v10041_v55, %v10045_v34  ;;  %v11415_v20 = vld [vmem:[#allocation47_spill] sm:$0xff]  ;;  %v11416_v47 = vld [vmem:[#allocation8_spill] sm:$0xff] }
 0x4db   : > { %v2030_v7 = vmin.f32 %v10041_v55, %v10045_v34  ;;  %v2125_v12 = vadd.f32 1e-12, %v1933_v46  ;;  %vm3182_vm3 = vcmp.gt.f32.partialorder %v10045_v34, %v10041_v55  ;;  %vm3465_vm2 = vcmp.lt.f32.partialorder %v11387_v27, 0.0 }
 0x4dc   : > { %v10060_v23 = vsel %vm3752_vm6, %v3848_v37, %v3656_v30  ;;  %v2410_v31 = vmul.f32 %v2314_v38, %v2314_v38  ;;  %v3273_v25 = vsub.f32 1.5707964, %v3081_v22  ;;  %v2126_v49 = vadd.f32 1e-12, %v1934_v2  ;;  %v11418_v2 = vld [vmem:[#allocation7_spill] sm:$0xff] }
 0x4dd   : > { %5972 = vrcp.f32 %v2125_v12  ;;  %v10072_v41 = vand.u32 2147483647, %v11414_v8  ;;  %v10075_v30 = vand.u32 2147483647, %v11415_v20  ;;  %v10078_v37 = vadd.f32 %v4199_v51, %v11416_v47 }
 0x4de   : > { %v2506_v10 = vmul.f32 -0.046496473, %v2410_v31  ;;  %v3369_v48 = vsel %vm3177_vm7, %v3273_v25, %v3081_v22  ;;  %5974 = vrcp.f32 %v2126_v49  ;;  %v10089_v12 = vand.u32 2147483647, %v11418_v2 }
 0x4df   : > { %v5969_v61 = vpop.eup %5968  ;;  %v3561_v15 = vsub.f32 3.1415927, %v3369_v48  ;;  %11417 = vst [vmem:[#allocation66_spill] sm:$0xff] %v10078_v37  ;;  %v1935_v27 = vmax.f32 %v10065_v42, %v10072_v41  ;;  %v2031_v63 = vmin.f32 %v10065_v42, %v10072_v41  ;;  %vm3183_vm9 = vcmp.gt.f32.partialorder %v10072_v41, %v10065_v42 }
 0x4e0   : > { %v2602_v58 = vadd.f32 0.15931422, %v2506_v10  ;;  %v10080_v46 = vmul.f32 %v5969_v61, %v2027_v33  ;;  %vm3753_vm1 = vcmp.lt.f32.partialorder %v11389_v45, 0.0  ;;  %v1936_v47 = vmax.f32 %v10075_v30, %v10089_v12 }
 0x4e1   : > { %v3657_v50 = vsel %vm3465_vm2, %v3561_v15, %v3369_v48  ;;  %v2127_v49 = vadd.f32 1e-12, %v1935_v27  ;;  %vm3184_vm7 = vcmp.gt.f32.partialorder %v10089_v12, %v10075_v30  ;;  %vm3466_vm4 = vcmp.lt.f32.partialorder %v11396_v17, 0.0 }
 0x4e2   : > { %v2698_v22 = vmul.f32 %v2602_v58, %v2410_v31  ;;  %v5971_v25 = vpop.eup %5970  ;;  %v3849_v51 = vsub.f32 0.0, %v3657_v50  ;;  %v2411_v33 = vmul.f32 %v10080_v46, %v10080_v46  ;;  %vm3754_vm8 = vcmp.lt.f32.partialorder %v11399_v19, 0.0 }
 0x4e3   : > { %v10094_v61 = vmul.f32 %v5971_v25, %v2028_v26  ;;  %5976 = vrcp.f32 %v2127_v49  ;;  %v11419_v25 = vld [vmem:[#allocation35_spill] sm:$0xff]  ;;  %vm3467_vm10 = vcmp.lt.f32.partialorder %v11404_v36, 0.0  ;;  %vm3468_vm12 = vcmp.lt.f32.partialorder %v11407_v6, 0.0 }
 0x4e4   : > { %v5049_v10 = vadd.f32 -0.32762277, %v2698_v22  ;;  %v10100_v15 = vsel %vm3753_vm1, %v3849_v51, %v3657_v50  ;;  %v2507_v58 = vmul.f32 -0.046496473, %v2411_v33  ;;  %v2128_v22 = vadd.f32 1e-12, %v1936_v47 }
 0x4e5   : > { %v2412_v27 = vmul.f32 %v10094_v61, %v10094_v61  ;;  %v10107_v16 = vand.u32 2147483647, %v11419_v25  ;;  %v11420_v50 = vld [vmem:[#allocation53_spill] sm:$0xff]  ;;  %v11423_v17 = vmin.f32 %v10075_v30, %v10089_v12  ;;  %vm3756_vm15 = vcmp.lt.f32.partialorder %v11408_v53, 0.0 }
 0x4e6   : > { %v2890_v45 = vmul.f32 %v5049_v10, %v2410_v31  ;;  %v2603_v26 = vadd.f32 0.15931422, %v2507_v58  ;;  %5978 = vrcp.f32 %v2128_v22  ;;  %v10110_v51 = vand.u32 2147483647, %v11420_v50  ;;  %v11421_v10 = vld [vmem:[#allocation9_spill] sm:$0xff] }
 0x4e7   : > { %v5973_v54 = vpop.eup %5972  ;;  %v2508_v14 = vmul.f32 -0.046496473, %v2412_v27  ;;  %v10116_v62 = vand.u32 2147483647, %v11421_v10  ;;  %vm3469_vm6 = vcmp.lt.f32.partialorder %v11409_v56, 0.0  ;;  %vm3757_vm1 = vcmp.lt.f32.partialorder %v11410_v28, 0.0 }
 0x4e8   : > { %v2986_v0 = vmul.f32 %v2890_v45, %v2314_v38  ;;  %v5975_v49 = vpop.eup %5974  ;;  %v2699_v48 = vmul.f32 %v2603_v26, %v2411_v33  ;;  %v10113_v31 = vmul.f32 %v5973_v54, %v2029_v24  ;;  %v1937_v45 = vmax.f32 %v10107_v16, %v10110_v51 }
 0x4e9   : > { %v2604_v58 = vadd.f32 0.15931422, %v2508_v14  ;;  %v10118_v4 = vmul.f32 %v5975_v49, %v2030_v7  ;;  %vm3185_vm13 = vcmp.gt.f32.partialorder %v10110_v51, %v10107_v16  ;;  %v11424_v21 = vmin.f32 %v10107_v16, %v10110_v51  ;;  %v11433_v51 = vld [vmem:[#allocation49_spill] sm:$0xff] }
 0x4ea   : > { %v3082_v47 = vadd.f32 %v2986_v0, %v2314_v38  ;;  %v5050_v22 = vadd.f32 -0.32762277, %v2699_v48  ;;  %v2413_v18 = vmul.f32 %v10113_v31, %v10113_v31  ;;  %v2129_v0 = vadd.f32 1e-12, %v1937_v45  ;;  %v11422_v48 = vld [vmem:[#allocation22_spill] sm:$0xff] }
 0x4eb   : > { %v2700_v24 = vmul.f32 %v2604_v58, %v2412_v27  ;;  %v2414_v14 = vmul.f32 %v10118_v4, %v10118_v4  ;;  %v10132_v26 = vand.u32 2147483647, %v11422_v48 }
 0x4ec   : > { %v3274_v54 = vsub.f32 1.5707964, %v3082_v47  ;;  %v2891_v38 = vmul.f32 %v5050_v22, %v2411_v33  ;;  %v2509_v7 = vmul.f32 -0.046496473, %v2413_v18  ;;  %5980 = vrcp.f32 %v2129_v0 }
 0x4ed   : > { %v5051_v9 = vadd.f32 -0.32762277, %v2700_v24  ;;  %v2510_v10 = vmul.f32 -0.046496473, %v2414_v14  ;;  %v5977_v50 = vpop.eup %5976  ;;  %v1938_v33 = vmax.f32 %v10116_v62, %v10132_v26  ;;  %v2034_v60 = vmin.f32 %v10116_v62, %v10132_v26 }
 0x4ee   : > { %v3370_v49 = vsel %vm3178_vm14, %v3274_v54, %v3082_v47  ;;  %v2987_v45 = vmul.f32 %v2891_v38, %v10080_v46  ;;  %v2605_v57 = vadd.f32 0.15931422, %v2509_v7  ;;  %v10141_v37 = vmul.f32 %v5977_v50, %v2031_v63 }
 0x4ef   : > { %v3562_v58 = vsub.f32 3.1415927, %v3370_v49  ;;  %v2892_v22 = vmul.f32 %v5051_v9, %v2412_v27  ;;  %v2606_v48 = vadd.f32 0.15931422, %v2510_v10  ;;  %v2130_v24 = vadd.f32 1e-12, %v1938_v33 }
 0x4f0   : > { %v3083_v47 = vadd.f32 %v2987_v45, %v10080_v46  ;;  %v2701_v54 = vmul.f32 %v2605_v57, %v2413_v18  ;;  %v5979_v0 = vpop.eup %5978  ;;  %vm3755_vm14 = vcmp.lt.f32.partialorder %v11406_v39, 0.0  ;;  %v2415_v27 = vmul.f32 %v10141_v37, %v10141_v37 }
 0x4f1   : > { %v3658_v13 = vsel %vm3466_vm4, %v3562_v58, %v3370_v49  ;;  %v2988_v9 = vmul.f32 %v2892_v22, %v10094_v61  ;;  %v2702_v63 = vmul.f32 %v2606_v48, %v2414_v14  ;;  %v10156_v46 = vmul.f32 %v5979_v0, %v11423_v17 }
 0x4f2   : > { %v3850_v38 = vsub.f32 0.0, %v3658_v13  ;;  %v3275_v50 = vsub.f32 1.5707964, %v3083_v47  ;;  %v5052_v10 = vadd.f32 -0.32762277, %v2701_v54  ;;  %5982 = vrcp.f32 %v2130_v24 }
 0x4f3   : > { %v3084_v7 = vadd.f32 %v2988_v9, %v10094_v61  ;;  %v5053_v49 = vadd.f32 -0.32762277, %v2702_v63  ;;  %v2511_v58 = vmul.f32 -0.046496473, %v2415_v27  ;;  %v10165_v48 = vmul.f32 %v10018_v11, %v10020_v40 }
 0x4f4   : > { %v10160_v57 = vsel %vm3754_vm8, %v3850_v38, %v3658_v13  ;;  %v3371_v45 = vsel %vm3179_vm11, %v3275_v50, %v3083_v47  ;;  %v2893_v33 = vmul.f32 %v5052_v10, %v2413_v18  ;;  %v2416_v19 = vmul.f32 %v10156_v46, %v10156_v46 }
 0x4f5   : > { %v3563_v22 = vsub.f32 3.1415927, %v3371_v45  ;;  %v3276_v13 = vsub.f32 1.5707964, %v3084_v7  ;;  %v2894_v54 = vmul.f32 %v5053_v49, %v2414_v14  ;;  %v2607_v61 = vadd.f32 0.15931422, %v2511_v58 }
 0x4f6   : > { %v2989_v24 = vmul.f32 %v2893_v33, %v10113_v31  ;;  %v2512_v40 = vmul.f32 -0.046496473, %v2416_v19  ;;  %vm3186_vm2 = vcmp.gt.f32.partialorder %v10132_v26, %v10116_v62  ;;  %v5981_v32 = vpop.eup %5980  ;;  %vm3470_vm11 = vcmp.lt.f32.partialorder %v11411_v43, 0.0  ;;  %v11441_v26 = vld [vmem:[#allocation62_spill] sm:$0xff] }
 0x4f7   : > { %v3659_v52 = vsel %vm3467_vm10, %v3563_v22, %v3371_v45  ;;  %v3372_v18 = vsel %vm3180_vm5, %v3276_v13, %v3084_v7  ;;  %v2990_v14 = vmul.f32 %v2894_v54, %v10118_v4  ;;  %v2703_v47 = vmul.f32 %v2607_v61, %v2415_v27  ;;  %v11426_v54 = vld [vmem:[#allocation23_spill] sm:$0xff] }
 0x4f8   : > { %v3851_v0 = vsub.f32 0.0, %v3659_v52  ;;  %v3564_v38 = vsub.f32 3.1415927, %v3372_v18  ;;  %v3085_v9 = vadd.f32 %v2989_v24, %v10113_v31  ;;  %v2608_v63 = vadd.f32 0.15931422, %v2512_v40 }
 0x4f9   : > { %v10187_v50 = vmul.f32 %v10018_v11, %v10060_v23  ;;  %v3086_v36 = vadd.f32 %v2990_v14, %v10118_v4  ;;  %v5054_v59 = vadd.f32 -0.32762277, %v2703_v47  ;;  %v10194_v10 = vmul.f32 %v5981_v32, %v11424_v21  ;;  %v11425_v4 = vld [vmem:[#allocation48_spill] sm:$0xff] }
 0x4fa   : > { %v3947_v17 = vsel %vm3755_vm14, %v3851_v0, %v3659_v52  ;;  %v3660_v31 = vsel %vm3468_vm12, %v3564_v38, %v3372_v18  ;;  %v3277_v7 = vsub.f32 1.5707964, %v3085_v9  ;;  %vm3758_vm5 = vcmp.lt.f32.partialorder %v11412_v5, 0.0 }
 0x4fb   : > { %v2704_v23 = vmul.f32 %v2608_v63, %v2416_v19  ;;  %v3852_v49 = vsub.f32 0.0, %v3660_v31  ;;  %v3278_v58 = vsub.f32 1.5707964, %v3086_v36  ;;  %v2895_v45 = vmul.f32 %v5054_v59, %v2415_v27 }
 0x4fc   : > { %v10202_v33 = vand.u32 2147483647, %v11425_v4  ;;  %v5983_v22 = vpop.eup %5982  ;;  %v3373_v13 = vsel %vm3181_vm0, %v3277_v7, %v3085_v9  ;;  %v2417_v6 = vmul.f32 %v10194_v10, %v10194_v10  ;;  %v10210_v61 = vand.u32 2147483647, %v11426_v54 }
 0x4fd   : > { %v5055_v39 = vadd.f32 -0.32762277, %v2704_v23  ;;  %v3948_v24 = vsel %vm3756_vm15, %v3852_v49, %v3660_v31  ;;  %v3565_v40 = vsub.f32 3.1415927, %v3373_v13  ;;  %v3374_v27 = vsel %vm3182_vm3, %v3278_v58, %v3086_v36 }
 0x4fe   : > { %v2991_v32 = vmul.f32 %v2895_v45, %v10141_v37  ;;  %v3566_v52 = vsub.f32 3.1415927, %v3374_v27  ;;  %vm3471_vm0 = vcmp.lt.f32.partialorder %v11413_v1, 0.0  ;;  %v2513_v29 = vmul.f32 -0.046496473, %v2417_v6 }
 0x4ff   : > { %v2896_v35 = vmul.f32 %v5055_v39, %v2416_v19  ;;  %v3661_v18 = vsel %vm3469_vm6, %v3565_v40, %v3373_v13  ;;  %v10225_v53 = vmul.f32 %v5983_v22, %v2034_v60  ;;  %v1939_v55 = vmax.f32 %v10202_v33, %v10210_v61  ;;  %v11427_v40 = vld [vmem:[#allocation26_spill] sm:$0xff] }
 0x500   : > { %v3087_v14 = vadd.f32 %v2991_v32, %v10141_v37  ;;  %v3853_v34 = vsub.f32 0.0, %v3661_v18  ;;  %v3662_v47 = vsel %vm3470_vm11, %v3566_v52, %v3374_v27  ;;  %vm3759_vm3 = vcmp.lt.f32.partialorder %v11414_v8, 0.0 }
 0x501   : > { %vm3472_vm4 = vcmp.lt.f32.partialorder %v11415_v20, 0.0  ;;  %v2992_v56 = vmul.f32 %v2896_v35, %v10156_v46  ;;  %v2609_v19 = vadd.f32 0.15931422, %v2513_v29  ;;  %v3854_v37 = vsub.f32 0.0, %v3662_v47  ;;  %v11428_v35 = vld [vmem:[#allocation66_spill] sm:$0xff] }
 0x502   : > { %v3279_v0 = vsub.f32 1.5707964, %v3087_v14  ;;  %v2418_v60 = vmul.f32 %v10225_v53, %v10225_v53  ;;  %v2035_v38 = vmin.f32 %v10202_v33, %v10210_v61  ;;  %v3949_v9 = vsel %vm3757_vm1, %v3853_v34, %v3661_v18  ;;  %v11429_v18 = vld [vmem:[#allocation43_spill] sm:$0xff] }
 0x503   : > { %v3088_v43 = vadd.f32 %v2992_v56, %v10156_v46  ;;  %v2705_v63 = vmul.f32 %v2609_v19, %v2417_v6  ;;  %v2131_v36 = vadd.f32 1e-12, %v1939_v55  ;;  %v3950_v59 = vsel %vm3758_vm5, %v3854_v37, %v3662_v47  ;;  %v11431_v56 = vld [vmem:[#allocation30_spill] sm:$0xff] }
 0x504   : > { %v3375_v21 = vsel %vm3183_vm9, %v3279_v0, %v3087_v14  ;;  %vm3760_vm8 = vcmp.lt.f32.partialorder %v11418_v2, 0.0  ;;  %v2514_v31 = vmul.f32 -0.046496473, %v2418_v60  ;;  %v4202_v7 = vmul.f32 %v10018_v11, %v10100_v15 }
 0x505   : > { %v3567_v23 = vsub.f32 3.1415927, %v3375_v21  ;;  %v3280_v28 = vsub.f32 1.5707964, %v3088_v43  ;;  %v5056_v49 = vadd.f32 -0.32762277, %v2705_v63  ;;  %v4203_v46 = vmul.f32 %v10018_v11, %v10160_v57 }
 0x506   : > { %v2610_v58 = vadd.f32 0.15931422, %v2514_v31  ;;  %5984 = vrcp.f32 %v2131_v36  ;;  %vm3187_vm10 = vcmp.gt.f32.partialorder %v10210_v61, %v10202_v33  ;;  %v4204_v5 = vmul.f32 %v10018_v11, %v3947_v17  ;;  %v11432_v31 = vld [vmem:[#allocation27_spill] sm:$0xff] }
 0x507   : > { %v3663_v42 = vsel %vm3471_vm0, %v3567_v23, %v3375_v21  ;;  %v3376_v41 = vsel %vm3184_vm7, %v3280_v28, %v3088_v43  ;;  %v2897_v15 = vmul.f32 %v5056_v49, %v2417_v6  ;;  %v10260_v57 = vand.u32 2147483647, %v9667_v44 }
 0x508   : > { %v3855_v45 = vsub.f32 0.0, %v3663_v42  ;;  %v3568_v22 = vsub.f32 3.1415927, %v3376_v41  ;;  %v2706_v13 = vmul.f32 %v2610_v58, %v2418_v60  ;;  %v4205_v39 = vmul.f32 %v10018_v11, %v3948_v24  ;;  %v11434_v58 = vld [vmem:[#allocation21_spill] sm:$0xff] }
 0x509   : > { %vm3473_vm9 = vcmp.lt.f32.partialorder %v11419_v25, 0.0  ;;  %v2993_v17 = vmul.f32 %v2897_v15, %v10194_v10  ;;  %v4216_v1 = vadd.f32 %v10165_v48, %v11427_v40  ;;  %v10268_v27 = vand.u32 2147483647, %v9698_v3  ;;  %v11430_v48 = vld [vmem:[#allocation53_spill] sm:$0xff] }
 0x50a   : > { %v4206_v30 = vmul.f32 %v10018_v11, %v3949_v9  ;;  %v3951_v12 = vsel %vm3759_vm3, %v3855_v45, %v3663_v42  ;;  %v3664_v6 = vsel %vm3472_vm4, %v3568_v22, %v3376_v41  ;;  %v5057_v32 = vadd.f32 -0.32762277, %v2706_v13  ;;  %v11435_v45 = vld [vmem:[#allocation58_spill] sm:$0xff]  ;;  %v11436_v13 = vld [vmem:[#allocation59_spill] sm:$0xff] }
 0x50b   : > { %v3856_v24 = vsub.f32 0.0, %v3664_v6  ;;  %v3089_v52 = vadd.f32 %v2993_v17, %v10194_v10  ;;  %v5531_v29 = vpack.c.bf16 %v4216_v1, %v11428_v35  ;;  %v10278_v14 = vand.u32 2147483647, %v11429_v18  ;;  %v11440_v35 = vld [vmem:[#allocation9_spill] sm:$0xff] }
 0x50c   : > { %vm3761_vm7 = vcmp.lt.f32.partialorder %v11430_v48, 0.0  ;;  %v2898_v55 = vmul.f32 %v5057_v32, %v2418_v60  ;;  %v1940_v34 = vmax.f32 %v10260_v57, %v10268_v27  ;;  %v2036_v8 = vmin.f32 %v10260_v57, %v10268_v27  ;;  %v11442_v48 = vld [vmem:[#allocation25_spill] sm:$0xff] }
 0x50d   : > { %vm3188_vm14 = vcmp.gt.f32.partialorder %v10268_v27, %v10260_v57  ;;  %v4207_v20 = vmul.f32 %v10018_v11, %v3950_v59  ;;  %v3952_v10 = vsel %vm3760_vm8, %v3856_v24, %v3664_v6  ;;  %v3281_v47 = vsub.f32 1.5707964, %v3089_v52  ;;  %5532 = vmatprep.subr.bf16.mxu0 %v5531_v29 }
 0x50e   : > { %v10291_v19 = vand.u32 2147483647, %v11431_v56  ;;  %v4208_v37 = vmul.f32 %v10018_v11, %v3951_v12  ;;  %v4209_v0 = vmul.f32 %v10018_v11, %v3952_v10  ;;  %v2994_v60 = vmul.f32 %v2898_v55, %v10225_v53  ;;  %5534 = vmatpush3.bf16.msra.mxu0 %v5531_v29 }
 0x50f   : > { %v2132_v9 = vadd.f32 1e-12, %v1940_v34  ;;  %v3377_v43 = vsel %vm3185_vm13, %v3281_v47, %v3089_v52  ;;  %v4217_v23 = vadd.f32 %v10187_v50, %v11432_v31  ;;  %v4218_v49 = vadd.f32 %v4202_v7, %v11433_v51  ;;  %v11437_v7 = vld [vmem:[#allocation36_spill] sm:$0xff]  ;;  %v11443_v47 = vld [vmem:[#allocation22_spill] sm:$0xff] }
 0x510   : > { %v1941_v2 = vmax.f32 %v10278_v14, %v10291_v19  ;;  %v2037_v63 = vmin.f32 %v10278_v14, %v10291_v19  ;;  %vm3189_vm12 = vcmp.gt.f32.partialorder %v10291_v19, %v10278_v14  ;;  %v5985_v36 = vpop.eup %5984  ;;  %v3569_v59 = vsub.f32 3.1415927, %v3377_v43  ;;  %v4250_v19 = vld [vmem:[%s10614_s2 + $0x10] sm:$0xff] }
 0x511   : > { %v3090_v21 = vadd.f32 %v2994_v60, %v10225_v53  ;;  %5986 = vrcp.f32 %v2132_v9  ;;  %v2323_v28 = vmul.f32 %v5985_v36, %v2035_v38  ;;  %v4219_v42 = vadd.f32 %v4203_v46, %v11434_v58  ;;  %v11438_v46 = vld [vmem:[#allocation12_spill] sm:$0xff] }
 0x512   : > { %v2133_v16 = vadd.f32 1e-12, %v1941_v2  ;;  %v3665_v41 = vsel %vm3473_vm9, %v3569_v59, %v3377_v43  ;;  %v4220_v22 = vadd.f32 %v4204_v5, %v11435_v45  ;;  %v4221_v17 = vadd.f32 %v4205_v39, %v11436_v13  ;;  %v11439_v39 = vld [vmem:[#allocation50_spill] sm:$0xff] }
 0x513   : > { %v3282_v15 = vsub.f32 1.5707964, %v3090_v21  ;;  %v3857_v40 = vsub.f32 0.0, %v3665_v41  ;;  %v2419_v53 = vmul.f32 %v2323_v28, %v2323_v28  ;;  %v5535_v1 = vpack.c.bf16 %v4218_v49, %v4217_v23  ;;  %v11444_v23 = vld [vmem:[#allocation18_spill] sm:$0xff] }
 0x514   : > { %5988 = vrcp.f32 %v2133_v16  ;;  %v5539_v38 = vpack.c.bf16 %v4220_v22, %v4219_v42  ;;  %v4222_v12 = vadd.f32 %v4206_v30, %v11437_v7  ;;  %v4223_v6 = vadd.f32 %v4207_v20, %v11438_v46 }
 0x515   : > { %v3378_v50 = vsel %vm3186_vm2, %v3282_v15, %v3090_v21  ;;  %v3953_v25 = vsel %vm3761_vm7, %v3857_v40, %v3665_v41  ;;  %v2515_v5 = vmul.f32 -0.046496473, %v2419_v53  ;;  %5536 = vmatprep.subr.bf16.mxu0 %v5535_v1  ;;  %v4224_v24 = vadd.f32 %v4208_v37, %v11439_v39 }
 0x516   : > { %v3570_v32 = vsub.f32 3.1415927, %v3378_v50  ;;  %v4210_v52 = vmul.f32 %v10018_v11, %v3953_v25  ;;  %vm3474_vm13 = vcmp.lt.f32.partialorder %v11440_v35, 0.0  ;;  %5538 = vmatpush3.bf16.msra.mxu0 %v5535_v1  ;;  %v5543_v62 = vpack.c.bf16 %v4222_v12, %v4221_v17 }
 0x517   : > { %v4225_v29 = vadd.f32 %v4209_v0, %v11441_v26  ;;  %v2611_v30 = vadd.f32 0.15931422, %v2515_v5  ;;  %5540 = vmatprep.subr.bf16.mxu0 %v5539_v38  ;;  %v5547_v34 = vpack.c.bf16 %v4224_v24, %v4223_v6  ;;  %vm3762_vm15 = vcmp.lt.f32.partialorder %v11443_v47, 0.0  ;;  %v11445_v5 = vld [vmem:[#allocation57_spill] sm:$0xff] }
 0x518   : > { %v3666_v55 = vsel %vm3474_vm13, %v3570_v32, %v3378_v50  ;;  %v4226_v10 = vadd.f32 %v4210_v52, %v11442_v48  ;;  %vm3475_vm6 = vcmp.lt.f32.partialorder %v11425_v4, 0.0  ;;  %vm3763_vm2 = vcmp.lt.f32.partialorder %v11426_v54, 0.0 }
 0x519   : > { %v3858_v20 = vsub.f32 0.0, %v3666_v55  ;;  %v2707_v60 = vmul.f32 %v2611_v30, %v2419_v53  ;;  %vm3476_vm11 = vcmp.lt.f32.partialorder %v9667_v44, 0.0  ;;  %vm3764_vm1 = vcmp.lt.f32.partialorder %v9698_v3, 0.0  ;;  %v4251_v3 = vld [vmem:[%s10614_s2 + $0x18] sm:$0xff] }
 0x51a   : > { %5542 = vmatpush3.bf16.msra.mxu0 %v5539_v38  ;;  %v5551_v43 = vpack.c.bf16 %v4226_v10, %v4225_v29  ;;  %vm3477_vm5 = vcmp.lt.f32.partialorder %v11429_v18, 0.0  ;;  %vm3765_vm0 = vcmp.lt.f32.partialorder %v11431_v56, 0.0  ;;  %v11447_v18 = vld [vmem:[#allocation65_spill] sm:$0xff]  ;;  %v5563_v47 = vpack.c.bf16 %v4251_v3, %v4250_v19  ;;  %v4252_v56 = vld [vmem:[%s10614_s2 + $0x20] sm:$0xff] }
 0x51b   : > { %v5987_v9 = vpop.eup %5986  ;;  %v3954_v37 = vsel %vm3762_vm15, %v3858_v20, %v3666_v55  ;;  %v5058_v36 = vadd.f32 -0.32762277, %v2707_v60  ;;  %5544 = vmatprep.subr.bf16.mxu0 %v5543_v62  ;;  %v10365_v60 = vld [vmem:[%s10613_s1 + $0x308] sm:$0xff]  ;;  %vm6005_vm3 = vmmov 0  }
 0x51c   : > { %v4211_v2 = vmul.f32 %v10018_v11, %v3954_v37  ;;  %v2324_v59 = vmul.f32 %v5987_v9, %v2036_v8  ;;  %v10370_v9 = vld [vmem:[%s10613_s1 + $0x310] sm:$0xff] }
 0x51d   : > { %v2899_v21 = vmul.f32 %v5058_v36, %v2419_v53  ;;  %v10383_v36 = vld [vmem:[%s10613_s1 + $0x318] sm:$0xff] }
 0x51e   : > { %v5989_v0 = vpop.eup %5988  ;;  %v2420_v31 = vmul.f32 %v2324_v59, %v2324_v59  ;;  %v4227_v16 = vadd.f32 %v4211_v2, %v11444_v23  ;;  %5546 = vmatpush3.bf16.msra.mxu0 %v5543_v62  ;;  %v4255_v2 = vld [vmem:[%s10614_s2 + $0x38] sm:$0xff]  ;;  %v10401_v23 = vld [vmem:[%s10613_s1 + $0x328] sm:$0xff] }
 0x51f   : > { %v2325_v51 = vmul.f32 %v5989_v0, %v2037_v63  ;;  %v2995_v49 = vmul.f32 %v2899_v21, %v2323_v28  ;;  %5548 = vmatprep.subr.bf16.mxu0 %v5547_v34  ;;  %v4256_v21 = vld [vmem:[%s10614_s2 + $0x40] sm:$0xff] }
 0x520   : > { %v2516_v58 = vmul.f32 -0.046496473, %v2420_v31 }
 0x521   : > { %v2421_v42 = vmul.f32 %v2325_v51, %v2325_v51  ;;  %v3091_v41 = vadd.f32 %v2995_v49, %v2323_v28  ;;  %v4258_v49 = vld [vmem:[%s10614_s2 + $0x50] sm:$0xff] }
 0x522   : > { %v2612_v15 = vadd.f32 0.15931422, %v2516_v58  ;;  %5550 = vmatpush3.bf16.msra.mxu0 %v5547_v34  ;;  %v11446_v34 = vld [vmem:[#allocation29_spill] sm:$0xff] }
 0x523   : > { %v2517_v45 = vmul.f32 -0.046496473, %v2421_v42  ;;  %v3283_v22 = vsub.f32 1.5707964, %v3091_v41  ;;  %5552 = vmatprep.subr.bf16.mxu0 %v5551_v43  ;;  %v4259_v58 = vld [vmem:[%s10614_s2 + $0x58] sm:$0xff] }
 0x524   : > { %v2708_v13 = vmul.f32 %v2612_v15, %v2420_v31  ;;  %v5579_v15 = vpack.c.bf16 %v4259_v58, %v4258_v49 }
 0x525   : > { %v2613_v8 = vadd.f32 0.15931422, %v2517_v45  ;;  %v3379_v17 = vsel %vm3187_vm10, %v3283_v22, %v3091_v41  ;;  %v10424_v41 = vld [vmem:[%s10613_s1 + $0x340] sm:$0xff]  ;;  %v4261_v22 = vld [vmem:[%s10614_s2 + $0x68] sm:$0xff] }
 0x526   : > { %v5059_v40 = vadd.f32 -0.32762277, %v2708_v13  ;;  %v3571_v53 = vsub.f32 3.1415927, %v3379_v17  ;;  %5554 = vmatpush3.bf16.msra.mxu0 %v5551_v43  ;;  %v4254_v43 = vld [vmem:[%s10614_s2 + $0x30] sm:$0xff]  ;;  %v4260_v45 = vld [vmem:[%s10614_s2 + $0x60] sm:$0xff] }
 0x527   : > { %v2709_v63 = vmul.f32 %v2613_v8, %v2421_v42  ;;  %v5571_v0 = vpack.c.bf16 %v4255_v2, %v4254_v43  ;;  %v10437_v13 = vld [vmem:[%s10613_s1 + $0x348] sm:$0xff]  ;;  %v10442_v8 = vld [vmem:[%s10613_s1 + $0x350] sm:$0xff] }
 0x528   : > { %v2900_v1 = vmul.f32 %v5059_v40, %v2420_v31  ;;  %v3667_v50 = vsel %vm3475_vm6, %v3571_v53, %v3379_v17  ;;  %v4257_v31 = vld [vmem:[%s10614_s2 + $0x48] sm:$0xff]  ;;  %v5583_v17 = vpack.c.bf16 %v4261_v22, %v4260_v45  ;;  %v4262_v40 = vld [vmem:[%s10614_s2 + $0x70] sm:$0xff]  ;;  %v4263_v53 = vld [vmem:[%s10614_s2 + $0x78] sm:$0xff] }
 0x529   : > { %v5060_v28 = vadd.f32 -0.32762277, %v2709_v63  ;;  %v3859_v38 = vsub.f32 0.0, %v3667_v50  ;;  %v10455_v63 = vld [vmem:[%s10613_s1 + $0x358] sm:$0xff] }
 0x52a   : > { %v2996_v7 = vmul.f32 %v2900_v1, %v2324_v59  ;;  %v10460_v1 = vld [vmem:[%s10613_s1 + $0x360] sm:$0xff] }
 0x52b   : > { %v2901_v12 = vmul.f32 %v5060_v28, %v2421_v42  ;;  %v3955_v46 = vsel %vm3763_vm2, %v3859_v38, %v3667_v50  ;;  %v10419_v42 = vld [vmem:[%s10613_s1 + $0x338] sm:$0xff]  ;;  %v5587_v50 = vpack.c.bf16 %v4263_v53, %v4262_v40  ;;  %v10467_v28 = vld [vmem:[%s10613_s1 + $0x368] sm:$0xff]  ;;  %v10472_v38 = vld [vmem:[%s10613_s1 + $0x370] sm:$0xff] }
 0x52c   : > { %v3092_v6 = vadd.f32 %v2996_v7, %v2324_v59  ;;  %v4212_v25 = vmul.f32 %v10018_v11, %v3955_v46  ;;  %v10388_v59 = vld [vmem:[%s10613_s1 + $0x320] sm:$0xff]  ;;  %v10479_v7 = vld [vmem:[%s10613_s1 + $0x378] sm:$0xff]  ;;  %v4265_v46 = vld [vmem:[%s10614_s2 + $0x88] sm:$0xff] }
 0x52d   : > { %v2997_v33 = vmul.f32 %v2901_v12, %v2325_v51  ;;  %v4264_v12 = vld [vmem:[%s10614_s2 + $0x80] sm:$0xff] }
 0x52e   : > { %v3284_v61 = vsub.f32 1.5707964, %v3092_v6  ;;  %v4228_v39 = vadd.f32 %v4212_v25, %v11445_v5  ;;  %v5061_v25 = vld [vmem:[%s10614_s2 + $0x8] ss:$0 sm:$0xff] }
 0x52f   : > { %v3093_v32 = vadd.f32 %v2997_v33, %v2325_v51  ;;  %v5575_v51 = vpack.c.bf16 %v4257_v31, %v4256_v21 }
 0x530   : > { %v3380_v4 = vsel %vm3188_vm14, %v3284_v61, %v3092_v6  ;;  %v5555_v35 = vpack.c.bf16 %v4228_v39, %v4227_v16  ;;  %v10406_v16 = vld [vmem:[%s10613_s1 + $0x330] sm:$0xff]  ;;  %v5591_v6 = vpack.c.bf16 %v4265_v46, %v4264_v12 }
 0x531   : > { %v3572_v24 = vsub.f32 3.1415927, %v3380_v4  ;;  %v3285_v52 = vsub.f32 1.5707964, %v3093_v32 }
 0x532   : > { %5556 = vmatprep.subr.bf16.mxu0 %v5555_v35 }
 0x533   : > { %v3668_v54 = vsel %vm3476_vm11, %v3572_v24, %v3380_v4  ;;  %v3381_v62 = vsel %vm3189_vm12, %v3285_v52, %v3093_v32  ;;  %5558 = vmatpush3.bf16.msra.mxu0 %v5555_v35 }
 0x534   : > { %v3860_v26 = vsub.f32 0.0, %v3668_v54  ;;  %v3573_v29 = vsub.f32 3.1415927, %v3381_v62 }
 0x536   : > { %v3956_v57 = vsel %vm3764_vm1, %v3860_v26, %v3668_v54  ;;  %v3669_v27 = vsel %vm3477_vm5, %v3573_v29, %v3381_v62 }
 0x537   : > { %v4213_v55 = vmul.f32 %v10018_v11, %v3956_v57  ;;  %v3861_v30 = vsub.f32 0.0, %v3669_v27 }
 0x539   : > { %v3957_v44 = vsel %vm3765_vm0, %v3861_v30, %v3669_v27  ;;  %v4229_v20 = vadd.f32 %v4213_v55, %v11446_v34 }
 0x53a   : > { %v4214_v14 = vmul.f32 %v10018_v11, %v3957_v44  ;;  %v4253_v11 = vld [vmem:[%s10614_s2 + $0x28] sm:$0xff] }
 0x53b   : > { %v5567_v37 = vpack.c.bf16 %v4253_v11, %v4252_v56 }
 0x53c   : > { %v4230_v48 = vadd.f32 %v4214_v14, %v11447_v18 }
 0x53e   : > { %v5559_v10 = vpack.c.bf16 %v4230_v48, %v4229_v20 }
 0x540   : > { %5560 = vmatprep.subr.bf16.mxu0 %v5559_v10 }
 0x541   : > { %5562 = vmatpush3.bf16.msra.mxu0 %v5559_v10 }
 0x542   : > { %5564 = vmatprep.subr.bf16.mxu0 %v5563_v47 }
 0x544   : > { %5230 = vmatmul.mubr.f32.vlgmr.msra.gmra.mrb[70].mxu0 %v10365_v60 }
 0x545   : > { %5232 = vmatprep.mubr.f32.mxu0 %v10370_v9  ;;  %5566 = vmatpush3.bf16.msra.mxu0 %v5563_v47 }
 0x546   : > { %5568 = vmatprep.subr.bf16.mxu0 %v5567_v37 }
 0x548   : > { %5233 = vmatmul.mubr.f32.gmra.mrb[72].mxu0 %v10383_v36 }
 0x549   : > { %5235 = vmatprep.mubr.f32.mxu0 %v10388_v59  ;;  %5570 = vmatpush3.bf16.msra.mxu0 %v5567_v37 }
 0x54a   : > { %5572 = vmatprep.subr.bf16.mxu0 %v5571_v0 }
 0x54c   : > { %5236 = vmatmul.mubr.f32.gmra.mrb[74].mxu0 %v10401_v23 }
 0x54d   : > { %5238 = vmatprep.mubr.f32.mxu0 %v10406_v16  ;;  %5574 = vmatpush3.bf16.msra.mxu0 %v5571_v0 }
 0x54e   : > { %5576 = vmatprep.subr.bf16.mxu0 %v5575_v51 }
 0x550   : > { %5239 = vmatmul.mubr.f32.gmra.mrb[76].mxu0 %v10419_v42 }
 0x551   : > { %5241 = vmatprep.mubr.f32.mxu0 %v10424_v41  ;;  %5578 = vmatpush3.bf16.msra.mxu0 %v5575_v51 }
 0x552   : > { %5580 = vmatprep.subr.bf16.mxu0 %v5579_v15 }
 0x554   : > { %5242 = vmatmul.mubr.f32.gmra.mrb[78].mxu0 %v10437_v13 }
 0x555   : > { %5244 = vmatprep.mubr.f32.mxu0 %v10442_v8  ;;  %5582 = vmatpush3.bf16.msra.mxu0 %v5579_v15 }
 0x556   : > { %5584 = vmatprep.subr.bf16.mxu0 %v5583_v17 }
 0x558   : > { %5245 = vmatmul.mubr.f32.gmra.mrb[80].mxu0 %v10455_v63 }
 0x559   : > { %5247 = vmatprep.mubr.f32.mxu0 %v10460_v1  ;;  %5586 = vmatpush3.bf16.msra.mxu0 %v5583_v17 }
 0x55a   : > { %5588 = vmatprep.subr.bf16.mxu0 %v5587_v50 }
 0x55c   : > { %5248 = vmatmul.mubr.f32.gmra.mrb[82].mxu0 %v10467_v28 }
 0x55d   : > { %5250 = vmatprep.mubr.f32.mxu0 %v10472_v38  ;;  %5590 = vmatpush3.bf16.msra.mxu0 %v5587_v50 }
 0x55e   : > { %5592 = vmatprep.subr.bf16.mxu0 %v5591_v6 }
 0x560   : > { %5251 = vmatmul.mubr.f32.gmra.mrb[84].mxu0 %v10479_v7 }
 0x561   : > { %5594 = vmatpush3.bf16.msra.mxu0 %v5591_v6 }
 0x617   : > { %v5231_v33 = vpop.f32.mrb[70].mxu0 }
 0x618   : > { %v4358_v61 = vadd.f32 %v5231_v33, %v5061_v25  ;;  %v4352_v32 = vpop.f32.mrb[71].mxu0  ;;  %v5994_v33 = vld [vmem:[%s10613_s1 + $0x300] sm:$0xff] }
 0x619   : > { %v4353_v5 = vadd.f32 %v5061_v25, %v4352_v32 }
 0x61a   : > { %v4432_v24 = vmax.f32 %v4358_v61, 0.0 }
 0x61b   : > { %v4431_v39 = vmax.f32 %v4353_v5, 0.0  ;;  %v5234_v4 = vpop.f32.mrb[72].mxu0 }
 0x61c   : > { %v4368_v52 = vadd.f32 %v5234_v4, %v5061_v25  ;;  %v4362_v35 = vpop.f32.mrb[73].mxu0 }
 0x61d   : > { %v4363_v54 = vadd.f32 %v5061_v25, %v4362_v35  ;;  %5285 = vmatprep.mubr.f32.mxu0 %v4431_v39 }
 0x61e   : > { %5286 = vmatmul.mubr.f32.vlgmr.msra.gmra.mrb[86].mxu0 %v4432_v24  ;;  %v4434_v29 = vmax.f32 %v4368_v52, 0.0 }
 0x61f   : > { %v4433_v62 = vmax.f32 %v4363_v54, 0.0  ;;  %v5237_v26 = vpop.f32.mrb[74].mxu0 }
 0x620   : > { %v4378_v57 = vadd.f32 %v5237_v26, %v5061_v25  ;;  %v4372_v27 = vpop.f32.mrb[75].mxu0 }
 0x621   : > { %v4373_v55 = vadd.f32 %v5061_v25, %v4372_v27  ;;  %5288 = vmatprep.mubr.f32.mxu0 %v4433_v62 }
 0x622   : > { %5289 = vmatmul.mubr.f32.gmra.mrb[88].mxu0 %v4434_v29  ;;  %v4436_v34 = vmax.f32 %v4378_v57, 0.0 }
 0x623   : > { %v4435_v30 = vmax.f32 %v4373_v55, 0.0  ;;  %v5240_v44 = vpop.f32.mrb[76].mxu0 }
 0x624   : > { %v4388_v20 = vadd.f32 %v5240_v44, %v5061_v25  ;;  %v4382_v14 = vpop.f32.mrb[77].mxu0 }
 0x625   : > { %v4383_v19 = vadd.f32 %v5061_v25, %v4382_v14  ;;  %5291 = vmatprep.mubr.f32.mxu0 %v4435_v30 }
 0x626   : > { %5292 = vmatmul.mubr.f32.gmra.mrb[90].mxu0 %v4436_v34  ;;  %v4438_v48 = vmax.f32 %v4388_v20, 0.0 }
 0x627   : > { %v4437_v3 = vmax.f32 %v4383_v19, 0.0  ;;  %v5243_v18 = vpop.f32.mrb[78].mxu0 }
 0x628   : > { %v4398_v10 = vadd.f32 %v5243_v18, %v5061_v25  ;;  %v4392_v47 = vpop.f32.mrb[79].mxu0 }
 0x629   : > { %v4393_v56 = vadd.f32 %v5061_v25, %v4392_v47  ;;  %5294 = vmatprep.mubr.f32.mxu0 %v4437_v3 }
 0x62a   : > { %5295 = vmatmul.mubr.f32.gmra.mrb[92].mxu0 %v4438_v48  ;;  %v4440_v43 = vmax.f32 %v4398_v10, 0.0 }
 0x62b   : > { %v4439_v11 = vmax.f32 %v4393_v56, 0.0  ;;  %v5246_v37 = vpop.f32.mrb[80].mxu0 }
 0x62c   : > { %v4408_v2 = vadd.f32 %v5246_v37, %v5061_v25  ;;  %v4402_v0 = vpop.f32.mrb[81].mxu0 }
 0x62d   : > { %v4403_v21 = vadd.f32 %v5061_v25, %v4402_v0  ;;  %5297 = vmatprep.mubr.f32.mxu0 %v4439_v11 }
 0x62e   : > { %5298 = vmatmul.mubr.f32.gmra.mrb[94].mxu0 %v4440_v43  ;;  %v4442_v49 = vmax.f32 %v4408_v2, 0.0 }
 0x62f   : > { %v4441_v31 = vmax.f32 %v4403_v21, 0.0  ;;  %v5249_v51 = vpop.f32.mrb[82].mxu0 }
 0x630   : > { %v4418_v58 = vadd.f32 %v5249_v51, %v5061_v25  ;;  %v4412_v15 = vpop.f32.mrb[83].mxu0 }
 0x631   : > { %v4413_v45 = vadd.f32 %v5061_v25, %v4412_v15  ;;  %5300 = vmatprep.mubr.f32.mxu0 %v4441_v31 }
 0x632   : > { %5301 = vmatmul.mubr.f32.gmra.mrb[96].mxu0 %v4442_v49  ;;  %v4444_v40 = vmax.f32 %v4418_v58, 0.0 }
 0x633   : > { %v4443_v22 = vmax.f32 %v4413_v45, 0.0  ;;  %v5252_v17 = vpop.f32.mrb[84].mxu0 }
 0x634   : > { %v4428_v53 = vadd.f32 %v5252_v17, %v5061_v25  ;;  %v4422_v50 = vpop.f32.mrb[85].mxu0 }
 0x635   : > { %v4423_v12 = vadd.f32 %v5061_v25, %v4422_v50  ;;  %5303 = vmatprep.mubr.f32.mxu0 %v4443_v22 }
 0x636   : > { %5304 = vmatmul.mubr.f32.gmra.mrb[98].mxu0 %v4444_v40  ;;  %v4446_v6 = vmax.f32 %v4428_v53, 0.0 }
 0x637   : > { %v4445_v46 = vmax.f32 %v4423_v12, 0.0 }
 0x639   : > { %5306 = vmatprep.mubr.f32.mxu0 %v4445_v46 }
 0x63a   : > { %5307 = vmatmul.mubr.f32.gmra.mrb[100].mxu0 %v4446_v6 }
 0x63b   : > { %5341 = vmatprep.mubr.f32.mxu0 %v5994_v33 }
 0x6f1   : > { %v5287_v61 = vpop.f32.mrb[86].mxu0 }
 0x6f2   : > { %v4513_v32 = vpop.f32.mrb[87].mxu0 }
 0x6f3   : > { %v5595_v5 = vpack.c.bf16 %v5287_v61, %v4513_v32 }
 0x6f5   : > { %v5290_v39 = vpop.f32.mrb[88].mxu0  ;;  %5596 = vmatprep.subr.bf16.mxu0 %v5595_v5 }
 0x6f6   : > { %v4523_v4 = vpop.f32.mrb[89].mxu0  ;;  %5598 = vmatpush3.bf16.msra.mxu0 %v5595_v5 }
 0x6f7   : > { %v5599_v24 = vpack.c.bf16 %v5290_v39, %v4523_v4 }
 0x6f9   : > { %v5293_v25 = vpop.f32.mrb[90].mxu0  ;;  %5600 = vmatprep.subr.bf16.mxu0 %v5599_v24 }
 0x6fa   : > { %v4533_v52 = vpop.f32.mrb[91].mxu0  ;;  %5602 = vmatpush3.bf16.msra.mxu0 %v5599_v24 }
 0x6fb   : > { %v5603_v35 = vpack.c.bf16 %v5293_v25, %v4533_v52 }
 0x6fd   : > { %v5296_v54 = vpop.f32.mrb[92].mxu0  ;;  %5604 = vmatprep.subr.bf16.mxu0 %v5603_v35 }
 0x6fe   : > { %v4543_v62 = vpop.f32.mrb[93].mxu0  ;;  %5606 = vmatpush3.bf16.msra.mxu0 %v5603_v35 }
 0x6ff   : > { %v5607_v26 = vpack.c.bf16 %v5296_v54, %v4543_v62 }
 0x701   : > { %v5299_v29 = vpop.f32.mrb[94].mxu0  ;;  %5608 = vmatprep.subr.bf16.mxu0 %v5607_v26 }
 0x702   : > { %v4553_v57 = vpop.f32.mrb[95].mxu0  ;;  %5610 = vmatpush3.bf16.msra.mxu0 %v5607_v26 }
 0x703   : > { %v5611_v27 = vpack.c.bf16 %v5299_v29, %v4553_v57 }
 0x705   : > { %v5302_v55 = vpop.f32.mrb[96].mxu0  ;;  %5612 = vmatprep.subr.bf16.mxu0 %v5611_v27 }
 0x706   : > { %v4563_v30 = vpop.f32.mrb[97].mxu0  ;;  %5614 = vmatpush3.bf16.msra.mxu0 %v5611_v27 }
 0x707   : > { %v5615_v44 = vpack.c.bf16 %v5302_v55, %v4563_v30 }
 0x709   : > { %v5305_v34 = vpop.f32.mrb[98].mxu0  ;;  %5616 = vmatprep.subr.bf16.mxu0 %v5615_v44 }
 0x70a   : > { %v4573_v20 = vpop.f32.mrb[99].mxu0  ;;  %5618 = vmatpush3.bf16.msra.mxu0 %v5615_v44 }
 0x70b   : > { %v5619_v14 = vpack.c.bf16 %v5305_v34, %v4573_v20  ;;  %v4266_v34 = vld [vmem:[%s10614_s2 + $0x90] sm:$0xff]  ;;  %v4267_v20 = vld [vmem:[%s10614_s2 + $0x98] sm:$0xff] }
 0x70d   : > { %v5308_v19 = vpop.f32.mrb[100].mxu0  ;;  %5620 = vmatprep.subr.bf16.mxu0 %v5619_v14 }
 0x70e   : > { %v4583_v3 = vpop.f32.mrb[101].mxu0  ;;  %5622 = vmatpush3.bf16.msra.mxu0 %v5619_v14 }
 0x70f   : > { %v5623_v18 = vpack.c.bf16 %v5308_v19, %v4583_v3  ;;  %v4757_v19 = vld [vmem:[%s10613_s1 + $0x380] sm:$0xff]  ;;  %v5652_v3 = vpack.c.bf16 %v4267_v20, %v4266_v34 }
 0x711   : > { %5624 = vmatprep.subr.bf16.mxu0 %v5623_v18 }
 0x712   : > { %5626 = vmatpush3.bf16.msra.mxu0 %v5623_v18  ;;  %v4268_v18 = vld [vmem:[%s10614_s2 + $0xa0] sm:$0xff] }
 0x715   : > { %5342 = vmatmul.mubr.f32.vlgmr.msra.gmra.mrb[102].mxu0 %v10365_v60  ;;  %v6004_v60 = vmov 0.0|0.0  }
 0x716   : > { %5344 = vmatprep.mubr.f32.mxu0 %v10370_v9  ;;  %5627 = vmatprep.subr.bf16.mxu0 %v6004_v60  ;;  %v11448_v9 = vmov 0.0  }
 0x719   : > { %5345 = vmatmul.mubr.f32.gmra.mrb[104].mxu0 %v10383_v36  ;;  %v10515_v36 = vld [vmem:[%s10614_s2 + $0x9] ss:$0 sm:$0xff] }
 0x71a   : > { %5347 = vmatprep.mubr.f32.mxu0 %v10388_v59 }
 0x71d   : > { %5348 = vmatmul.mubr.f32.gmra.mrb[106].mxu0 %v10401_v23 }
 0x71e   : > { %5350 = vmatprep.mubr.f32.mxu0 %v10406_v16 }
 0x721   : > { %5351 = vmatmul.mubr.f32.gmra.mrb[108].mxu0 %v10419_v42 }
 0x722   : > { %5353 = vmatprep.mubr.f32.mxu0 %v10424_v41 }
 0x725   : > { %5354 = vmatmul.mubr.f32.gmra.mrb[110].mxu0 %v10437_v13 }
 0x726   : > { %5356 = vmatprep.mubr.f32.mxu0 %v10442_v8 }
 0x729   : > { %5357 = vmatmul.mubr.f32.gmra.mrb[112].mxu0 %v10455_v63 }
 0x72a   : > { %5359 = vmatprep.mubr.f32.mxu0 %v10460_v1 }
 0x72d   : > { %5360 = vmatmul.mubr.f32.gmra.mrb[114].mxu0 %v10467_v28 }
 0x72e   : > { %5362 = vmatprep.mubr.f32.mxu0 %v10472_v38 }
 0x731   : > { %5363 = vmatmul.mubr.f32.gmra.mrb[116].mxu0 %v10479_v7 }
 0x732   : > { %5397 = vmatprep.mubr.msk.f32.mxu0 %vm6005_vm3, %v11448_v9 }
 0x7e8   : > { %v5343_v59 = vpop.f32.mrb[102].mxu0 }
 0x7e9   : > { %v4668_v23 = vadd.f32 %v5343_v59, %v10515_v36  ;;  %v4662_v16 = vpop.f32.mrb[103].mxu0 }
 0x7ea   : > { %v4663_v42 = vadd.f32 %v10515_v36, %v4662_v16  ;;  %v4271_v16 = vld [vmem:[%s10614_s2 + $0xb8] sm:$0xff] }
 0x7eb   : > { %v4742_v41 = vmax.f32 %v4668_v23, 0.0  ;;  %v4270_v23 = vld [vmem:[%s10614_s2 + $0xb0] sm:$0xff] }
 0x7ec   : > { %v4741_v13 = vmax.f32 %v4663_v42, 0.0  ;;  %v5346_v8 = vpop.f32.mrb[104].mxu0  ;;  %v5658_v42 = vpack.c.bf16 %v4271_v16, %v4270_v23 }
 0x7ed   : > { %v4678_v63 = vadd.f32 %v5346_v8, %v10515_v36  ;;  %v4672_v1 = vpop.f32.mrb[105].mxu0  ;;  %v4274_v8 = vld [vmem:[%s10614_s2 + $0xd0] sm:$0xff] }
 0x7ee   : > { %v5628_v28 = vpack.c.bf16 %v4742_v41, %v4741_v13  ;;  %v4673_v38 = vadd.f32 %v10515_v36, %v4672_v1  ;;  %v4272_v41 = vld [vmem:[%s10614_s2 + $0xc0] sm:$0xff] }
 0x7ef   : > { %v4744_v7 = vmax.f32 %v4678_v63, 0.0  ;;  %v4275_v63 = vld [vmem:[%s10614_s2 + $0xd8] sm:$0xff] }
 0x7f0   : > { %v4743_v48 = vmax.f32 %v4673_v38, 0.0  ;;  %v5349_v10 = vpop.f32.mrb[106].mxu0  ;;  %5629 = vmatpush3.bf16.msra.mxu0 %v5628_v28  ;;  %v5664_v1 = vpack.c.bf16 %v4275_v63, %v4274_v8  ;;  %v4276_v28 = vld [vmem:[%s10614_s2 + $0xe0] sm:$0xff]  ;;  %v4277_v38 = vld [vmem:[%s10614_s2 + $0xe8] sm:$0xff] }
 0x7f1   : > { %v4688_v47 = vadd.f32 %v5349_v10, %v10515_v36  ;;  %v4682_v56 = vpop.f32.mrb[107].mxu0  ;;  %5630 = vmatprep.subr.bf16.mxu0 %v6004_v60  ;;  %v4279_v10 = vld [vmem:[%s10614_s2 + $0xf8] sm:$0xff] }
 0x7f2   : > { %v5631_v11 = vpack.c.bf16 %v4744_v7, %v4743_v48  ;;  %v4683_v37 = vadd.f32 %v10515_v36, %v4682_v56  ;;  %v5667_v7 = vpack.c.bf16 %v4277_v38, %v4276_v28  ;;  %v4278_v48 = vld [vmem:[%s10614_s2 + $0xf0] sm:$0xff]  ;;  %v4280_v56 = vld [vmem:[%s10614_s2 + $0x100] sm:$0xff] }
 0x7f3   : > { %v4746_v43 = vmax.f32 %v4688_v47, 0.0  ;;  %v5670_v47 = vpack.c.bf16 %v4279_v10, %v4278_v48 }
 0x7f4   : > { %v4745_v2 = vmax.f32 %v4683_v37, 0.0  ;;  %v5352_v0 = vpop.f32.mrb[108].mxu0  ;;  %5632 = vmatpush3.bf16.msra.mxu0 %v5631_v11  ;;  %v4281_v11 = vld [vmem:[%s10614_s2 + $0x108] sm:$0xff] }
 0x7f5   : > { %v4698_v21 = vadd.f32 %v5352_v0, %v10515_v36  ;;  %v4692_v31 = vpop.f32.mrb[109].mxu0  ;;  %5633 = vmatprep.subr.bf16.mxu0 %v6004_v60  ;;  %v5673_v37 = vpack.c.bf16 %v4281_v11, %v4280_v56  ;;  %v5063_v0 = vld [vmem:[%s10614_s2 + $0xa] ss:$0 sm:$0xff] }
 0x7f6   : > { %v5634_v51 = vpack.c.bf16 %v4746_v43, %v4745_v2  ;;  %v4693_v49 = vadd.f32 %v10515_v36, %v4692_v31 }
 0x7f7   : > { %v4748_v58 = vmax.f32 %v4698_v21, 0.0 }
 0x7f8   : > { %v4747_v15 = vmax.f32 %v4693_v49, 0.0  ;;  %v5355_v45 = vpop.f32.mrb[110].mxu0  ;;  %5635 = vmatpush3.bf16.msra.mxu0 %v5634_v51 }
 0x7f9   : > { %v4708_v22 = vadd.f32 %v5355_v45, %v10515_v36  ;;  %v4702_v17 = vpop.f32.mrb[111].mxu0  ;;  %5636 = vmatprep.subr.bf16.mxu0 %v6004_v60 }
 0x7fa   : > { %v5637_v40 = vpack.c.bf16 %v4748_v58, %v4747_v15  ;;  %v4703_v53 = vadd.f32 %v10515_v36, %v4702_v17 }
 0x7fb   : > { %v4750_v50 = vmax.f32 %v4708_v22, 0.0 }
 0x7fc   : > { %v4749_v12 = vmax.f32 %v4703_v53, 0.0  ;;  %v5358_v46 = vpop.f32.mrb[112].mxu0  ;;  %5638 = vmatpush3.bf16.msra.mxu0 %v5637_v40 }
 0x7fd   : > { %v4718_v6 = vadd.f32 %v5358_v46, %v10515_v36  ;;  %v4712_v33 = vpop.f32.mrb[113].mxu0  ;;  %5639 = vmatprep.subr.bf16.mxu0 %v6004_v60 }
 0x7fe   : > { %v5640_v61 = vpack.c.bf16 %v4750_v50, %v4749_v12  ;;  %v4713_v32 = vadd.f32 %v10515_v36, %v4712_v33 }
 0x7ff   : > { %v4752_v5 = vmax.f32 %v4718_v6, 0.0 }
 0x800   : > { %v4751_v39 = vmax.f32 %v4713_v32, 0.0  ;;  %v5361_v4 = vpop.f32.mrb[114].mxu0  ;;  %5641 = vmatpush3.bf16.msra.mxu0 %v5640_v61 }
 0x801   : > { %v4728_v24 = vadd.f32 %v5361_v4, %v10515_v36  ;;  %v4722_v25 = vpop.f32.mrb[115].mxu0  ;;  %5642 = vmatprep.subr.bf16.mxu0 %v6004_v60 }
 0x802   : > { %v5643_v52 = vpack.c.bf16 %v4752_v5, %v4751_v39  ;;  %v4723_v35 = vadd.f32 %v10515_v36, %v4722_v25 }
 0x803   : > { %v4754_v54 = vmax.f32 %v4728_v24, 0.0 }
 0x804   : > { %v4753_v62 = vmax.f32 %v4723_v35, 0.0  ;;  %v5364_v26 = vpop.f32.mrb[116].mxu0  ;;  %5644 = vmatpush3.bf16.msra.mxu0 %v5643_v52 }
 0x805   : > { %v4738_v29 = vadd.f32 %v5364_v26, %v10515_v36  ;;  %v4732_v57 = vpop.f32.mrb[117].mxu0  ;;  %5645 = vmatprep.subr.bf16.mxu0 %v6004_v60 }
 0x806   : > { %v5646_v27 = vpack.c.bf16 %v4754_v54, %v4753_v62  ;;  %v4733_v55 = vadd.f32 %v10515_v36, %v4732_v57  ;;  %v4269_v36 = vld [vmem:[%s10614_s2 + $0xa8] sm:$0xff] }
 0x807   : > { %v4756_v30 = vmax.f32 %v4738_v29, 0.0  ;;  %v5655_v59 = vpack.c.bf16 %v4269_v36, %v4268_v18 }
 0x808   : > { %v4755_v44 = vmax.f32 %v4733_v55, 0.0  ;;  %5647 = vmatpush3.bf16.msra.mxu0 %v5646_v27 }
 0x809   : > { %5648 = vmatprep.subr.bf16.mxu0 %v6004_v60 }
 0x80a   : > { %v5649_v14 = vpack.c.bf16 %v4756_v30, %v4755_v44 }
 0x80c   : > { %5650 = vmatpush3.bf16.msra.mxu0 %v5649_v14 }
 0x80d   : > { %5651 = vmatprep.subr.bf16.mxu0 %v6004_v60 }
 0x80f   : > { %5398 = vmatmul.mubr.f32.vlgmr.msra.gmra.mrb[118].mxu0 %v4757_v19 }
 0x810   : > { %5653 = vmatpush3.bf16.msra.mxu0 %v5652_v3  ;;  %5432 = vmatprep.mubr.msk.f32.mxu0 %vm6005_vm3, %v11448_v9  ;;  %v4273_v9 = vld [vmem:[%s10614_s2 + $0xc8] sm:$0xff] }
 0x811   : > { %5654 = vmatprep.subr.bf16.mxu0 %v6004_v60  ;;  %v5661_v13 = vpack.c.bf16 %v4273_v9, %v4272_v41 }
 0x814   : > { %5656 = vmatpush3.bf16.msra.mxu0 %v5655_v59 }
 0x815   : > { %5657 = vmatprep.subr.bf16.mxu0 %v6004_v60 }
 0x818   : > { %5659 = vmatpush3.bf16.msra.mxu0 %v5658_v42 }
 0x819   : > { %5660 = vmatprep.subr.bf16.mxu0 %v6004_v60 }
 0x81c   : > { %5662 = vmatpush3.bf16.msra.mxu0 %v5661_v13 }
 0x81d   : > { %5663 = vmatprep.subr.bf16.mxu0 %v6004_v60 }
 0x820   : > { %5665 = vmatpush3.bf16.msra.mxu0 %v5664_v1 }
 0x821   : > { %5666 = vmatprep.subr.bf16.mxu0 %v6004_v60 }
 0x824   : > { %5668 = vmatpush3.bf16.msra.mxu0 %v5667_v7 }
 0x825   : > { %5669 = vmatprep.subr.bf16.mxu0 %v6004_v60 }
 0x828   : > { %5671 = vmatpush3.bf16.msra.mxu0 %v5670_v47 }
 0x829   : > { %5672 = vmatprep.subr.bf16.mxu0 %v6004_v60 }
 0x82c   : > { %5674 = vmatpush3.bf16.msra.mxu0 %v5673_v37 }
 0x8e2   : > { %v4824_v43 = vpop.f32.mrb[118].mxu0 }
 0x8e3   : > { %v5399_v2 = vpop.f32.mrb[119].mxu0  ;;  %5433 = vmatmul.mubr.f32.vlgmr.msra.gmra.mrb[120].mxu0 %v4824_v43 }
 0x9b6   : > { %v4898_v21 = vpop.f32.mrb[120].mxu0 }
 0x9b7   : > { %v4899_v31 = vadd.f32 %v5063_v0, %v4898_v21  ;;  %v5434_v51 = vpop.f32.mrb[121].mxu0 }
 0x9b9   : > { %4902 = vst [vmem:[%s173_s30] sm:$0xff] %v4899_v31 }
 0x9ba PF: > { %s13_s12 = sadd.s32 1, %s6001_s12  }
 0x9bb   : > { %p10_p5 = scmp.ge.s32.totalorder %s13_s12, 4  }
 0x9bd   :  { %12 = sbr.rel (!%p10_p5) target bundleno = 1 (0x1), region = 62 }

</bundles_post_ra>
